<compile_context>
chip_gen: v5e
topology: v5e:2x2
jax: 0.10.0
libtpu: 0.0.40
codegen_flags: <defaults>
</compile_context>

<pallas_src>
import functools
import math

import jax
import jax.numpy as jnp
from jax.experimental import pallas as pl
from jax.experimental.pallas import tpu as pltpu

EXPANSION = 1  # BasicBlock


def _round_up(x, m):
    return (x + m - 1) // m * m


# --------------------------- compiler params ---------------------------------

_CP_CACHE = None


def _compiler_params():
    """Generation-aware VMEM budget (v7x has 64 MiB/TC vs 128 MiB on v5e/v6e)."""
    global _CP_CACHE
    if _CP_CACHE is None:
        vmem_cap = 128 * 1024 * 1024
        try:
            vmem_cap = int(pltpu.get_tpu_info().vmem_capacity_bytes)
        except Exception:  # older jax / query unavailable -> conservative default
            pass
        limit = max(16 * 1024 * 1024,
                    min(vmem_cap // 2 - 4 * 1024 * 1024, 48 * 1024 * 1024))
        _CP_CACHE = pltpu.CompilerParams(
            dimension_semantics=("parallel", "parallel", "arbitrary"),
            vmem_limit_bytes=limit)
    return _CP_CACHE


# --------------------------- Pallas kernel -----------------------------------

def _gemm_bn_kernel(*refs, relu, has_res):
    """Tiled GEMM with K-reduction accumulator and fused BN/ReLU/residual epilogue.

    refs = (a, b, bias[, residual], out, acc_scratch)
      a    : (tm, tk) bf16  im2col activations
      b    : (tk, tn) bf16  BN-scale-folded weights
      bias : (1,  tn) f32   BN shift
      res  : (tm, tn) bf16  optional residual (identity branch)
      out  : (tm, tn) bf16
      acc  : (tm, tn) f32   VMEM scratch accumulator
    """
    if has_res:
        a_ref, b_ref, bias_ref, res_ref, o_ref, acc_ref = refs
    else:
        a_ref, b_ref, bias_ref, o_ref, acc_ref = refs
        res_ref = None

    kk = pl.program_id(2)

    @pl.when(kk == 0)
    def _():
        acc_ref[...] = jnp.zeros_like(acc_ref)

    acc_ref[...] += jnp.dot(a_ref[...], b_ref[...],
                            preferred_element_type=jnp.float32)

    @pl.when(kk == pl.num_programs(2) - 1)
    def _():
        y = acc_ref[...] + bias_ref[...]          # BN shift (scale already folded)
        if has_res:
            y = y + res_ref[...].astype(jnp.float32)
        if relu:
            y = jnp.maximum(y, 0.0)
        o_ref[...] = y.astype(o_ref.dtype)


def fused_gemm_bn(a, b, bias, *, relu, residual=None):
    """(M,K)@(K,N) + BN shift (+residual)(+ReLU).  a,b,residual bf16; bias f32."""
    M, K = a.shape
    Kb, N = b.shape
    assert K == Kb, (K, Kb)

    # ---- tile selection (K and N are already multiples of 128 / full dims) ---
    Mp = _round_up(M, 8)
    if Mp <= 512:
        tm = Mp                              # single M tile
    else:
        tm = 256
        Mp = _round_up(M, tm)
    if K <= 1024:
        tk = K                               # single K step
    else:
        tk = next(c for c in (512, 384, 256, 128) if K % c == 0)
    tn = N if N <= 256 else 256              # N in this net is 64/128/256/512

    # ---- pad ragged M rows only when needed (never at the demo shapes) -------
    if Mp != M:
        a = jnp.pad(a, ((0, Mp - M), (0, 0)))
        if residual is not None:
            residual = jnp.pad(residual, ((0, Mp - M), (0, 0)))

    grid = (Mp // tm, N // tn, K // tk)
    has_res = residual is not None

    in_specs = [
        pl.BlockSpec((tm, tk), lambda i, j, k: (i, k)),
        pl.BlockSpec((tk, tn), lambda i, j, k: (k, j)),
        pl.BlockSpec((1, tn), lambda i, j, k: (0, j)),
    ]
    operands = [a, b, bias]
    if has_res:
        in_specs.append(pl.BlockSpec((tm, tn), lambda i, j, k: (i, j)))
        operands.append(residual)

    # NOTE: pipeline_mode=pl.Buffered(3) on the weight spec would further hide
    # DMA latency for the large-K layer3/layer4 GEMMs; default double-buffering
    # is kept here for portability.
    out = pl.pallas_call(
        functools.partial(_gemm_bn_kernel, relu=relu, has_res=has_res),
        out_shape=jax.ShapeDtypeStruct((Mp, N), jnp.bfloat16),
        grid=grid,
        in_specs=in_specs,
        out_specs=pl.BlockSpec((tm, tn), lambda i, j, k: (i, j)),
        scratch_shapes=[pltpu.VMEM((tm, tn), jnp.float32)],
        compiler_params=_compiler_params(),
    )(*operands)

    if Mp != M:
        out = out[:M]
    return out


# --------------------------- conv / pool glue ---------------------------------

def _im2col(x, k, stride, pad, k_pad):
    """(ki, kj, C)-ordered patches in bf16; zero columns appended to pad K to 128n."""
    n, h, w, c = x.shape
    ho = (h + 2 * pad - k) // stride + 1
    wo = (w + 2 * pad - k) // stride + 1
    xp = jnp.pad(x, ((0, 0), (pad, pad), (pad, pad), (0, 0))) if pad else x
    cols = [xp[:, ki:ki + stride * ho:stride, kj:kj + stride * wo:stride, :]
            for ki in range(k) for kj in range(k)]
    if k_pad:
        cols.append(jnp.zeros((n, ho, wo, k_pad), x.dtype))
    patches = jnp.concatenate(cols, axis=-1)
    return patches.reshape(n * ho * wo, k * k * c + k_pad), ho, wo


def conv_bn(x, prep, *, stride, pad, relu, residual=None):
    """Conv2d(no bias)+BN(+residual)(+ReLU) as one fused Pallas GEMM.  x: NHWC bf16."""
    n = x.shape[0]
    cols, ho, wo = _im2col(x, prep["k"], stride, pad, prep["k_pad"])
    res2d = None
    if residual is not None:
        res2d = residual.reshape(-1, residual.shape[-1])
    out = fused_gemm_bn(cols, prep["w"], prep["bias"], relu=relu, residual=res2d)
    return out.reshape(n, ho, wo, -1)


def maxpool2d(x, k=3, stride=2, pad=1):
    """MaxPool2d(3,2,1): jnp.maximum tree over the 9 strided views (VPU-trivial)."""
    n, h, w, c = x.shape
    ho = (h + 2 * pad - k) // stride + 1
    wo = (w + 2 * pad - k) // stride + 1
    xp = jnp.pad(x, ((0, 0), (pad, pad), (pad, pad), (0, 0)),
                 constant_values=-jnp.inf)
    out = None
    for ki in range(k):
        for kj in range(k):
            v = xp[:, ki:ki + stride * ho:stride, kj:kj + stride * wo:stride, :]
            out = v if out is None else jnp.maximum(out, v)
    return out


# --------------------------- parameters ---------------------------------------

class KeyGen:
    def __init__(self, key):
        self.key = key

    def __call__(self):
        self.key, sub = jax.random.split(self.key)
        return sub


def _init_bn_params(c):
    # PyTorch eval-mode defaults: gamma=1, beta=0, running_mean=0, running_var=1.
    return (jnp.ones((c,), jnp.float32), jnp.zeros((c,), jnp.float32),
            jnp.zeros((c,), jnp.float32), jnp.ones((c,), jnp.float32))


def _prep_conv_bn(w_pt, bn, eps=1e-5):
    """PyTorch (Cout,Cin,k,k) weight + BN -> GEMM-ready bf16 matrix + f32 shift."""
    gamma, beta, mean, var = bn
    scale = gamma * jax.lax.rsqrt(var + eps)
    shift = beta - mean * scale
    cout, cin, k, _ = w_pt.shape
    wm = jnp.transpose(w_pt, (2, 3, 1, 0)).reshape(k * k * cin, cout)
    wm = wm * scale[None, :]                       # fold BN scale into weights (f32)
    K = k * k * cin
    Kp = _round_up(K, 128)
    if Kp != K:
        wm = jnp.pad(wm, ((0, Kp - K), (0, 0)))
    assert cout <= 256 or cout % 256 == 0          # keeps N tiles lane-dense
    return {"w": wm.astype(jnp.bfloat16),
            "bias": shift.reshape(1, cout).astype(jnp.float32),
            "k": k, "k_pad": Kp - K}


def _init_conv_bn(kg, cout, cin, k):
    fan_in = cin * k * k
    w = jax.random.normal(kg(), (cout, cin, k, k), jnp.float32) * math.sqrt(2.0 / fan_in)
    return _prep_conv_bn(w, _init_bn_params(cout))


def _init_basic_block(kg, inplanes, planes, stride):
    p = {"stride": stride,
         "conv1": _init_conv_bn(kg, planes, inplanes, 3),
         "conv2": _init_conv_bn(kg, planes, planes, 3)}
    if stride != 1 or inplanes != planes * EXPANSION:
        p["down"] = _init_conv_bn(kg, planes * EXPANSION, inplanes, 1)
    return p


def init_resnet(key, layers=(1, 1, 1, 1), num_classes=10):
    kg = KeyGen(key)
    params = {"conv1": _init_conv_bn(kg, 64, 3, 7)}
    inplanes = 64
    cfg = (("layer1", 64, 1), ("layer2", 128, 2), ("layer3", 256, 2), ("layer4", 512, 1))
    for (name, planes, stride), nblocks in zip(cfg, layers):
        blocks = [_init_basic_block(kg, inplanes, planes, stride)]
        inplanes = planes * EXPANSION
        for _ in range(1, nblocks):
            blocks.append(_init_basic_block(kg, inplanes, planes, 1))
        params[name] = blocks
    fc_in = 512 * EXPANSION
    params["fc_w"] = jax.random.normal(kg(), (num_classes, fc_in), jnp.float32) / math.sqrt(fc_in)
    params["fc_b"] = jnp.zeros((num_classes,), jnp.float32)
    return params


# --------------------------- forward -------------------------------------------

def basic_block_forward(x, p):
    stride = p["stride"]
    out = conv_bn(x, p["conv1"], stride=stride, pad=1, relu=True)
    if "down" in p:
        identity = conv_bn(x, p["down"], stride=stride, pad=0, relu=False)
    else:
        identity = x
    # Residual add + ReLU fused into the conv2 GEMM epilogue.
    return conv_bn(out, p["conv2"], stride=1, pad=1, relu=True, residual=identity)


def resnet_forward(params, x_nchw):
    x = jnp.transpose(x_nchw, (0, 2, 3, 1)).astype(jnp.bfloat16)   # NCHW -> NHWC bf16
    x = conv_bn(x, params["conv1"], stride=2, pad=3, relu=True)
    x = maxpool2d(x, k=3, stride=2, pad=1)
    for name in ("layer1", "layer2", "layer3", "layer4"):
        for blk in params[name]:
            x = basic_block_forward(x, blk)
    pooled = jnp.mean(x.astype(jnp.float32), axis=(1, 2))           # AdaptiveAvgPool2d((1,1))
    # Tiny lane-sparse (10-wide) FC head: plain jnp.dot beats a masked-store Pallas call.
    return pooled @ params["fc_w"].T + params["fc_b"]


if __name__ == "__main__":
    key = jax.random.PRNGKey(0)
    pkey, xkey = jax.random.split(key)
    params = init_resnet(pkey, layers=(1, 1, 1, 1), num_classes=10)
    x = jax.random.normal(xkey, (2, 3, 32, 32), jnp.float32)        # NCHW like PyTorch
    fwd = jax.jit(functools.partial(resnet_forward, params))
    out = jax.block_until_ready(fwd(x))
    assert out.shape == (2, 10)
    assert bool(jnp.all(jnp.isfinite(out)))
    print("KERNEL_OK")
</pallas_src>

<mosaic_0001>
module attributes {stable_mosaic.version = 11 : i64} {
  func.func @_gemm_bn_kernel(%arg0: i32, %arg1: i32, %arg2: i32, %arg3: memref<512x256xbf16, #tpu.memory_space<vmem>>, %arg4: memref<256x64xbf16, #tpu.memory_space<vmem>>, %arg5: memref<1x64xf32, #tpu.memory_space<vmem>>, %arg6: memref<512x64xbf16, #tpu.memory_space<vmem>>, %arg7: memref<512x64xf32, #tpu.memory_space<vmem>>) attributes {dimension_semantics = [#tpu.dimension_semantics<parallel>, #tpu.dimension_semantics<parallel>, #tpu.dimension_semantics<arbitrary>], iteration_bounds = array<i64: 1, 1, 1>, scalar_prefetch = 0 : i64, scratch_operands = 1 : i64, tpu.core_type = #tpu.core_type<tc>, window_params = [{transform_indices = @transform_0, window_bounds = array<i64: 512, 256>}, {transform_indices = @transform_1, window_bounds = array<i64: 256, 64>}, {transform_indices = @transform_2, window_bounds = array<i64: 1, 64>}, {transform_indices = @transform_3, window_bounds = array<i64: 512, 64>}]} {
    %c0_i32 = arith.constant 0 : i32
    %0 = arith.cmpi eq, %arg2, %c0_i32 : i32
    %1 = arith.extui %0 : i1 to i32
    %c0_i32_0 = arith.constant 0 : i32
    %2 = arith.cmpi ne, %1, %c0_i32_0 : i32
    scf.if %2 {
      %cst_10 = arith.constant 0.000000e+00 : f32
      %12 = vector.broadcast %cst_10 : f32 to vector<512x64xf32>
      %c0_11 = arith.constant 0 : index
      %c0_12 = arith.constant 0 : index
      %13 = vector.load %arg7[%c0_11, %c0_12] : memref<512x64xf32, #tpu.memory_space<vmem>>, vector<512x64xf32>
      tpu.vector_store %arg7[%c0_11, %c0_12], %12 {strides = array<i32>} : memref<512x64xf32, #tpu.memory_space<vmem>>, vector<512x64xf32>,
    } else {
    }
    %c0 = arith.constant 0 : index
    %c0_1 = arith.constant 0 : index
    %3 = vector.load %arg7[%c0, %c0_1] : memref<512x64xf32, #tpu.memory_space<vmem>>, vector<512x64xf32>
    %c0_2 = arith.constant 0 : index
    %c0_3 = arith.constant 0 : index
    %4 = vector.load %arg3[%c0_2, %c0_3] : memref<512x256xbf16, #tpu.memory_space<vmem>>, vector<512x256xbf16>
    %c0_4 = arith.constant 0 : index
    %c0_5 = arith.constant 0 : index
    %5 = vector.load %arg4[%c0_4, %c0_5] : memref<256x64xbf16, #tpu.memory_space<vmem>>, vector<256x64xbf16>
    %cst = arith.constant dense<0.000000e+00> : vector<512x64xf32>
    %6 = tpu.matmul %4, %5, %cst {dimension_numbers = #tpu.dot_dimension_numbers<[1], [0], [0], [1], [0, 0, 1, 1], [], []>} : vector<512x256xbf16>, vector<256x64xbf16>, vector<512x64xf32> -> vector<512x64xf32>
    %7 = arith.addf %3, %6 : vector<512x64xf32>
    %c0_6 = arith.constant 0 : index
    %c0_7 = arith.constant 0 : index
    %8 = vector.load %arg7[%c0_6, %c0_7] : memref<512x64xf32, #tpu.memory_space<vmem>>, vector<512x64xf32>
    tpu.vector_store %arg7[%c0_6, %c0_7], %7 {strides = array<i32>} : memref<512x64xf32, #tpu.memory_space<vmem>>, vector<512x64xf32>,
    %c0_i32_8 = arith.constant 0 : i32
    %9 = arith.cmpi eq, %arg2, %c0_i32_8 : i32
    %10 = arith.extui %9 : i1 to i32
    %c0_i32_9 = arith.constant 0 : i32
    %11 = arith.cmpi ne, %10, %c0_i32_9 : i32
    scf.if %11 {
      %c0_10 = arith.constant 0 : index
      %c0_11 = arith.constant 0 : index
      %12 = vector.load %arg7[%c0_10, %c0_11] : memref<512x64xf32, #tpu.memory_space<vmem>>, vector<512x64xf32>
      %c0_12 = arith.constant 0 : index
      %c0_13 = arith.constant 0 : index
      %13 = vector.load %arg5[%c0_12, %c0_13] : memref<1x64xf32, #tpu.memory_space<vmem>>, vector<1x64xf32>
      %14 = vector.broadcast %13 : vector<1x64xf32> to vector<512x64xf32>
      %15 = arith.addf %12, %14 : vector<512x64xf32>
      %cst_14 = arith.constant 0.000000e+00 : f32
      %16 = vector.broadcast %cst_14 : f32 to vector<512x64xf32>
      %17 = arith.maximumf %15, %16 : vector<512x64xf32>
      %18 = arith.truncf %17 : vector<512x64xf32> to vector<512x64xbf16>
      %c0_15 = arith.constant 0 : index
      %c0_16 = arith.constant 0 : index
      %19 = vector.load %arg6[%c0_15, %c0_16] : memref<512x64xbf16, #tpu.memory_space<vmem>>, vector<512x64xbf16>
      tpu.vector_store %arg6[%c0_15, %c0_16], %18 {strides = array<i32>} : memref<512x64xbf16, #tpu.memory_space<vmem>>, vector<512x64xbf16>,
    } else {
    }
    return
  }
  func.func @transform_0(%arg0: i32, %arg1: i32, %arg2: i32) -> (i32, i32) {
    %c0_i32 = arith.constant 0 : i32
    return %arg0, %arg2 : i32, i32
  }
  func.func @transform_1(%arg0: i32, %arg1: i32, %arg2: i32) -> (i32, i32) {
    %c0_i32 = arith.constant 0 : i32
    return %arg2, %arg1 : i32, i32
  }
  func.func @transform_2(%arg0: i32, %arg1: i32, %arg2: i32) -> (i32, i32) {
    %c0_i32 = arith.constant 0 : i32
    %c0_i32_0 = arith.constant 0 : i32
    return %c0_i32, %arg1 : i32, i32
  }
  func.func @transform_3(%arg0: i32, %arg1: i32, %arg2: i32) -> (i32, i32) {
    %c0_i32 = arith.constant 0 : i32
    return %arg0, %arg1 : i32, i32
  }
}

module attributes {stable_mosaic.version = 11 : i64} {
  func.func @_gemm_bn_kernel(%arg0: i32, %arg1: i32, %arg2: i32, %arg3: memref<128x640xbf16, #tpu.memory_space<vmem>>, %arg4: memref<640x64xbf16, #tpu.memory_space<vmem>>, %arg5: memref<1x64xf32, #tpu.memory_space<vmem>>, %arg6: memref<128x64xbf16, #tpu.memory_space<vmem>>, %arg7: memref<128x64xf32, #tpu.memory_space<vmem>>) attributes {dimension_semantics = [#tpu.dimension_semantics<parallel>, #tpu.dimension_semantics<parallel>, #tpu.dimension_semantics<arbitrary>], iteration_bounds = array<i64: 1, 1, 1>, scalar_prefetch = 0 : i64, scratch_operands = 1 : i64, tpu.core_type = #tpu.core_type<tc>, window_params = [{transform_indices = @transform_0, window_bounds = array<i64: 128, 640>}, {transform_indices = @transform_1, window_bounds = array<i64: 640, 64>}, {transform_indices = @transform_2, window_bounds = array<i64: 1, 64>}, {transform_indices = @transform_3, window_bounds = array<i64: 128, 64>}]} {
    %c0_i32 = arith.constant 0 : i32
    %0 = arith.cmpi eq, %arg2, %c0_i32 : i32
    %1 = arith.extui %0 : i1 to i32
    %c0_i32_0 = arith.constant 0 : i32
    %2 = arith.cmpi ne, %1, %c0_i32_0 : i32
    scf.if %2 {
      %cst_10 = arith.constant 0.000000e+00 : f32
      %12 = vector.broadcast %cst_10 : f32 to vector<128x64xf32>
      %c0_11 = arith.constant 0 : index
      %c0_12 = arith.constant 0 : index
      %13 = vector.load %arg7[%c0_11, %c0_12] : memref<128x64xf32, #tpu.memory_space<vmem>>, vector<128x64xf32>
      tpu.vector_store %arg7[%c0_11, %c0_12], %12 {strides = array<i32>} : memref<128x64xf32, #tpu.memory_space<vmem>>, vector<128x64xf32>,
    } else {
    }
    %c0 = arith.constant 0 : index
    %c0_1 = arith.constant 0 : index
    %3 = vector.load %arg7[%c0, %c0_1] : memref<128x64xf32, #tpu.memory_space<vmem>>, vector<128x64xf32>
    %c0_2 = arith.constant 0 : index
    %c0_3 = arith.constant 0 : index
    %4 = vector.load %arg3[%c0_2, %c0_3] : memref<128x640xbf16, #tpu.memory_space<vmem>>, vector<128x640xbf16>
    %c0_4 = arith.constant 0 : index
    %c0_5 = arith.constant 0 : index
    %5 = vector.load %arg4[%c0_4, %c0_5] : memref<640x64xbf16, #tpu.memory_space<vmem>>, vector<640x64xbf16>
    %cst = arith.constant dense<0.000000e+00> : vector<128x64xf32>
    %6 = tpu.matmul %4, %5, %cst {dimension_numbers = #tpu.dot_dimension_numbers<[1], [0], [0], [1], [0, 0, 1, 1], [], []>} : vector<128x640xbf16>, vector<640x64xbf16>, vector<128x64xf32> -> vector<128x64xf32>
    %7 = arith.addf %3, %6 : vector<128x64xf32>
    %c0_6 = arith.constant 0 : index
    %c0_7 = arith.constant 0 : index
    %8 = vector.load %arg7[%c0_6, %c0_7] : memref<128x64xf32, #tpu.memory_space<vmem>>, vector<128x64xf32>
    tpu.vector_store %arg7[%c0_6, %c0_7], %7 {strides = array<i32>} : memref<128x64xf32, #tpu.memory_space<vmem>>, vector<128x64xf32>,
    %c0_i32_8 = arith.constant 0 : i32
    %9 = arith.cmpi eq, %arg2, %c0_i32_8 : i32
    %10 = arith.extui %9 : i1 to i32
    %c0_i32_9 = arith.constant 0 : i32
    %11 = arith.cmpi ne, %10, %c0_i32_9 : i32
    scf.if %11 {
      %c0_10 = arith.constant 0 : index
      %c0_11 = arith.constant 0 : index
      %12 = vector.load %arg7[%c0_10, %c0_11] : memref<128x64xf32, #tpu.memory_space<vmem>>, vector<128x64xf32>
      %c0_12 = arith.constant 0 : index
      %c0_13 = arith.constant 0 : index
      %13 = vector.load %arg5[%c0_12, %c0_13] : memref<1x64xf32, #tpu.memory_space<vmem>>, vector<1x64xf32>
      %14 = vector.broadcast %13 : vector<1x64xf32> to vector<128x64xf32>
      %15 = arith.addf %12, %14 : vector<128x64xf32>
      %cst_14 = arith.constant 0.000000e+00 : f32
      %16 = vector.broadcast %cst_14 : f32 to vector<128x64xf32>
      %17 = arith.maximumf %15, %16 : vector<128x64xf32>
      %18 = arith.truncf %17 : vector<128x64xf32> to vector<128x64xbf16>
      %c0_15 = arith.constant 0 : index
      %c0_16 = arith.constant 0 : index
      %19 = vector.load %arg6[%c0_15, %c0_16] : memref<128x64xbf16, #tpu.memory_space<vmem>>, vector<128x64xbf16>
      tpu.vector_store %arg6[%c0_15, %c0_16], %18 {strides = array<i32>} : memref<128x64xbf16, #tpu.memory_space<vmem>>, vector<128x64xbf16>,
    } else {
    }
    return
  }
  func.func @transform_0(%arg0: i32, %arg1: i32, %arg2: i32) -> (i32, i32) {
    %c0_i32 = arith.constant 0 : i32
    return %arg0, %arg2 : i32, i32
  }
  func.func @transform_1(%arg0: i32, %arg1: i32, %arg2: i32) -> (i32, i32) {
    %c0_i32 = arith.constant 0 : i32
    return %arg2, %arg1 : i32, i32
  }
  func.func @transform_2(%arg0: i32, %arg1: i32, %arg2: i32) -> (i32, i32) {
    %c0_i32 = arith.constant 0 : i32
    %c0_i32_0 = arith.constant 0 : i32
    return %c0_i32, %arg1 : i32, i32
  }
  func.func @transform_3(%arg0: i32, %arg1: i32, %arg2: i32) -> (i32, i32) {
    %c0_i32 = arith.constant 0 : i32
    return %arg0, %arg1 : i32, i32
  }
}

module attributes {stable_mosaic.version = 11 : i64} {
  func.func @_gemm_bn_kernel(%arg0: i32, %arg1: i32, %arg2: i32, %arg3: memref<128x640xbf16, #tpu.memory_space<vmem>>, %arg4: memref<640x64xbf16, #tpu.memory_space<vmem>>, %arg5: memref<1x64xf32, #tpu.memory_space<vmem>>, %arg6: memref<128x64xbf16, #tpu.memory_space<vmem>>, %arg7: memref<128x64xbf16, #tpu.memory_space<vmem>>, %arg8: memref<128x64xf32, #tpu.memory_space<vmem>>) attributes {dimension_semantics = [#tpu.dimension_semantics<parallel>, #tpu.dimension_semantics<parallel>, #tpu.dimension_semantics<arbitrary>], iteration_bounds = array<i64: 1, 1, 1>, scalar_prefetch = 0 : i64, scratch_operands = 1 : i64, tpu.core_type = #tpu.core_type<tc>, window_params = [{transform_indices = @transform_0, window_bounds = array<i64: 128, 640>}, {transform_indices = @transform_1, window_bounds = array<i64: 640, 64>}, {transform_indices = @transform_2, window_bounds = array<i64: 1, 64>}, {transform_indices = @transform_3, window_bounds = array<i64: 128, 64>}, {transform_indices = @transform_4, window_bounds = array<i64: 128, 64>}]} {
    %c0_i32 = arith.constant 0 : i32
    %0 = arith.cmpi eq, %arg2, %c0_i32 : i32
    %1 = arith.extui %0 : i1 to i32
    %c0_i32_0 = arith.constant 0 : i32
    %2 = arith.cmpi ne, %1, %c0_i32_0 : i32
    scf.if %2 {
      %cst_10 = arith.constant 0.000000e+00 : f32
      %12 = vector.broadcast %cst_10 : f32 to vector<128x64xf32>
      %c0_11 = arith.constant 0 : index
      %c0_12 = arith.constant 0 : index
      %13 = vector.load %arg8[%c0_11, %c0_12] : memref<128x64xf32, #tpu.memory_space<vmem>>, vector<128x64xf32>
      tpu.vector_store %arg8[%c0_11, %c0_12], %12 {strides = array<i32>} : memref<128x64xf32, #tpu.memory_space<vmem>>, vector<128x64xf32>,
    } else {
    }
    %c0 = arith.constant 0 : index
    %c0_1 = arith.constant 0 : index
    %3 = vector.load %arg8[%c0, %c0_1] : memref<128x64xf32, #tpu.memory_space<vmem>>, vector<128x64xf32>
    %c0_2 = arith.constant 0 : index
    %c0_3 = arith.constant 0 : index
    %4 = vector.load %arg3[%c0_2, %c0_3] : memref<128x640xbf16, #tpu.memory_space<vmem>>, vector<128x640xbf16>
    %c0_4 = arith.constant 0 : index
    %c0_5 = arith.constant 0 : index
    %5 = vector.load %arg4[%c0_4, %c0_5] : memref<640x64xbf16, #tpu.memory_space<vmem>>, vector<640x64xbf16>
    %cst = arith.constant dense<0.000000e+00> : vector<128x64xf32>
    %6 = tpu.matmul %4, %5, %cst {dimension_numbers = #tpu.dot_dimension_numbers<[1], [0], [0], [1], [0, 0, 1, 1], [], []>} : vector<128x640xbf16>, vector<640x64xbf16>, vector<128x64xf32> -> vector<128x64xf32>
    %7 = arith.addf %3, %6 : vector<128x64xf32>
    %c0_6 = arith.constant 0 : index
    %c0_7 = arith.constant 0 : index
    %8 = vector.load %arg8[%c0_6, %c0_7] : memref<128x64xf32, #tpu.memory_space<vmem>>, vector<128x64xf32>
    tpu.vector_store %arg8[%c0_6, %c0_7], %7 {strides = array<i32>} : memref<128x64xf32, #tpu.memory_space<vmem>>, vector<128x64xf32>,
    %c0_i32_8 = arith.constant 0 : i32
    %9 = arith.cmpi eq, %arg2, %c0_i32_8 : i32
    %10 = arith.extui %9 : i1 to i32
    %c0_i32_9 = arith.constant 0 : i32
    %11 = arith.cmpi ne, %10, %c0_i32_9 : i32
    scf.if %11 {
      %c0_10 = arith.constant 0 : index
      %c0_11 = arith.constant 0 : index
      %12 = vector.load %arg8[%c0_10, %c0_11] : memref<128x64xf32, #tpu.memory_space<vmem>>, vector<128x64xf32>
      %c0_12 = arith.constant 0 : index
      %c0_13 = arith.constant 0 : index
      %13 = vector.load %arg5[%c0_12, %c0_13] : memref<1x64xf32, #tpu.memory_space<vmem>>, vector<1x64xf32>
      %14 = vector.broadcast %13 : vector<1x64xf32> to vector<128x64xf32>
      %15 = arith.addf %12, %14 : vector<128x64xf32>
      %c0_14 = arith.constant 0 : index
      %c0_15 = arith.constant 0 : index
      %16 = vector.load %arg6[%c0_14, %c0_15] : memref<128x64xbf16, #tpu.memory_space<vmem>>, vector<128x64xbf16>
      %17 = arith.extf %16 : vector<128x64xbf16> to vector<128x64xf32>
      %18 = arith.addf %15, %17 : vector<128x64xf32>
      %cst_16 = arith.constant 0.000000e+00 : f32
      %19 = vector.broadcast %cst_16 : f32 to vector<128x64xf32>
      %20 = arith.maximumf %18, %19 : vector<128x64xf32>
      %21 = arith.truncf %20 : vector<128x64xf32> to vector<128x64xbf16>
      %c0_17 = arith.constant 0 : index
      %c0_18 = arith.constant 0 : index
      %22 = vector.load %arg7[%c0_17, %c0_18] : memref<128x64xbf16, #tpu.memory_space<vmem>>, vector<128x64xbf16>
      tpu.vector_store %arg7[%c0_17, %c0_18], %21 {strides = array<i32>} : memref<128x64xbf16, #tpu.memory_space<vmem>>, vector<128x64xbf16>,
    } else {
    }
    return
  }
  func.func @transform_0(%arg0: i32, %arg1: i32, %arg2: i32) -> (i32, i32) {
    %c0_i32 = arith.constant 0 : i32
    return %arg0, %arg2 : i32, i32
  }
  func.func @transform_1(%arg0: i32, %arg1: i32, %arg2: i32) -> (i32, i32) {
    %c0_i32 = arith.constant 0 : i32
    return %arg2, %arg1 : i32, i32
  }
  func.func @transform_2(%arg0: i32, %arg1: i32, %arg2: i32) -> (i32, i32) {
    %c0_i32 = arith.constant 0 : i32
    %c0_i32_0 = arith.constant 0 : i32
    return %c0_i32, %arg1 : i32, i32
  }
  func.func @transform_3(%arg0: i32, %arg1: i32, %arg2: i32) -> (i32, i32) {
    %c0_i32 = arith.constant 0 : i32
    return %arg0, %arg1 : i32, i32
  }
  func.func @transform_4(%arg0: i32, %arg1: i32, %arg2: i32) -> (i32, i32) {
    %c0_i32 = arith.constant 0 : i32
    return %arg0, %arg1 : i32, i32
  }
}

module attributes {stable_mosaic.version = 11 : i64} {
  func.func @_gemm_bn_kernel(%arg0: i32, %arg1: i32, %arg2: i32, %arg3: memref<32x640xbf16, #tpu.memory_space<vmem>>, %arg4: memref<640x128xbf16, #tpu.memory_space<vmem>>, %arg5: memref<1x128xf32, #tpu.memory_space<vmem>>, %arg6: memref<32x128xbf16, #tpu.memory_space<vmem>>, %arg7: memref<32x128xf32, #tpu.memory_space<vmem>>) attributes {dimension_semantics = [#tpu.dimension_semantics<parallel>, #tpu.dimension_semantics<parallel>, #tpu.dimension_semantics<arbitrary>], iteration_bounds = array<i64: 1, 1, 1>, scalar_prefetch = 0 : i64, scratch_operands = 1 : i64, tpu.core_type = #tpu.core_type<tc>, window_params = [{transform_indices = @transform_0, window_bounds = array<i64: 32, 640>}, {transform_indices = @transform_1, window_bounds = array<i64: 640, 128>}, {transform_indices = @transform_2, window_bounds = array<i64: 1, 128>}, {transform_indices = @transform_3, window_bounds = array<i64: 32, 128>}]} {
    %c0_i32 = arith.constant 0 : i32
    %0 = arith.cmpi eq, %arg2, %c0_i32 : i32
    %1 = arith.extui %0 : i1 to i32
    %c0_i32_0 = arith.constant 0 : i32
    %2 = arith.cmpi ne, %1, %c0_i32_0 : i32
    scf.if %2 {
      %cst_10 = arith.constant 0.000000e+00 : f32
      %12 = vector.broadcast %cst_10 : f32 to vector<32x128xf32>
      %c0_11 = arith.constant 0 : index
      %c0_12 = arith.constant 0 : index
      %13 = vector.load %arg7[%c0_11, %c0_12] : memref<32x128xf32, #tpu.memory_space<vmem>>, vector<32x128xf32>
      tpu.vector_store %arg7[%c0_11, %c0_12], %12 {strides = array<i32>} : memref<32x128xf32, #tpu.memory_space<vmem>>, vector<32x128xf32>,
    } else {
    }
    %c0 = arith.constant 0 : index
    %c0_1 = arith.constant 0 : index
    %3 = vector.load %arg7[%c0, %c0_1] : memref<32x128xf32, #tpu.memory_space<vmem>>, vector<32x128xf32>
    %c0_2 = arith.constant 0 : index
    %c0_3 = arith.constant 0 : index
    %4 = vector.load %arg3[%c0_2, %c0_3] : memref<32x640xbf16, #tpu.memory_space<vmem>>, vector<32x640xbf16>
    %c0_4 = arith.constant 0 : index
    %c0_5 = arith.constant 0 : index
    %5 = vector.load %arg4[%c0_4, %c0_5] : memref<640x128xbf16, #tpu.memory_space<vmem>>, vector<640x128xbf16>
    %cst = arith.constant dense<0.000000e+00> : vector<32x128xf32>
    %6 = tpu.matmul %4, %5, %cst {dimension_numbers = #tpu.dot_dimension_numbers<[1], [0], [0], [1], [0, 0, 1, 1], [], []>} : vector<32x640xbf16>, vector<640x128xbf16>, vector<32x128xf32> -> vector<32x128xf32>
    %7 = arith.addf %3, %6 : vector<32x128xf32>
    %c0_6 = arith.constant 0 : index
    %c0_7 = arith.constant 0 : index
    %8 = vector.load %arg7[%c0_6, %c0_7] : memref<32x128xf32, #tpu.memory_space<vmem>>, vector<32x128xf32>
    tpu.vector_store %arg7[%c0_6, %c0_7], %7 {strides = array<i32>} : memref<32x128xf32, #tpu.memory_space<vmem>>, vector<32x128xf32>,
    %c0_i32_8 = arith.constant 0 : i32
    %9 = arith.cmpi eq, %arg2, %c0_i32_8 : i32
    %10 = arith.extui %9 : i1 to i32
    %c0_i32_9 = arith.constant 0 : i32
    %11 = arith.cmpi ne, %10, %c0_i32_9 : i32
    scf.if %11 {
      %c0_10 = arith.constant 0 : index
      %c0_11 = arith.constant 0 : index
      %12 = vector.load %arg7[%c0_10, %c0_11] : memref<32x128xf32, #tpu.memory_space<vmem>>, vector<32x128xf32>
      %c0_12 = arith.constant 0 : index
      %c0_13 = arith.constant 0 : index
      %13 = vector.load %arg5[%c0_12, %c0_13] : memref<1x128xf32, #tpu.memory_space<vmem>>, vector<1x128xf32>
      %14 = vector.broadcast %13 : vector<1x128xf32> to vector<32x128xf32>
      %15 = arith.addf %12, %14 : vector<32x128xf32>
      %cst_14 = arith.constant 0.000000e+00 : f32
      %16 = vector.broadcast %cst_14 : f32 to vector<32x128xf32>
      %17 = arith.maximumf %15, %16 : vector<32x128xf32>
      %18 = arith.truncf %17 : vector<32x128xf32> to vector<32x128xbf16>
      %c0_15 = arith.constant 0 : index
      %c0_16 = arith.constant 0 : index
      %19 = vector.load %arg6[%c0_15, %c0_16] : memref<32x128xbf16, #tpu.memory_space<vmem>>, vector<32x128xbf16>
      tpu.vector_store %arg6[%c0_15, %c0_16], %18 {strides = array<i32>} : memref<32x128xbf16, #tpu.memory_space<vmem>>, vector<32x128xbf16>,
    } else {
    }
    return
  }
  func.func @transform_0(%arg0: i32, %arg1: i32, %arg2: i32) -> (i32, i32) {
    %c0_i32 = arith.constant 0 : i32
    return %arg0, %arg2 : i32, i32
  }
  func.func @transform_1(%arg0: i32, %arg1: i32, %arg2: i32) -> (i32, i32) {
    %c0_i32 = arith.constant 0 : i32
    return %arg2, %arg1 : i32, i32
  }
  func.func @transform_2(%arg0: i32, %arg1: i32, %arg2: i32) -> (i32, i32) {
    %c0_i32 = arith.constant 0 : i32
    %c0_i32_0 = arith.constant 0 : i32
    return %c0_i32, %arg1 : i32, i32
  }
  func.func @transform_3(%arg0: i32, %arg1: i32, %arg2: i32) -> (i32, i32) {
    %c0_i32 = arith.constant 0 : i32
    return %arg0, %arg1 : i32, i32
  }
}

module attributes {stable_mosaic.version = 11 : i64} {
  func.func @_gemm_bn_kernel(%arg0: i32, %arg1: i32, %arg2: i32, %arg3: memref<32x128xbf16, #tpu.memory_space<vmem>>, %arg4: memref<128x128xbf16, #tpu.memory_space<vmem>>, %arg5: memref<1x128xf32, #tpu.memory_space<vmem>>, %arg6: memref<32x128xbf16, #tpu.memory_space<vmem>>, %arg7: memref<32x128xf32, #tpu.memory_space<vmem>>) attributes {dimension_semantics = [#tpu.dimension_semantics<parallel>, #tpu.dimension_semantics<parallel>, #tpu.dimension_semantics<arbitrary>], iteration_bounds = array<i64: 1, 1, 1>, scalar_prefetch = 0 : i64, scratch_operands = 1 : i64, tpu.core_type = #tpu.core_type<tc>, window_params = [{transform_indices = @transform_0, window_bounds = array<i64: 32, 128>}, {transform_indices = @transform_1, window_bounds = array<i64: 128, 128>}, {transform_indices = @transform_2, window_bounds = array<i64: 1, 128>}, {transform_indices = @transform_3, window_bounds = array<i64: 32, 128>}]} {
    %c0_i32 = arith.constant 0 : i32
    %0 = arith.cmpi eq, %arg2, %c0_i32 : i32
    %1 = arith.extui %0 : i1 to i32
    %c0_i32_0 = arith.constant 0 : i32
    %2 = arith.cmpi ne, %1, %c0_i32_0 : i32
    scf.if %2 {
      %cst_10 = arith.constant 0.000000e+00 : f32
      %12 = vector.broadcast %cst_10 : f32 to vector<32x128xf32>
      %c0_11 = arith.constant 0 : index
      %c0_12 = arith.constant 0 : index
      %13 = vector.load %arg7[%c0_11, %c0_12] : memref<32x128xf32, #tpu.memory_space<vmem>>, vector<32x128xf32>
      tpu.vector_store %arg7[%c0_11, %c0_12], %12 {strides = array<i32>} : memref<32x128xf32, #tpu.memory_space<vmem>>, vector<32x128xf32>,
    } else {
    }
    %c0 = arith.constant 0 : index
    %c0_1 = arith.constant 0 : index
    %3 = vector.load %arg7[%c0, %c0_1] : memref<32x128xf32, #tpu.memory_space<vmem>>, vector<32x128xf32>
    %c0_2 = arith.constant 0 : index
    %c0_3 = arith.constant 0 : index
    %4 = vector.load %arg3[%c0_2, %c0_3] : memref<32x128xbf16, #tpu.memory_space<vmem>>, vector<32x128xbf16>
    %c0_4 = arith.constant 0 : index
    %c0_5 = arith.constant 0 : index
    %5 = vector.load %arg4[%c0_4, %c0_5] : memref<128x128xbf16, #tpu.memory_space<vmem>>, vector<128x128xbf16>
    %cst = arith.constant dense<0.000000e+00> : vector<32x128xf32>
    %6 = tpu.matmul %4, %5, %cst {dimension_numbers = #tpu.dot_dimension_numbers<[1], [0], [0], [1], [0, 0, 1, 1], [], []>} : vector<32x128xbf16>, vector<128x128xbf16>, vector<32x128xf32> -> vector<32x128xf32>
    %7 = arith.addf %3, %6 : vector<32x128xf32>
    %c0_6 = arith.constant 0 : index
    %c0_7 = arith.constant 0 : index
    %8 = vector.load %arg7[%c0_6, %c0_7] : memref<32x128xf32, #tpu.memory_space<vmem>>, vector<32x128xf32>
    tpu.vector_store %arg7[%c0_6, %c0_7], %7 {strides = array<i32>} : memref<32x128xf32, #tpu.memory_space<vmem>>, vector<32x128xf32>,
    %c0_i32_8 = arith.constant 0 : i32
    %9 = arith.cmpi eq, %arg2, %c0_i32_8 : i32
    %10 = arith.extui %9 : i1 to i32
    %c0_i32_9 = arith.constant 0 : i32
    %11 = arith.cmpi ne, %10, %c0_i32_9 : i32
    scf.if %11 {
      %c0_10 = arith.constant 0 : index
      %c0_11 = arith.constant 0 : index
      %12 = vector.load %arg7[%c0_10, %c0_11] : memref<32x128xf32, #tpu.memory_space<vmem>>, vector<32x128xf32>
      %c0_12 = arith.constant 0 : index
      %c0_13 = arith.constant 0 : index
      %13 = vector.load %arg5[%c0_12, %c0_13] : memref<1x128xf32, #tpu.memory_space<vmem>>, vector<1x128xf32>
      %14 = vector.broadcast %13 : vector<1x128xf32> to vector<32x128xf32>
      %15 = arith.addf %12, %14 : vector<32x128xf32>
      %16 = arith.truncf %15 : vector<32x128xf32> to vector<32x128xbf16>
      %c0_14 = arith.constant 0 : index
      %c0_15 = arith.constant 0 : index
      %17 = vector.load %arg6[%c0_14, %c0_15] : memref<32x128xbf16, #tpu.memory_space<vmem>>, vector<32x128xbf16>
      tpu.vector_store %arg6[%c0_14, %c0_15], %16 {strides = array<i32>} : memref<32x128xbf16, #tpu.memory_space<vmem>>, vector<32x128xbf16>,
    } else {
    }
    return
  }
  func.func @transform_0(%arg0: i32, %arg1: i32, %arg2: i32) -> (i32, i32) {
    %c0_i32 = arith.constant 0 : i32
    return %arg0, %arg2 : i32, i32
  }
  func.func @transform_1(%arg0: i32, %arg1: i32, %arg2: i32) -> (i32, i32) {
    %c0_i32 = arith.constant 0 : i32
    return %arg2, %arg1 : i32, i32
  }
  func.func @transform_2(%arg0: i32, %arg1: i32, %arg2: i32) -> (i32, i32) {
    %c0_i32 = arith.constant 0 : i32
    %c0_i32_0 = arith.constant 0 : i32
    return %c0_i32, %arg1 : i32, i32
  }
  func.func @transform_3(%arg0: i32, %arg1: i32, %arg2: i32) -> (i32, i32) {
    %c0_i32 = arith.constant 0 : i32
    return %arg0, %arg1 : i32, i32
  }
}

module attributes {stable_mosaic.version = 11 : i64} {
  func.func @_gemm_bn_kernel(%arg0: i32, %arg1: i32, %arg2: i32, %arg3: memref<32x384xbf16, #tpu.memory_space<vmem>>, %arg4: memref<384x128xbf16, #tpu.memory_space<vmem>>, %arg5: memref<1x128xf32, #tpu.memory_space<vmem>>, %arg6: memref<32x128xbf16, #tpu.memory_space<vmem>>, %arg7: memref<32x128xbf16, #tpu.memory_space<vmem>>, %arg8: memref<32x128xf32, #tpu.memory_space<vmem>>) attributes {dimension_semantics = [#tpu.dimension_semantics<parallel>, #tpu.dimension_semantics<parallel>, #tpu.dimension_semantics<arbitrary>], iteration_bounds = array<i64: 1, 1, 3>, scalar_prefetch = 0 : i64, scratch_operands = 1 : i64, tpu.core_type = #tpu.core_type<tc>, window_params = [{transform_indices = @transform_0, window_bounds = array<i64: 32, 384>}, {transform_indices = @transform_1, window_bounds = array<i64: 384, 128>}, {transform_indices = @transform_2, window_bounds = array<i64: 1, 128>}, {transform_indices = @transform_3, window_bounds = array<i64: 32, 128>}, {transform_indices = @transform_4, window_bounds = array<i64: 32, 128>}]} {
    %c0_i32 = arith.constant 0 : i32
    %0 = arith.cmpi eq, %arg2, %c0_i32 : i32
    %1 = arith.extui %0 : i1 to i32
    %c0_i32_0 = arith.constant 0 : i32
    %2 = arith.cmpi ne, %1, %c0_i32_0 : i32
    scf.if %2 {
      %cst_9 = arith.constant 0.000000e+00 : f32
      %12 = vector.broadcast %cst_9 : f32 to vector<32x128xf32>
      %c0_10 = arith.constant 0 : index
      %c0_11 = arith.constant 0 : index
      %13 = vector.load %arg8[%c0_10, %c0_11] : memref<32x128xf32, #tpu.memory_space<vmem>>, vector<32x128xf32>
      tpu.vector_store %arg8[%c0_10, %c0_11], %12 {strides = array<i32>} : memref<32x128xf32, #tpu.memory_space<vmem>>, vector<32x128xf32>,
    } else {
    }
    %c0 = arith.constant 0 : index
    %c0_1 = arith.constant 0 : index
    %3 = vector.load %arg8[%c0, %c0_1] : memref<32x128xf32, #tpu.memory_space<vmem>>, vector<32x128xf32>
    %c0_2 = arith.constant 0 : index
    %c0_3 = arith.constant 0 : index
    %4 = vector.load %arg3[%c0_2, %c0_3] : memref<32x384xbf16, #tpu.memory_space<vmem>>, vector<32x384xbf16>
    %c0_4 = arith.constant 0 : index
    %c0_5 = arith.constant 0 : index
    %5 = vector.load %arg4[%c0_4, %c0_5] : memref<384x128xbf16, #tpu.memory_space<vmem>>, vector<384x128xbf16>
    %cst = arith.constant dense<0.000000e+00> : vector<32x128xf32>
    %6 = tpu.matmul %4, %5, %cst {dimension_numbers = #tpu.dot_dimension_numbers<[1], [0], [0], [1], [0, 0, 1, 1], [], []>} : vector<32x384xbf16>, vector<384x128xbf16>, vector<32x128xf32> -> vector<32x128xf32>
    %7 = arith.addf %3, %6 : vector<32x128xf32>
    %c0_6 = arith.constant 0 : index
    %c0_7 = arith.constant 0 : index
    %8 = vector.load %arg8[%c0_6, %c0_7] : memref<32x128xf32, #tpu.memory_space<vmem>>, vector<32x128xf32>
    tpu.vector_store %arg8[%c0_6, %c0_7], %7 {strides = array<i32>} : memref<32x128xf32, #tpu.memory_space<vmem>>, vector<32x128xf32>,
    %c2_i32 = arith.constant 2 : i32
    %9 = arith.cmpi eq, %arg2, %c2_i32 : i32
    %10 = arith.extui %9 : i1 to i32
    %c0_i32_8 = arith.constant 0 : i32
    %11 = arith.cmpi ne, %10, %c0_i32_8 : i32
    scf.if %11 {
      %c0_9 = arith.constant 0 : index
      %c0_10 = arith.constant 0 : index
      %12 = vector.load %arg8[%c0_9, %c0_10] : memref<32x128xf32, #tpu.memory_space<vmem>>, vector<32x128xf32>
      %c0_11 = arith.constant 0 : index
      %c0_12 = arith.constant 0 : index
      %13 = vector.load %arg5[%c0_11, %c0_12] : memref<1x128xf32, #tpu.memory_space<vmem>>, vector<1x128xf32>
      %14 = vector.broadcast %13 : vector<1x128xf32> to vector<32x128xf32>
      %15 = arith.addf %12, %14 : vector<32x128xf32>
      %c0_13 = arith.constant 0 : index
      %c0_14 = arith.constant 0 : index
      %16 = vector.load %arg6[%c0_13, %c0_14] : memref<32x128xbf16, #tpu.memory_space<vmem>>, vector<32x128xbf16>
      %17 = arith.extf %16 : vector<32x128xbf16> to vector<32x128xf32>
      %18 = arith.addf %15, %17 : vector<32x128xf32>
      %cst_15 = arith.constant 0.000000e+00 : f32
      %19 = vector.broadcast %cst_15 : f32 to vector<32x128xf32>
      %20 = arith.maximumf %18, %19 : vector<32x128xf32>
      %21 = arith.truncf %20 : vector<32x128xf32> to vector<32x128xbf16>
      %c0_16 = arith.constant 0 : index
      %c0_17 = arith.constant 0 : index
      %22 = vector.load %arg7[%c0_16, %c0_17] : memref<32x128xbf16, #tpu.memory_space<vmem>>, vector<32x128xbf16>
      tpu.vector_store %arg7[%c0_16, %c0_17], %21 {strides = array<i32>} : memref<32x128xbf16, #tpu.memory_space<vmem>>, vector<32x128xbf16>,
    } else {
    }
    return
  }
  func.func @transform_0(%arg0: i32, %arg1: i32, %arg2: i32) -> (i32, i32) {
    %c0_i32 = arith.constant 0 : i32
    return %arg0, %arg2 : i32, i32
  }
  func.func @transform_1(%arg0: i32, %arg1: i32, %arg2: i32) -> (i32, i32) {
    %c0_i32 = arith.constant 0 : i32
    return %arg2, %arg1 : i32, i32
  }
  func.func @transform_2(%arg0: i32, %arg1: i32, %arg2: i32) -> (i32, i32) {
    %c0_i32 = arith.constant 0 : i32
    %c0_i32_0 = arith.constant 0 : i32
    return %c0_i32, %arg1 : i32, i32
  }
  func.func @transform_3(%arg0: i32, %arg1: i32, %arg2: i32) -> (i32, i32) {
    %c0_i32 = arith.constant 0 : i32
    return %arg0, %arg1 : i32, i32
  }
  func.func @transform_4(%arg0: i32, %arg1: i32, %arg2: i32) -> (i32, i32) {
    %c0_i32 = arith.constant 0 : i32
    return %arg0, %arg1 : i32, i32
  }
}

module attributes {stable_mosaic.version = 11 : i64} {
  func.func @_gemm_bn_kernel(%arg0: i32, %arg1: i32, %arg2: i32, %arg3: memref<8x384xbf16, #tpu.memory_space<vmem>>, %arg4: memref<384x256xbf16, #tpu.memory_space<vmem>>, %arg5: memref<1x256xf32, #tpu.memory_space<vmem>>, %arg6: memref<8x256xbf16, #tpu.memory_space<vmem>>, %arg7: memref<8x256xf32, #tpu.memory_space<vmem>>) attributes {dimension_semantics = [#tpu.dimension_semantics<parallel>, #tpu.dimension_semantics<parallel>, #tpu.dimension_semantics<arbitrary>], iteration_bounds = array<i64: 1, 1, 3>, scalar_prefetch = 0 : i64, scratch_operands = 1 : i64, tpu.core_type = #tpu.core_type<tc>, window_params = [{transform_indices = @transform_0, window_bounds = array<i64: 8, 384>}, {transform_indices = @transform_1, window_bounds = array<i64: 384, 256>}, {transform_indices = @transform_2, window_bounds = array<i64: 1, 256>}, {transform_indices = @transform_3, window_bounds = array<i64: 8, 256>}]} {
    %c0_i32 = arith.constant 0 : i32
    %0 = arith.cmpi eq, %arg2, %c0_i32 : i32
    %1 = arith.extui %0 : i1 to i32
    %c0_i32_0 = arith.constant 0 : i32
    %2 = arith.cmpi ne, %1, %c0_i32_0 : i32
    scf.if %2 {
      %cst_9 = arith.constant 0.000000e+00 : f32
      %12 = vector.broadcast %cst_9 : f32 to vector<8x256xf32>
      %c0_10 = arith.constant 0 : index
      %c0_11 = arith.constant 0 : index
      %13 = vector.load %arg7[%c0_10, %c0_11] : memref<8x256xf32, #tpu.memory_space<vmem>>, vector<8x256xf32>
      tpu.vector_store %arg7[%c0_10, %c0_11], %12 {strides = array<i32>} : memref<8x256xf32, #tpu.memory_space<vmem>>, vector<8x256xf32>,
    } else {
    }
    %c0 = arith.constant 0 : index
    %c0_1 = arith.constant 0 : index
    %3 = vector.load %arg7[%c0, %c0_1] : memref<8x256xf32, #tpu.memory_space<vmem>>, vector<8x256xf32>
    %c0_2 = arith.constant 0 : index
    %c0_3 = arith.constant 0 : index
    %4 = vector.load %arg3[%c0_2, %c0_3] : memref<8x384xbf16, #tpu.memory_space<vmem>>, vector<8x384xbf16>
    %c0_4 = arith.constant 0 : index
    %c0_5 = arith.constant 0 : index
    %5 = vector.load %arg4[%c0_4, %c0_5] : memref<384x256xbf16, #tpu.memory_space<vmem>>, vector<384x256xbf16>
    %cst = arith.constant dense<0.000000e+00> : vector<8x256xf32>
    %6 = tpu.matmul %4, %5, %cst {dimension_numbers = #tpu.dot_dimension_numbers<[1], [0], [0], [1], [0, 0, 1, 1], [], []>} : vector<8x384xbf16>, vector<384x256xbf16>, vector<8x256xf32> -> vector<8x256xf32>
    %7 = arith.addf %3, %6 : vector<8x256xf32>
    %c0_6 = arith.constant 0 : index
    %c0_7 = arith.constant 0 : index
    %8 = vector.load %arg7[%c0_6, %c0_7] : memref<8x256xf32, #tpu.memory_space<vmem>>, vector<8x256xf32>
    tpu.vector_store %arg7[%c0_6, %c0_7], %7 {strides = array<i32>} : memref<8x256xf32, #tpu.memory_space<vmem>>, vector<8x256xf32>,
    %c2_i32 = arith.constant 2 : i32
    %9 = arith.cmpi eq, %arg2, %c2_i32 : i32
    %10 = arith.extui %9 : i1 to i32
    %c0_i32_8 = arith.constant 0 : i32
    %11 = arith.cmpi ne, %10, %c0_i32_8 : i32
    scf.if %11 {
      %c0_9 = arith.constant 0 : index
      %c0_10 = arith.constant 0 : index
      %12 = vector.load %arg7[%c0_9, %c0_10] : memref<8x256xf32, #tpu.memory_space<vmem>>, vector<8x256xf32>
      %c0_11 = arith.constant 0 : index
      %c0_12 = arith.constant 0 : index
      %13 = vector.load %arg5[%c0_11, %c0_12] : memref<1x256xf32, #tpu.memory_space<vmem>>, vector<1x256xf32>
      %14 = vector.broadcast %13 : vector<1x256xf32> to vector<8x256xf32>
      %15 = arith.addf %12, %14 : vector<8x256xf32>
      %cst_13 = arith.constant 0.000000e+00 : f32
      %16 = vector.broadcast %cst_13 : f32 to vector<8x256xf32>
      %17 = arith.maximumf %15, %16 : vector<8x256xf32>
      %18 = arith.truncf %17 : vector<8x256xf32> to vector<8x256xbf16>
      %c0_14 = arith.constant 0 : index
      %c0_15 = arith.constant 0 : index
      %19 = vector.load %arg6[%c0_14, %c0_15] : memref<8x256xbf16, #tpu.memory_space<vmem>>, vector<8x256xbf16>
      tpu.vector_store %arg6[%c0_14, %c0_15], %18 {strides = array<i32>} : memref<8x256xbf16, #tpu.memory_space<vmem>>, vector<8x256xbf16>,
    } else {
    }
    return
  }
  func.func @transform_0(%arg0: i32, %arg1: i32, %arg2: i32) -> (i32, i32) {
    %c0_i32 = arith.constant 0 : i32
    return %arg0, %arg2 : i32, i32
  }
  func.func @transform_1(%arg0: i32, %arg1: i32, %arg2: i32) -> (i32, i32) {
    %c0_i32 = arith.constant 0 : i32
    return %arg2, %arg1 : i32, i32
  }
  func.func @transform_2(%arg0: i32, %arg1: i32, %arg2: i32) -> (i32, i32) {
    %c0_i32 = arith.constant 0 : i32
    %c0_i32_0 = arith.constant 0 : i32
    return %c0_i32, %arg1 : i32, i32
  }
  func.func @transform_3(%arg0: i32, %arg1: i32, %arg2: i32) -> (i32, i32) {
    %c0_i32 = arith.constant 0 : i32
    return %arg0, %arg1 : i32, i32
  }
}

module attributes {stable_mosaic.version = 11 : i64} {
  func.func @_gemm_bn_kernel(%arg0: i32, %arg1: i32, %arg2: i32, %arg3: memref<8x384xbf16, #tpu.memory_space<vmem>>, %arg4: memref<384x256xbf16, #tpu.memory_space<vmem>>, %arg5: memref<1x256xf32, #tpu.memory_space<vmem>>, %arg6: memref<8x256xbf16, #tpu.memory_space<vmem>>, %arg7: memref<8x256xbf16, #tpu.memory_space<vmem>>, %arg8: memref<8x256xf32, #tpu.memory_space<vmem>>) attributes {dimension_semantics = [#tpu.dimension_semantics<parallel>, #tpu.dimension_semantics<parallel>, #tpu.dimension_semantics<arbitrary>], iteration_bounds = array<i64: 1, 1, 6>, scalar_prefetch = 0 : i64, scratch_operands = 1 : i64, tpu.core_type = #tpu.core_type<tc>, window_params = [{transform_indices = @transform_0, window_bounds = array<i64: 8, 384>}, {transform_indices = @transform_1, window_bounds = array<i64: 384, 256>}, {transform_indices = @transform_2, window_bounds = array<i64: 1, 256>}, {transform_indices = @transform_3, window_bounds = array<i64: 8, 256>}, {transform_indices = @transform_4, window_bounds = array<i64: 8, 256>}]} {
    %c0_i32 = arith.constant 0 : i32
    %0 = arith.cmpi eq, %arg2, %c0_i32 : i32
    %1 = arith.extui %0 : i1 to i32
    %c0_i32_0 = arith.constant 0 : i32
    %2 = arith.cmpi ne, %1, %c0_i32_0 : i32
    scf.if %2 {
      %cst_9 = arith.constant 0.000000e+00 : f32
      %12 = vector.broadcast %cst_9 : f32 to vector<8x256xf32>
      %c0_10 = arith.constant 0 : index
      %c0_11 = arith.constant 0 : index
      %13 = vector.load %arg8[%c0_10, %c0_11] : memref<8x256xf32, #tpu.memory_space<vmem>>, vector<8x256xf32>
      tpu.vector_store %arg8[%c0_10, %c0_11], %12 {strides = array<i32>} : memref<8x256xf32, #tpu.memory_space<vmem>>, vector<8x256xf32>,
    } else {
    }
    %c0 = arith.constant 0 : index
    %c0_1 = arith.constant 0 : index
    %3 = vector.load %arg8[%c0, %c0_1] : memref<8x256xf32, #tpu.memory_space<vmem>>, vector<8x256xf32>
    %c0_2 = arith.constant 0 : index
    %c0_3 = arith.constant 0 : index
    %4 = vector.load %arg3[%c0_2, %c0_3] : memref<8x384xbf16, #tpu.memory_space<vmem>>, vector<8x384xbf16>
    %c0_4 = arith.constant 0 : index
    %c0_5 = arith.constant 0 : index
    %5 = vector.load %arg4[%c0_4, %c0_5] : memref<384x256xbf16, #tpu.memory_space<vmem>>, vector<384x256xbf16>
    %cst = arith.constant dense<0.000000e+00> : vector<8x256xf32>
    %6 = tpu.matmul %4, %5, %cst {dimension_numbers = #tpu.dot_dimension_numbers<[1], [0], [0], [1], [0, 0, 1, 1], [], []>} : vector<8x384xbf16>, vector<384x256xbf16>, vector<8x256xf32> -> vector<8x256xf32>
    %7 = arith.addf %3, %6 : vector<8x256xf32>
    %c0_6 = arith.constant 0 : index
    %c0_7 = arith.constant 0 : index
    %8 = vector.load %arg8[%c0_6, %c0_7] : memref<8x256xf32, #tpu.memory_space<vmem>>, vector<8x256xf32>
    tpu.vector_store %arg8[%c0_6, %c0_7], %7 {strides = array<i32>} : memref<8x256xf32, #tpu.memory_space<vmem>>, vector<8x256xf32>,
    %c5_i32 = arith.constant 5 : i32
    %9 = arith.cmpi eq, %arg2, %c5_i32 : i32
    %10 = arith.extui %9 : i1 to i32
    %c0_i32_8 = arith.constant 0 : i32
    %11 = arith.cmpi ne, %10, %c0_i32_8 : i32
    scf.if %11 {
      %c0_9 = arith.constant 0 : index
      %c0_10 = arith.constant 0 : index
      %12 = vector.load %arg8[%c0_9, %c0_10] : memref<8x256xf32, #tpu.memory_space<vmem>>, vector<8x256xf32>
      %c0_11 = arith.constant 0 : index
      %c0_12 = arith.constant 0 : index
      %13 = vector.load %arg5[%c0_11, %c0_12] : memref<1x256xf32, #tpu.memory_space<vmem>>, vector<1x256xf32>
      %14 = vector.broadcast %13 : vector<1x256xf32> to vector<8x256xf32>
      %15 = arith.addf %12, %14 : vector<8x256xf32>
      %c0_13 = arith.constant 0 : index
      %c0_14 = arith.constant 0 : index
      %16 = vector.load %arg6[%c0_13, %c0_14] : memref<8x256xbf16, #tpu.memory_space<vmem>>, vector<8x256xbf16>
      %17 = arith.extf %16 : vector<8x256xbf16> to vector<8x256xf32>
      %18 = arith.addf %15, %17 : vector<8x256xf32>
      %cst_15 = arith.constant 0.000000e+00 : f32
      %19 = vector.broadcast %cst_15 : f32 to vector<8x256xf32>
      %20 = arith.maximumf %18, %19 : vector<8x256xf32>
      %21 = arith.truncf %20 : vector<8x256xf32> to vector<8x256xbf16>
      %c0_16 = arith.constant 0 : index
      %c0_17 = arith.constant 0 : index
      %22 = vector.load %arg7[%c0_16, %c0_17] : memref<8x256xbf16, #tpu.memory_space<vmem>>, vector<8x256xbf16>
      tpu.vector_store %arg7[%c0_16, %c0_17], %21 {strides = array<i32>} : memref<8x256xbf16, #tpu.memory_space<vmem>>, vector<8x256xbf16>,
    } else {
    }
    return
  }
  func.func @transform_0(%arg0: i32, %arg1: i32, %arg2: i32) -> (i32, i32) {
    %c0_i32 = arith.constant 0 : i32
    return %arg0, %arg2 : i32, i32
  }
  func.func @transform_1(%arg0: i32, %arg1: i32, %arg2: i32) -> (i32, i32) {
    %c0_i32 = arith.constant 0 : i32
    return %arg2, %arg1 : i32, i32
  }
  func.func @transform_2(%arg0: i32, %arg1: i32, %arg2: i32) -> (i32, i32) {
    %c0_i32 = arith.constant 0 : i32
    %c0_i32_0 = arith.constant 0 : i32
    return %c0_i32, %arg1 : i32, i32
  }
  func.func @transform_3(%arg0: i32, %arg1: i32, %arg2: i32) -> (i32, i32) {
    %c0_i32 = arith.constant 0 : i32
    return %arg0, %arg1 : i32, i32
  }
  func.func @transform_4(%arg0: i32, %arg1: i32, %arg2: i32) -> (i32, i32) {
    %c0_i32 = arith.constant 0 : i32
    return %arg0, %arg1 : i32, i32
  }
}

module attributes {stable_mosaic.version = 11 : i64} {
  func.func @_gemm_bn_kernel(%arg0: i32, %arg1: i32, %arg2: i32, %arg3: memref<8x384xbf16, #tpu.memory_space<vmem>>, %arg4: memref<384x256xbf16, #tpu.memory_space<vmem>>, %arg5: memref<1x256xf32, #tpu.memory_space<vmem>>, %arg6: memref<8x256xbf16, #tpu.memory_space<vmem>>, %arg7: memref<8x256xf32, #tpu.memory_space<vmem>>) attributes {dimension_semantics = [#tpu.dimension_semantics<parallel>, #tpu.dimension_semantics<parallel>, #tpu.dimension_semantics<arbitrary>], iteration_bounds = array<i64: 1, 2, 6>, scalar_prefetch = 0 : i64, scratch_operands = 1 : i64, tpu.core_type = #tpu.core_type<tc>, window_params = [{transform_indices = @transform_0, window_bounds = array<i64: 8, 384>}, {transform_indices = @transform_1, window_bounds = array<i64: 384, 256>}, {transform_indices = @transform_2, window_bounds = array<i64: 1, 256>}, {transform_indices = @transform_3, window_bounds = array<i64: 8, 256>}]} {
    %c0_i32 = arith.constant 0 : i32
    %0 = arith.cmpi eq, %arg2, %c0_i32 : i32
    %1 = arith.extui %0 : i1 to i32
    %c0_i32_0 = arith.constant 0 : i32
    %2 = arith.cmpi ne, %1, %c0_i32_0 : i32
    scf.if %2 {
      %cst_9 = arith.constant 0.000000e+00 : f32
      %12 = vector.broadcast %cst_9 : f32 to vector<8x256xf32>
      %c0_10 = arith.constant 0 : index
      %c0_11 = arith.constant 0 : index
      %13 = vector.load %arg7[%c0_10, %c0_11] : memref<8x256xf32, #tpu.memory_space<vmem>>, vector<8x256xf32>
      tpu.vector_store %arg7[%c0_10, %c0_11], %12 {strides = array<i32>} : memref<8x256xf32, #tpu.memory_space<vmem>>, vector<8x256xf32>,
    } else {
    }
    %c0 = arith.constant 0 : index
    %c0_1 = arith.constant 0 : index
    %3 = vector.load %arg7[%c0, %c0_1] : memref<8x256xf32, #tpu.memory_space<vmem>>, vector<8x256xf32>
    %c0_2 = arith.constant 0 : index
    %c0_3 = arith.constant 0 : index
    %4 = vector.load %arg3[%c0_2, %c0_3] : memref<8x384xbf16, #tpu.memory_space<vmem>>, vector<8x384xbf16>
    %c0_4 = arith.constant 0 : index
    %c0_5 = arith.constant 0 : index
    %5 = vector.load %arg4[%c0_4, %c0_5] : memref<384x256xbf16, #tpu.memory_space<vmem>>, vector<384x256xbf16>
    %cst = arith.constant dense<0.000000e+00> : vector<8x256xf32>
    %6 = tpu.matmul %4, %5, %cst {dimension_numbers = #tpu.dot_dimension_numbers<[1], [0], [0], [1], [0, 0, 1, 1], [], []>} : vector<8x384xbf16>, vector<384x256xbf16>, vector<8x256xf32> -> vector<8x256xf32>
    %7 = arith.addf %3, %6 : vector<8x256xf32>
    %c0_6 = arith.constant 0 : index
    %c0_7 = arith.constant 0 : index
    %8 = vector.load %arg7[%c0_6, %c0_7] : memref<8x256xf32, #tpu.memory_space<vmem>>, vector<8x256xf32>
    tpu.vector_store %arg7[%c0_6, %c0_7], %7 {strides = array<i32>} : memref<8x256xf32, #tpu.memory_space<vmem>>, vector<8x256xf32>,
    %c5_i32 = arith.constant 5 : i32
    %9 = arith.cmpi eq, %arg2, %c5_i32 : i32
    %10 = arith.extui %9 : i1 to i32
    %c0_i32_8 = arith.constant 0 : i32
    %11 = arith.cmpi ne, %10, %c0_i32_8 : i32
    scf.if %11 {
      %c0_9 = arith.constant 0 : index
      %c0_10 = arith.constant 0 : index
      %12 = vector.load %arg7[%c0_9, %c0_10] : memref<8x256xf32, #tpu.memory_space<vmem>>, vector<8x256xf32>
      %c0_11 = arith.constant 0 : index
      %c0_12 = arith.constant 0 : index
      %13 = vector.load %arg5[%c0_11, %c0_12] : memref<1x256xf32, #tpu.memory_space<vmem>>, vector<1x256xf32>
      %14 = vector.broadcast %13 : vector<1x256xf32> to vector<8x256xf32>
      %15 = arith.addf %12, %14 : vector<8x256xf32>
      %cst_13 = arith.constant 0.000000e+00 : f32
      %16 = vector.broadcast %cst_13 : f32 to vector<8x256xf32>
      %17 = arith.maximumf %15, %16 : vector<8x256xf32>
      %18 = arith.truncf %17 : vector<8x256xf32> to vector<8x256xbf16>
      %c0_14 = arith.constant 0 : index
      %c0_15 = arith.constant 0 : index
      %19 = vector.load %arg6[%c0_14, %c0_15] : memref<8x256xbf16, #tpu.memory_space<vmem>>, vector<8x256xbf16>
      tpu.vector_store %arg6[%c0_14, %c0_15], %18 {strides = array<i32>} : memref<8x256xbf16, #tpu.memory_space<vmem>>, vector<8x256xbf16>,
    } else {
    }
    return
  }
  func.func @transform_0(%arg0: i32, %arg1: i32, %arg2: i32) -> (i32, i32) {
    %c0_i32 = arith.constant 0 : i32
    return %arg0, %arg2 : i32, i32
  }
  func.func @transform_1(%arg0: i32, %arg1: i32, %arg2: i32) -> (i32, i32) {
    %c0_i32 = arith.constant 0 : i32
    return %arg2, %arg1 : i32, i32
  }
  func.func @transform_2(%arg0: i32, %arg1: i32, %arg2: i32) -> (i32, i32) {
    %c0_i32 = arith.constant 0 : i32
    %c0_i32_0 = arith.constant 0 : i32
    return %c0_i32, %arg1 : i32, i32
  }
  func.func @transform_3(%arg0: i32, %arg1: i32, %arg2: i32) -> (i32, i32) {
    %c0_i32 = arith.constant 0 : i32
    return %arg0, %arg1 : i32, i32
  }
}

module attributes {stable_mosaic.version = 11 : i64} {
  func.func @_gemm_bn_kernel(%arg0: i32, %arg1: i32, %arg2: i32, %arg3: memref<8x128xbf16, #tpu.memory_space<vmem>>, %arg4: memref<128x256xbf16, #tpu.memory_space<vmem>>, %arg5: memref<1x256xf32, #tpu.memory_space<vmem>>, %arg6: memref<8x256xbf16, #tpu.memory_space<vmem>>, %arg7: memref<8x256xf32, #tpu.memory_space<vmem>>) attributes {dimension_semantics = [#tpu.dimension_semantics<parallel>, #tpu.dimension_semantics<parallel>, #tpu.dimension_semantics<arbitrary>], iteration_bounds = array<i64: 1, 1, 1>, scalar_prefetch = 0 : i64, scratch_operands = 1 : i64, tpu.core_type = #tpu.core_type<tc>, window_params = [{transform_indices = @transform_0, window_bounds = array<i64: 8, 128>}, {transform_indices = @transform_1, window_bounds = array<i64: 128, 256>}, {transform_indices = @transform_2, window_bounds = array<i64: 1, 256>}, {transform_indices = @transform_3, window_bounds = array<i64: 8, 256>}]} {
    %c0_i32 = arith.constant 0 : i32
    %0 = arith.cmpi eq, %arg2, %c0_i32 : i32
    %1 = arith.extui %0 : i1 to i32
    %c0_i32_0 = arith.constant 0 : i32
    %2 = arith.cmpi ne, %1, %c0_i32_0 : i32
    scf.if %2 {
      %cst_10 = arith.constant 0.000000e+00 : f32
      %12 = vector.broadcast %cst_10 : f32 to vector<8x256xf32>
      %c0_11 = arith.constant 0 : index
      %c0_12 = arith.constant 0 : index
      %13 = vector.load %arg7[%c0_11, %c0_12] : memref<8x256xf32, #tpu.memory_space<vmem>>, vector<8x256xf32>
      tpu.vector_store %arg7[%c0_11, %c0_12], %12 {strides = array<i32>} : memref<8x256xf32, #tpu.memory_space<vmem>>, vector<8x256xf32>,
    } else {
    }
    %c0 = arith.constant 0 : index
    %c0_1 = arith.constant 0 : index
    %3 = vector.load %arg7[%c0, %c0_1] : memref<8x256xf32, #tpu.memory_space<vmem>>, vector<8x256xf32>
    %c0_2 = arith.constant 0 : index
    %c0_3 = arith.constant 0 : index
    %4 = vector.load %arg3[%c0_2, %c0_3] : memref<8x128xbf16, #tpu.memory_space<vmem>>, vector<8x128xbf16>
    %c0_4 = arith.constant 0 : index
    %c0_5 = arith.constant 0 : index
    %5 = vector.load %arg4[%c0_4, %c0_5] : memref<128x256xbf16, #tpu.memory_space<vmem>>, vector<128x256xbf16>
    %cst = arith.constant dense<0.000000e+00> : vector<8x256xf32>
    %6 = tpu.matmul %4, %5, %cst {dimension_numbers = #tpu.dot_dimension_numbers<[1], [0], [0], [1], [0, 0, 1, 1], [], []>} : vector<8x128xbf16>, vector<128x256xbf16>, vector<8x256xf32> -> vector<8x256xf32>
    %7 = arith.addf %3, %6 : vector<8x256xf32>
    %c0_6 = arith.constant 0 : index
    %c0_7 = arith.constant 0 : index
    %8 = vector.load %arg7[%c0_6, %c0_7] : memref<8x256xf32, #tpu.memory_space<vmem>>, vector<8x256xf32>
    tpu.vector_store %arg7[%c0_6, %c0_7], %7 {strides = array<i32>} : memref<8x256xf32, #tpu.memory_space<vmem>>, vector<8x256xf32>,
    %c0_i32_8 = arith.constant 0 : i32
    %9 = arith.cmpi eq, %arg2, %c0_i32_8 : i32
    %10 = arith.extui %9 : i1 to i32
    %c0_i32_9 = arith.constant 0 : i32
    %11 = arith.cmpi ne, %10, %c0_i32_9 : i32
    scf.if %11 {
      %c0_10 = arith.constant 0 : index
      %c0_11 = arith.constant 0 : index
      %12 = vector.load %arg7[%c0_10, %c0_11] : memref<8x256xf32, #tpu.memory_space<vmem>>, vector<8x256xf32>
      %c0_12 = arith.constant 0 : index
      %c0_13 = arith.constant 0 : index
      %13 = vector.load %arg5[%c0_12, %c0_13] : memref<1x256xf32, #tpu.memory_space<vmem>>, vector<1x256xf32>
      %14 = vector.broadcast %13 : vector<1x256xf32> to vector<8x256xf32>
      %15 = arith.addf %12, %14 : vector<8x256xf32>
      %16 = arith.truncf %15 : vector<8x256xf32> to vector<8x256xbf16>
      %c0_14 = arith.constant 0 : index
      %c0_15 = arith.constant 0 : index
      %17 = vector.load %arg6[%c0_14, %c0_15] : memref<8x256xbf16, #tpu.memory_space<vmem>>, vector<8x256xbf16>
      tpu.vector_store %arg6[%c0_14, %c0_15], %16 {strides = array<i32>} : memref<8x256xbf16, #tpu.memory_space<vmem>>, vector<8x256xbf16>,
    } else {
    }
    return
  }
  func.func @transform_0(%arg0: i32, %arg1: i32, %arg2: i32) -> (i32, i32) {
    %c0_i32 = arith.constant 0 : i32
    return %arg0, %arg2 : i32, i32
  }
  func.func @transform_1(%arg0: i32, %arg1: i32, %arg2: i32) -> (i32, i32) {
    %c0_i32 = arith.constant 0 : i32
    return %arg2, %arg1 : i32, i32
  }
  func.func @transform_2(%arg0: i32, %arg1: i32, %arg2: i32) -> (i32, i32) {
    %c0_i32 = arith.constant 0 : i32
    %c0_i32_0 = arith.constant 0 : i32
    return %c0_i32, %arg1 : i32, i32
  }
  func.func @transform_3(%arg0: i32, %arg1: i32, %arg2: i32) -> (i32, i32) {
    %c0_i32 = arith.constant 0 : i32
    return %arg0, %arg1 : i32, i32
  }
}

module attributes {stable_mosaic.version = 11 : i64} {
  func.func @_gemm_bn_kernel(%arg0: i32, %arg1: i32, %arg2: i32, %arg3: memref<8x512xbf16, #tpu.memory_space<vmem>>, %arg4: memref<512x256xbf16, #tpu.memory_space<vmem>>, %arg5: memref<1x256xf32, #tpu.memory_space<vmem>>, %arg6: memref<8x256xbf16, #tpu.memory_space<vmem>>, %arg7: memref<8x256xbf16, #tpu.memory_space<vmem>>, %arg8: memref<8x256xf32, #tpu.memory_space<vmem>>) attributes {dimension_semantics = [#tpu.dimension_semantics<parallel>, #tpu.dimension_semantics<parallel>, #tpu.dimension_semantics<arbitrary>], iteration_bounds = array<i64: 1, 2, 9>, scalar_prefetch = 0 : i64, scratch_operands = 1 : i64, tpu.core_type = #tpu.core_type<tc>, window_params = [{transform_indices = @transform_0, window_bounds = array<i64: 8, 512>}, {transform_indices = @transform_1, window_bounds = array<i64: 512, 256>}, {transform_indices = @transform_2, window_bounds = array<i64: 1, 256>}, {transform_indices = @transform_3, window_bounds = array<i64: 8, 256>}, {transform_indices = @transform_4, window_bounds = array<i64: 8, 256>}]} {
    %c0_i32 = arith.constant 0 : i32
    %0 = arith.cmpi eq, %arg2, %c0_i32 : i32
    %1 = arith.extui %0 : i1 to i32
    %c0_i32_0 = arith.constant 0 : i32
    %2 = arith.cmpi ne, %1, %c0_i32_0 : i32
    scf.if %2 {
      %cst_9 = arith.constant 0.000000e+00 : f32
      %12 = vector.broadcast %cst_9 : f32 to vector<8x256xf32>
      %c0_10 = arith.constant 0 : index
      %c0_11 = arith.constant 0 : index
      %13 = vector.load %arg8[%c0_10, %c0_11] : memref<8x256xf32, #tpu.memory_space<vmem>>, vector<8x256xf32>
      tpu.vector_store %arg8[%c0_10, %c0_11], %12 {strides = array<i32>} : memref<8x256xf32, #tpu.memory_space<vmem>>, vector<8x256xf32>,
    } else {
    }
    %c0 = arith.constant 0 : index
    %c0_1 = arith.constant 0 : index
    %3 = vector.load %arg8[%c0, %c0_1] : memref<8x256xf32, #tpu.memory_space<vmem>>, vector<8x256xf32>
    %c0_2 = arith.constant 0 : index
    %c0_3 = arith.constant 0 : index
    %4 = vector.load %arg3[%c0_2, %c0_3] : memref<8x512xbf16, #tpu.memory_space<vmem>>, vector<8x512xbf16>
    %c0_4 = arith.constant 0 : index
    %c0_5 = arith.constant 0 : index
    %5 = vector.load %arg4[%c0_4, %c0_5] : memref<512x256xbf16, #tpu.memory_space<vmem>>, vector<512x256xbf16>
    %cst = arith.constant dense<0.000000e+00> : vector<8x256xf32>
    %6 = tpu.matmul %4, %5, %cst {dimension_numbers = #tpu.dot_dimension_numbers<[1], [0], [0], [1], [0, 0, 1, 1], [], []>} : vector<8x512xbf16>, vector<512x256xbf16>, vector<8x256xf32> -> vector<8x256xf32>
    %7 = arith.addf %3, %6 : vector<8x256xf32>
    %c0_6 = arith.constant 0 : index
    %c0_7 = arith.constant 0 : index
    %8 = vector.load %arg8[%c0_6, %c0_7] : memref<8x256xf32, #tpu.memory_space<vmem>>, vector<8x256xf32>
    tpu.vector_store %arg8[%c0_6, %c0_7], %7 {strides = array<i32>} : memref<8x256xf32, #tpu.memory_space<vmem>>, vector<8x256xf32>,
    %c8_i32 = arith.constant 8 : i32
    %9 = arith.cmpi eq, %arg2, %c8_i32 : i32
    %10 = arith.extui %9 : i1 to i32
    %c0_i32_8 = arith.constant 0 : i32
    %11 = arith.cmpi ne, %10, %c0_i32_8 : i32
    scf.if %11 {
      %c0_9 = arith.constant 0 : index
      %c0_10 = arith.constant 0 : index
      %12 = vector.load %arg8[%c0_9, %c0_10] : memref<8x256xf32, #tpu.memory_space<vmem>>, vector<8x256xf32>
      %c0_11 = arith.constant 0 : index
      %c0_12 = arith.constant 0 : index
      %13 = vector.load %arg5[%c0_11, %c0_12] : memref<1x256xf32, #tpu.memory_space<vmem>>, vector<1x256xf32>
      %14 = vector.broadcast %13 : vector<1x256xf32> to vector<8x256xf32>
      %15 = arith.addf %12, %14 : vector<8x256xf32>
      %c0_13 = arith.constant 0 : index
      %c0_14 = arith.constant 0 : index
      %16 = vector.load %arg6[%c0_13, %c0_14] : memref<8x256xbf16, #tpu.memory_space<vmem>>, vector<8x256xbf16>
      %17 = arith.extf %16 : vector<8x256xbf16> to vector<8x256xf32>
      %18 = arith.addf %15, %17 : vector<8x256xf32>
      %cst_15 = arith.constant 0.000000e+00 : f32
      %19 = vector.broadcast %cst_15 : f32 to vector<8x256xf32>
      %20 = arith.maximumf %18, %19 : vector<8x256xf32>
      %21 = arith.truncf %20 : vector<8x256xf32> to vector<8x256xbf16>
      %c0_16 = arith.constant 0 : index
      %c0_17 = arith.constant 0 : index
      %22 = vector.load %arg7[%c0_16, %c0_17] : memref<8x256xbf16, #tpu.memory_space<vmem>>, vector<8x256xbf16>
      tpu.vector_store %arg7[%c0_16, %c0_17], %21 {strides = array<i32>} : memref<8x256xbf16, #tpu.memory_space<vmem>>, vector<8x256xbf16>,
    } else {
    }
    return
  }
  func.func @transform_0(%arg0: i32, %arg1: i32, %arg2: i32) -> (i32, i32) {
    %c0_i32 = arith.constant 0 : i32
    return %arg0, %arg2 : i32, i32
  }
  func.func @transform_1(%arg0: i32, %arg1: i32, %arg2: i32) -> (i32, i32) {
    %c0_i32 = arith.constant 0 : i32
    return %arg2, %arg1 : i32, i32
  }
  func.func @transform_2(%arg0: i32, %arg1: i32, %arg2: i32) -> (i32, i32) {
    %c0_i32 = arith.constant 0 : i32
    %c0_i32_0 = arith.constant 0 : i32
    return %c0_i32, %arg1 : i32, i32
  }
  func.func @transform_3(%arg0: i32, %arg1: i32, %arg2: i32) -> (i32, i32) {
    %c0_i32 = arith.constant 0 : i32
    return %arg0, %arg1 : i32, i32
  }
  func.func @transform_4(%arg0: i32, %arg1: i32, %arg2: i32) -> (i32, i32) {
    %c0_i32 = arith.constant 0 : i32
    return %arg0, %arg1 : i32, i32
  }
}

module attributes {stable_mosaic.version = 11 : i64} {
  func.func @_gemm_bn_kernel(%arg0: i32, %arg1: i32, %arg2: i32, %arg3: memref<8x256xbf16, #tpu.memory_space<vmem>>, %arg4: memref<256x256xbf16, #tpu.memory_space<vmem>>, %arg5: memref<1x256xf32, #tpu.memory_space<vmem>>, %arg6: memref<8x256xbf16, #tpu.memory_space<vmem>>, %arg7: memref<8x256xf32, #tpu.memory_space<vmem>>) attributes {dimension_semantics = [#tpu.dimension_semantics<parallel>, #tpu.dimension_semantics<parallel>, #tpu.dimension_semantics<arbitrary>], iteration_bounds = array<i64: 1, 2, 1>, scalar_prefetch = 0 : i64, scratch_operands = 1 : i64, tpu.core_type = #tpu.core_type<tc>, window_params = [{transform_indices = @transform_0, window_bounds = array<i64: 8, 256>}, {transform_indices = @transform_1, window_bounds = array<i64: 256, 256>}, {transform_indices = @transform_2, window_bounds = array<i64: 1, 256>}, {transform_indices = @transform_3, window_bounds = array<i64: 8, 256>}]} {
    %c0_i32 = arith.constant 0 : i32
    %0 = arith.cmpi eq, %arg2, %c0_i32 : i32
    %1 = arith.extui %0 : i1 to i32
    %c0_i32_0 = arith.constant 0 : i32
    %2 = arith.cmpi ne, %1, %c0_i32_0 : i32
    scf.if %2 {
      %cst_10 = arith.constant 0.000000e+00 : f32
      %12 = vector.broadcast %cst_10 : f32 to vector<8x256xf32>
      %c0_11 = arith.constant 0 : index
      %c0_12 = arith.constant 0 : index
      %13 = vector.load %arg7[%c0_11, %c0_12] : memref<8x256xf32, #tpu.memory_space<vmem>>, vector<8x256xf32>
      tpu.vector_store %arg7[%c0_11, %c0_12], %12 {strides = array<i32>} : memref<8x256xf32, #tpu.memory_space<vmem>>, vector<8x256xf32>,
    } else {
    }
    %c0 = arith.constant 0 : index
    %c0_1 = arith.constant 0 : index
    %3 = vector.load %arg7[%c0, %c0_1] : memref<8x256xf32, #tpu.memory_space<vmem>>, vector<8x256xf32>
    %c0_2 = arith.constant 0 : index
    %c0_3 = arith.constant 0 : index
    %4 = vector.load %arg3[%c0_2, %c0_3] : memref<8x256xbf16, #tpu.memory_space<vmem>>, vector<8x256xbf16>
    %c0_4 = arith.constant 0 : index
    %c0_5 = arith.constant 0 : index
    %5 = vector.load %arg4[%c0_4, %c0_5] : memref<256x256xbf16, #tpu.memory_space<vmem>>, vector<256x256xbf16>
    %cst = arith.constant dense<0.000000e+00> : vector<8x256xf32>
    %6 = tpu.matmul %4, %5, %cst {dimension_numbers = #tpu.dot_dimension_numbers<[1], [0], [0], [1], [0, 0, 1, 1], [], []>} : vector<8x256xbf16>, vector<256x256xbf16>, vector<8x256xf32> -> vector<8x256xf32>
    %7 = arith.addf %3, %6 : vector<8x256xf32>
    %c0_6 = arith.constant 0 : index
    %c0_7 = arith.constant 0 : index
    %8 = vector.load %arg7[%c0_6, %c0_7] : memref<8x256xf32, #tpu.memory_space<vmem>>, vector<8x256xf32>
    tpu.vector_store %arg7[%c0_6, %c0_7], %7 {strides = array<i32>} : memref<8x256xf32, #tpu.memory_space<vmem>>, vector<8x256xf32>,
    %c0_i32_8 = arith.constant 0 : i32
    %9 = arith.cmpi eq, %arg2, %c0_i32_8 : i32
    %10 = arith.extui %9 : i1 to i32
    %c0_i32_9 = arith.constant 0 : i32
    %11 = arith.cmpi ne, %10, %c0_i32_9 : i32
    scf.if %11 {
      %c0_10 = arith.constant 0 : index
      %c0_11 = arith.constant 0 : index
      %12 = vector.load %arg7[%c0_10, %c0_11] : memref<8x256xf32, #tpu.memory_space<vmem>>, vector<8x256xf32>
      %c0_12 = arith.constant 0 : index
      %c0_13 = arith.constant 0 : index
      %13 = vector.load %arg5[%c0_12, %c0_13] : memref<1x256xf32, #tpu.memory_space<vmem>>, vector<1x256xf32>
      %14 = vector.broadcast %13 : vector<1x256xf32> to vector<8x256xf32>
      %15 = arith.addf %12, %14 : vector<8x256xf32>
      %16 = arith.truncf %15 : vector<8x256xf32> to vector<8x256xbf16>
      %c0_14 = arith.constant 0 : index
      %c0_15 = arith.constant 0 : index
      %17 = vector.load %arg6[%c0_14, %c0_15] : memref<8x256xbf16, #tpu.memory_space<vmem>>, vector<8x256xbf16>
      tpu.vector_store %arg6[%c0_14, %c0_15], %16 {strides = array<i32>} : memref<8x256xbf16, #tpu.memory_space<vmem>>, vector<8x256xbf16>,
    } else {
    }
    return
  }
  func.func @transform_0(%arg0: i32, %arg1: i32, %arg2: i32) -> (i32, i32) {
    %c0_i32 = arith.constant 0 : i32
    return %arg0, %arg2 : i32, i32
  }
  func.func @transform_1(%arg0: i32, %arg1: i32, %arg2: i32) -> (i32, i32) {
    %c0_i32 = arith.constant 0 : i32
    return %arg2, %arg1 : i32, i32
  }
  func.func @transform_2(%arg0: i32, %arg1: i32, %arg2: i32) -> (i32, i32) {
    %c0_i32 = arith.constant 0 : i32
    %c0_i32_0 = arith.constant 0 : i32
    return %c0_i32, %arg1 : i32, i32
  }
  func.func @transform_3(%arg0: i32, %arg1: i32, %arg2: i32) -> (i32, i32) {
    %c0_i32 = arith.constant 0 : i32
    return %arg0, %arg1 : i32, i32
  }
}

</mosaic_0001>

<bundles_post_ra>
// kernel: resnet_forward.12
= control target key start
LH: loop header
LB: loop body
LE: loop exit
PB: predicated region body
PF: predicated region fallthrough
CT: control target
= control target key end

     0   :  { %vm18_vm0 = vcmask 523264   ;;  %vm1389_vm1 = vcmask 519168   ;;  %s2852_s1 = inlined_call_operand.vmem [shape: bf16[256,64], index: 1, kind: input, shape index: {}]   ;;  %s2853_s0 = inlined_call_operand.vmem [shape: bf16[512,256], index: 0, kind: input, shape index: {}]   ;;  %s2854_s2 = inlined_call_operand.vmem [shape: f32[1,64], index: 2, kind: input, shape index: {}]   ;;  %s2855_s3 = inlined_call_operand.vmem [shape: bf16[512,64], index: 3, kind: output, shape index: {}]  }
   0x1   :  { %v1849_v0 = vld [vmem:[%s2852_s1 + $0x38] sm:$0xff]  ;;  %v1848_v2 = vld [vmem:[%s2852_s1 + $0x30] sm:$0xff]  ;;  %v1847_v4 = vld [vmem:[%s2852_s1 + $0x28] sm:$0xff] }
   0x2   :  { %v1857_v1 = vld [vmem:[%s2852_s1 + $0x78] sm:$0xff]  ;;  %659 = vmatpush.bf16.msra.mxu0 %v1849_v0  ;;  %1858 = vmatpush.bf16.msra.mxu2 %v1849_v0  ;;  %v1856_v3 = vld [vmem:[%s2852_s1 + $0x70] sm:$0xff]  ;;  %v1855_v5 = vld [vmem:[%s2852_s1 + $0x68] sm:$0xff] }
   0x3   :  { %828 = vmatpush.bf16.msra.mxu1 %v1857_v1  ;;  %1866 = vmatpush.bf16.msra.mxu3 %v1857_v1  ;;  %v1846_v6 = vld [vmem:[%s2852_s1 + $0x20] sm:$0xff]  ;;  %v1845_v8 = vld [vmem:[%s2852_s1 + $0x18] sm:$0xff]  ;;  %v1844_v10 = vld [vmem:[%s2852_s1 + $0x10] sm:$0xff] }
   0x4   :  { %v1854_v7 = vld [vmem:[%s2852_s1 + $0x60] sm:$0xff]  ;;  %v1853_v9 = vld [vmem:[%s2852_s1 + $0x58] sm:$0xff]  ;;  %v1852_v11 = vld [vmem:[%s2852_s1 + $0x50] sm:$0xff] }
   0x5   :  { %v1843_v12 = vld [vmem:[%s2852_s1 + $0x8] sm:$0xff]  ;;  %v1842_v14 = vld [vmem:[%s2852_s1] sm:$0xff]  ;;  %v1468_v28 = vld [vmem:[%s2853_s0 + $0x10] sm:$0xf] }
   0x6   :  { %660 = vmatpush.bf16.msra.mxu0 %v1848_v2  ;;  %1859 = vmatpush.bf16.msra.mxu2 %v1848_v2  ;;  %v1851_v13 = vld [vmem:[%s2852_s1 + $0x48] sm:$0xff]  ;;  %v1850_v15 = vld [vmem:[%s2852_s1 + $0x40] sm:$0xff]  ;;  %v1781_v29 = vld [vmem:[%s2853_s0 + $0x14] sm:$0xf0] }
   0x7   :  { %829 = vmatpush.bf16.msra.mxu1 %v1856_v3  ;;  %1867 = vmatpush.bf16.msra.mxu3 %v1856_v3  ;;  %v1460_v16 = vld [vmem:[%s2853_s0] sm:$0xf]  ;;  %v1779_v17 = vld [vmem:[%s2853_s0 + $0x4] sm:$0xf0]  ;;  %v1778_v20 = vld [vmem:[%s2853_s0 + $0x4] sm:$0xf]  ;;  %v1469_v36 = vor.u32 %v1781_v29, %v1468_v28 }
   0x8   :  { %v1588_v18 = vld [vmem:[%s2853_s0 + $0x100] sm:$0xf]  ;;  %v1811_v19 = vld [vmem:[%s2853_s0 + $0x104] sm:$0xf0]  ;;  %v1462_v21 = vld [vmem:[%s2853_s0 + $0x8] sm:$0xf0]  ;;  %v1461_v24 = vor.u32 %v1779_v17, %v1460_v16 }
   0x9   :  { %v1810_v22 = vld [vmem:[%s2853_s0 + $0x104] sm:$0xf]  ;;  %v1590_v23 = vld [vmem:[%s2853_s0 + $0x108] sm:$0xf0]  ;;  %v1589_v25 = vor.u32 %v1811_v19, %v1588_v18  ;;  %v1465_v26 = vor.u32 %v1778_v20, %v1462_v21  ;;  %v1596_v30 = vld [vmem:[%s2853_s0 + $0x110] sm:$0xf] }
   0xa   :  { %661 = vmatpush.bf16.msra.mxu0 %v1847_v4  ;;  %1860 = vmatpush.bf16.msra.mxu2 %v1847_v4  ;;  %v1593_v27 = vor.u32 %v1810_v22, %v1590_v23  ;;  %v1813_v31 = vld [vmem:[%s2853_s0 + $0x114] sm:$0xf0]  ;;  %v1780_v32 = vld [vmem:[%s2853_s0 + $0x14] sm:$0xf]  ;;  %v1470_v33 = vld [vmem:[%s2853_s0 + $0x18] sm:$0xf0] }
   0xb   :  { %830 = vmatpush.bf16.msra.mxu1 %v1855_v5  ;;  %1868 = vmatpush.bf16.msra.mxu3 %v1855_v5  ;;  %v1812_v34 = vld [vmem:[%s2853_s0 + $0x114] sm:$0xf]  ;;  %v1598_v35 = vld [vmem:[%s2853_s0 + $0x118] sm:$0xf0]  ;;  %v1597_v37 = vor.u32 %v1813_v31, %v1596_v30  ;;  %v1473_v38 = vor.u32 %v1780_v32, %v1470_v33  ;;  %v1476_v40 = vld [vmem:[%s2853_s0 + $0x20] sm:$0xf] }
   0xc   :  { %v1601_v39 = vor.u32 %v1812_v34, %v1598_v35  ;;  %v1783_v41 = vld [vmem:[%s2853_s0 + $0x24] sm:$0xf0]  ;;  %v1604_v42 = vld [vmem:[%s2853_s0 + $0x120] sm:$0xf]  ;;  %v1782_v44 = vld [vmem:[%s2853_s0 + $0x24] sm:$0xf] }
   0xd   :  { %v1815_v43 = vld [vmem:[%s2853_s0 + $0x124] sm:$0xf0]  ;;  %v1478_v45 = vld [vmem:[%s2853_s0 + $0x28] sm:$0xf0]  ;;  %v1814_v46 = vld [vmem:[%s2853_s0 + $0x124] sm:$0xf]  ;;  %v1477_v48 = vor.u32 %v1783_v41, %v1476_v40 }
   0xe   :  { %662 = vmatpush.bf16.msra.mxu0 %v1846_v6  ;;  %1861 = vmatpush.bf16.msra.mxu2 %v1846_v6  ;;  %v1606_v47 = vld [vmem:[%s2853_s0 + $0x128] sm:$0xf0]  ;;  %v1605_v49 = vor.u32 %v1815_v43, %v1604_v42  ;;  %v1481_v50 = vor.u32 %v1782_v44, %v1478_v45  ;;  %v1484_v52 = vld [vmem:[%s2853_s0 + $0x30] sm:$0xf]  ;;  %v1785_v53 = vld [vmem:[%s2853_s0 + $0x34] sm:$0xf0] }
   0xf   :  { %831 = vmatpush.bf16.msra.mxu1 %v1854_v7  ;;  %1869 = vmatpush.bf16.msra.mxu3 %v1854_v7  ;;  %v1609_v51 = vor.u32 %v1814_v46, %v1606_v47  ;;  %v1612_v54 = vld [vmem:[%s2853_s0 + $0x130] sm:$0xf]  ;;  %v1817_v55 = vld [vmem:[%s2853_s0 + $0x134] sm:$0xf0]  ;;  %v1784_v56 = vld [vmem:[%s2853_s0 + $0x34] sm:$0xf]  ;;  %v1485_v60 = vor.u32 %v1785_v53, %v1484_v52 }
  0x10   :  { %v1486_v57 = vld [vmem:[%s2853_s0 + $0x38] sm:$0xf0]  ;;  %v1816_v58 = vld [vmem:[%s2853_s0 + $0x134] sm:$0xf]  ;;  %v1613_v61 = vor.u32 %v1817_v55, %v1612_v54  ;;  %v1492_v0 = vld [vmem:[%s2853_s0 + $0x40] sm:$0xf] }
  0x11   :  { %v1614_v59 = vld [vmem:[%s2853_s0 + $0x138] sm:$0xf0]  ;;  %v1489_v62 = vor.u32 %v1784_v56, %v1486_v57  ;;  %v1787_v1 = vld [vmem:[%s2853_s0 + $0x44] sm:$0xf0]  ;;  %v1620_v2 = vld [vmem:[%s2853_s0 + $0x140] sm:$0xf] }
  0x12   :  { %663 = vmatpush.bf16.msra.mxu0 %v1845_v8  ;;  %1862 = vmatpush.bf16.msra.mxu2 %v1845_v8  ;;  %v1617_v63 = vor.u32 %v1816_v58, %v1614_v59  ;;  %v1819_v3 = vld [vmem:[%s2853_s0 + $0x144] sm:$0xf0]  ;;  %v1786_v4 = vld [vmem:[%s2853_s0 + $0x44] sm:$0xf]  ;;  %v1494_v5 = vld [vmem:[%s2853_s0 + $0x48] sm:$0xf0]  ;;  %v1493_v8 = vor.u32 %v1787_v1, %v1492_v0 }
  0x13   :  { %832 = vmatpush.bf16.msra.mxu1 %v1853_v9  ;;  %1870 = vmatpush.bf16.msra.mxu3 %v1853_v9  ;;  %v1818_v6 = vld [vmem:[%s2853_s0 + $0x144] sm:$0xf]  ;;  %v1622_v7 = vld [vmem:[%s2853_s0 + $0x148] sm:$0xf0]  ;;  %v1621_v9 = vor.u32 %v1819_v3, %v1620_v2  ;;  %v1788_v16 = vld [vmem:[%s2853_s0 + $0x54] sm:$0xf] }
  0x14   :  { %v1502_v17 = vld [vmem:[%s2853_s0 + $0x58] sm:$0xf0]  ;;  %v1820_v18 = vld [vmem:[%s2853_s0 + $0x154] sm:$0xf]  ;;  %v1790_v28 = vld [vmem:[%s2853_s0 + $0x64] sm:$0xf] }
  0x15   :  { %v1630_v19 = vld [vmem:[%s2853_s0 + $0x158] sm:$0xf0]  ;;  %v1505_v22 = vor.u32 %v1788_v16, %v1502_v17  ;;  %v1510_v29 = vld [vmem:[%s2853_s0 + $0x68] sm:$0xf0]  ;;  %v1822_v30 = vld [vmem:[%s2853_s0 + $0x164] sm:$0xf] }
  0x16   :  { %664 = vmatpush.bf16.msra.mxu0 %v1844_v10  ;;  %1863 = vmatpush.bf16.msra.mxu2 %v1844_v10  ;;  %v1497_v10 = vor.u32 %v1786_v4, %v1494_v5  ;;  %v1633_v23 = vor.u32 %v1820_v18, %v1630_v19  ;;  %v1638_v31 = vld [vmem:[%s2853_s0 + $0x168] sm:$0xf0]  ;;  %v1513_v34 = vor.u32 %v1790_v28, %v1510_v29  ;;  %v1825_v40 = vld [vmem:[%s2853_s0 + $0x174] sm:$0xf0]  ;;  %v1792_v41 = vld [vmem:[%s2853_s0 + $0x74] sm:$0xf] }
  0x17   :  { %833 = vmatpush.bf16.msra.mxu1 %v1852_v11  ;;  %1871 = vmatpush.bf16.msra.mxu3 %v1852_v11  ;;  %v1625_v11 = vor.u32 %v1818_v6, %v1622_v7  ;;  %v1641_v35 = vor.u32 %v1822_v30, %v1638_v31  ;;  %v1518_v42 = vld [vmem:[%s2853_s0 + $0x78] sm:$0xf0]  ;;  %v1824_v43 = vld [vmem:[%s2853_s0 + $0x174] sm:$0xf]  ;;  %v1827_v52 = vld [vmem:[%s2853_s0 + $0x184] sm:$0xf0] }
  0x18   :  { %v1646_v44 = vld [vmem:[%s2853_s0 + $0x178] sm:$0xf0]  ;;  %v1521_v47 = vor.u32 %v1792_v41, %v1518_v42  ;;  %v1794_v53 = vld [vmem:[%s2853_s0 + $0x84] sm:$0xf]  ;;  %v1526_v54 = vld [vmem:[%s2853_s0 + $0x88] sm:$0xf0] }
  0x19   :  { %v1826_v55 = vld [vmem:[%s2853_s0 + $0x184] sm:$0xf]  ;;  %v1654_v56 = vld [vmem:[%s2853_s0 + $0x188] sm:$0xf0]  ;;  %v2244_v5 = vld [vmem:[%s2854_s2] ss:$0 sm:$0xff] }
  0x1a   :  { %665 = vmatpush.bf16.msra.mxu0 %v1843_v12  ;;  %1864 = vmatpush.bf16.msra.mxu2 %v1843_v12  ;;  %v1500_v12 = vld [vmem:[%s2853_s0 + $0x50] sm:$0xf]  ;;  %v1540_v31 = vld [vmem:[%s2853_s0 + $0xa0] sm:$0xf] }
  0x1b   :  { %834 = vmatpush.bf16.msra.mxu1 %v1851_v13  ;;  %1872 = vmatpush.bf16.msra.mxu3 %v1851_v13  ;;  %v1789_v13 = vld [vmem:[%s2853_s0 + $0x54] sm:$0xf0]  ;;  %v1532_v7 = vld [vmem:[%s2853_s0 + $0x90] sm:$0xf] }
  0x1c   :  { %v1501_v20 = vor.u32 %v1789_v13, %v1500_v12  ;;  %v1534_v12 = vld [vmem:[%s2853_s0 + $0x98] sm:$0xf0] }
  0x1e   :  { %666 = vmatpush.bf16.msra.mxu0 %v1842_v14  ;;  %1865 = vmatpush.bf16.msra.mxu2 %v1842_v14  ;;  %v1628_v14 = vld [vmem:[%s2853_s0 + $0x150] sm:$0xf] }
  0x1f   :  { %835 = vmatpush.bf16.msra.mxu1 %v1850_v15  ;;  %1873 = vmatpush.bf16.msra.mxu3 %v1850_v15  ;;  %v1821_v15 = vld [vmem:[%s2853_s0 + $0x154] sm:$0xf0] }
  0x20   :  { %v1629_v21 = vor.u32 %v1821_v15, %v1628_v14  ;;  %v1828_v14 = vld [vmem:[%s2853_s0 + $0x194] sm:$0xf]  ;;  %v1662_v15 = vld [vmem:[%s2853_s0 + $0x198] sm:$0xf0] }
  0x21   :  { %667 = vmatmul.bf16.vlgmr.msra.gmra.mxu0 %v1461_v24  ;;  %747 = vmatmul.bf16.vlgmr.msra.gmra.mxu2 %v1589_v25  ;;  %v1508_v24 = vld [vmem:[%s2853_s0 + $0x60] sm:$0xf]  ;;  %v1791_v25 = vld [vmem:[%s2853_s0 + $0x64] sm:$0xf0] }
  0x22   :  { %836 = vmatmul.bf16.vlgmr.msra.gmra.mxu1 %v1465_v26  ;;  %916 = vmatmul.bf16.vlgmr.msra.gmra.mxu3 %v1593_v27  ;;  %v1636_v26 = vld [vmem:[%s2853_s0 + $0x160] sm:$0xf]  ;;  %v1823_v27 = vld [vmem:[%s2853_s0 + $0x164] sm:$0xf0]  ;;  %v1509_v32 = vor.u32 %v1791_v25, %v1508_v24  ;;  %v1665_v24 = vor.u32 %v1828_v14, %v1662_v15 }
  0x23   :  { %v1637_v33 = vor.u32 %v1823_v27, %v1636_v26 }
  0x31   :  { %672 = vmatmul.bf16.gmra.mxu0 %v1469_v36  ;;  %752 = vmatmul.bf16.gmra.mxu2 %v1597_v37  ;;  %v1877_v36 = vmov 0.0   ;;  %v1516_v37 = vld [vmem:[%s2853_s0 + $0x70] sm:$0xf] }
  0x32   :  { %841 = vmatmul.bf16.gmra.mxu1 %v1473_v38  ;;  %921 = vmatmul.bf16.gmra.mxu3 %v1601_v39  ;;  %19 = vst.msk [vmem:[#allocation2] sm:$0xff] %vm18_vm0, %v1877_v36  ;;  %v1793_v38 = vld [vmem:[%s2853_s0 + $0x74] sm:$0xf0]  ;;  %v1644_v39 = vld [vmem:[%s2853_s0 + $0x170] sm:$0xf] }
  0x33   :  { %20 = vst.msk [vmem:[#allocation2 + $0x8] sm:$0xff] %vm18_vm0, %v1877_v36  ;;  %v1517_v45 = vor.u32 %v1793_v38, %v1516_v37  ;;  %v1645_v46 = vor.u32 %v1825_v40, %v1644_v39  ;;  %v1798_v39 = vld [vmem:[%s2853_s0 + $0xa4] sm:$0xf]  ;;  %v1542_v40 = vld [vmem:[%s2853_s0 + $0xa8] sm:$0xf0] }
  0x34   :  { %21 = vst.msk [vmem:[#allocation2 + $0x10] sm:$0xff] %vm18_vm0, %v1877_v36 }
  0x35   :  { %22 = vst.msk [vmem:[#allocation2 + $0x18] sm:$0xff] %vm18_vm0, %v1877_v36 }
  0x36   :  { %23 = vst.msk [vmem:[#allocation2 + $0x20] sm:$0xff] %vm18_vm0, %v1877_v36 }
  0x37   :  { %24 = vst.msk [vmem:[#allocation2 + $0x28] sm:$0xff] %vm18_vm0, %v1877_v36 }
  0x38   :  { %25 = vst.msk [vmem:[#allocation2 + $0x30] sm:$0xff] %vm18_vm0, %v1877_v36 }
  0x39   :  { %26 = vst.msk [vmem:[#allocation2 + $0x38] sm:$0xff] %vm18_vm0, %v1877_v36 }
  0x3a   :  { %27 = vst.msk [vmem:[#allocation2 + $0x40] sm:$0xff] %vm18_vm0, %v1877_v36  ;;  %v84_v41 = vld [vmem:[#allocation2 + $0x8] sm:$0xff] }
  0x3b   :  { %28 = vst.msk [vmem:[#allocation2 + $0x48] sm:$0xff] %vm18_vm0, %v1877_v36 }
  0x3c   :  { %29 = vst.msk [vmem:[#allocation2 + $0x50] sm:$0xff] %vm18_vm0, %v1877_v36 }
  0x3d   :  { %30 = vst.msk [vmem:[#allocation2 + $0x58] sm:$0xff] %vm18_vm0, %v1877_v36 }
  0x3e   :  { %31 = vst.msk [vmem:[#allocation2 + $0x60] sm:$0xff] %vm18_vm0, %v1877_v36 }
  0x3f   :  { %32 = vst.msk [vmem:[#allocation2 + $0x68] sm:$0xff] %vm18_vm0, %v1877_v36 }
  0x40   :  { %33 = vst.msk [vmem:[#allocation2 + $0x70] sm:$0xff] %vm18_vm0, %v1877_v36 }
  0x41   :  { %677 = vmatmul.bf16.gmra.mxu0 %v1477_v48  ;;  %757 = vmatmul.bf16.gmra.mxu2 %v1605_v49  ;;  %v1649_v48 = vor.u32 %v1824_v43, %v1646_v44  ;;  %34 = vst.msk [vmem:[#allocation2 + $0x78] sm:$0xff] %vm18_vm0, %v1877_v36  ;;  %v1524_v49 = vld [vmem:[%s2853_s0 + $0x80] sm:$0xf]  ;;  %v1830_v43 = vld [vmem:[%s2853_s0 + $0x1a4] sm:$0xf] }
  0x42   :  { %846 = vmatmul.bf16.gmra.mxu1 %v1481_v50  ;;  %926 = vmatmul.bf16.gmra.mxu3 %v1609_v51  ;;  %35 = vst.msk [vmem:[#allocation2 + $0x80] sm:$0xff] %vm18_vm0, %v1877_v36  ;;  %v1795_v50 = vld [vmem:[%s2853_s0 + $0x84] sm:$0xf0]  ;;  %v1652_v51 = vld [vmem:[%s2853_s0 + $0x180] sm:$0xf] }
  0x43   :  { %36 = vst.msk [vmem:[#allocation2 + $0x88] sm:$0xff] %vm18_vm0, %v1877_v36  ;;  %v1525_v57 = vor.u32 %v1795_v50, %v1524_v49  ;;  %v1653_v58 = vor.u32 %v1827_v52, %v1652_v51  ;;  %v1670_v44 = vld [vmem:[%s2853_s0 + $0x1a8] sm:$0xf0]  ;;  %v85_v49 = vld [vmem:[#allocation2 + $0x10] sm:$0xff] }
  0x44   :  { %37 = vst.msk [vmem:[#allocation2 + $0x90] sm:$0xff] %vm18_vm0, %v1877_v36 }
  0x45   :  { %38 = vst.msk [vmem:[#allocation2 + $0x98] sm:$0xff] %vm18_vm0, %v1877_v36 }
  0x46   :  { %39 = vst.msk [vmem:[#allocation2 + $0xa0] sm:$0xff] %vm18_vm0, %v1877_v36 }
  0x47   :  { %40 = vst.msk [vmem:[#allocation2 + $0xa8] sm:$0xff] %vm18_vm0, %v1877_v36 }
  0x48   :  { %41 = vst.msk [vmem:[#allocation2 + $0xb0] sm:$0xff] %vm18_vm0, %v1877_v36 }
  0x49   :  { %42 = vst.msk [vmem:[#allocation2 + $0xb8] sm:$0xff] %vm18_vm0, %v1877_v36 }
  0x4a   :  { %43 = vst.msk [vmem:[#allocation2 + $0xc0] sm:$0xff] %vm18_vm0, %v1877_v36 }
  0x4b   :  { %44 = vst.msk [vmem:[#allocation2 + $0xc8] sm:$0xff] %vm18_vm0, %v1877_v36 }
  0x4c   :  { %45 = vst.msk [vmem:[#allocation2 + $0xd0] sm:$0xff] %vm18_vm0, %v1877_v36 }
  0x4d   :  { %46 = vst.msk [vmem:[#allocation2 + $0xd8] sm:$0xff] %vm18_vm0, %v1877_v36 }
  0x4e   :  { %47 = vst.msk [vmem:[#allocation2 + $0xe0] sm:$0xff] %vm18_vm0, %v1877_v36 }
  0x4f   :  { %48 = vst.msk [vmem:[#allocation2 + $0xe8] sm:$0xff] %vm18_vm0, %v1877_v36 }
  0x50   :  { %49 = vst.msk [vmem:[#allocation2 + $0xf0] sm:$0xff] %vm18_vm0, %v1877_v36 }
  0x51   :  { %682 = vmatmul.bf16.gmra.mxu0 %v1485_v60  ;;  %762 = vmatmul.bf16.gmra.mxu2 %v1613_v61  ;;  %50 = vst.msk [vmem:[#allocation2 + $0xf8] sm:$0xff] %vm18_vm0, %v1877_v36  ;;  %v1529_v60 = vor.u32 %v1794_v53, %v1526_v54  ;;  %v1657_v61 = vor.u32 %v1826_v55, %v1654_v56 }
  0x52   :  { %851 = vmatmul.bf16.gmra.mxu1 %v1489_v62  ;;  %931 = vmatmul.bf16.gmra.mxu3 %v1617_v63  ;;  %v83_v62 = vld [vmem:[#allocation2] sm:$0xff]  ;;  %51 = vst.msk [vmem:[#allocation2 + $0x100] sm:$0xff] %vm18_vm0, %v1877_v36 }
  0x53   :  { %52 = vst.msk [vmem:[#allocation2 + $0x108] sm:$0xff] %vm18_vm0, %v1877_v36 }
  0x54   :  { %53 = vst.msk [vmem:[#allocation2 + $0x110] sm:$0xff] %vm18_vm0, %v1877_v36 }
  0x55   :  { %54 = vst.msk [vmem:[#allocation2 + $0x118] sm:$0xff] %vm18_vm0, %v1877_v36 }
  0x56   :  { %55 = vst.msk [vmem:[#allocation2 + $0x120] sm:$0xff] %vm18_vm0, %v1877_v36 }
  0x57   :  { %56 = vst.msk [vmem:[#allocation2 + $0x128] sm:$0xff] %vm18_vm0, %v1877_v36 }
  0x58   :  { %57 = vst.msk [vmem:[#allocation2 + $0x130] sm:$0xff] %vm18_vm0, %v1877_v36 }
  0x59   :  { %58 = vst.msk [vmem:[#allocation2 + $0x138] sm:$0xff] %vm18_vm0, %v1877_v36  ;;  %v115_v37 = vld [vmem:[#allocation2 + $0x100] sm:$0xff] }
  0x5a   :  { %59 = vst.msk [vmem:[#allocation2 + $0x140] sm:$0xff] %vm18_vm0, %v1877_v36 }
  0x5b   :  { %60 = vst.msk [vmem:[#allocation2 + $0x148] sm:$0xff] %vm18_vm0, %v1877_v36  ;;  %v117_v55 = vld [vmem:[#allocation2 + $0x110] sm:$0xff] }
  0x5c   :  { %61 = vst.msk [vmem:[#allocation2 + $0x150] sm:$0xff] %vm18_vm0, %v1877_v36 }
  0x5d   :  { %62 = vst.msk [vmem:[#allocation2 + $0x158] sm:$0xff] %vm18_vm0, %v1877_v36 }
  0x5e   :  { %63 = vst.msk [vmem:[#allocation2 + $0x160] sm:$0xff] %vm18_vm0, %v1877_v36 }
  0x5f   :  { %64 = vst.msk [vmem:[#allocation2 + $0x168] sm:$0xff] %vm18_vm0, %v1877_v36 }
  0x60   :  { %65 = vst.msk [vmem:[#allocation2 + $0x170] sm:$0xff] %vm18_vm0, %v1877_v36 }
  0x61   :  { %687 = vmatmul.bf16.gmra.mxu0 %v1493_v8  ;;  %767 = vmatmul.bf16.gmra.mxu2 %v1621_v9  ;;  %v1797_v8 = vld [vmem:[%s2853_s0 + $0x94] sm:$0xf0]  ;;  %v1660_v9 = vld [vmem:[%s2853_s0 + $0x190] sm:$0xf]  ;;  %66 = vst.msk [vmem:[#allocation2 + $0x178] sm:$0xff] %vm18_vm0, %v1877_v36 }
  0x62   :  { %856 = vmatmul.bf16.gmra.mxu1 %v1497_v10  ;;  %936 = vmatmul.bf16.gmra.mxu3 %v1625_v11  ;;  %v1829_v10 = vld [vmem:[%s2853_s0 + $0x194] sm:$0xf0]  ;;  %v1796_v11 = vld [vmem:[%s2853_s0 + $0x94] sm:$0xf]  ;;  %v1533_v19 = vor.u32 %v1797_v8, %v1532_v7  ;;  %67 = vst.msk [vmem:[#allocation2 + $0x180] sm:$0xff] %vm18_vm0, %v1877_v36 }
  0x63   :  { %68 = vst.msk [vmem:[#allocation2 + $0x188] sm:$0xff] %vm18_vm0, %v1877_v36 }
  0x64   :  { %69 = vst.msk [vmem:[#allocation2 + $0x190] sm:$0xff] %vm18_vm0, %v1877_v36 }
  0x65   :  { %70 = vst.msk [vmem:[#allocation2 + $0x198] sm:$0xff] %vm18_vm0, %v1877_v36 }
  0x66   :  { %71 = vst.msk [vmem:[#allocation2 + $0x1a0] sm:$0xff] %vm18_vm0, %v1877_v36 }
  0x67   :  { %72 = vst.msk [vmem:[#allocation2 + $0x1a8] sm:$0xff] %vm18_vm0, %v1877_v36 }
  0x68   :  { %73 = vst.msk [vmem:[#allocation2 + $0x1b0] sm:$0xff] %vm18_vm0, %v1877_v36 }
  0x69   :  { %74 = vst.msk [vmem:[#allocation2 + $0x1b8] sm:$0xff] %vm18_vm0, %v1877_v36 }
  0x6a   :  { %75 = vst.msk [vmem:[#allocation2 + $0x1c0] sm:$0xff] %vm18_vm0, %v1877_v36 }
  0x6b   :  { %76 = vst.msk [vmem:[#allocation2 + $0x1c8] sm:$0xff] %vm18_vm0, %v1877_v36 }
  0x6c   :  { %77 = vst.msk [vmem:[#allocation2 + $0x1d0] sm:$0xff] %vm18_vm0, %v1877_v36 }
  0x6d   :  { %78 = vst.msk [vmem:[#allocation2 + $0x1d8] sm:$0xff] %vm18_vm0, %v1877_v36 }
  0x6e   :  { %79 = vst.msk [vmem:[#allocation2 + $0x1e0] sm:$0xff] %vm18_vm0, %v1877_v36 }
  0x6f   :  { %80 = vst.msk [vmem:[#allocation2 + $0x1e8] sm:$0xff] %vm18_vm0, %v1877_v36 }
  0x70   :  { %81 = vst.msk [vmem:[#allocation2 + $0x1f0] sm:$0xff] %vm18_vm0, %v1877_v36 }
  0x71   :  { %692 = vmatmul.bf16.gmra.mxu0 %v1501_v20  ;;  %772 = vmatmul.bf16.gmra.mxu2 %v1629_v21  ;;  %v1661_v20 = vor.u32 %v1829_v10, %v1660_v9  ;;  %82 = vst.msk [vmem:[#allocation2 + $0x1f8] sm:$0xff] %vm18_vm0, %v1877_v36  ;;  %v119_v9 = vld [vmem:[#allocation2 + $0x120] sm:$0xff] }
  0x72   :  { %861 = vmatmul.bf16.gmra.mxu1 %v1505_v22  ;;  %941 = vmatmul.bf16.gmra.mxu3 %v1633_v23  ;;  %v1537_v23 = vor.u32 %v1796_v11, %v1534_v12 }
  0x81   :  { %697 = vmatmul.bf16.gmra.mxu0 %v1509_v32  ;;  %777 = vmatmul.bf16.gmra.mxu2 %v1637_v33  ;;  %v1799_v32 = vld [vmem:[%s2853_s0 + $0xa4] sm:$0xf0] }
  0x82   :  { %866 = vmatmul.bf16.gmra.mxu1 %v1513_v34  ;;  %946 = vmatmul.bf16.gmra.mxu3 %v1641_v35  ;;  %v1668_v34 = vld [vmem:[%s2853_s0 + $0x1a0] sm:$0xf]  ;;  %v1831_v35 = vld [vmem:[%s2853_s0 + $0x1a4] sm:$0xf0]  ;;  %v1541_v52 = vor.u32 %v1799_v32, %v1540_v31  ;;  %v1832_v32 = vld [vmem:[%s2853_s0 + $0x1b4] sm:$0xf] }
  0x83   :  { %v1669_v53 = vor.u32 %v1831_v35, %v1668_v34 }
  0x91   :  { %702 = vmatmul.bf16.gmra.mxu0 %v1517_v45  ;;  %782 = vmatmul.bf16.gmra.mxu2 %v1645_v46  ;;  %v116_v45 = vld [vmem:[#allocation2 + $0x108] sm:$0xff] }
  0x92   :  { %871 = vmatmul.bf16.gmra.mxu1 %v1521_v47  ;;  %951 = vmatmul.bf16.gmra.mxu3 %v1649_v48 }
  0x9e   :  { %v668_v59 = vpop.f32.mrf.mxu0 }
  0x9f   :  { %v837_v63 = vpop.f32.mrf.mxu1 }
  0xa0   :  { %v838_v0 = vadd.f32 %v837_v63, %v668_v59  ;;  %v1673_v59 = vor.u32 %v1830_v43, %v1670_v44 }
  0xa1   :  { %707 = vmatmul.bf16.gmra.mxu0 %v1525_v57  ;;  %787 = vmatmul.bf16.gmra.mxu2 %v1653_v58  ;;  %v1545_v58 = vor.u32 %v1798_v39, %v1542_v40 }
  0xa2   :  { %v997_v1 = vadd.f32 %v838_v0, %v83_v62  ;;  %876 = vmatmul.bf16.gmra.mxu1 %v1529_v60  ;;  %956 = vmatmul.bf16.gmra.mxu3 %v1657_v61  ;;  %v86_v61 = vld [vmem:[#allocation2 + $0x18] sm:$0xff] }
  0xa4   :  { %1062 = vst.msk [vmem:[#allocation2] sm:$0xff] %vm18_vm0, %v997_v1  ;;  %v748_v2 = vpop.f32.mrf.mxu2  ;;  %v118_v1 = vld [vmem:[#allocation2 + $0x118] sm:$0xff] }
  0xa5   :  { %v917_v3 = vpop.f32.mrf.mxu3 }
  0xa6   :  { %v670_v4 = vpop.f32.mrf.mxu0  ;;  %v918_v33 = vadd.f32 %v917_v3, %v748_v2 }
  0xa7   :  { %v839_v6 = vpop.f32.mrf.mxu1 }
  0xa8   :  { %v840_v38 = vadd.f32 %v839_v6, %v670_v4  ;;  %v1029_v48 = vadd.f32 %v918_v33, %v115_v37  ;;  %v87_v4 = vld [vmem:[#allocation2 + $0x20] sm:$0xff]  ;;  %v1678_v33 = vld [vmem:[%s2853_s0 + $0x1b8] sm:$0xf0] }
  0xaa   :  { %v998_v54 = vadd.f32 %v840_v38, %v84_v41  ;;  %1094 = vst.msk [vmem:[#allocation2 + $0x100] sm:$0xff] %vm18_vm0, %v1029_v48 }
  0xab   :  { %v1129_v13 = vld [vmem:[#allocation2] sm:$0xff] }
  0xac   :  { %v1197_v16 = vadd.f32 %v2244_v5, %v1129_v13  ;;  %v750_v17 = vpop.f32.mrf.mxu2  ;;  %1063 = vst.msk [vmem:[#allocation2 + $0x8] sm:$0xff] %vm18_vm0, %v998_v54  ;;  %v88_v13 = vld [vmem:[#allocation2 + $0x28] sm:$0xff] }
  0xad   :  { %v919_v18 = vpop.f32.mrf.mxu3 }
  0xae   :  { %v1261_v21 = vmax.f32 %v1197_v16, 0.0  ;;  %v673_v22 = vpop.f32.mrf.mxu0  ;;  %v920_v42 = vadd.f32 %v919_v18, %v750_v17  ;;  %v1548_v18 = vld [vmem:[%s2853_s0 + $0xb0] sm:$0xf] }
  0xaf   :  { %v842_v25 = vpop.f32.mrf.mxu1 }
  0xb0   :  { %v1325_v26 = vpack.c.bf16 %v1261_v21, %v1261_v21  ;;  %v843_v46 = vadd.f32 %v842_v25, %v673_v22  ;;  %v1030_v60 = vadd.f32 %v920_v42, %v116_v45  ;;  %v1676_v22 = vld [vmem:[%s2853_s0 + $0x1b0] sm:$0xf] }
  0xb1   :  { %712 = vmatmul.bf16.gmra.mxu0 %v1533_v19  ;;  %792 = vmatmul.bf16.gmra.mxu2 %v1661_v20  ;;  %v1161_v15 = vld [vmem:[#allocation2 + $0x100] sm:$0xff]  ;;  %v1801_v19 = vld [vmem:[%s2853_s0 + $0xb4] sm:$0xf0] }
  0xb2   :  { %1390 = vst.msk [vmem:[%s2855_s3] sm:$0xf] %vm1389_vm1, %v1325_v26  ;;  %881 = vmatmul.bf16.gmra.mxu1 %v1537_v23  ;;  %961 = vmatmul.bf16.gmra.mxu3 %v1665_v24  ;;  %v999_v0 = vadd.f32 %v843_v46, %v85_v49  ;;  %v1229_v20 = vadd.f32 %v2244_v5, %v1161_v15  ;;  %v1833_v23 = vld [vmem:[%s2853_s0 + $0x1b4] sm:$0xf0]  ;;  %v121_v15 = vld [vmem:[#allocation2 + $0x130] sm:$0xff] }
  0xb3   :  { %1095 = vst.msk [vmem:[#allocation2 + $0x108] sm:$0xff] %vm18_vm0, %v1030_v60  ;;  %v1130_v21 = vld [vmem:[#allocation2 + $0x8] sm:$0xff]  ;;  %v1549_v39 = vor.u32 %v1801_v19, %v1548_v18  ;;  %v1677_v40 = vor.u32 %v1833_v23, %v1676_v22 }
  0xb4   :  { %v753_v27 = vpop.f32.mrf.mxu2  ;;  %1064 = vst.msk [vmem:[#allocation2 + $0x10] sm:$0xff] %vm18_vm0, %v999_v0  ;;  %v1198_v24 = vadd.f32 %v2244_v5, %v1130_v21  ;;  %v90_v21 = vld [vmem:[#allocation2 + $0x38] sm:$0xff] }
  0xb5   :  { %v922_v28 = vpop.f32.mrf.mxu3 }
  0xb6   :  { %v675_v29 = vpop.f32.mrf.mxu0  ;;  %v923_v50 = vadd.f32 %v922_v28, %v753_v27  ;;  %v1800_v27 = vld [vmem:[%s2853_s0 + $0xb4] sm:$0xf]  ;;  %v1550_v28 = vld [vmem:[%s2853_s0 + $0xb8] sm:$0xf0]  ;;  %v1262_v34 = vmax.f32 %v1198_v24, 0.0 }
  0xb7   :  { %v844_v30 = vpop.f32.mrf.mxu1  ;;  %v1553_v46 = vor.u32 %v1800_v27, %v1550_v28  ;;  %v1803_v27 = vld [vmem:[%s2853_s0 + $0xc4] sm:$0xf0]  ;;  %v1684_v28 = vld [vmem:[%s2853_s0 + $0x1c0] sm:$0xf] }
  0xb8   :  { %v845_v56 = vadd.f32 %v844_v30, %v675_v29  ;;  %v1031_v3 = vadd.f32 %v923_v50, %v117_v55  ;;  %v1293_v29 = vmax.f32 %v1229_v20, 0.0 }
  0xba   :  { %v1000_v6 = vadd.f32 %v845_v56, %v86_v61  ;;  %1096 = vst.msk [vmem:[#allocation2 + $0x110] sm:$0xff] %vm18_vm0, %v1031_v3  ;;  %v1162_v25 = vld [vmem:[#allocation2 + $0x108] sm:$0xff]  ;;  %v1357_v41 = vpack.c.bf16 %v1293_v29, %v1293_v29 }
  0xbb   :  { %v1230_v30 = vadd.f32 %v2244_v5, %v1162_v25  ;;  %v1131_v31 = vld [vmem:[#allocation2 + $0x10] sm:$0xff]  ;;  %v1835_v29 = vld [vmem:[%s2853_s0 + $0x1c4] sm:$0xf0] }
  0xbc   :  { %v755_v47 = vpop.f32.mrf.mxu2  ;;  %1065 = vst.msk [vmem:[#allocation2 + $0x18] sm:$0xff] %vm18_vm0, %v1000_v6  ;;  %v1199_v35 = vadd.f32 %v2244_v5, %v1131_v31  ;;  %v1802_v31 = vld [vmem:[%s2853_s0 + $0xc4] sm:$0xf] }
  0xbd   :  { %v924_v51 = vpop.f32.mrf.mxu3  ;;  %v1294_v42 = vmax.f32 %v1230_v30, 0.0  ;;  %1422 = vst.msk [vmem:[%s2855_s3 + $0x80] sm:$0xf] %vm1389_vm1, %v1357_v41 }
  0xbe   :  { %v678_v57 = vpop.f32.mrf.mxu0  ;;  %v925_v62 = vadd.f32 %v924_v51, %v755_v47  ;;  %v1326_v47 = vpack.c.bf16 %v1262_v34, %v1262_v34  ;;  %v1263_v48 = vmax.f32 %v1199_v35, 0.0  ;;  %v1686_v34 = vld [vmem:[%s2853_s0 + $0x1c8] sm:$0xf0] }
  0xbf   :  { %v847_v63 = vpop.f32.mrf.mxu1 }
  0xc0   :  { %v848_v2 = vadd.f32 %v847_v63, %v678_v57  ;;  %v1032_v7 = vadd.f32 %v925_v62, %v118_v1  ;;  %1391 = vst.msk [vmem:[%s2855_s3 + $0x4] sm:$0xf] %vm1389_vm1, %v1326_v47  ;;  %v120_v62 = vld [vmem:[#allocation2 + $0x128] sm:$0xff]  ;;  %v91_v47 = vld [vmem:[#allocation2 + $0x40] sm:$0xff] }
  0xc1   :  { %717 = vmatmul.bf16.gmra.mxu0 %v1541_v52  ;;  %797 = vmatmul.bf16.gmra.mxu2 %v1669_v53  ;;  %v1163_v37 = vld [vmem:[#allocation2 + $0x110] sm:$0xff]  ;;  %v1681_v52 = vor.u32 %v1832_v32, %v1678_v33  ;;  %v1358_v53 = vpack.c.bf16 %v1294_v42, %v1294_v42  ;;  %v1558_v32 = vld [vmem:[%s2853_s0 + $0xc8] sm:$0xf0]  ;;  %v1834_v33 = vld [vmem:[%s2853_s0 + $0x1c4] sm:$0xf] }
  0xc2   :  { %886 = vmatmul.bf16.gmra.mxu1 %v1545_v58  ;;  %966 = vmatmul.bf16.gmra.mxu3 %v1673_v59  ;;  %v1001_v36 = vadd.f32 %v848_v2, %v87_v4  ;;  %1097 = vst.msk [vmem:[#allocation2 + $0x118] sm:$0xff] %vm18_vm0, %v1032_v7  ;;  %v1231_v43 = vadd.f32 %v2244_v5, %v1163_v37  ;;  %v89_v7 = vld [vmem:[#allocation2 + $0x30] sm:$0xff]  ;;  %v122_v37 = vld [vmem:[#allocation2 + $0x138] sm:$0xff] }
  0xc3   :  { %v1132_v44 = vld [vmem:[#allocation2 + $0x18] sm:$0xff]  ;;  %v1327_v59 = vpack.c.bf16 %v1263_v48, %v1263_v48  ;;  %1423 = vst.msk [vmem:[%s2855_s3 + $0x84] sm:$0xf] %vm1389_vm1, %v1358_v53 }
  0xc4   :  { %v758_v8 = vpop.f32.mrf.mxu2  ;;  %1066 = vst.msk [vmem:[#allocation2 + $0x20] sm:$0xff] %vm18_vm0, %v1001_v36  ;;  %v1200_v49 = vadd.f32 %v2244_v5, %v1132_v44  ;;  %v1295_v54 = vmax.f32 %v1231_v43, 0.0  ;;  %v1561_v44 = vor.u32 %v1802_v31, %v1558_v32 }
  0xc5   :  { %v927_v10 = vpop.f32.mrf.mxu3  ;;  %1392 = vst.msk [vmem:[%s2855_s3 + $0x8] sm:$0xf] %vm1389_vm1, %v1327_v59 }
  0xc6   :  { %v928_v11 = vadd.f32 %v927_v10, %v758_v8  ;;  %v680_v12 = vpop.f32.mrf.mxu0  ;;  %v1264_v60 = vmax.f32 %v1200_v49, 0.0  ;;  %v1359_v63 = vpack.c.bf16 %v1295_v54, %v1295_v54 }
  0xc7   :  { %v849_v14 = vpop.f32.mrf.mxu1 }
  0xc8   :  { %v1033_v16 = vadd.f32 %v928_v11, %v119_v9  ;;  %v850_v17 = vadd.f32 %v849_v14, %v680_v12  ;;  %v1328_v3 = vpack.c.bf16 %v1264_v60, %v1264_v60  ;;  %1424 = vst.msk [vmem:[%s2855_s3 + $0x88] sm:$0xf] %vm1389_vm1, %v1359_v63 }
  0xc9   :  { %v1164_v50 = vld [vmem:[#allocation2 + $0x118] sm:$0xff] }
  0xca   :  { %1098 = vst.msk [vmem:[#allocation2 + $0x120] sm:$0xff] %vm18_vm0, %v1033_v16  ;;  %v1002_v26 = vadd.f32 %v850_v17, %v88_v13  ;;  %v1232_v55 = vadd.f32 %v2244_v5, %v1164_v50 }
  0xcb   :  { %v1133_v56 = vld [vmem:[#allocation2 + $0x20] sm:$0xff]  ;;  %1393 = vst.msk [vmem:[%s2855_s3 + $0xc] sm:$0xf] %vm1389_vm1, %v1328_v3 }
  0xcc   :  { %1067 = vst.msk [vmem:[#allocation2 + $0x28] sm:$0xff] %vm18_vm0, %v1002_v26  ;;  %v760_v38 = vpop.f32.mrf.mxu2  ;;  %v1201_v61 = vadd.f32 %v2244_v5, %v1133_v56  ;;  %v1296_v0 = vmax.f32 %v1232_v55, 0.0  ;;  %v1556_v26 = vld [vmem:[%s2853_s0 + $0xc0] sm:$0xf] }
  0xcd   :  { %v929_v45 = vpop.f32.mrf.mxu3 }
  0xce   :  { %v683_v51 = vpop.f32.mrf.mxu0  ;;  %v930_v57 = vadd.f32 %v929_v45, %v760_v38  ;;  %v1265_v4 = vmax.f32 %v1201_v61, 0.0  ;;  %v1360_v36 = vpack.c.bf16 %v1296_v0, %v1296_v0  ;;  %v1689_v45 = vor.u32 %v1834_v33, %v1686_v34  ;;  %v123_v0 = vld [vmem:[#allocation2 + $0x140] sm:$0xff] }
  0xcf   :  { %v852_v58 = vpop.f32.mrf.mxu1 }
  0xd0   :  { %v853_v2 = vadd.f32 %v852_v58, %v683_v51  ;;  %v1034_v9 = vadd.f32 %v930_v57, %v120_v62  ;;  %v1329_v10 = vpack.c.bf16 %v1265_v4, %v1265_v4  ;;  %1425 = vst.msk [vmem:[%s2855_s3 + $0x8c] sm:$0xf] %vm1389_vm1, %v1360_v36 }
  0xd1   :  { %v1165_v1 = vld [vmem:[#allocation2 + $0x120] sm:$0xff]  ;;  %722 = vmatmul.bf16.gmra.mxu0 %v1549_v39  ;;  %802 = vmatmul.bf16.gmra.mxu2 %v1677_v40  ;;  %v1557_v39 = vor.u32 %v1803_v27, %v1556_v26  ;;  %v1685_v40 = vor.u32 %v1835_v29, %v1684_v28  ;;  %v124_v26 = vld [vmem:[#allocation2 + $0x148] sm:$0xff] }
  0xd2   :  { %v1233_v6 = vadd.f32 %v2244_v5, %v1165_v1  ;;  %891 = vmatmul.bf16.gmra.mxu1 %v1553_v46  ;;  %971 = vmatmul.bf16.gmra.mxu3 %v1681_v52  ;;  %v1003_v14 = vadd.f32 %v853_v2, %v89_v7  ;;  %1394 = vst.msk [vmem:[%s2855_s3 + $0x10] sm:$0xf] %vm1389_vm1, %v1329_v10  ;;  %v92_v7 = vld [vmem:[#allocation2 + $0x48] sm:$0xff] }
  0xd3   :  { %v1134_v8 = vld [vmem:[#allocation2 + $0x28] sm:$0xff]  ;;  %1099 = vst.msk [vmem:[#allocation2 + $0x128] sm:$0xff] %vm18_vm0, %v1034_v9 }
  0xd4   :  { %v1297_v11 = vmax.f32 %v1233_v6, 0.0  ;;  %v1202_v12 = vadd.f32 %v2244_v5, %v1134_v8  ;;  %v763_v13 = vpop.f32.mrf.mxu2  ;;  %1068 = vst.msk [vmem:[#allocation2 + $0x30] sm:$0xff] %vm18_vm0, %v1003_v14 }
  0xd5   :  { %v932_v16 = vpop.f32.mrf.mxu3 }
  0xd6   :  { %v1361_v17 = vpack.c.bf16 %v1297_v11, %v1297_v11  ;;  %v1266_v18 = vmax.f32 %v1202_v12, 0.0  ;;  %v933_v19 = vadd.f32 %v932_v16, %v763_v13  ;;  %v685_v20 = vpop.f32.mrf.mxu0  ;;  %v1564_v11 = vld [vmem:[%s2853_s0 + $0xd0] sm:$0xf]  ;;  %v1805_v12 = vld [vmem:[%s2853_s0 + $0xd4] sm:$0xf0] }
  0xd7   :  { %v854_v22 = vpop.f32.mrf.mxu1  ;;  %v1692_v13 = vld [vmem:[%s2853_s0 + $0x1d0] sm:$0xf]  ;;  %v1565_v28 = vor.u32 %v1805_v12, %v1564_v11  ;;  %v126_v11 = vld [vmem:[#allocation2 + $0x158] sm:$0xff] }
  0xd8   :  { %1426 = vst.msk [vmem:[%s2855_s3 + $0x90] sm:$0xf] %vm1389_vm1, %v1361_v17  ;;  %v1330_v23 = vpack.c.bf16 %v1266_v18, %v1266_v18  ;;  %v1035_v24 = vadd.f32 %v933_v19, %v121_v15  ;;  %v855_v25 = vadd.f32 %v854_v22, %v685_v20  ;;  %v1837_v15 = vld [vmem:[%s2853_s0 + $0x1d4] sm:$0xf0]  ;;  %v1804_v18 = vld [vmem:[%s2853_s0 + $0xd4] sm:$0xf] }
  0xd9   :  { %v1566_v19 = vld [vmem:[%s2853_s0 + $0xd8] sm:$0xf0]  ;;  %v1693_v29 = vor.u32 %v1837_v15, %v1692_v13 }
  0xda   :  { %1395 = vst.msk [vmem:[%s2855_s3 + $0x14] sm:$0xf] %vm1389_vm1, %v1330_v23  ;;  %v1004_v30 = vadd.f32 %v855_v25, %v90_v21  ;;  %v1166_v41 = vld [vmem:[#allocation2 + $0x128] sm:$0xff]  ;;  %v1836_v21 = vld [vmem:[%s2853_s0 + $0x1d4] sm:$0xf] }
  0xdb   :  { %1100 = vst.msk [vmem:[#allocation2 + $0x130] sm:$0xff] %vm18_vm0, %v1035_v24  ;;  %v1234_v46 = vadd.f32 %v2244_v5, %v1166_v41  ;;  %v1135_v49 = vld [vmem:[#allocation2 + $0x30] sm:$0xff]  ;;  %v1694_v22 = vld [vmem:[%s2853_s0 + $0x1d8] sm:$0xf0] }
  0xdc   :  { %1069 = vst.msk [vmem:[#allocation2 + $0x38] sm:$0xff] %vm18_vm0, %v1004_v30  ;;  %v765_v35 = vpop.f32.mrf.mxu2  ;;  %v1203_v53 = vadd.f32 %v2244_v5, %v1135_v49  ;;  %v1569_v30 = vor.u32 %v1804_v18, %v1566_v19  ;;  %v125_v49 = vld [vmem:[#allocation2 + $0x150] sm:$0xff] }
  0xdd   :  { %v934_v38 = vpop.f32.mrf.mxu3  ;;  %v1298_v52 = vmax.f32 %v1234_v46, 0.0 }
  0xde   :  { %v935_v42 = vadd.f32 %v934_v38, %v765_v35  ;;  %v688_v43 = vpop.f32.mrf.mxu0  ;;  %v1267_v57 = vmax.f32 %v1203_v53, 0.0  ;;  %v1697_v35 = vor.u32 %v1836_v21, %v1694_v22  ;;  %v95_v21 = vld [vmem:[#allocation2 + $0x60] sm:$0xff] }
  0xdf   :  { %v857_v48 = vpop.f32.mrf.mxu1  ;;  %v1362_v56 = vpack.c.bf16 %v1298_v52, %v1298_v52 }
  0xe0   :  { %v1036_v50 = vadd.f32 %v935_v42, %v122_v37  ;;  %v858_v51 = vadd.f32 %v857_v48, %v688_v43  ;;  %v1331_v62 = vpack.c.bf16 %v1267_v57, %v1267_v57  ;;  %v93_v37 = vld [vmem:[#allocation2 + $0x50] sm:$0xff] }
  0xe1   :  { %727 = vmatmul.bf16.gmra.mxu0 %v1557_v39  ;;  %807 = vmatmul.bf16.gmra.mxu2 %v1685_v40  ;;  %1427 = vst.msk [vmem:[%s2855_s3 + $0x94] sm:$0xf] %vm1389_vm1, %v1362_v56 }
  0xe2   :  { %v1167_v54 = vld [vmem:[#allocation2 + $0x130] sm:$0xff]  ;;  %1101 = vst.msk [vmem:[#allocation2 + $0x138] sm:$0xff] %vm18_vm0, %v1036_v50  ;;  %v1005_v55 = vadd.f32 %v858_v51, %v91_v47  ;;  %896 = vmatmul.bf16.gmra.mxu1 %v1561_v44  ;;  %976 = vmatmul.bf16.gmra.mxu3 %v1689_v45 }
  0xe3   :  { %v1235_v58 = vadd.f32 %v2244_v5, %v1167_v54  ;;  %v1136_v59 = vld [vmem:[#allocation2 + $0x38] sm:$0xff]  ;;  %1396 = vst.msk [vmem:[%s2855_s3 + $0x18] sm:$0xf] %vm1389_vm1, %v1331_v62  ;;  %v1700_v62 = vld [vmem:[%s2853_s0 + $0x1e0] sm:$0xf] }
  0xe4   :  { %v1204_v60 = vadd.f32 %v2244_v5, %v1136_v59  ;;  %1070 = vst.msk [vmem:[#allocation2 + $0x40] sm:$0xff] %vm18_vm0, %v1005_v55  ;;  %v768_v61 = vpop.f32.mrf.mxu2  ;;  %v94_v55 = vld [vmem:[#allocation2 + $0x58] sm:$0xff] }
  0xe5   :  { %v1299_v63 = vmax.f32 %v1235_v58, 0.0  ;;  %v937_v1 = vpop.f32.mrf.mxu3 }
  0xe6   :  { %v1268_v2 = vmax.f32 %v1204_v60, 0.0  ;;  %v938_v3 = vadd.f32 %v937_v1, %v768_v61  ;;  %v690_v4 = vpop.f32.mrf.mxu0  ;;  %v1572_v60 = vld [vmem:[%s2853_s0 + $0xe0] sm:$0xf]  ;;  %v1807_v61 = vld [vmem:[%s2853_s0 + $0xe4] sm:$0xf0] }
  0xe7   :  { %v1363_v6 = vpack.c.bf16 %v1299_v63, %v1299_v63  ;;  %v859_v36 = vpop.f32.mrf.mxu1  ;;  %v1839_v63 = vld [vmem:[%s2853_s0 + $0x1e4] sm:$0xf0]  ;;  %v1573_v13 = vor.u32 %v1807_v61, %v1572_v60 }
  0xe8   :  { %v1332_v8 = vpack.c.bf16 %v1268_v2, %v1268_v2  ;;  %v1037_v9 = vadd.f32 %v938_v3, %v123_v0  ;;  %v860_v10 = vadd.f32 %v859_v36, %v690_v4  ;;  %v1806_v0 = vld [vmem:[%s2853_s0 + $0xe4] sm:$0xf]  ;;  %v1574_v3 = vld [vmem:[%s2853_s0 + $0xe8] sm:$0xf0] }
  0xe9   :  { %1428 = vst.msk [vmem:[%s2855_s3 + $0x98] sm:$0xf] %vm1389_vm1, %v1363_v6  ;;  %v1168_v14 = vld [vmem:[#allocation2 + $0x138] sm:$0xff]  ;;  %v1702_v36 = vld [vmem:[%s2853_s0 + $0x1e8] sm:$0xf0]  ;;  %v1577_v18 = vor.u32 %v1806_v0, %v1574_v3 }
  0xea   :  { %1397 = vst.msk [vmem:[%s2855_s3 + $0x1c] sm:$0xf] %vm1389_vm1, %v1332_v8  ;;  %v1236_v16 = vadd.f32 %v2244_v5, %v1168_v14  ;;  %v1006_v17 = vadd.f32 %v860_v10, %v92_v7  ;;  %v1838_v7 = vld [vmem:[%s2853_s0 + $0x1e4] sm:$0xf]  ;;  %v1701_v14 = vor.u32 %v1839_v63, %v1700_v62  ;;  %v128_v60 = vld [vmem:[#allocation2 + $0x168] sm:$0xff] }
  0xeb   :  { %v1137_v20 = vld [vmem:[#allocation2 + $0x40] sm:$0xff]  ;;  %1102 = vst.msk [vmem:[#allocation2 + $0x140] sm:$0xff] %vm18_vm0, %v1037_v9  ;;  %v1705_v19 = vor.u32 %v1838_v7, %v1702_v36  ;;  %v97_v7 = vld [vmem:[#allocation2 + $0x70] sm:$0xff] }
  0xec   :  { %v1300_v23 = vmax.f32 %v1236_v16, 0.0  ;;  %v1205_v24 = vadd.f32 %v2244_v5, %v1137_v20  ;;  %1071 = vst.msk [vmem:[#allocation2 + $0x48] sm:$0xff] %vm18_vm0, %v1006_v17  ;;  %v770_v25 = vpop.f32.mrf.mxu2 }
  0xed   :  { %v939_v27 = vpop.f32.mrf.mxu3 }
  0xee   :  { %v1364_v31 = vpack.c.bf16 %v1300_v23, %v1300_v23  ;;  %v1269_v32 = vmax.f32 %v1205_v24, 0.0  ;;  %v940_v33 = vadd.f32 %v939_v27, %v770_v25  ;;  %v693_v34 = vpop.f32.mrf.mxu0 }
  0xef   :  { %v862_v38 = vpop.f32.mrf.mxu1 }
  0xf0   :  { %1429 = vst.msk [vmem:[%s2855_s3 + $0x9c] sm:$0xf] %vm1389_vm1, %v1364_v31  ;;  %v1333_v39 = vpack.c.bf16 %v1269_v32, %v1269_v32  ;;  %v1038_v40 = vadd.f32 %v940_v33, %v124_v26  ;;  %v863_v41 = vadd.f32 %v862_v38, %v693_v34  ;;  %v127_v33 = vld [vmem:[#allocation2 + $0x160] sm:$0xff] }
  0xf1   :  { %732 = vmatmul.bf16.gmra.mxu0 %v1565_v28  ;;  %812 = vmatmul.bf16.gmra.mxu2 %v1693_v29 }
  0xf2   :  { %1398 = vst.msk [vmem:[%s2855_s3 + $0x20] sm:$0xf] %vm1389_vm1, %v1333_v39  ;;  %v1169_v42 = vld [vmem:[#allocation2 + $0x140] sm:$0xff]  ;;  %v1007_v43 = vadd.f32 %v863_v41, %v93_v37  ;;  %901 = vmatmul.bf16.gmra.mxu1 %v1569_v30  ;;  %981 = vmatmul.bf16.gmra.mxu3 %v1697_v35 }
  0xf3   :  { %v1237_v44 = vadd.f32 %v2244_v5, %v1169_v42  ;;  %v1138_v45 = vld [vmem:[#allocation2 + $0x48] sm:$0xff]  ;;  %1103 = vst.msk [vmem:[#allocation2 + $0x148] sm:$0xff] %vm18_vm0, %v1038_v40 }
  0xf4   :  { %v1206_v46 = vadd.f32 %v2244_v5, %v1138_v45  ;;  %1072 = vst.msk [vmem:[#allocation2 + $0x50] sm:$0xff] %vm18_vm0, %v1007_v43  ;;  %v773_v47 = vpop.f32.mrf.mxu2  ;;  %v96_v40 = vld [vmem:[#allocation2 + $0x68] sm:$0xff]  ;;  %v1580_v45 = vld [vmem:[%s2853_s0 + $0xf0] sm:$0xf] }
  0xf5   :  { %v1301_v48 = vmax.f32 %v1237_v44, 0.0  ;;  %v942_v50 = vpop.f32.mrf.mxu3 }
  0xf6   :  { %v1270_v51 = vmax.f32 %v1206_v46, 0.0  ;;  %v943_v52 = vadd.f32 %v942_v50, %v773_v47  ;;  %v695_v53 = vpop.f32.mrf.mxu0  ;;  %v1809_v46 = vld [vmem:[%s2853_s0 + $0xf4] sm:$0xf0]  ;;  %v1708_v47 = vld [vmem:[%s2853_s0 + $0x1f0] sm:$0xf] }
  0xf7   :  { %v1365_v54 = vpack.c.bf16 %v1301_v48, %v1301_v48  ;;  %v864_v56 = vpop.f32.mrf.mxu1  ;;  %v1841_v48 = vld [vmem:[%s2853_s0 + $0x1f4] sm:$0xf0]  ;;  %v1581_v62 = vor.u32 %v1809_v46, %v1580_v45 }
  0xf8   :  { %v1334_v57 = vpack.c.bf16 %v1270_v51, %v1270_v51  ;;  %v1039_v58 = vadd.f32 %v943_v52, %v125_v49  ;;  %v865_v59 = vadd.f32 %v864_v56, %v695_v53  ;;  %v1808_v49 = vld [vmem:[%s2853_s0 + $0xf4] sm:$0xf]  ;;  %v1582_v52 = vld [vmem:[%s2853_s0 + $0xf8] sm:$0xf0]  ;;  %v1709_v63 = vor.u32 %v1841_v48, %v1708_v47 }
  0xf9   :  { %1430 = vst.msk [vmem:[%s2855_s3 + $0xa0] sm:$0xf] %vm1389_vm1, %v1365_v54  ;;  %v1710_v56 = vld [vmem:[%s2853_s0 + $0x1f8] sm:$0xf0]  ;;  %v1585_v3 = vor.u32 %v1808_v49, %v1582_v52 }
  0xfa   :  { %1399 = vst.msk [vmem:[%s2855_s3 + $0x24] sm:$0xf] %vm1389_vm1, %v1334_v57  ;;  %v1170_v1 = vld [vmem:[#allocation2 + $0x148] sm:$0xff]  ;;  %v1008_v2 = vadd.f32 %v865_v59, %v94_v55  ;;  %v1840_v55 = vld [vmem:[%s2853_s0 + $0x1f4] sm:$0xf] }
  0xfb   :  { %v1238_v4 = vadd.f32 %v2244_v5, %v1170_v1  ;;  %v1139_v6 = vld [vmem:[#allocation2 + $0x50] sm:$0xff]  ;;  %1104 = vst.msk [vmem:[#allocation2 + $0x150] sm:$0xff] %vm18_vm0, %v1039_v58 }
  0xfc   :  { %v1207_v8 = vadd.f32 %v2244_v5, %v1139_v6  ;;  %1073 = vst.msk [vmem:[#allocation2 + $0x58] sm:$0xff] %vm18_vm0, %v1008_v2  ;;  %v775_v9 = vpop.f32.mrf.mxu2 }
  0xfd   :  { %v1302_v10 = vmax.f32 %v1238_v4, 0.0  ;;  %v944_v12 = vpop.f32.mrf.mxu3  ;;  %v1713_v4 = vor.u32 %v1840_v55, %v1710_v56  ;;  %v131_v55 = vld [vmem:[#allocation2 + $0x180] sm:$0xff] }
  0xfe   :  { %v1271_v15 = vmax.f32 %v1207_v8, 0.0  ;;  %v945_v16 = vadd.f32 %v944_v12, %v775_v9  ;;  %v698_v17 = vpop.f32.mrf.mxu0 }
  0xff   :  { %v1366_v20 = vpack.c.bf16 %v1302_v10, %v1302_v10  ;;  %v867_v22 = vpop.f32.mrf.mxu1 }
 0x100   :  { %v1335_v23 = vpack.c.bf16 %v1271_v15, %v1271_v15  ;;  %v1040_v24 = vadd.f32 %v945_v16, %v126_v11  ;;  %v868_v25 = vadd.f32 %v867_v22, %v698_v17 }
 0x101   :  { %1431 = vst.msk [vmem:[%s2855_s3 + $0xa4] sm:$0xf] %vm1389_vm1, %v1366_v20  ;;  %737 = vmatmul.bf16.gmra.mxu0 %v1573_v13  ;;  %817 = vmatmul.bf16.gmra.mxu2 %v1701_v14 }
 0x102   :  { %1400 = vst.msk [vmem:[%s2855_s3 + $0x28] sm:$0xf] %vm1389_vm1, %v1335_v23  ;;  %v1171_v26 = vld [vmem:[#allocation2 + $0x150] sm:$0xff]  ;;  %v1009_v27 = vadd.f32 %v868_v25, %v95_v21  ;;  %906 = vmatmul.bf16.gmra.mxu1 %v1577_v18  ;;  %986 = vmatmul.bf16.gmra.mxu3 %v1705_v19 }
 0x103   :  { %v1239_v28 = vadd.f32 %v2244_v5, %v1171_v26  ;;  %v1140_v29 = vld [vmem:[#allocation2 + $0x58] sm:$0xff]  ;;  %1105 = vst.msk [vmem:[#allocation2 + $0x158] sm:$0xff] %vm18_vm0, %v1040_v24  ;;  %v129_v18 = vld [vmem:[#allocation2 + $0x170] sm:$0xff] }
 0x104   :  { %v1208_v30 = vadd.f32 %v2244_v5, %v1140_v29  ;;  %1074 = vst.msk [vmem:[#allocation2 + $0x60] sm:$0xff] %vm18_vm0, %v1009_v27  ;;  %v778_v31 = vpop.f32.mrf.mxu2  ;;  %v98_v24 = vld [vmem:[#allocation2 + $0x78] sm:$0xff] }
 0x105   :  { %v1303_v32 = vmax.f32 %v1239_v28, 0.0  ;;  %v947_v34 = vpop.f32.mrf.mxu3 }
 0x106   :  { %v1272_v35 = vmax.f32 %v1208_v30, 0.0  ;;  %v948_v37 = vadd.f32 %v947_v34, %v778_v31  ;;  %v700_v38 = vpop.f32.mrf.mxu0 }
 0x107   :  { %v1367_v39 = vpack.c.bf16 %v1303_v32, %v1303_v32  ;;  %v869_v41 = vpop.f32.mrf.mxu1 }
 0x108   :  { %v1336_v42 = vpack.c.bf16 %v1272_v35, %v1272_v35  ;;  %v1041_v43 = vadd.f32 %v948_v37, %v127_v33  ;;  %v870_v44 = vadd.f32 %v869_v41, %v700_v38  ;;  %v130_v37 = vld [vmem:[#allocation2 + $0x178] sm:$0xff] }
 0x109   :  { %1432 = vst.msk [vmem:[%s2855_s3 + $0xa8] sm:$0xf] %vm1389_vm1, %v1367_v39 }
 0x10a   :  { %1401 = vst.msk [vmem:[%s2855_s3 + $0x2c] sm:$0xf] %vm1389_vm1, %v1336_v42  ;;  %v1172_v50 = vld [vmem:[#allocation2 + $0x158] sm:$0xff]  ;;  %v1010_v51 = vadd.f32 %v870_v44, %v96_v40 }
 0x10b   :  { %v1240_v53 = vadd.f32 %v2244_v5, %v1172_v50  ;;  %v1141_v54 = vld [vmem:[#allocation2 + $0x60] sm:$0xff]  ;;  %1106 = vst.msk [vmem:[#allocation2 + $0x160] sm:$0xff] %vm18_vm0, %v1041_v43 }
 0x10c   :  { %v1209_v57 = vadd.f32 %v2244_v5, %v1141_v54  ;;  %1075 = vst.msk [vmem:[#allocation2 + $0x68] sm:$0xff] %vm18_vm0, %v1010_v51  ;;  %v780_v58 = vpop.f32.mrf.mxu2  ;;  %v99_v43 = vld [vmem:[#allocation2 + $0x80] sm:$0xff] }
 0x10d   :  { %v1304_v59 = vmax.f32 %v1240_v53, 0.0  ;;  %v949_v61 = vpop.f32.mrf.mxu3 }
 0x10e   :  { %v1273_v0 = vmax.f32 %v1209_v57, 0.0  ;;  %v950_v1 = vadd.f32 %v949_v61, %v780_v58  ;;  %v703_v2 = vpop.f32.mrf.mxu0  ;;  %v100_v61 = vld [vmem:[#allocation2 + $0x88] sm:$0xff] }
 0x10f   :  { %v1368_v6 = vpack.c.bf16 %v1304_v59, %v1304_v59  ;;  %v872_v36 = vpop.f32.mrf.mxu1 }
 0x110   :  { %v1337_v8 = vpack.c.bf16 %v1273_v0, %v1273_v0  ;;  %v1042_v9 = vadd.f32 %v950_v1, %v128_v60  ;;  %v873_v10 = vadd.f32 %v872_v36, %v703_v2 }
 0x111   :  { %1433 = vst.msk [vmem:[%s2855_s3 + $0xac] sm:$0xf] %vm1389_vm1, %v1368_v6  ;;  %742 = vmatmul.bf16.gmra.mxu0 %v1581_v62  ;;  %822 = vmatmul.bf16.gmra.mxu2 %v1709_v63 }
 0x112   :  { %1402 = vst.msk [vmem:[%s2855_s3 + $0x30] sm:$0xf] %vm1389_vm1, %v1337_v8  ;;  %v1173_v11 = vld [vmem:[#allocation2 + $0x160] sm:$0xff]  ;;  %v1011_v12 = vadd.f32 %v873_v10, %v97_v7  ;;  %911 = vmatmul.bf16.gmra.mxu1 %v1585_v3  ;;  %991 = vmatmul.bf16.gmra.mxu3 %v1713_v4 }
 0x113   :  { %v1241_v13 = vadd.f32 %v2244_v5, %v1173_v11  ;;  %v1142_v14 = vld [vmem:[#allocation2 + $0x68] sm:$0xff]  ;;  %1107 = vst.msk [vmem:[#allocation2 + $0x168] sm:$0xff] %vm18_vm0, %v1042_v9 }
 0x114   :  { %v1210_v15 = vadd.f32 %v2244_v5, %v1142_v14  ;;  %1076 = vst.msk [vmem:[#allocation2 + $0x70] sm:$0xff] %vm18_vm0, %v1011_v12  ;;  %v783_v16 = vpop.f32.mrf.mxu2  ;;  %v132_v9 = vld [vmem:[#allocation2 + $0x188] sm:$0xff] }
 0x115   :  { %v1305_v17 = vmax.f32 %v1241_v13, 0.0  ;;  %v952_v19 = vpop.f32.mrf.mxu3 }
 0x116   :  { %v1274_v20 = vmax.f32 %v1210_v15, 0.0  ;;  %v953_v21 = vadd.f32 %v952_v19, %v783_v16  ;;  %v705_v22 = vpop.f32.mrf.mxu0  ;;  %v101_v15 = vld [vmem:[#allocation2 + $0x90] sm:$0xff] }
 0x117   :  { %v1369_v23 = vpack.c.bf16 %v1305_v17, %v1305_v17  ;;  %v874_v25 = vpop.f32.mrf.mxu1 }
 0x118   :  { %v1338_v26 = vpack.c.bf16 %v1274_v20, %v1274_v20  ;;  %v1043_v27 = vadd.f32 %v953_v21, %v129_v18  ;;  %v875_v28 = vadd.f32 %v874_v25, %v705_v22  ;;  %v2666_v21 = vld [vmem:[%s2854_s2] ss:$0 sm:$0xff] }
 0x119   :  { %1434 = vst.msk [vmem:[%s2855_s3 + $0xb0] sm:$0xf] %vm1389_vm1, %v1369_v23 }
 0x11a   :  { %1403 = vst.msk [vmem:[%s2855_s3 + $0x34] sm:$0xf] %vm1389_vm1, %v1338_v26  ;;  %v1174_v29 = vld [vmem:[#allocation2 + $0x168] sm:$0xff]  ;;  %v1012_v30 = vadd.f32 %v875_v28, %v98_v24 }
 0x11b   :  { %v1242_v31 = vadd.f32 %v2244_v5, %v1174_v29  ;;  %v1143_v32 = vld [vmem:[#allocation2 + $0x70] sm:$0xff]  ;;  %1108 = vst.msk [vmem:[#allocation2 + $0x170] sm:$0xff] %vm18_vm0, %v1043_v27 }
 0x11c   :  { %v1211_v33 = vadd.f32 %v2244_v5, %v1143_v32  ;;  %1077 = vst.msk [vmem:[#allocation2 + $0x78] sm:$0xff] %vm18_vm0, %v1012_v30  ;;  %v785_v34 = vpop.f32.mrf.mxu2  ;;  %v133_v27 = vld [vmem:[#allocation2 + $0x190] sm:$0xff] }
 0x11d   :  { %v1306_v35 = vmax.f32 %v1242_v31, 0.0  ;;  %v954_v38 = vpop.f32.mrf.mxu3 }
 0x11e   :  { %v1275_v39 = vmax.f32 %v1211_v33, 0.0  ;;  %v955_v40 = vadd.f32 %v954_v38, %v785_v34  ;;  %v708_v41 = vpop.f32.mrf.mxu0  ;;  %v102_v33 = vld [vmem:[#allocation2 + $0x98] sm:$0xff] }
 0x11f   :  { %v1370_v42 = vpack.c.bf16 %v1306_v35, %v1306_v35  ;;  %v877_v44 = vpop.f32.mrf.mxu1 }
 0x120   :  { %v1339_v45 = vpack.c.bf16 %v1275_v39, %v1275_v39  ;;  %v1044_v46 = vadd.f32 %v955_v40, %v130_v37  ;;  %v878_v47 = vadd.f32 %v877_v44, %v708_v41 }
 0x121   :  { %1435 = vst.msk [vmem:[%s2855_s3 + $0xb4] sm:$0xf] %vm1389_vm1, %v1370_v42 }
 0x122   :  { %1404 = vst.msk [vmem:[%s2855_s3 + $0x38] sm:$0xf] %vm1389_vm1, %v1339_v45  ;;  %v1175_v48 = vld [vmem:[#allocation2 + $0x170] sm:$0xff]  ;;  %v1013_v49 = vadd.f32 %v878_v47, %v99_v43 }
 0x123   :  { %v1243_v50 = vadd.f32 %v2244_v5, %v1175_v48  ;;  %v1144_v51 = vld [vmem:[#allocation2 + $0x78] sm:$0xff]  ;;  %1109 = vst.msk [vmem:[#allocation2 + $0x178] sm:$0xff] %vm18_vm0, %v1044_v46 }
 0x124   :  { %v1212_v52 = vadd.f32 %v2244_v5, %v1144_v51  ;;  %1078 = vst.msk [vmem:[#allocation2 + $0x80] sm:$0xff] %vm18_vm0, %v1013_v49  ;;  %v788_v53 = vpop.f32.mrf.mxu2  ;;  %v134_v46 = vld [vmem:[#allocation2 + $0x198] sm:$0xff] }
 0x125   :  { %v1307_v54 = vmax.f32 %v1243_v50, 0.0  ;;  %v957_v56 = vpop.f32.mrf.mxu3 }
 0x126   :  { %v1276_v57 = vmax.f32 %v1212_v52, 0.0  ;;  %v958_v58 = vadd.f32 %v957_v56, %v788_v53  ;;  %v710_v59 = vpop.f32.mrf.mxu0  ;;  %v103_v52 = vld [vmem:[#allocation2 + $0xa0] sm:$0xff] }
 0x127   :  { %v1371_v60 = vpack.c.bf16 %v1307_v54, %v1307_v54  ;;  %v879_v62 = vpop.f32.mrf.mxu1 }
 0x128   :  { %v1340_v63 = vpack.c.bf16 %v1276_v57, %v1276_v57  ;;  %v1045_v0 = vadd.f32 %v958_v58, %v131_v55  ;;  %v880_v1 = vadd.f32 %v879_v62, %v710_v59 }
 0x129   :  { %1436 = vst.msk [vmem:[%s2855_s3 + $0xb8] sm:$0xf] %vm1389_vm1, %v1371_v60 }
 0x12a   :  { %1405 = vst.msk [vmem:[%s2855_s3 + $0x3c] sm:$0xf] %vm1389_vm1, %v1340_v63  ;;  %v1176_v2 = vld [vmem:[#allocation2 + $0x178] sm:$0xff]  ;;  %v1014_v3 = vadd.f32 %v880_v1, %v100_v61 }
 0x12b   :  { %v1244_v4 = vadd.f32 %v2244_v5, %v1176_v2  ;;  %v1145_v6 = vld [vmem:[#allocation2 + $0x80] sm:$0xff]  ;;  %1110 = vst.msk [vmem:[#allocation2 + $0x180] sm:$0xff] %vm18_vm0, %v1045_v0 }
 0x12c   :  { %v1213_v7 = vadd.f32 %v2244_v5, %v1145_v6  ;;  %1079 = vst.msk [vmem:[#allocation2 + $0x88] sm:$0xff] %vm18_vm0, %v1014_v3  ;;  %v790_v36 = vpop.f32.mrf.mxu2  ;;  %v135_v0 = vld [vmem:[#allocation2 + $0x1a0] sm:$0xff] }
 0x12d   :  { %v1308_v8 = vmax.f32 %v1244_v4, 0.0  ;;  %v959_v10 = vpop.f32.mrf.mxu3 }
 0x12e   :  { %v1277_v11 = vmax.f32 %v1213_v7, 0.0  ;;  %v960_v12 = vadd.f32 %v959_v10, %v790_v36  ;;  %v713_v13 = vpop.f32.mrf.mxu0  ;;  %v104_v7 = vld [vmem:[#allocation2 + $0xa8] sm:$0xff] }
 0x12f   :  { %v1372_v14 = vpack.c.bf16 %v1308_v8, %v1308_v8  ;;  %v882_v16 = vpop.f32.mrf.mxu1 }
 0x130   :  { %v1341_v17 = vpack.c.bf16 %v1277_v11, %v1277_v11  ;;  %v1046_v18 = vadd.f32 %v960_v12, %v132_v9  ;;  %v883_v19 = vadd.f32 %v882_v16, %v713_v13 }
 0x131   :  { %1437 = vst.msk [vmem:[%s2855_s3 + $0xbc] sm:$0xf] %vm1389_vm1, %v1372_v14 }
 0x132   :  { %1406 = vst.msk [vmem:[%s2855_s3 + $0x40] sm:$0xf] %vm1389_vm1, %v1341_v17  ;;  %v1177_v5 = vld [vmem:[#allocation2 + $0x180] sm:$0xff]  ;;  %v1015_v20 = vadd.f32 %v883_v19, %v101_v15 }
 0x133   :  { %v1245_v22 = vadd.f32 %v2666_v21, %v1177_v5  ;;  %v1146_v23 = vld [vmem:[#allocation2 + $0x88] sm:$0xff]  ;;  %1111 = vst.msk [vmem:[#allocation2 + $0x188] sm:$0xff] %vm18_vm0, %v1046_v18 }
 0x134   :  { %v1214_v24 = vadd.f32 %v2666_v21, %v1146_v23  ;;  %1080 = vst.msk [vmem:[#allocation2 + $0x90] sm:$0xff] %vm18_vm0, %v1015_v20  ;;  %v793_v25 = vpop.f32.mrf.mxu2  ;;  %v136_v18 = vld [vmem:[#allocation2 + $0x1a8] sm:$0xff] }
 0x135   :  { %v1309_v26 = vmax.f32 %v1245_v22, 0.0  ;;  %v962_v28 = vpop.f32.mrf.mxu3 }
 0x136   :  { %v1278_v29 = vmax.f32 %v1214_v24, 0.0  ;;  %v963_v30 = vadd.f32 %v962_v28, %v793_v25  ;;  %v715_v31 = vpop.f32.mrf.mxu0  ;;  %v105_v24 = vld [vmem:[#allocation2 + $0xb0] sm:$0xff] }
 0x137   :  { %v1373_v32 = vpack.c.bf16 %v1309_v26, %v1309_v26  ;;  %v884_v34 = vpop.f32.mrf.mxu1 }
 0x138   :  { %v1342_v35 = vpack.c.bf16 %v1278_v29, %v1278_v29  ;;  %v1047_v37 = vadd.f32 %v963_v30, %v133_v27  ;;  %v885_v38 = vadd.f32 %v884_v34, %v715_v31 }
 0x139   :  { %1438 = vst.msk [vmem:[%s2855_s3 + $0xc0] sm:$0xf] %vm1389_vm1, %v1373_v32 }
 0x13a   :  { %1407 = vst.msk [vmem:[%s2855_s3 + $0x44] sm:$0xf] %vm1389_vm1, %v1342_v35  ;;  %v1178_v39 = vld [vmem:[#allocation2 + $0x188] sm:$0xff]  ;;  %v1016_v40 = vadd.f32 %v885_v38, %v102_v33 }
 0x13b   :  { %v1246_v41 = vadd.f32 %v2666_v21, %v1178_v39  ;;  %v1147_v42 = vld [vmem:[#allocation2 + $0x90] sm:$0xff]  ;;  %1112 = vst.msk [vmem:[#allocation2 + $0x190] sm:$0xff] %vm18_vm0, %v1047_v37 }
 0x13c   :  { %v1215_v43 = vadd.f32 %v2666_v21, %v1147_v42  ;;  %1081 = vst.msk [vmem:[#allocation2 + $0x98] sm:$0xff] %vm18_vm0, %v1016_v40  ;;  %v795_v44 = vpop.f32.mrf.mxu2  ;;  %v137_v37 = vld [vmem:[#allocation2 + $0x1b0] sm:$0xff] }
 0x13d   :  { %v1310_v45 = vmax.f32 %v1246_v41, 0.0  ;;  %v964_v47 = vpop.f32.mrf.mxu3 }
 0x13e   :  { %v1279_v48 = vmax.f32 %v1215_v43, 0.0  ;;  %v965_v49 = vadd.f32 %v964_v47, %v795_v44  ;;  %v718_v50 = vpop.f32.mrf.mxu0  ;;  %v106_v43 = vld [vmem:[#allocation2 + $0xb8] sm:$0xff] }
 0x13f   :  { %v1374_v51 = vpack.c.bf16 %v1310_v45, %v1310_v45  ;;  %v887_v53 = vpop.f32.mrf.mxu1 }
 0x140   :  { %v1343_v54 = vpack.c.bf16 %v1279_v48, %v1279_v48  ;;  %v1048_v55 = vadd.f32 %v965_v49, %v134_v46  ;;  %v888_v56 = vadd.f32 %v887_v53, %v718_v50 }
 0x141   :  { %1439 = vst.msk [vmem:[%s2855_s3 + $0xc4] sm:$0xf] %vm1389_vm1, %v1374_v51 }
 0x142   :  { %1408 = vst.msk [vmem:[%s2855_s3 + $0x48] sm:$0xf] %vm1389_vm1, %v1343_v54  ;;  %v1179_v57 = vld [vmem:[#allocation2 + $0x190] sm:$0xff]  ;;  %v1017_v58 = vadd.f32 %v888_v56, %v103_v52 }
 0x143   :  { %v1247_v59 = vadd.f32 %v2666_v21, %v1179_v57  ;;  %v1148_v60 = vld [vmem:[#allocation2 + $0x98] sm:$0xff]  ;;  %1113 = vst.msk [vmem:[#allocation2 + $0x198] sm:$0xff] %vm18_vm0, %v1048_v55 }
 0x144   :  { %v1216_v61 = vadd.f32 %v2666_v21, %v1148_v60  ;;  %1082 = vst.msk [vmem:[#allocation2 + $0xa0] sm:$0xff] %vm18_vm0, %v1017_v58  ;;  %v798_v62 = vpop.f32.mrf.mxu2  ;;  %v138_v55 = vld [vmem:[#allocation2 + $0x1b8] sm:$0xff] }
 0x145   :  { %v1311_v63 = vmax.f32 %v1247_v59, 0.0  ;;  %v967_v1 = vpop.f32.mrf.mxu3 }
 0x146   :  { %v1280_v2 = vmax.f32 %v1216_v61, 0.0  ;;  %v968_v3 = vadd.f32 %v967_v1, %v798_v62  ;;  %v720_v4 = vpop.f32.mrf.mxu0  ;;  %v107_v61 = vld [vmem:[#allocation2 + $0xc0] sm:$0xff] }
 0x147   :  { %v1375_v6 = vpack.c.bf16 %v1311_v63, %v1311_v63  ;;  %v889_v36 = vpop.f32.mrf.mxu1 }
 0x148   :  { %v1344_v8 = vpack.c.bf16 %v1280_v2, %v1280_v2  ;;  %v1049_v9 = vadd.f32 %v968_v3, %v135_v0  ;;  %v890_v10 = vadd.f32 %v889_v36, %v720_v4 }
 0x149   :  { %1440 = vst.msk [vmem:[%s2855_s3 + $0xc8] sm:$0xf] %vm1389_vm1, %v1375_v6 }
 0x14a   :  { %1409 = vst.msk [vmem:[%s2855_s3 + $0x4c] sm:$0xf] %vm1389_vm1, %v1344_v8  ;;  %v1180_v11 = vld [vmem:[#allocation2 + $0x198] sm:$0xff]  ;;  %v1018_v12 = vadd.f32 %v890_v10, %v104_v7 }
 0x14b   :  { %v1248_v13 = vadd.f32 %v2666_v21, %v1180_v11  ;;  %v1149_v14 = vld [vmem:[#allocation2 + $0xa0] sm:$0xff]  ;;  %1114 = vst.msk [vmem:[#allocation2 + $0x1a0] sm:$0xff] %vm18_vm0, %v1049_v9 }
 0x14c   :  { %v1217_v15 = vadd.f32 %v2666_v21, %v1149_v14  ;;  %1083 = vst.msk [vmem:[#allocation2 + $0xa8] sm:$0xff] %vm18_vm0, %v1018_v12  ;;  %v800_v16 = vpop.f32.mrf.mxu2  ;;  %v139_v9 = vld [vmem:[#allocation2 + $0x1c0] sm:$0xff] }
 0x14d   :  { %v1312_v17 = vmax.f32 %v1248_v13, 0.0  ;;  %v969_v19 = vpop.f32.mrf.mxu3 }
 0x14e   :  { %v1281_v5 = vmax.f32 %v1217_v15, 0.0  ;;  %v970_v20 = vadd.f32 %v969_v19, %v800_v16  ;;  %v723_v22 = vpop.f32.mrf.mxu0  ;;  %v108_v15 = vld [vmem:[#allocation2 + $0xc8] sm:$0xff] }
 0x14f   :  { %v1376_v23 = vpack.c.bf16 %v1312_v17, %v1312_v17  ;;  %v892_v25 = vpop.f32.mrf.mxu1 }
 0x150   :  { %v1345_v26 = vpack.c.bf16 %v1281_v5, %v1281_v5  ;;  %v1050_v27 = vadd.f32 %v970_v20, %v136_v18  ;;  %v893_v28 = vadd.f32 %v892_v25, %v723_v22 }
 0x151   :  { %1441 = vst.msk [vmem:[%s2855_s3 + $0xcc] sm:$0xf] %vm1389_vm1, %v1376_v23 }
 0x152   :  { %1410 = vst.msk [vmem:[%s2855_s3 + $0x50] sm:$0xf] %vm1389_vm1, %v1345_v26  ;;  %v1181_v29 = vld [vmem:[#allocation2 + $0x1a0] sm:$0xff]  ;;  %v1019_v30 = vadd.f32 %v893_v28, %v105_v24 }
 0x153   :  { %v1249_v31 = vadd.f32 %v2666_v21, %v1181_v29  ;;  %v1150_v32 = vld [vmem:[#allocation2 + $0xa8] sm:$0xff]  ;;  %1115 = vst.msk [vmem:[#allocation2 + $0x1a8] sm:$0xff] %vm18_vm0, %v1050_v27 }
 0x154   :  { %v1218_v33 = vadd.f32 %v2666_v21, %v1150_v32  ;;  %1084 = vst.msk [vmem:[#allocation2 + $0xb0] sm:$0xff] %vm18_vm0, %v1019_v30  ;;  %v803_v34 = vpop.f32.mrf.mxu2  ;;  %v140_v27 = vld [vmem:[#allocation2 + $0x1c8] sm:$0xff] }
 0x155   :  { %v1313_v35 = vmax.f32 %v1249_v31, 0.0  ;;  %v972_v38 = vpop.f32.mrf.mxu3 }
 0x156   :  { %v1282_v39 = vmax.f32 %v1218_v33, 0.0  ;;  %v973_v40 = vadd.f32 %v972_v38, %v803_v34  ;;  %v725_v41 = vpop.f32.mrf.mxu0  ;;  %v109_v33 = vld [vmem:[#allocation2 + $0xd0] sm:$0xff] }
 0x157   :  { %v1377_v42 = vpack.c.bf16 %v1313_v35, %v1313_v35  ;;  %v894_v44 = vpop.f32.mrf.mxu1 }
 0x158   :  { %v1346_v45 = vpack.c.bf16 %v1282_v39, %v1282_v39  ;;  %v1051_v46 = vadd.f32 %v973_v40, %v137_v37  ;;  %v895_v47 = vadd.f32 %v894_v44, %v725_v41 }
 0x159   :  { %1442 = vst.msk [vmem:[%s2855_s3 + $0xd0] sm:$0xf] %vm1389_vm1, %v1377_v42 }
 0x15a   :  { %1411 = vst.msk [vmem:[%s2855_s3 + $0x54] sm:$0xf] %vm1389_vm1, %v1346_v45  ;;  %v1182_v48 = vld [vmem:[#allocation2 + $0x1a8] sm:$0xff]  ;;  %v1020_v49 = vadd.f32 %v895_v47, %v106_v43 }
 0x15b   :  { %v1250_v50 = vadd.f32 %v2666_v21, %v1182_v48  ;;  %v1151_v51 = vld [vmem:[#allocation2 + $0xb0] sm:$0xff]  ;;  %1116 = vst.msk [vmem:[#allocation2 + $0x1b0] sm:$0xff] %vm18_vm0, %v1051_v46 }
 0x15c   :  { %v1219_v52 = vadd.f32 %v2666_v21, %v1151_v51  ;;  %1085 = vst.msk [vmem:[#allocation2 + $0xb8] sm:$0xff] %vm18_vm0, %v1020_v49  ;;  %v805_v53 = vpop.f32.mrf.mxu2  ;;  %v141_v46 = vld [vmem:[#allocation2 + $0x1d0] sm:$0xff] }
 0x15d   :  { %v1314_v54 = vmax.f32 %v1250_v50, 0.0  ;;  %v974_v56 = vpop.f32.mrf.mxu3 }
 0x15e   :  { %v1283_v57 = vmax.f32 %v1219_v52, 0.0  ;;  %v975_v58 = vadd.f32 %v974_v56, %v805_v53  ;;  %v728_v59 = vpop.f32.mrf.mxu0  ;;  %v110_v52 = vld [vmem:[#allocation2 + $0xd8] sm:$0xff] }
 0x15f   :  { %v1378_v60 = vpack.c.bf16 %v1314_v54, %v1314_v54  ;;  %v897_v62 = vpop.f32.mrf.mxu1 }
 0x160   :  { %v1347_v63 = vpack.c.bf16 %v1283_v57, %v1283_v57  ;;  %v1052_v0 = vadd.f32 %v975_v58, %v138_v55  ;;  %v898_v1 = vadd.f32 %v897_v62, %v728_v59 }
 0x161   :  { %1443 = vst.msk [vmem:[%s2855_s3 + $0xd4] sm:$0xf] %vm1389_vm1, %v1378_v60 }
 0x162   :  { %1412 = vst.msk [vmem:[%s2855_s3 + $0x58] sm:$0xf] %vm1389_vm1, %v1347_v63  ;;  %v1183_v2 = vld [vmem:[#allocation2 + $0x1b0] sm:$0xff]  ;;  %v1021_v3 = vadd.f32 %v898_v1, %v107_v61 }
 0x163   :  { %v1251_v4 = vadd.f32 %v2666_v21, %v1183_v2  ;;  %v1152_v6 = vld [vmem:[#allocation2 + $0xb8] sm:$0xff]  ;;  %1117 = vst.msk [vmem:[#allocation2 + $0x1b8] sm:$0xff] %vm18_vm0, %v1052_v0 }
 0x164   :  { %v1220_v7 = vadd.f32 %v2666_v21, %v1152_v6  ;;  %1086 = vst.msk [vmem:[#allocation2 + $0xc0] sm:$0xff] %vm18_vm0, %v1021_v3  ;;  %v808_v36 = vpop.f32.mrf.mxu2  ;;  %v142_v0 = vld [vmem:[#allocation2 + $0x1d8] sm:$0xff] }
 0x165   :  { %v1315_v8 = vmax.f32 %v1251_v4, 0.0  ;;  %v977_v10 = vpop.f32.mrf.mxu3 }
 0x166   :  { %v1284_v11 = vmax.f32 %v1220_v7, 0.0  ;;  %v978_v12 = vadd.f32 %v977_v10, %v808_v36  ;;  %v730_v13 = vpop.f32.mrf.mxu0  ;;  %v111_v7 = vld [vmem:[#allocation2 + $0xe0] sm:$0xff] }
 0x167   :  { %v1379_v14 = vpack.c.bf16 %v1315_v8, %v1315_v8  ;;  %v899_v16 = vpop.f32.mrf.mxu1 }
 0x168   :  { %v1348_v17 = vpack.c.bf16 %v1284_v11, %v1284_v11  ;;  %v1053_v18 = vadd.f32 %v978_v12, %v139_v9  ;;  %v900_v19 = vadd.f32 %v899_v16, %v730_v13 }
 0x169   :  { %1444 = vst.msk [vmem:[%s2855_s3 + $0xd8] sm:$0xf] %vm1389_vm1, %v1379_v14 }
 0x16a   :  { %1413 = vst.msk [vmem:[%s2855_s3 + $0x5c] sm:$0xf] %vm1389_vm1, %v1348_v17  ;;  %v1184_v5 = vld [vmem:[#allocation2 + $0x1b8] sm:$0xff]  ;;  %v1022_v20 = vadd.f32 %v900_v19, %v108_v15 }
 0x16b   :  { %v1252_v22 = vadd.f32 %v2666_v21, %v1184_v5  ;;  %v1153_v23 = vld [vmem:[#allocation2 + $0xc0] sm:$0xff]  ;;  %1118 = vst.msk [vmem:[#allocation2 + $0x1c0] sm:$0xff] %vm18_vm0, %v1053_v18 }
 0x16c   :  { %v1221_v24 = vadd.f32 %v2666_v21, %v1153_v23  ;;  %1087 = vst.msk [vmem:[#allocation2 + $0xc8] sm:$0xff] %vm18_vm0, %v1022_v20  ;;  %v810_v25 = vpop.f32.mrf.mxu2  ;;  %v143_v18 = vld [vmem:[#allocation2 + $0x1e0] sm:$0xff] }
 0x16d   :  { %v1316_v26 = vmax.f32 %v1252_v22, 0.0  ;;  %v979_v28 = vpop.f32.mrf.mxu3 }
 0x16e   :  { %v1285_v29 = vmax.f32 %v1221_v24, 0.0  ;;  %v980_v30 = vadd.f32 %v979_v28, %v810_v25  ;;  %v733_v31 = vpop.f32.mrf.mxu0  ;;  %v112_v24 = vld [vmem:[#allocation2 + $0xe8] sm:$0xff] }
 0x16f   :  { %v1380_v32 = vpack.c.bf16 %v1316_v26, %v1316_v26  ;;  %v902_v34 = vpop.f32.mrf.mxu1 }
 0x170   :  { %v1349_v35 = vpack.c.bf16 %v1285_v29, %v1285_v29  ;;  %v1054_v37 = vadd.f32 %v980_v30, %v140_v27  ;;  %v903_v38 = vadd.f32 %v902_v34, %v733_v31 }
 0x171   :  { %1445 = vst.msk [vmem:[%s2855_s3 + $0xdc] sm:$0xf] %vm1389_vm1, %v1380_v32 }
 0x172   :  { %1414 = vst.msk [vmem:[%s2855_s3 + $0x60] sm:$0xf] %vm1389_vm1, %v1349_v35  ;;  %v1185_v39 = vld [vmem:[#allocation2 + $0x1c0] sm:$0xff]  ;;  %v1023_v40 = vadd.f32 %v903_v38, %v109_v33 }
 0x173   :  { %v1253_v41 = vadd.f32 %v2666_v21, %v1185_v39  ;;  %v1154_v42 = vld [vmem:[#allocation2 + $0xc8] sm:$0xff]  ;;  %1119 = vst.msk [vmem:[#allocation2 + $0x1c8] sm:$0xff] %vm18_vm0, %v1054_v37 }
 0x174   :  { %v1222_v43 = vadd.f32 %v2666_v21, %v1154_v42  ;;  %1088 = vst.msk [vmem:[#allocation2 + $0xd0] sm:$0xff] %vm18_vm0, %v1023_v40  ;;  %v813_v44 = vpop.f32.mrf.mxu2  ;;  %v144_v37 = vld [vmem:[#allocation2 + $0x1e8] sm:$0xff] }
 0x175   :  { %v1317_v45 = vmax.f32 %v1253_v41, 0.0  ;;  %v982_v47 = vpop.f32.mrf.mxu3 }
 0x176   :  { %v1286_v48 = vmax.f32 %v1222_v43, 0.0  ;;  %v983_v49 = vadd.f32 %v982_v47, %v813_v44  ;;  %v735_v50 = vpop.f32.mrf.mxu0  ;;  %v113_v43 = vld [vmem:[#allocation2 + $0xf0] sm:$0xff] }
 0x177   :  { %v1381_v51 = vpack.c.bf16 %v1317_v45, %v1317_v45  ;;  %v904_v53 = vpop.f32.mrf.mxu1 }
 0x178   :  { %v1350_v54 = vpack.c.bf16 %v1286_v48, %v1286_v48  ;;  %v1055_v55 = vadd.f32 %v983_v49, %v141_v46  ;;  %v905_v56 = vadd.f32 %v904_v53, %v735_v50 }
 0x179   :  { %1446 = vst.msk [vmem:[%s2855_s3 + $0xe0] sm:$0xf] %vm1389_vm1, %v1381_v51 }
 0x17a   :  { %1415 = vst.msk [vmem:[%s2855_s3 + $0x64] sm:$0xf] %vm1389_vm1, %v1350_v54  ;;  %v1186_v57 = vld [vmem:[#allocation2 + $0x1c8] sm:$0xff]  ;;  %v1024_v58 = vadd.f32 %v905_v56, %v110_v52 }
 0x17b   :  { %v1254_v59 = vadd.f32 %v2666_v21, %v1186_v57  ;;  %v1155_v60 = vld [vmem:[#allocation2 + $0xd0] sm:$0xff]  ;;  %1120 = vst.msk [vmem:[#allocation2 + $0x1d0] sm:$0xff] %vm18_vm0, %v1055_v55 }
 0x17c   :  { %v1223_v61 = vadd.f32 %v2666_v21, %v1155_v60  ;;  %1089 = vst.msk [vmem:[#allocation2 + $0xd8] sm:$0xff] %vm18_vm0, %v1024_v58  ;;  %v815_v62 = vpop.f32.mrf.mxu2  ;;  %v145_v55 = vld [vmem:[#allocation2 + $0x1f0] sm:$0xff] }
 0x17d   :  { %v1318_v63 = vmax.f32 %v1254_v59, 0.0  ;;  %v984_v1 = vpop.f32.mrf.mxu3 }
 0x17e   :  { %v1287_v2 = vmax.f32 %v1223_v61, 0.0  ;;  %v985_v3 = vadd.f32 %v984_v1, %v815_v62  ;;  %v738_v4 = vpop.f32.mrf.mxu0  ;;  %v114_v61 = vld [vmem:[#allocation2 + $0xf8] sm:$0xff] }
 0x17f   :  { %v1382_v6 = vpack.c.bf16 %v1318_v63, %v1318_v63  ;;  %v907_v36 = vpop.f32.mrf.mxu1 }
 0x180   :  { %v1351_v8 = vpack.c.bf16 %v1287_v2, %v1287_v2  ;;  %v1056_v9 = vadd.f32 %v985_v3, %v142_v0  ;;  %v908_v10 = vadd.f32 %v907_v36, %v738_v4 }
 0x181   :  { %1447 = vst.msk [vmem:[%s2855_s3 + $0xe4] sm:$0xf] %vm1389_vm1, %v1382_v6 }
 0x182   :  { %1416 = vst.msk [vmem:[%s2855_s3 + $0x68] sm:$0xf] %vm1389_vm1, %v1351_v8  ;;  %v1187_v11 = vld [vmem:[#allocation2 + $0x1d0] sm:$0xff]  ;;  %v1025_v12 = vadd.f32 %v908_v10, %v111_v7 }
 0x183   :  { %v1255_v13 = vadd.f32 %v2666_v21, %v1187_v11  ;;  %v1156_v14 = vld [vmem:[#allocation2 + $0xd8] sm:$0xff]  ;;  %1121 = vst.msk [vmem:[#allocation2 + $0x1d8] sm:$0xff] %vm18_vm0, %v1056_v9 }
 0x184   :  { %v1224_v15 = vadd.f32 %v2666_v21, %v1156_v14  ;;  %1090 = vst.msk [vmem:[#allocation2 + $0xe0] sm:$0xff] %vm18_vm0, %v1025_v12  ;;  %v818_v16 = vpop.f32.mrf.mxu2  ;;  %v146_v9 = vld [vmem:[#allocation2 + $0x1f8] sm:$0xff] }
 0x185   :  { %v1319_v17 = vmax.f32 %v1255_v13, 0.0  ;;  %v987_v19 = vpop.f32.mrf.mxu3 }
 0x186   :  { %v1288_v5 = vmax.f32 %v1224_v15, 0.0  ;;  %v988_v20 = vadd.f32 %v987_v19, %v818_v16  ;;  %v740_v22 = vpop.f32.mrf.mxu0 }
 0x187   :  { %v1383_v23 = vpack.c.bf16 %v1319_v17, %v1319_v17  ;;  %v909_v25 = vpop.f32.mrf.mxu1 }
 0x188   :  { %v1352_v26 = vpack.c.bf16 %v1288_v5, %v1288_v5  ;;  %v1057_v27 = vadd.f32 %v988_v20, %v143_v18  ;;  %v910_v28 = vadd.f32 %v909_v25, %v740_v22 }
 0x189   :  { %1448 = vst.msk [vmem:[%s2855_s3 + $0xe8] sm:$0xf] %vm1389_vm1, %v1383_v23 }
 0x18a   :  { %1417 = vst.msk [vmem:[%s2855_s3 + $0x6c] sm:$0xf] %vm1389_vm1, %v1352_v26  ;;  %v1188_v29 = vld [vmem:[#allocation2 + $0x1d8] sm:$0xff]  ;;  %v1026_v30 = vadd.f32 %v910_v28, %v112_v24 }
 0x18b   :  { %v1256_v31 = vadd.f32 %v2666_v21, %v1188_v29  ;;  %v1157_v32 = vld [vmem:[#allocation2 + $0xe0] sm:$0xff]  ;;  %1122 = vst.msk [vmem:[#allocation2 + $0x1e0] sm:$0xff] %vm18_vm0, %v1057_v27 }
 0x18c   :  { %v1225_v33 = vadd.f32 %v2666_v21, %v1157_v32  ;;  %1091 = vst.msk [vmem:[#allocation2 + $0xe8] sm:$0xff] %vm18_vm0, %v1026_v30  ;;  %v820_v34 = vpop.f32.mrf.mxu2 }
 0x18d   :  { %v1320_v35 = vmax.f32 %v1256_v31, 0.0  ;;  %v989_v38 = vpop.f32.mrf.mxu3 }
 0x18e   :  { %v1289_v39 = vmax.f32 %v1225_v33, 0.0  ;;  %v990_v40 = vadd.f32 %v989_v38, %v820_v34  ;;  %v743_v41 = vpop.f32.mrf.mxu0 }
 0x18f   :  { %v1384_v42 = vpack.c.bf16 %v1320_v35, %v1320_v35  ;;  %v912_v44 = vpop.f32.mrf.mxu1 }
 0x190   :  { %v1353_v45 = vpack.c.bf16 %v1289_v39, %v1289_v39  ;;  %v1058_v46 = vadd.f32 %v990_v40, %v144_v37  ;;  %v913_v47 = vadd.f32 %v912_v44, %v743_v41 }
 0x191   :  { %1449 = vst.msk [vmem:[%s2855_s3 + $0xec] sm:$0xf] %vm1389_vm1, %v1384_v42 }
 0x192   :  { %1418 = vst.msk [vmem:[%s2855_s3 + $0x70] sm:$0xf] %vm1389_vm1, %v1353_v45  ;;  %v1189_v48 = vld [vmem:[#allocation2 + $0x1e0] sm:$0xff]  ;;  %v1027_v49 = vadd.f32 %v913_v47, %v113_v43 }
 0x193   :  { %v1257_v50 = vadd.f32 %v2666_v21, %v1189_v48  ;;  %v1158_v51 = vld [vmem:[#allocation2 + $0xe8] sm:$0xff]  ;;  %1123 = vst.msk [vmem:[#allocation2 + $0x1e8] sm:$0xff] %vm18_vm0, %v1058_v46 }
 0x194   :  { %v1226_v52 = vadd.f32 %v2666_v21, %v1158_v51  ;;  %1092 = vst.msk [vmem:[#allocation2 + $0xf0] sm:$0xff] %vm18_vm0, %v1027_v49  ;;  %v823_v53 = vpop.f32.mrf.mxu2 }
 0x195   :  { %v1321_v54 = vmax.f32 %v1257_v50, 0.0  ;;  %v992_v56 = vpop.f32.mrf.mxu3 }
 0x196   :  { %v1290_v57 = vmax.f32 %v1226_v52, 0.0  ;;  %v993_v58 = vadd.f32 %v992_v56, %v823_v53  ;;  %v745_v59 = vpop.f32.mrf.mxu0 }
 0x197   :  { %v1385_v60 = vpack.c.bf16 %v1321_v54, %v1321_v54  ;;  %v914_v62 = vpop.f32.mrf.mxu1 }
 0x198   :  { %v1354_v63 = vpack.c.bf16 %v1290_v57, %v1290_v57  ;;  %v1059_v0 = vadd.f32 %v993_v58, %v145_v55  ;;  %v915_v1 = vadd.f32 %v914_v62, %v745_v59 }
 0x199   :  { %1450 = vst.msk [vmem:[%s2855_s3 + $0xf0] sm:$0xf] %vm1389_vm1, %v1385_v60 }
 0x19a   :  { %1419 = vst.msk [vmem:[%s2855_s3 + $0x74] sm:$0xf] %vm1389_vm1, %v1354_v63  ;;  %v1190_v2 = vld [vmem:[#allocation2 + $0x1e8] sm:$0xff]  ;;  %v1028_v3 = vadd.f32 %v915_v1, %v114_v61 }
 0x19b   :  { %v1258_v4 = vadd.f32 %v2666_v21, %v1190_v2  ;;  %v1159_v6 = vld [vmem:[#allocation2 + $0xf0] sm:$0xff]  ;;  %1124 = vst.msk [vmem:[#allocation2 + $0x1f0] sm:$0xff] %vm18_vm0, %v1059_v0 }
 0x19c   :  { %v1227_v7 = vadd.f32 %v2666_v21, %v1159_v6  ;;  %1093 = vst.msk [vmem:[#allocation2 + $0xf8] sm:$0xff] %vm18_vm0, %v1028_v3  ;;  %v825_v36 = vpop.f32.mrf.mxu2 }
 0x19d   :  { %v1322_v8 = vmax.f32 %v1258_v4, 0.0  ;;  %v994_v10 = vpop.f32.mrf.mxu3 }
 0x19e   :  { %v1291_v11 = vmax.f32 %v1227_v7, 0.0  ;;  %v995_v12 = vadd.f32 %v994_v10, %v825_v36 }
 0x19f   :  { %v1386_v13 = vpack.c.bf16 %v1322_v8, %v1322_v8 }
 0x1a0   :  { %v1355_v14 = vpack.c.bf16 %v1291_v11, %v1291_v11  ;;  %v1060_v15 = vadd.f32 %v995_v12, %v146_v9 }
 0x1a1   :  { %1451 = vst.msk [vmem:[%s2855_s3 + $0xf4] sm:$0xf] %vm1389_vm1, %v1386_v13 }
 0x1a2   :  { %1420 = vst.msk [vmem:[%s2855_s3 + $0x78] sm:$0xf] %vm1389_vm1, %v1355_v14  ;;  %v1191_v16 = vld [vmem:[#allocation2 + $0x1f0] sm:$0xff] }
 0x1a3   :  { %v1259_v17 = vadd.f32 %v2666_v21, %v1191_v16  ;;  %v1160_v18 = vld [vmem:[#allocation2 + $0xf8] sm:$0xff]  ;;  %1125 = vst.msk [vmem:[#allocation2 + $0x1f8] sm:$0xff] %vm18_vm0, %v1060_v15 }
 0x1a4   :  { %v1228_v19 = vadd.f32 %v2666_v21, %v1160_v18 }
 0x1a5   :  { %v1323_v5 = vmax.f32 %v1259_v17, 0.0 }
 0x1a6   :  { %v1292_v20 = vmax.f32 %v1228_v19, 0.0 }
 0x1a7   :  { %v1387_v22 = vpack.c.bf16 %v1323_v5, %v1323_v5 }
 0x1a8   :  { %v1356_v23 = vpack.c.bf16 %v1292_v20, %v1292_v20 }
 0x1a9   :  { %1452 = vst.msk [vmem:[%s2855_s3 + $0xf8] sm:$0xf] %vm1389_vm1, %v1387_v22 }
 0x1aa   :  { %1421 = vst.msk [vmem:[%s2855_s3 + $0x7c] sm:$0xf] %vm1389_vm1, %v1356_v23  ;;  %v1192_v24 = vld [vmem:[#allocation2 + $0x1f8] sm:$0xff] }
 0x1ab   :  { %v1260_v25 = vadd.f32 %v2666_v21, %v1192_v24 }
 0x1ad   :  { %v1324_v26 = vmax.f32 %v1260_v25, 0.0 }
 0x1af   :  { %v1388_v27 = vpack.c.bf16 %v1324_v26, %v1324_v26 }
 0x1b1   :  { %1453 = vst.msk [vmem:[%s2855_s3 + $0xfc] sm:$0xf] %vm1389_vm1, %v1388_v27 }

// kernel: resnet_forward.13
= control target key start
LH: loop header
LB: loop body
LE: loop exit
PB: predicated region body
PF: predicated region fallthrough
CT: control target
= control target key end

     0   :  { %vm18_vm0 = vcmask 523264   ;;  %vm976_vm1 = vcmask 519168   ;;  %s1957_s1 = inlined_call_operand.vmem [shape: bf16[640,64], index: 1, kind: input, shape index: {}]   ;;  %s1958_s0 = inlined_call_operand.vmem [shape: bf16[128,640], index: 0, kind: input, shape index: {}]   ;;  %s1959_s2 = inlined_call_operand.vmem [shape: f32[1,64], index: 2, kind: input, shape index: {}]   ;;  %s1960_s3 = inlined_call_operand.vmem [shape: bf16[128,64], index: 3, kind: output, shape index: {}]  }
   0x1   :  { %v1364_v0 = vld [vmem:[%s1957_s1 + $0x38] sm:$0xff]  ;;  %v1363_v1 = vld [vmem:[%s1957_s1 + $0x30] sm:$0xff]  ;;  %v1362_v2 = vld [vmem:[%s1957_s1 + $0x28] sm:$0xff] }
   0x2   :  { %1397 = vmatpush.bf16.msra.mxu1 %v1364_v0  ;;  %1398 = vmatpush.bf16.msra.mxu2 %v1364_v0  ;;  %v1361_v3 = vld [vmem:[%s1957_s1 + $0x20] sm:$0xff]  ;;  %v1360_v4 = vld [vmem:[%s1957_s1 + $0x18] sm:$0xff]  ;;  %v1359_v5 = vld [vmem:[%s1957_s1 + $0x10] sm:$0xff] }
   0x3   :  { %1399 = vmatpush.bf16.msra.mxu3 %v1364_v0  ;;  %627 = vmatpush.bf16.msra.mxu0 %v1364_v0  ;;  %v1358_v6 = vld [vmem:[%s1957_s1 + $0x8] sm:$0xff]  ;;  %v1357_v7 = vld [vmem:[%s1957_s1] sm:$0xff]  ;;  %v1039_v8 = vld [vmem:[%s1958_s0 + $0x50] sm:$0xf] }
   0x4   :  { %v1329_v9 = vld [vmem:[%s1958_s0 + $0x60] sm:$0xf0]  ;;  %v1079_v10 = vld [vmem:[%s1958_s0 + $0xa0] sm:$0xf]  ;;  %v1339_v11 = vld [vmem:[%s1958_s0 + $0xb0] sm:$0xf0] }
   0x5   :  { %v1119_v12 = vld [vmem:[%s1958_s0 + $0xf0] sm:$0xf]  ;;  %v1349_v13 = vld [vmem:[%s1958_s0 + $0x100] sm:$0xf0]  ;;  %v999_v14 = vld [vmem:[%s1958_s0] sm:$0xf]  ;;  %v1040_v18 = vor.u32 %v1329_v9, %v1039_v8  ;;  %v1080_v19 = vor.u32 %v1339_v11, %v1079_v10 }
   0x6   :  { %1400 = vmatpush.bf16.msra.mxu1 %v1363_v1  ;;  %1401 = vmatpush.bf16.msra.mxu2 %v1363_v1  ;;  %v1319_v15 = vld [vmem:[%s1958_s0 + $0x10] sm:$0xf0]  ;;  %v1380_v16 = vld [vmem:[%s1957_s1 + $0xb8] sm:$0xff]  ;;  %v1120_v20 = vor.u32 %v1349_v13, %v1119_v12  ;;  %v1378_v28 = vld [vmem:[%s1957_s1 + $0xa8] sm:$0xff] }
   0x7   :  { %1402 = vmatpush.bf16.msra.mxu3 %v1363_v1  ;;  %628 = vmatpush.bf16.msra.mxu0 %v1363_v1  ;;  %v1372_v17 = vld [vmem:[%s1957_s1 + $0x78] sm:$0xff]  ;;  %v1000_v21 = vor.u32 %v1319_v15, %v999_v14  ;;  %v1379_v24 = vld [vmem:[%s1957_s1 + $0xb0] sm:$0xff]  ;;  %v1370_v29 = vld [vmem:[%s1957_s1 + $0x68] sm:$0xff] }
   0x8   :  { %v1388_v22 = vld [vmem:[%s1957_s1 + $0xf8] sm:$0xff]  ;;  %v1371_v25 = vld [vmem:[%s1957_s1 + $0x70] sm:$0xff]  ;;  %v1386_v30 = vld [vmem:[%s1957_s1 + $0xe8] sm:$0xff] }
   0x9   :  { %v1396_v23 = vld [vmem:[%s1957_s1 + $0x138] sm:$0xff]  ;;  %v1387_v26 = vld [vmem:[%s1957_s1 + $0xf0] sm:$0xff]  ;;  %v1394_v31 = vld [vmem:[%s1957_s1 + $0x128] sm:$0xff] }
   0xa   :  { %1403 = vmatpush.bf16.msra.mxu1 %v1362_v2  ;;  %1404 = vmatpush.bf16.msra.mxu2 %v1362_v2  ;;  %v1395_v27 = vld [vmem:[%s1957_s1 + $0x130] sm:$0xff]  ;;  %v1377_v32 = vld [vmem:[%s1957_s1 + $0xa0] sm:$0xff]  ;;  %v1059_v36 = vld [vmem:[%s1958_s0 + $0x78] sm:$0xf] }
   0xb   :  { %1405 = vmatpush.bf16.msra.mxu3 %v1362_v2  ;;  %629 = vmatpush.bf16.msra.mxu0 %v1362_v2  ;;  %v1369_v33 = vld [vmem:[%s1957_s1 + $0x60] sm:$0xff]  ;;  %v1334_v37 = vld [vmem:[%s1958_s0 + $0x88] sm:$0xf0]  ;;  %v1099_v38 = vld [vmem:[%s1958_s0 + $0xc8] sm:$0xf] }
   0xc   :  { %v1385_v34 = vld [vmem:[%s1957_s1 + $0xe0] sm:$0xff]  ;;  %v1344_v39 = vld [vmem:[%s1958_s0 + $0xd8] sm:$0xf0]  ;;  %v1139_v40 = vld [vmem:[%s1958_s0 + $0x118] sm:$0xf]  ;;  %v1060_v46 = vor.u32 %v1334_v37, %v1059_v36 }
   0xd   :  { %v1393_v35 = vld [vmem:[%s1957_s1 + $0x120] sm:$0xff]  ;;  %v1354_v41 = vld [vmem:[%s1958_s0 + $0x128] sm:$0xf0]  ;;  %v1019_v42 = vld [vmem:[%s1958_s0 + $0x28] sm:$0xf]  ;;  %v1100_v47 = vor.u32 %v1344_v39, %v1099_v38 }
   0xe   :  { %1406 = vmatpush.bf16.msra.mxu1 %v1361_v3  ;;  %1407 = vmatpush.bf16.msra.mxu2 %v1361_v3  ;;  %v1324_v43 = vld [vmem:[%s1958_s0 + $0x38] sm:$0xf0]  ;;  %v1140_v48 = vor.u32 %v1354_v41, %v1139_v40  ;;  %v1375_v52 = vld [vmem:[%s1957_s1 + $0x90] sm:$0xff]  ;;  %v1374_v56 = vld [vmem:[%s1957_s1 + $0x88] sm:$0xff] }
   0xf   :  { %1408 = vmatpush.bf16.msra.mxu3 %v1361_v3  ;;  %630 = vmatpush.bf16.msra.mxu0 %v1361_v3  ;;  %v1376_v44 = vld [vmem:[%s1957_s1 + $0x98] sm:$0xff]  ;;  %v1020_v49 = vor.u32 %v1324_v43, %v1019_v42  ;;  %v1367_v53 = vld [vmem:[%s1957_s1 + $0x50] sm:$0xff]  ;;  %v1366_v57 = vld [vmem:[%s1957_s1 + $0x48] sm:$0xff] }
  0x10   :  { %v1368_v45 = vld [vmem:[%s1957_s1 + $0x58] sm:$0xff]  ;;  %v1383_v54 = vld [vmem:[%s1957_s1 + $0xd0] sm:$0xff]  ;;  %v1382_v58 = vld [vmem:[%s1957_s1 + $0xc8] sm:$0xff] }
  0x11   :  { %v1384_v50 = vld [vmem:[%s1957_s1 + $0xd8] sm:$0xff]  ;;  %v1391_v55 = vld [vmem:[%s1957_s1 + $0x110] sm:$0xff]  ;;  %v1390_v59 = vld [vmem:[%s1957_s1 + $0x108] sm:$0xff] }
  0x12   :  { %1409 = vmatpush.bf16.msra.mxu1 %v1360_v4  ;;  %1410 = vmatpush.bf16.msra.mxu2 %v1360_v4  ;;  %v1392_v51 = vld [vmem:[%s1957_s1 + $0x118] sm:$0xff]  ;;  %v1373_v60 = vld [vmem:[%s1957_s1 + $0x80] sm:$0xff]  ;;  %v1007_v2 = vld [vmem:[%s1958_s0 + $0x8] sm:$0xf] }
  0x13   :  { %1411 = vmatpush.bf16.msra.mxu3 %v1360_v4  ;;  %631 = vmatpush.bf16.msra.mxu0 %v1360_v4  ;;  %v1365_v61 = vld [vmem:[%s1957_s1 + $0x40] sm:$0xff]  ;;  %v1001_v1 = vld [vmem:[%s1958_s0 + $0x14] sm:$0xf0]  ;;  %v1320_v3 = vld [vmem:[%s1958_s0 + $0x18] sm:$0xf0] }
  0x14   :  { %v1381_v62 = vld [vmem:[%s1957_s1 + $0xc0] sm:$0xff]  ;;  %v1318_v4 = vld [vmem:[%s1958_s0 + $0xc] sm:$0xf]  ;;  %v1008_v9 = vor.u32 %v1320_v3, %v1007_v2  ;;  %v1027_v14 = vld [vmem:[%s1958_s0 + $0x30] sm:$0xf] }
  0x15   :  { %v1389_v63 = vld [vmem:[%s1957_s1 + $0x100] sm:$0xff]  ;;  %v1322_v12 = vld [vmem:[%s1958_s0 + $0x2c] sm:$0xf]  ;;  %v1332_v36 = vld [vmem:[%s1958_s0 + $0x7c] sm:$0xf] }
  0x16   :  { %1412 = vmatpush.bf16.msra.mxu1 %v1359_v5  ;;  %1413 = vmatpush.bf16.msra.mxu2 %v1359_v5  ;;  %v1317_v0 = vld [vmem:[%s1958_s0 + $0x4] sm:$0xf]  ;;  %v1021_v13 = vld [vmem:[%s1958_s0 + $0x3c] sm:$0xf0]  ;;  %v1061_v37 = vld [vmem:[%s1958_s0 + $0x8c] sm:$0xf0] }
  0x17   :  { %1414 = vmatpush.bf16.msra.mxu3 %v1359_v5  ;;  %632 = vmatpush.bf16.msra.mxu0 %v1359_v5  ;;  %v1009_v5 = vld [vmem:[%s1958_s0 + $0x1c] sm:$0xf0]  ;;  %v1004_v8 = vor.u32 %v1317_v0, %v1001_v1  ;;  %v1325_v15 = vld [vmem:[%s1958_s0 + $0x40] sm:$0xf0]  ;;  %v1335_v39 = vld [vmem:[%s1958_s0 + $0x90] sm:$0xf0] }
  0x18   :  { %v1012_v10 = vor.u32 %v1318_v4, %v1009_v5  ;;  %v1067_v38 = vld [vmem:[%s1958_s0 + $0x80] sm:$0xf]  ;;  %v1333_v40 = vld [vmem:[%s1958_s0 + $0x84] sm:$0xf]  ;;  %v1069_v41 = vld [vmem:[%s1958_s0 + $0x94] sm:$0xf0] }
  0x19   :  { %v1075_v42 = vld [vmem:[%s1958_s0 + $0x88] sm:$0xf]  ;;  %v1336_v43 = vld [vmem:[%s1958_s0 + $0x98] sm:$0xf0]  ;;  %v1343_v0 = vld [vmem:[%s1958_s0 + $0xd4] sm:$0xf] }
  0x1a   :  { %1415 = vmatpush.bf16.msra.mxu1 %v1358_v6  ;;  %1416 = vmatpush.bf16.msra.mxu2 %v1358_v6  ;;  %v1109_v1 = vld [vmem:[%s1958_s0 + $0xe4] sm:$0xf0]  ;;  %v1115_v2 = vld [vmem:[%s1958_s0 + $0xd8] sm:$0xf]  ;;  %v1346_v3 = vld [vmem:[%s1958_s0 + $0xe8] sm:$0xf0] }
  0x1b   :  { %1417 = vmatpush.bf16.msra.mxu3 %v1358_v6  ;;  %633 = vmatpush.bf16.msra.mxu0 %v1358_v6  ;;  %v1015_v6 = vld [vmem:[%s1958_s0 + $0x10] sm:$0xf] }
  0x1e   :  { %1418 = vmatpush.bf16.msra.mxu1 %v1357_v7  ;;  %1419 = vmatpush.bf16.msra.mxu2 %v1357_v7 }
  0x1f   :  { %1420 = vmatpush.bf16.msra.mxu3 %v1357_v7  ;;  %634 = vmatpush.bf16.msra.mxu0 %v1357_v7  ;;  %v1321_v7 = vld [vmem:[%s1958_s0 + $0x20] sm:$0xf0] }
  0x20   :  { %v1016_v11 = vor.u32 %v1321_v7, %v1015_v6  ;;  %v1112_v6 = vor.u32 %v1343_v0, %v1109_v1  ;;  %v1116_v7 = vor.u32 %v1346_v3, %v1115_v2 }
  0x21   :  { %645 = vmatmul.bf16.vlgmr.msra.gmra.mxu1 %v1040_v18  ;;  %655 = vmatmul.bf16.vlgmr.msra.gmra.mxu2 %v1080_v19  ;;  %v1035_v18 = vld [vmem:[%s1958_s0 + $0x38] sm:$0xf]  ;;  %v1326_v19 = vld [vmem:[%s1958_s0 + $0x48] sm:$0xf0] }
  0x22   :  { %725 = vmatpush.bf16.msrb.mxu2 %v1380_v16  ;;  %676 = vmatpush.bf16.msrb.mxu1 %v1372_v17  ;;  %v1323_v16 = vld [vmem:[%s1958_s0 + $0x34] sm:$0xf]  ;;  %v1029_v17 = vld [vmem:[%s1958_s0 + $0x44] sm:$0xf0] }
  0x23   :  { %665 = vmatmul.bf16.vlgmr.msra.gmra.mxu3 %v1120_v20  ;;  %635 = vmatmul.bf16.vlgmr.msra.gmra.mxu0 %v1000_v21  ;;  %v1024_v20 = vor.u32 %v1322_v12, %v1021_v13  ;;  %v1028_v21 = vor.u32 %v1325_v15, %v1027_v14  ;;  %v1348_v12 = vld [vmem:[%s1958_s0 + $0xfc] sm:$0xf]  ;;  %v1129_v13 = vld [vmem:[%s1958_s0 + $0x10c] sm:$0xf0]  ;;  %v1135_v14 = vld [vmem:[%s1958_s0 + $0x100] sm:$0xf] }
  0x24   :  { %774 = vmatpush.bf16.msrb.mxu3 %v1388_v22  ;;  %823 = vmatpush.bf16.msrb.mxu0 %v1396_v23  ;;  %v1032_v22 = vor.u32 %v1323_v16, %v1029_v17  ;;  %v1036_v23 = vor.u32 %v1326_v19, %v1035_v18  ;;  %v1351_v15 = vld [vmem:[%s1958_s0 + $0x110] sm:$0xf0]  ;;  %v1132_v19 = vor.u32 %v1348_v12, %v1129_v13 }
  0x26   :  { %726 = vmatpush.bf16.msrb.mxu2 %v1379_v24  ;;  %677 = vmatpush.bf16.msrb.mxu1 %v1371_v25  ;;  %v1327_v24 = vld [vmem:[%s1958_s0 + $0x54] sm:$0xf]  ;;  %v1041_v25 = vld [vmem:[%s1958_s0 + $0x64] sm:$0xf0] }
  0x28   :  { %775 = vmatpush.bf16.msrb.mxu3 %v1387_v26  ;;  %824 = vmatpush.bf16.msrb.mxu0 %v1395_v27  ;;  %v1047_v26 = vld [vmem:[%s1958_s0 + $0x58] sm:$0xf]  ;;  %v1330_v27 = vld [vmem:[%s1958_s0 + $0x68] sm:$0xf0] }
  0x2a   :  { %727 = vmatpush.bf16.msrb.mxu2 %v1378_v28  ;;  %678 = vmatpush.bf16.msrb.mxu1 %v1370_v29  ;;  %v1328_v28 = vld [vmem:[%s1958_s0 + $0x5c] sm:$0xf]  ;;  %v1049_v29 = vld [vmem:[%s1958_s0 + $0x6c] sm:$0xf0] }
  0x2c   :  { %776 = vmatpush.bf16.msrb.mxu3 %v1386_v30  ;;  %825 = vmatpush.bf16.msrb.mxu0 %v1394_v31  ;;  %v1055_v30 = vld [vmem:[%s1958_s0 + $0x60] sm:$0xf]  ;;  %v1331_v31 = vld [vmem:[%s1958_s0 + $0x70] sm:$0xf0] }
  0x2e   :  { %728 = vmatpush.bf16.msrb.mxu2 %v1377_v32  ;;  %679 = vmatpush.bf16.msrb.mxu1 %v1369_v33  ;;  %v1044_v32 = vor.u32 %v1327_v24, %v1041_v25  ;;  %v1048_v33 = vor.u32 %v1330_v27, %v1047_v26  ;;  %v1352_v27 = vld [vmem:[%s1958_s0 + $0x11c] sm:$0xf] }
  0x30   :  { %777 = vmatpush.bf16.msrb.mxu3 %v1385_v34  ;;  %826 = vmatpush.bf16.msrb.mxu0 %v1393_v35  ;;  %v1052_v34 = vor.u32 %v1328_v28, %v1049_v29  ;;  %v1056_v35 = vor.u32 %v1331_v31, %v1055_v30  ;;  %v1141_v28 = vld [vmem:[%s1958_s0 + $0x12c] sm:$0xf0]  ;;  %v1147_v29 = vld [vmem:[%s1958_s0 + $0x120] sm:$0xf]  ;;  %v1355_v30 = vld [vmem:[%s1958_s0 + $0x130] sm:$0xf0] }
  0x31   :  { %650 = vmatmul.bf16.gmra.mxu1 %v1060_v46  ;;  %660 = vmatmul.bf16.gmra.mxu2 %v1100_v47  ;;  %v1072_v46 = vor.u32 %v1333_v40, %v1069_v41  ;;  %v1076_v47 = vor.u32 %v1336_v43, %v1075_v42  ;;  %v1353_v31 = vld [vmem:[%s1958_s0 + $0x124] sm:$0xf] }
  0x32   :  { %729 = vmatpush.bf16.msrb.mxu2 %v1376_v44  ;;  %680 = vmatpush.bf16.msrb.mxu1 %v1368_v45  ;;  %v1064_v44 = vor.u32 %v1332_v36, %v1061_v37  ;;  %v1068_v45 = vor.u32 %v1335_v39, %v1067_v38  ;;  %v1144_v37 = vor.u32 %v1352_v27, %v1141_v28 }
  0x33   :  { %670 = vmatmul.bf16.gmra.mxu3 %v1140_v48  ;;  %640 = vmatmul.bf16.gmra.mxu0 %v1020_v49  ;;  %v1337_v48 = vld [vmem:[%s1958_s0 + $0xa4] sm:$0xf]  ;;  %v1081_v49 = vld [vmem:[%s1958_s0 + $0xb4] sm:$0xf0]  ;;  %v1148_v38 = vor.u32 %v1355_v30, %v1147_v29 }
  0x34   :  { %778 = vmatpush.bf16.msrb.mxu3 %v1384_v50  ;;  %827 = vmatpush.bf16.msrb.mxu0 %v1392_v51  ;;  %v1087_v50 = vld [vmem:[%s1958_s0 + $0xa8] sm:$0xf]  ;;  %v1340_v51 = vld [vmem:[%s1958_s0 + $0xb8] sm:$0xf0] }
  0x36   :  { %730 = vmatpush.bf16.msrb.mxu2 %v1375_v52  ;;  %681 = vmatpush.bf16.msrb.mxu1 %v1367_v53  ;;  %v1338_v52 = vld [vmem:[%s1958_s0 + $0xac] sm:$0xf]  ;;  %v1089_v53 = vld [vmem:[%s1958_s0 + $0xbc] sm:$0xf0] }
  0x38   :  { %779 = vmatpush.bf16.msrb.mxu3 %v1383_v54  ;;  %828 = vmatpush.bf16.msrb.mxu0 %v1391_v55  ;;  %v1095_v54 = vld [vmem:[%s1958_s0 + $0xb0] sm:$0xf]  ;;  %v1341_v55 = vld [vmem:[%s1958_s0 + $0xc0] sm:$0xf0] }
  0x3a   :  { %731 = vmatpush.bf16.msrb.mxu2 %v1374_v56  ;;  %682 = vmatpush.bf16.msrb.mxu1 %v1366_v57  ;;  %v1084_v56 = vor.u32 %v1337_v48, %v1081_v49  ;;  %v1088_v57 = vor.u32 %v1340_v51, %v1087_v50 }
  0x3c   :  { %780 = vmatpush.bf16.msrb.mxu3 %v1382_v58  ;;  %829 = vmatpush.bf16.msrb.mxu0 %v1390_v59  ;;  %v1092_v58 = vor.u32 %v1338_v52, %v1089_v53  ;;  %v1096_v59 = vor.u32 %v1341_v55, %v1095_v54 }
  0x3e   :  { %732 = vmatpush.bf16.msrb.mxu2 %v1373_v60  ;;  %683 = vmatpush.bf16.msrb.mxu1 %v1365_v61  ;;  %v1342_v60 = vld [vmem:[%s1958_s0 + $0xcc] sm:$0xf]  ;;  %v1101_v61 = vld [vmem:[%s1958_s0 + $0xdc] sm:$0xf0] }
  0x3f   :  { %v1104_v4 = vor.u32 %v1342_v60, %v1101_v61 }
  0x40   :  { %781 = vmatpush.bf16.msrb.mxu3 %v1381_v62  ;;  %830 = vmatpush.bf16.msrb.mxu0 %v1389_v63  ;;  %v1107_v62 = vld [vmem:[%s1958_s0 + $0xd0] sm:$0xf]  ;;  %v1345_v63 = vld [vmem:[%s1958_s0 + $0xe0] sm:$0xf0] }
  0x41   :  { %684 = vmatmul.bf16.vlgmr.msrb.gmra.mxu1 %v1004_v8  ;;  %733 = vmatmul.bf16.vlgmr.msrb.gmra.mxu2 %v1008_v9  ;;  %v1108_v5 = vor.u32 %v1345_v63, %v1107_v62  ;;  %v1347_v8 = vld [vmem:[%s1958_s0 + $0xf4] sm:$0xf]  ;;  %v1121_v9 = vld [vmem:[%s1958_s0 + $0x104] sm:$0xf0] }
  0x42   :  { %v1124_v16 = vor.u32 %v1347_v8, %v1121_v9 }
  0x43   :  { %782 = vmatmul.bf16.vlgmr.msrb.gmra.mxu3 %v1012_v10  ;;  %831 = vmatmul.bf16.vlgmr.msrb.gmra.mxu0 %v1016_v11  ;;  %v1127_v10 = vld [vmem:[%s1958_s0 + $0xf8] sm:$0xf]  ;;  %v1350_v11 = vld [vmem:[%s1958_s0 + $0x108] sm:$0xf0] }
  0x44   :  { %v1128_v17 = vor.u32 %v1350_v11, %v1127_v10 }
  0x51   :  { %689 = vmatmul.bf16.gmra.mxu1 %v1024_v20  ;;  %738 = vmatmul.bf16.gmra.mxu2 %v1028_v21  ;;  %v1136_v20 = vor.u32 %v1351_v15, %v1135_v14 }
  0x53   :  { %787 = vmatmul.bf16.gmra.mxu3 %v1032_v22  ;;  %836 = vmatmul.bf16.gmra.mxu0 %v1036_v23  ;;  %v1423_v23 = vmov 0.0  }
  0x54   :  { %19 = vst.msk [vmem:[#allocation2] sm:$0xff] %vm18_vm0, %v1423_v23 }
  0x55   :  { %20 = vst.msk [vmem:[#allocation2 + $0x8] sm:$0xff] %vm18_vm0, %v1423_v23 }
  0x56   :  { %21 = vst.msk [vmem:[#allocation2 + $0x10] sm:$0xff] %vm18_vm0, %v1423_v23 }
  0x57   :  { %22 = vst.msk [vmem:[#allocation2 + $0x18] sm:$0xff] %vm18_vm0, %v1423_v23 }
  0x58   :  { %23 = vst.msk [vmem:[#allocation2 + $0x20] sm:$0xff] %vm18_vm0, %v1423_v23 }
  0x59   :  { %24 = vst.msk [vmem:[#allocation2 + $0x28] sm:$0xff] %vm18_vm0, %v1423_v23 }
  0x5a   :  { %25 = vst.msk [vmem:[#allocation2 + $0x30] sm:$0xff] %vm18_vm0, %v1423_v23 }
  0x5b   :  { %26 = vst.msk [vmem:[#allocation2 + $0x38] sm:$0xff] %vm18_vm0, %v1423_v23 }
  0x5c   :  { %27 = vst.msk [vmem:[#allocation2 + $0x40] sm:$0xff] %vm18_vm0, %v1423_v23 }
  0x5d   :  { %28 = vst.msk [vmem:[#allocation2 + $0x48] sm:$0xff] %vm18_vm0, %v1423_v23 }
  0x5e   :  { %29 = vst.msk [vmem:[#allocation2 + $0x50] sm:$0xff] %vm18_vm0, %v1423_v23 }
  0x5f   :  { %30 = vst.msk [vmem:[#allocation2 + $0x58] sm:$0xff] %vm18_vm0, %v1423_v23 }
  0x60   :  { %31 = vst.msk [vmem:[#allocation2 + $0x60] sm:$0xff] %vm18_vm0, %v1423_v23 }
  0x61   :  { %694 = vmatmul.bf16.gmra.mxu1 %v1044_v32  ;;  %743 = vmatmul.bf16.gmra.mxu2 %v1048_v33  ;;  %v1149_v32 = vld [vmem:[%s1958_s0 + $0x134] sm:$0xf0]  ;;  %v1155_v33 = vld [vmem:[%s1958_s0 + $0x128] sm:$0xf]  ;;  %32 = vst.msk [vmem:[#allocation2 + $0x68] sm:$0xff] %vm18_vm0, %v1423_v23 }
  0x62   :  { %v1152_v40 = vor.u32 %v1353_v31, %v1149_v32  ;;  %33 = vst.msk [vmem:[#allocation2 + $0x70] sm:$0xff] %vm18_vm0, %v1423_v23 }
  0x63   :  { %792 = vmatmul.bf16.gmra.mxu3 %v1052_v34  ;;  %841 = vmatmul.bf16.gmra.mxu0 %v1056_v35  ;;  %v1356_v34 = vld [vmem:[%s1958_s0 + $0x138] sm:$0xf0]  ;;  %34 = vst.msk [vmem:[#allocation2 + $0x78] sm:$0xff] %vm18_vm0, %v1423_v23 }
  0x64   :  { %v1156_v41 = vor.u32 %v1356_v34, %v1155_v33 }
  0x71   :  { %699 = vmatmul.bf16.gmra.mxu1 %v1064_v44  ;;  %748 = vmatmul.bf16.gmra.mxu2 %v1068_v45 }
  0x73   :  { %797 = vmatmul.bf16.gmra.mxu3 %v1072_v46  ;;  %846 = vmatmul.bf16.gmra.mxu0 %v1076_v47 }
  0x81   :  { %704 = vmatmul.bf16.gmra.mxu1 %v1084_v56  ;;  %753 = vmatmul.bf16.gmra.mxu2 %v1088_v57 }
  0x83   :  { %802 = vmatmul.bf16.gmra.mxu3 %v1092_v58  ;;  %851 = vmatmul.bf16.gmra.mxu0 %v1096_v59  ;;  %v35_v58 = vld [vmem:[#allocation2] sm:$0xff] }
  0x91   :  { %709 = vmatmul.bf16.gmra.mxu1 %v1104_v4  ;;  %758 = vmatmul.bf16.gmra.mxu2 %v1108_v5  ;;  %v36_v4 = vld [vmem:[#allocation2 + $0x8] sm:$0xff]  ;;  %v1848_v5 = vld [vmem:[%s1959_s2] ss:$0 sm:$0xff] }
  0x93   :  { %807 = vmatmul.bf16.gmra.mxu3 %v1112_v6  ;;  %856 = vmatmul.bf16.gmra.mxu0 %v1116_v7 }
  0x9e   :  { %v1780_v18 = vpop.f32.mrf.mxu1 }
  0xa0   :  { %v636_v21 = vpop.f32.mrf.mxu0 }
  0xa1   :  { %714 = vmatmul.bf16.gmra.mxu1 %v1124_v16  ;;  %763 = vmatmul.bf16.gmra.mxu2 %v1128_v17 }
  0xa3   :  { %812 = vmatmul.bf16.gmra.mxu3 %v1132_v19  ;;  %861 = vmatmul.bf16.gmra.mxu0 %v1136_v20  ;;  %v37_v19 = vld [vmem:[#allocation2 + $0x10] sm:$0xff] }
  0xa4   :  { %v1782_v22 = vpop.f32.mrf.mxu2 }
  0xa6   :  { %v1785_v24 = vpop.f32.mrf.mxu3  ;;  %v1788_v25 = vpop.f32.mrf.mxu1 }
  0xa8   :  { %v638_v26 = vpop.f32.mrf.mxu0 }
  0xac   :  { %v1820_v35 = vpop.f32.mrf.mxu2 }
  0xae   :  { %v1823_v36 = vpop.f32.mrf.mxu3  ;;  %v1826_v39 = vpop.f32.mrf.mxu1 }
  0xb0   :  { %v641_v42 = vpop.f32.mrf.mxu0 }
  0xb1   :  { %719 = vmatmul.bf16.gmra.mxu1 %v1144_v37  ;;  %768 = vmatmul.bf16.gmra.mxu2 %v1148_v38  ;;  %v38_v38 = vld [vmem:[#allocation2 + $0x18] sm:$0xff] }
  0xb3   :  { %817 = vmatmul.bf16.gmra.mxu3 %v1152_v40  ;;  %866 = vmatmul.bf16.gmra.mxu0 %v1156_v41 }
  0xb4   :  { %v1834_v43 = vpop.f32.mrf.mxu2 }
  0xb6   :  { %v1836_v44 = vpop.f32.mrf.mxu3  ;;  %v1838_v45 = vpop.f32.mrf.mxu1 }
  0xb8   :  { %v643_v46 = vpop.f32.mrf.mxu0 }
  0xbc   :  { %v1840_v47 = vpop.f32.mrf.mxu2 }
  0xbe   :  { %v1842_v48 = vpop.f32.mrf.mxu3  ;;  %v685_v49 = vpop.f32.mrf.mxu1 }
  0xbf   :  { %v686_v51 = vadd.f32 %v685_v49, %v636_v21 }
  0xc0   :  { %v832_v50 = vpop.f32.mrf.mxu0 }
  0xc4   :  { %v734_v52 = vpop.f32.mrf.mxu2 }
  0xc5   :  { %v735_v53 = vadd.f32 %v734_v52, %v686_v51 }
  0xc6   :  { %v783_v54 = vpop.f32.mrf.mxu3  ;;  %v687_v55 = vpop.f32.mrf.mxu1 }
  0xc7   :  { %v784_v56 = vadd.f32 %v783_v54, %v735_v53  ;;  %v688_v61 = vadd.f32 %v687_v55, %v638_v26 }
  0xc8   :  { %v834_v57 = vpop.f32.mrf.mxu0 }
  0xc9   :  { %v833_v59 = vadd.f32 %v832_v50, %v784_v56 }
  0xcb   :  { %v872_v60 = vadd.f32 %v833_v59, %v35_v58  ;;  %v39_v58 = vld [vmem:[#allocation2 + $0x20] sm:$0xff] }
  0xcc   :  { %v736_v62 = vpop.f32.mrf.mxu2 }
  0xcd   :  { %889 = vst.msk [vmem:[#allocation2] sm:$0xff] %vm18_vm0, %v872_v60  ;;  %v737_v63 = vadd.f32 %v736_v62, %v688_v61 }
  0xce   :  { %v785_v0 = vpop.f32.mrf.mxu3  ;;  %v690_v1 = vpop.f32.mrf.mxu1 }
  0xcf   :  { %v786_v2 = vadd.f32 %v785_v0, %v737_v63  ;;  %v691_v8 = vadd.f32 %v690_v1, %v641_v42 }
  0xd0   :  { %v837_v3 = vpop.f32.mrf.mxu0 }
  0xd1   :  { %v835_v6 = vadd.f32 %v834_v57, %v786_v2 }
  0xd3   :  { %v873_v7 = vadd.f32 %v835_v6, %v36_v4 }
  0xd4   :  { %v908_v9 = vld [vmem:[#allocation2] sm:$0xff]  ;;  %v739_v10 = vpop.f32.mrf.mxu2 }
  0xd5   :  { %v928_v11 = vadd.f32 %v1848_v5, %v908_v9  ;;  %890 = vst.msk [vmem:[#allocation2 + $0x8] sm:$0xff] %vm18_vm0, %v873_v7  ;;  %v740_v12 = vadd.f32 %v739_v10, %v691_v8  ;;  %v40_v8 = vld [vmem:[#allocation2 + $0x28] sm:$0xff] }
  0xd6   :  { %v788_v13 = vpop.f32.mrf.mxu3  ;;  %v692_v14 = vpop.f32.mrf.mxu1 }
  0xd7   :  { %v944_v15 = vmax.f32 %v928_v11, 0.0  ;;  %v789_v16 = vadd.f32 %v788_v13, %v740_v12  ;;  %v693_v26 = vadd.f32 %v692_v14, %v643_v46 }
  0xd8   :  { %v839_v17 = vpop.f32.mrf.mxu0 }
  0xd9   :  { %v960_v20 = vpack.c.bf16 %v944_v15, %v944_v15  ;;  %v838_v21 = vadd.f32 %v837_v3, %v789_v16 }
  0xdb   :  { %977 = vst.msk [vmem:[%s1960_s3] sm:$0xf] %vm976_vm1, %v960_v20  ;;  %v874_v23 = vadd.f32 %v838_v21, %v37_v19 }
  0xdc   :  { %v909_v27 = vld [vmem:[#allocation2 + $0x8] sm:$0xff]  ;;  %v741_v28 = vpop.f32.mrf.mxu2 }
  0xdd   :  { %v929_v29 = vadd.f32 %v1848_v5, %v909_v27  ;;  %891 = vst.msk [vmem:[#allocation2 + $0x10] sm:$0xff] %vm18_vm0, %v874_v23  ;;  %v742_v30 = vadd.f32 %v741_v28, %v693_v26  ;;  %v41_v23 = vld [vmem:[#allocation2 + $0x30] sm:$0xff] }
  0xde   :  { %v790_v31 = vpop.f32.mrf.mxu3  ;;  %v695_v32 = vpop.f32.mrf.mxu1 }
  0xdf   :  { %v945_v33 = vmax.f32 %v929_v29, 0.0  ;;  %v791_v34 = vadd.f32 %v790_v31, %v742_v30  ;;  %v696_v46 = vadd.f32 %v695_v32, %v1780_v18 }
  0xe0   :  { %v842_v37 = vpop.f32.mrf.mxu0 }
  0xe1   :  { %v961_v40 = vpack.c.bf16 %v945_v33, %v945_v33  ;;  %v840_v41 = vadd.f32 %v839_v17, %v791_v34 }
  0xe3   :  { %978 = vst.msk [vmem:[%s1960_s3 + $0x4] sm:$0xf] %vm976_vm1, %v961_v40  ;;  %v875_v42 = vadd.f32 %v840_v41, %v38_v38  ;;  %v42_v41 = vld [vmem:[#allocation2 + $0x38] sm:$0xff] }
  0xe4   :  { %v910_v49 = vld [vmem:[#allocation2 + $0x10] sm:$0xff]  ;;  %v744_v50 = vpop.f32.mrf.mxu2 }
  0xe5   :  { %v930_v51 = vadd.f32 %v1848_v5, %v910_v49  ;;  %892 = vst.msk [vmem:[#allocation2 + $0x18] sm:$0xff] %vm18_vm0, %v875_v42  ;;  %v745_v52 = vadd.f32 %v744_v50, %v696_v46 }
  0xe6   :  { %v793_v53 = vpop.f32.mrf.mxu3  ;;  %v697_v54 = vpop.f32.mrf.mxu1 }
  0xe7   :  { %v946_v55 = vmax.f32 %v930_v51, 0.0  ;;  %v794_v56 = vadd.f32 %v793_v53, %v745_v52  ;;  %v698_v61 = vadd.f32 %v697_v54, %v1788_v25 }
  0xe8   :  { %v844_v57 = vpop.f32.mrf.mxu0 }
  0xe9   :  { %v962_v59 = vpack.c.bf16 %v946_v55, %v946_v55  ;;  %v843_v60 = vadd.f32 %v842_v37, %v794_v56 }
  0xeb   :  { %979 = vst.msk [vmem:[%s1960_s3 + $0x8] sm:$0xf] %vm976_vm1, %v962_v59  ;;  %v876_v18 = vadd.f32 %v843_v60, %v39_v58  ;;  %v43_v59 = vld [vmem:[#allocation2 + $0x40] sm:$0xff] }
  0xec   :  { %v911_v62 = vld [vmem:[#allocation2 + $0x18] sm:$0xff]  ;;  %v746_v63 = vpop.f32.mrf.mxu2 }
  0xed   :  { %v931_v0 = vadd.f32 %v1848_v5, %v911_v62  ;;  %893 = vst.msk [vmem:[#allocation2 + $0x20] sm:$0xff] %vm18_vm0, %v876_v18  ;;  %v747_v1 = vadd.f32 %v746_v63, %v698_v61 }
  0xee   :  { %v795_v2 = vpop.f32.mrf.mxu3  ;;  %v700_v3 = vpop.f32.mrf.mxu1 }
  0xef   :  { %v947_v4 = vmax.f32 %v931_v0, 0.0  ;;  %v796_v6 = vadd.f32 %v795_v2, %v747_v1  ;;  %v701_v11 = vadd.f32 %v700_v3, %v1826_v39 }
  0xf0   :  { %v847_v7 = vpop.f32.mrf.mxu0 }
  0xf1   :  { %v963_v9 = vpack.c.bf16 %v947_v4, %v947_v4  ;;  %v845_v10 = vadd.f32 %v844_v57, %v796_v6 }
  0xf3   :  { %980 = vst.msk [vmem:[%s1960_s3 + $0xc] sm:$0xf] %vm976_vm1, %v963_v9  ;;  %v877_v25 = vadd.f32 %v845_v10, %v40_v8  ;;  %v44_v8 = vld [vmem:[#allocation2 + $0x48] sm:$0xff] }
  0xf4   :  { %v912_v12 = vld [vmem:[#allocation2 + $0x20] sm:$0xff]  ;;  %v749_v13 = vpop.f32.mrf.mxu2 }
  0xf5   :  { %v932_v14 = vadd.f32 %v1848_v5, %v912_v12  ;;  %894 = vst.msk [vmem:[#allocation2 + $0x28] sm:$0xff] %vm18_vm0, %v877_v25  ;;  %v750_v15 = vadd.f32 %v749_v13, %v701_v11 }
  0xf6   :  { %v798_v16 = vpop.f32.mrf.mxu3  ;;  %v702_v17 = vpop.f32.mrf.mxu1 }
  0xf7   :  { %v948_v19 = vmax.f32 %v932_v14, 0.0  ;;  %v799_v20 = vadd.f32 %v798_v16, %v750_v15  ;;  %v703_v28 = vadd.f32 %v702_v17, %v1838_v45 }
  0xf8   :  { %v849_v21 = vpop.f32.mrf.mxu0 }
  0xf9   :  { %v964_v26 = vpack.c.bf16 %v948_v19, %v948_v19  ;;  %v848_v27 = vadd.f32 %v847_v7, %v799_v20  ;;  %v45_v20 = vld [vmem:[#allocation2 + $0x50] sm:$0xff] }
  0xfb   :  { %981 = vst.msk [vmem:[%s1960_s3 + $0x10] sm:$0xf] %vm976_vm1, %v964_v26  ;;  %v878_v39 = vadd.f32 %v848_v27, %v41_v23 }
  0xfc   :  { %v913_v29 = vld [vmem:[#allocation2 + $0x28] sm:$0xff]  ;;  %v751_v30 = vpop.f32.mrf.mxu2 }
  0xfd   :  { %v933_v31 = vadd.f32 %v1848_v5, %v913_v29  ;;  %895 = vst.msk [vmem:[#allocation2 + $0x30] sm:$0xff] %vm18_vm0, %v878_v39  ;;  %v752_v32 = vadd.f32 %v751_v30, %v703_v28 }
  0xfe   :  { %v800_v33 = vpop.f32.mrf.mxu3  ;;  %v705_v34 = vpop.f32.mrf.mxu1 }
  0xff   :  { %v949_v37 = vmax.f32 %v933_v31, 0.0  ;;  %v801_v38 = vadd.f32 %v800_v33, %v752_v32  ;;  %v706_v49 = vadd.f32 %v705_v34, %v1782_v22 }
 0x100   :  { %v852_v40 = vpop.f32.mrf.mxu0 }
 0x101   :  { %v965_v42 = vpack.c.bf16 %v949_v37, %v949_v37  ;;  %v850_v46 = vadd.f32 %v849_v21, %v801_v38  ;;  %v46_v37 = vld [vmem:[#allocation2 + $0x58] sm:$0xff] }
 0x103   :  { %982 = vst.msk [vmem:[%s1960_s3 + $0x14] sm:$0xf] %vm976_vm1, %v965_v42  ;;  %v879_v45 = vadd.f32 %v850_v46, %v42_v41 }
 0x104   :  { %v914_v50 = vld [vmem:[#allocation2 + $0x30] sm:$0xff]  ;;  %v754_v51 = vpop.f32.mrf.mxu2 }
 0x105   :  { %v934_v52 = vadd.f32 %v1848_v5, %v914_v50  ;;  %896 = vst.msk [vmem:[#allocation2 + $0x38] sm:$0xff] %vm18_vm0, %v879_v45  ;;  %v755_v53 = vadd.f32 %v754_v51, %v706_v49 }
 0x106   :  { %v803_v54 = vpop.f32.mrf.mxu3  ;;  %v707_v55 = vpop.f32.mrf.mxu1 }
 0x107   :  { %v950_v56 = vmax.f32 %v934_v52, 0.0  ;;  %v804_v57 = vadd.f32 %v803_v54, %v755_v53  ;;  %v708_v61 = vadd.f32 %v707_v55, %v1820_v35  ;;  %v47_v55 = vld [vmem:[#allocation2 + $0x60] sm:$0xff] }
 0x108   :  { %v854_v58 = vpop.f32.mrf.mxu0 }
 0x109   :  { %v966_v60 = vpack.c.bf16 %v950_v56, %v950_v56  ;;  %v853_v18 = vadd.f32 %v852_v40, %v804_v57 }
 0x10b   :  { %983 = vst.msk [vmem:[%s1960_s3 + $0x18] sm:$0xf] %vm976_vm1, %v966_v60  ;;  %v880_v22 = vadd.f32 %v853_v18, %v43_v59 }
 0x10c   :  { %v915_v62 = vld [vmem:[#allocation2 + $0x38] sm:$0xff]  ;;  %v756_v63 = vpop.f32.mrf.mxu2 }
 0x10d   :  { %v935_v0 = vadd.f32 %v1848_v5, %v915_v62  ;;  %897 = vst.msk [vmem:[#allocation2 + $0x40] sm:$0xff] %vm18_vm0, %v880_v22  ;;  %v757_v1 = vadd.f32 %v756_v63, %v708_v61 }
 0x10e   :  { %v805_v2 = vpop.f32.mrf.mxu3  ;;  %v710_v3 = vpop.f32.mrf.mxu1 }
 0x10f   :  { %v951_v4 = vmax.f32 %v935_v0, 0.0  ;;  %v806_v6 = vadd.f32 %v805_v2, %v757_v1  ;;  %v711_v25 = vadd.f32 %v710_v3, %v1834_v43  ;;  %v48_v2 = vld [vmem:[#allocation2 + $0x68] sm:$0xff] }
 0x110   :  { %v857_v7 = vpop.f32.mrf.mxu0 }
 0x111   :  { %v967_v9 = vpack.c.bf16 %v951_v4, %v951_v4  ;;  %v855_v10 = vadd.f32 %v854_v58, %v806_v6 }
 0x113   :  { %984 = vst.msk [vmem:[%s1960_s3 + $0x1c] sm:$0xf] %vm976_vm1, %v967_v9  ;;  %v881_v35 = vadd.f32 %v855_v10, %v44_v8 }
 0x114   :  { %v916_v11 = vld [vmem:[#allocation2 + $0x40] sm:$0xff]  ;;  %v759_v12 = vpop.f32.mrf.mxu2 }
 0x115   :  { %v936_v13 = vadd.f32 %v1848_v5, %v916_v11  ;;  %898 = vst.msk [vmem:[#allocation2 + $0x48] sm:$0xff] %vm18_vm0, %v881_v35  ;;  %v760_v14 = vadd.f32 %v759_v12, %v711_v25 }
 0x116   :  { %v808_v15 = vpop.f32.mrf.mxu3  ;;  %v712_v16 = vpop.f32.mrf.mxu1 }
 0x117   :  { %v952_v17 = vmax.f32 %v936_v13, 0.0  ;;  %v809_v19 = vadd.f32 %v808_v15, %v760_v14  ;;  %v713_v27 = vadd.f32 %v712_v16, %v1840_v47  ;;  %v49_v13 = vld [vmem:[#allocation2 + $0x70] sm:$0xff] }
 0x118   :  { %v859_v21 = vpop.f32.mrf.mxu0 }
 0x119   :  { %v968_v23 = vpack.c.bf16 %v952_v17, %v952_v17  ;;  %v858_v26 = vadd.f32 %v857_v7, %v809_v19 }
 0x11b   :  { %985 = vst.msk [vmem:[%s1960_s3 + $0x20] sm:$0xf] %vm976_vm1, %v968_v23  ;;  %v882_v43 = vadd.f32 %v858_v26, %v45_v20 }
 0x11c   :  { %v917_v39 = vld [vmem:[#allocation2 + $0x48] sm:$0xff]  ;;  %v761_v28 = vpop.f32.mrf.mxu2 }
 0x11d   :  { %v937_v29 = vadd.f32 %v1848_v5, %v917_v39  ;;  %899 = vst.msk [vmem:[#allocation2 + $0x50] sm:$0xff] %vm18_vm0, %v882_v43  ;;  %v762_v30 = vadd.f32 %v761_v28, %v713_v27  ;;  %v50_v28 = vld [vmem:[#allocation2 + $0x78] sm:$0xff] }
 0x11e   :  { %v810_v31 = vpop.f32.mrf.mxu3  ;;  %v715_v32 = vpop.f32.mrf.mxu1 }
 0x11f   :  { %v953_v33 = vmax.f32 %v937_v29, 0.0  ;;  %v811_v34 = vadd.f32 %v810_v31, %v762_v30  ;;  %v716_v42 = vadd.f32 %v715_v32, %v1785_v24 }
 0x120   :  { %v862_v41 = vpop.f32.mrf.mxu0 }
 0x121   :  { %v969_v38 = vpack.c.bf16 %v953_v33, %v953_v33  ;;  %v860_v40 = vadd.f32 %v859_v21, %v811_v34 }
 0x123   :  { %986 = vst.msk [vmem:[%s1960_s3 + $0x24] sm:$0xf] %vm976_vm1, %v969_v38  ;;  %v883_v47 = vadd.f32 %v860_v40, %v46_v37 }
 0x124   :  { %v918_v46 = vld [vmem:[#allocation2 + $0x50] sm:$0xff]  ;;  %v764_v45 = vpop.f32.mrf.mxu2 }
 0x125   :  { %v938_v49 = vadd.f32 %v1848_v5, %v918_v46  ;;  %900 = vst.msk [vmem:[#allocation2 + $0x58] sm:$0xff] %vm18_vm0, %v883_v47  ;;  %v765_v50 = vadd.f32 %v764_v45, %v716_v42 }
 0x126   :  { %v813_v51 = vpop.f32.mrf.mxu3  ;;  %v717_v52 = vpop.f32.mrf.mxu1 }
 0x127   :  { %v954_v53 = vmax.f32 %v938_v49, 0.0  ;;  %v814_v54 = vadd.f32 %v813_v51, %v765_v50  ;;  %v718_v58 = vadd.f32 %v717_v52, %v1823_v36 }
 0x128   :  { %v864_v60 = vpop.f32.mrf.mxu0 }
 0x129   :  { %v970_v56 = vpack.c.bf16 %v954_v53, %v954_v53  ;;  %v863_v57 = vadd.f32 %v862_v41, %v814_v54 }
 0x12b   :  { %987 = vst.msk [vmem:[%s1960_s3 + $0x28] sm:$0xf] %vm976_vm1, %v970_v56  ;;  %v884_v24 = vadd.f32 %v863_v57, %v47_v55 }
 0x12c   :  { %v919_v59 = vld [vmem:[#allocation2 + $0x58] sm:$0xff]  ;;  %v766_v18 = vpop.f32.mrf.mxu2 }
 0x12d   :  { %v939_v22 = vadd.f32 %v1848_v5, %v919_v59  ;;  %901 = vst.msk [vmem:[#allocation2 + $0x60] sm:$0xff] %vm18_vm0, %v884_v24  ;;  %v767_v61 = vadd.f32 %v766_v18, %v718_v58 }
 0x12e   :  { %v815_v62 = vpop.f32.mrf.mxu3  ;;  %v720_v63 = vpop.f32.mrf.mxu1 }
 0x12f   :  { %v955_v0 = vmax.f32 %v939_v22, 0.0  ;;  %v816_v1 = vadd.f32 %v815_v62, %v767_v61  ;;  %v721_v6 = vadd.f32 %v720_v63, %v1836_v44 }
 0x130   :  { %v867_v25 = vpop.f32.mrf.mxu0 }
 0x131   :  { %v971_v3 = vpack.c.bf16 %v955_v0, %v955_v0  ;;  %v865_v4 = vadd.f32 %v864_v60, %v816_v1 }
 0x133   :  { %988 = vst.msk [vmem:[%s1960_s3 + $0x2c] sm:$0xf] %vm976_vm1, %v971_v3  ;;  %v885_v36 = vadd.f32 %v865_v4, %v48_v2 }
 0x134   :  { %v920_v7 = vld [vmem:[#allocation2 + $0x60] sm:$0xff]  ;;  %v769_v8 = vpop.f32.mrf.mxu2 }
 0x135   :  { %v940_v9 = vadd.f32 %v1848_v5, %v920_v7  ;;  %902 = vst.msk [vmem:[#allocation2 + $0x68] sm:$0xff] %vm18_vm0, %v885_v36  ;;  %v770_v10 = vadd.f32 %v769_v8, %v721_v6 }
 0x136   :  { %v818_v35 = vpop.f32.mrf.mxu3  ;;  %v722_v14 = vpop.f32.mrf.mxu1 }
 0x137   :  { %v956_v11 = vmax.f32 %v940_v9, 0.0  ;;  %v819_v12 = vadd.f32 %v818_v35, %v770_v10  ;;  %v723_v17 = vadd.f32 %v722_v14, %v1842_v48 }
 0x138   :  { %v869_v39 = vpop.f32.mrf.mxu0 }
 0x139   :  { %v972_v15 = vpack.c.bf16 %v956_v11, %v956_v11  ;;  %v868_v16 = vadd.f32 %v867_v25, %v819_v12 }
 0x13b   :  { %989 = vst.msk [vmem:[%s1960_s3 + $0x30] sm:$0xf] %vm976_vm1, %v972_v15  ;;  %v886_v44 = vadd.f32 %v868_v16, %v49_v13 }
 0x13c   :  { %v921_v19 = vld [vmem:[#allocation2 + $0x68] sm:$0xff]  ;;  %v771_v20 = vpop.f32.mrf.mxu2 }
 0x13d   :  { %v941_v21 = vadd.f32 %v1848_v5, %v921_v19  ;;  %903 = vst.msk [vmem:[#allocation2 + $0x70] sm:$0xff] %vm18_vm0, %v886_v44  ;;  %v772_v23 = vadd.f32 %v771_v20, %v723_v17 }
 0x13e   :  { %v820_v26 = vpop.f32.mrf.mxu3 }
 0x13f   :  { %v957_v43 = vmax.f32 %v941_v21, 0.0  ;;  %v821_v27 = vadd.f32 %v820_v26, %v772_v23 }
 0x141   :  { %v973_v29 = vpack.c.bf16 %v957_v43, %v957_v43  ;;  %v870_v30 = vadd.f32 %v869_v39, %v821_v27 }
 0x143   :  { %990 = vst.msk [vmem:[%s1960_s3 + $0x34] sm:$0xf] %vm976_vm1, %v973_v29  ;;  %v887_v48 = vadd.f32 %v870_v30, %v50_v28 }
 0x144   :  { %v922_v31 = vld [vmem:[#allocation2 + $0x70] sm:$0xff] }
 0x145   :  { %v942_v32 = vadd.f32 %v1848_v5, %v922_v31  ;;  %904 = vst.msk [vmem:[#allocation2 + $0x78] sm:$0xff] %vm18_vm0, %v887_v48 }
 0x147   :  { %v958_v33 = vmax.f32 %v942_v32, 0.0 }
 0x149   :  { %v974_v34 = vpack.c.bf16 %v958_v33, %v958_v33 }
 0x14b   :  { %991 = vst.msk [vmem:[%s1960_s3 + $0x38] sm:$0xf] %vm976_vm1, %v974_v34 }
 0x14c   :  { %v923_v37 = vld [vmem:[#allocation2 + $0x78] sm:$0xff] }
 0x14d   :  { %v943_v38 = vadd.f32 %v1848_v5, %v923_v37 }
 0x14f   :  { %v959_v40 = vmax.f32 %v943_v38, 0.0 }
 0x151   :  { %v975_v41 = vpack.c.bf16 %v959_v40, %v959_v40 }
 0x153   :  { %992 = vst.msk [vmem:[%s1960_s3 + $0x3c] sm:$0xf] %vm976_vm1, %v975_v41 }

// kernel: resnet_forward.14
= control target key start
LH: loop header
LB: loop body
LE: loop exit
PB: predicated region body
PF: predicated region fallthrough
CT: control target
= control target key end

     0   :  { %vm21_vm0 = vcmask 523264   ;;  %vm1027_vm1 = vcmask 519168   ;;  %s2076_s1 = inlined_call_operand.vmem [shape: bf16[640,64], index: 1, kind: input, shape index: {}]   ;;  %s2077_s0 = inlined_call_operand.vmem [shape: bf16[128,640], index: 0, kind: input, shape index: {}]   ;;  %s2078_s2 = inlined_call_operand.vmem [shape: f32[1,64], index: 2, kind: input, shape index: {}]   ;;  %s2079_s3 = inlined_call_operand.vmem [shape: bf16[128,64], index: 3, kind: input, shape index: {}]   ;;  %s2080_s4 = inlined_call_operand.vmem [shape: bf16[128,64], index: 4, kind: output, shape index: {}]  }
   0x1   :  { %v1415_v0 = vld [vmem:[%s2076_s1 + $0x38] sm:$0xff]  ;;  %v1414_v1 = vld [vmem:[%s2076_s1 + $0x30] sm:$0xff]  ;;  %v1413_v2 = vld [vmem:[%s2076_s1 + $0x28] sm:$0xff] }
   0x2   :  { %1487 = vmatpush.bf16.msra.mxu1 %v1415_v0  ;;  %1488 = vmatpush.bf16.msra.mxu2 %v1415_v0  ;;  %v1412_v3 = vld [vmem:[%s2076_s1 + $0x20] sm:$0xff]  ;;  %v1411_v4 = vld [vmem:[%s2076_s1 + $0x18] sm:$0xff]  ;;  %v1410_v5 = vld [vmem:[%s2076_s1 + $0x10] sm:$0xff] }
   0x3   :  { %1489 = vmatpush.bf16.msra.mxu3 %v1415_v0  ;;  %630 = vmatpush.bf16.msra.mxu0 %v1415_v0  ;;  %v1409_v6 = vld [vmem:[%s2076_s1 + $0x8] sm:$0xff]  ;;  %v1408_v7 = vld [vmem:[%s2076_s1] sm:$0xff]  ;;  %v1090_v8 = vld [vmem:[%s2077_s0 + $0x50] sm:$0xf] }
   0x4   :  { %v1380_v9 = vld [vmem:[%s2077_s0 + $0x60] sm:$0xf0]  ;;  %v1130_v10 = vld [vmem:[%s2077_s0 + $0xa0] sm:$0xf]  ;;  %v1390_v11 = vld [vmem:[%s2077_s0 + $0xb0] sm:$0xf0] }
   0x5   :  { %v1170_v12 = vld [vmem:[%s2077_s0 + $0xf0] sm:$0xf]  ;;  %v1400_v13 = vld [vmem:[%s2077_s0 + $0x100] sm:$0xf0]  ;;  %v1050_v14 = vld [vmem:[%s2077_s0] sm:$0xf]  ;;  %v1091_v18 = vor.u32 %v1380_v9, %v1090_v8  ;;  %v1131_v19 = vor.u32 %v1390_v11, %v1130_v10 }
   0x6   :  { %1490 = vmatpush.bf16.msra.mxu1 %v1414_v1  ;;  %1491 = vmatpush.bf16.msra.mxu2 %v1414_v1  ;;  %v1370_v15 = vld [vmem:[%s2077_s0 + $0x10] sm:$0xf0]  ;;  %v1431_v16 = vld [vmem:[%s2076_s1 + $0xb8] sm:$0xff]  ;;  %v1171_v20 = vor.u32 %v1400_v13, %v1170_v12  ;;  %v1429_v28 = vld [vmem:[%s2076_s1 + $0xa8] sm:$0xff] }
   0x7   :  { %1492 = vmatpush.bf16.msra.mxu3 %v1414_v1  ;;  %631 = vmatpush.bf16.msra.mxu0 %v1414_v1  ;;  %v1423_v17 = vld [vmem:[%s2076_s1 + $0x78] sm:$0xff]  ;;  %v1051_v21 = vor.u32 %v1370_v15, %v1050_v14  ;;  %v1430_v24 = vld [vmem:[%s2076_s1 + $0xb0] sm:$0xff]  ;;  %v1421_v29 = vld [vmem:[%s2076_s1 + $0x68] sm:$0xff] }
   0x8   :  { %v1439_v22 = vld [vmem:[%s2076_s1 + $0xf8] sm:$0xff]  ;;  %v1422_v25 = vld [vmem:[%s2076_s1 + $0x70] sm:$0xff]  ;;  %v1437_v30 = vld [vmem:[%s2076_s1 + $0xe8] sm:$0xff] }
   0x9   :  { %v1447_v23 = vld [vmem:[%s2076_s1 + $0x138] sm:$0xff]  ;;  %v1438_v26 = vld [vmem:[%s2076_s1 + $0xf0] sm:$0xff]  ;;  %v1445_v31 = vld [vmem:[%s2076_s1 + $0x128] sm:$0xff] }
   0xa   :  { %1493 = vmatpush.bf16.msra.mxu1 %v1413_v2  ;;  %1494 = vmatpush.bf16.msra.mxu2 %v1413_v2  ;;  %v1446_v27 = vld [vmem:[%s2076_s1 + $0x130] sm:$0xff]  ;;  %v1428_v32 = vld [vmem:[%s2076_s1 + $0xa0] sm:$0xff]  ;;  %v1110_v36 = vld [vmem:[%s2077_s0 + $0x78] sm:$0xf] }
   0xb   :  { %1495 = vmatpush.bf16.msra.mxu3 %v1413_v2  ;;  %632 = vmatpush.bf16.msra.mxu0 %v1413_v2  ;;  %v1420_v33 = vld [vmem:[%s2076_s1 + $0x60] sm:$0xff]  ;;  %v1385_v37 = vld [vmem:[%s2077_s0 + $0x88] sm:$0xf0]  ;;  %v1150_v38 = vld [vmem:[%s2077_s0 + $0xc8] sm:$0xf] }
   0xc   :  { %v1436_v34 = vld [vmem:[%s2076_s1 + $0xe0] sm:$0xff]  ;;  %v1395_v39 = vld [vmem:[%s2077_s0 + $0xd8] sm:$0xf0]  ;;  %v1190_v40 = vld [vmem:[%s2077_s0 + $0x118] sm:$0xf]  ;;  %v1111_v46 = vor.u32 %v1385_v37, %v1110_v36 }
   0xd   :  { %v1444_v35 = vld [vmem:[%s2076_s1 + $0x120] sm:$0xff]  ;;  %v1405_v41 = vld [vmem:[%s2077_s0 + $0x128] sm:$0xf0]  ;;  %v1070_v42 = vld [vmem:[%s2077_s0 + $0x28] sm:$0xf]  ;;  %v1151_v47 = vor.u32 %v1395_v39, %v1150_v38 }
   0xe   :  { %1496 = vmatpush.bf16.msra.mxu1 %v1412_v3  ;;  %1497 = vmatpush.bf16.msra.mxu2 %v1412_v3  ;;  %v1375_v43 = vld [vmem:[%s2077_s0 + $0x38] sm:$0xf0]  ;;  %v1191_v48 = vor.u32 %v1405_v41, %v1190_v40  ;;  %v1426_v52 = vld [vmem:[%s2076_s1 + $0x90] sm:$0xff]  ;;  %v1425_v56 = vld [vmem:[%s2076_s1 + $0x88] sm:$0xff] }
   0xf   :  { %1498 = vmatpush.bf16.msra.mxu3 %v1412_v3  ;;  %633 = vmatpush.bf16.msra.mxu0 %v1412_v3  ;;  %v1427_v44 = vld [vmem:[%s2076_s1 + $0x98] sm:$0xff]  ;;  %v1071_v49 = vor.u32 %v1375_v43, %v1070_v42  ;;  %v1418_v53 = vld [vmem:[%s2076_s1 + $0x50] sm:$0xff]  ;;  %v1417_v57 = vld [vmem:[%s2076_s1 + $0x48] sm:$0xff] }
  0x10   :  { %v1419_v45 = vld [vmem:[%s2076_s1 + $0x58] sm:$0xff]  ;;  %v1434_v54 = vld [vmem:[%s2076_s1 + $0xd0] sm:$0xff]  ;;  %v1433_v58 = vld [vmem:[%s2076_s1 + $0xc8] sm:$0xff] }
  0x11   :  { %v1435_v50 = vld [vmem:[%s2076_s1 + $0xd8] sm:$0xff]  ;;  %v1442_v55 = vld [vmem:[%s2076_s1 + $0x110] sm:$0xff]  ;;  %v1441_v59 = vld [vmem:[%s2076_s1 + $0x108] sm:$0xff] }
  0x12   :  { %1499 = vmatpush.bf16.msra.mxu1 %v1411_v4  ;;  %1500 = vmatpush.bf16.msra.mxu2 %v1411_v4  ;;  %v1443_v51 = vld [vmem:[%s2076_s1 + $0x118] sm:$0xff]  ;;  %v1424_v60 = vld [vmem:[%s2076_s1 + $0x80] sm:$0xff]  ;;  %v1058_v2 = vld [vmem:[%s2077_s0 + $0x8] sm:$0xf] }
  0x13   :  { %1501 = vmatpush.bf16.msra.mxu3 %v1411_v4  ;;  %634 = vmatpush.bf16.msra.mxu0 %v1411_v4  ;;  %v1416_v61 = vld [vmem:[%s2076_s1 + $0x40] sm:$0xff]  ;;  %v1052_v1 = vld [vmem:[%s2077_s0 + $0x14] sm:$0xf0]  ;;  %v1371_v3 = vld [vmem:[%s2077_s0 + $0x18] sm:$0xf0] }
  0x14   :  { %v1432_v62 = vld [vmem:[%s2076_s1 + $0xc0] sm:$0xff]  ;;  %v1369_v4 = vld [vmem:[%s2077_s0 + $0xc] sm:$0xf]  ;;  %v1059_v9 = vor.u32 %v1371_v3, %v1058_v2  ;;  %v1078_v14 = vld [vmem:[%s2077_s0 + $0x30] sm:$0xf] }
  0x15   :  { %v1440_v63 = vld [vmem:[%s2076_s1 + $0x100] sm:$0xff]  ;;  %v1373_v12 = vld [vmem:[%s2077_s0 + $0x2c] sm:$0xf]  ;;  %v1383_v36 = vld [vmem:[%s2077_s0 + $0x7c] sm:$0xf] }
  0x16   :  { %1502 = vmatpush.bf16.msra.mxu1 %v1410_v5  ;;  %1503 = vmatpush.bf16.msra.mxu2 %v1410_v5  ;;  %v1368_v0 = vld [vmem:[%s2077_s0 + $0x4] sm:$0xf]  ;;  %v1072_v13 = vld [vmem:[%s2077_s0 + $0x3c] sm:$0xf0]  ;;  %v1112_v37 = vld [vmem:[%s2077_s0 + $0x8c] sm:$0xf0] }
  0x17   :  { %1504 = vmatpush.bf16.msra.mxu3 %v1410_v5  ;;  %635 = vmatpush.bf16.msra.mxu0 %v1410_v5  ;;  %v1060_v5 = vld [vmem:[%s2077_s0 + $0x1c] sm:$0xf0]  ;;  %v1055_v8 = vor.u32 %v1368_v0, %v1052_v1  ;;  %v1376_v15 = vld [vmem:[%s2077_s0 + $0x40] sm:$0xf0]  ;;  %v1386_v39 = vld [vmem:[%s2077_s0 + $0x90] sm:$0xf0] }
  0x18   :  { %v1063_v10 = vor.u32 %v1369_v4, %v1060_v5  ;;  %v1118_v38 = vld [vmem:[%s2077_s0 + $0x80] sm:$0xf]  ;;  %v1384_v40 = vld [vmem:[%s2077_s0 + $0x84] sm:$0xf]  ;;  %v1120_v41 = vld [vmem:[%s2077_s0 + $0x94] sm:$0xf0] }
  0x19   :  { %v1126_v42 = vld [vmem:[%s2077_s0 + $0x88] sm:$0xf]  ;;  %v1387_v43 = vld [vmem:[%s2077_s0 + $0x98] sm:$0xf0]  ;;  %v1394_v0 = vld [vmem:[%s2077_s0 + $0xd4] sm:$0xf] }
  0x1a   :  { %1505 = vmatpush.bf16.msra.mxu1 %v1409_v6  ;;  %1506 = vmatpush.bf16.msra.mxu2 %v1409_v6  ;;  %v1160_v1 = vld [vmem:[%s2077_s0 + $0xe4] sm:$0xf0]  ;;  %v1166_v2 = vld [vmem:[%s2077_s0 + $0xd8] sm:$0xf]  ;;  %v1397_v3 = vld [vmem:[%s2077_s0 + $0xe8] sm:$0xf0] }
  0x1b   :  { %1507 = vmatpush.bf16.msra.mxu3 %v1409_v6  ;;  %636 = vmatpush.bf16.msra.mxu0 %v1409_v6  ;;  %v1066_v6 = vld [vmem:[%s2077_s0 + $0x10] sm:$0xf] }
  0x1e   :  { %1508 = vmatpush.bf16.msra.mxu1 %v1408_v7  ;;  %1509 = vmatpush.bf16.msra.mxu2 %v1408_v7 }
  0x1f   :  { %1510 = vmatpush.bf16.msra.mxu3 %v1408_v7  ;;  %637 = vmatpush.bf16.msra.mxu0 %v1408_v7  ;;  %v1372_v7 = vld [vmem:[%s2077_s0 + $0x20] sm:$0xf0] }
  0x20   :  { %v1067_v11 = vor.u32 %v1372_v7, %v1066_v6  ;;  %v1163_v6 = vor.u32 %v1394_v0, %v1160_v1  ;;  %v1167_v7 = vor.u32 %v1397_v3, %v1166_v2 }
  0x21   :  { %648 = vmatmul.bf16.vlgmr.msra.gmra.mxu1 %v1091_v18  ;;  %658 = vmatmul.bf16.vlgmr.msra.gmra.mxu2 %v1131_v19  ;;  %v1086_v18 = vld [vmem:[%s2077_s0 + $0x38] sm:$0xf]  ;;  %v1377_v19 = vld [vmem:[%s2077_s0 + $0x48] sm:$0xf0] }
  0x22   :  { %728 = vmatpush.bf16.msrb.mxu2 %v1431_v16  ;;  %679 = vmatpush.bf16.msrb.mxu1 %v1423_v17  ;;  %v1374_v16 = vld [vmem:[%s2077_s0 + $0x34] sm:$0xf]  ;;  %v1080_v17 = vld [vmem:[%s2077_s0 + $0x44] sm:$0xf0] }
  0x23   :  { %668 = vmatmul.bf16.vlgmr.msra.gmra.mxu3 %v1171_v20  ;;  %638 = vmatmul.bf16.vlgmr.msra.gmra.mxu0 %v1051_v21  ;;  %v1075_v20 = vor.u32 %v1373_v12, %v1072_v13  ;;  %v1079_v21 = vor.u32 %v1376_v15, %v1078_v14  ;;  %v1399_v12 = vld [vmem:[%s2077_s0 + $0xfc] sm:$0xf]  ;;  %v1180_v13 = vld [vmem:[%s2077_s0 + $0x10c] sm:$0xf0]  ;;  %v1186_v14 = vld [vmem:[%s2077_s0 + $0x100] sm:$0xf] }
  0x24   :  { %777 = vmatpush.bf16.msrb.mxu3 %v1439_v22  ;;  %826 = vmatpush.bf16.msrb.mxu0 %v1447_v23  ;;  %v1083_v22 = vor.u32 %v1374_v16, %v1080_v17  ;;  %v1087_v23 = vor.u32 %v1377_v19, %v1086_v18  ;;  %v1402_v15 = vld [vmem:[%s2077_s0 + $0x110] sm:$0xf0]  ;;  %v1183_v19 = vor.u32 %v1399_v12, %v1180_v13 }
  0x26   :  { %729 = vmatpush.bf16.msrb.mxu2 %v1430_v24  ;;  %680 = vmatpush.bf16.msrb.mxu1 %v1422_v25  ;;  %v1378_v24 = vld [vmem:[%s2077_s0 + $0x54] sm:$0xf]  ;;  %v1092_v25 = vld [vmem:[%s2077_s0 + $0x64] sm:$0xf0] }
  0x28   :  { %778 = vmatpush.bf16.msrb.mxu3 %v1438_v26  ;;  %827 = vmatpush.bf16.msrb.mxu0 %v1446_v27  ;;  %v1098_v26 = vld [vmem:[%s2077_s0 + $0x58] sm:$0xf]  ;;  %v1381_v27 = vld [vmem:[%s2077_s0 + $0x68] sm:$0xf0] }
  0x2a   :  { %730 = vmatpush.bf16.msrb.mxu2 %v1429_v28  ;;  %681 = vmatpush.bf16.msrb.mxu1 %v1421_v29  ;;  %v1379_v28 = vld [vmem:[%s2077_s0 + $0x5c] sm:$0xf]  ;;  %v1100_v29 = vld [vmem:[%s2077_s0 + $0x6c] sm:$0xf0] }
  0x2c   :  { %779 = vmatpush.bf16.msrb.mxu3 %v1437_v30  ;;  %828 = vmatpush.bf16.msrb.mxu0 %v1445_v31  ;;  %v1106_v30 = vld [vmem:[%s2077_s0 + $0x60] sm:$0xf]  ;;  %v1382_v31 = vld [vmem:[%s2077_s0 + $0x70] sm:$0xf0] }
  0x2e   :  { %731 = vmatpush.bf16.msrb.mxu2 %v1428_v32  ;;  %682 = vmatpush.bf16.msrb.mxu1 %v1420_v33  ;;  %v1095_v32 = vor.u32 %v1378_v24, %v1092_v25  ;;  %v1099_v33 = vor.u32 %v1381_v27, %v1098_v26  ;;  %v1403_v27 = vld [vmem:[%s2077_s0 + $0x11c] sm:$0xf] }
  0x30   :  { %780 = vmatpush.bf16.msrb.mxu3 %v1436_v34  ;;  %829 = vmatpush.bf16.msrb.mxu0 %v1444_v35  ;;  %v1103_v34 = vor.u32 %v1379_v28, %v1100_v29  ;;  %v1107_v35 = vor.u32 %v1382_v31, %v1106_v30  ;;  %v1192_v28 = vld [vmem:[%s2077_s0 + $0x12c] sm:$0xf0]  ;;  %v1198_v29 = vld [vmem:[%s2077_s0 + $0x120] sm:$0xf]  ;;  %v1406_v30 = vld [vmem:[%s2077_s0 + $0x130] sm:$0xf0] }
  0x31   :  { %653 = vmatmul.bf16.gmra.mxu1 %v1111_v46  ;;  %663 = vmatmul.bf16.gmra.mxu2 %v1151_v47  ;;  %v1123_v46 = vor.u32 %v1384_v40, %v1120_v41  ;;  %v1127_v47 = vor.u32 %v1387_v43, %v1126_v42  ;;  %v1404_v31 = vld [vmem:[%s2077_s0 + $0x124] sm:$0xf] }
  0x32   :  { %732 = vmatpush.bf16.msrb.mxu2 %v1427_v44  ;;  %683 = vmatpush.bf16.msrb.mxu1 %v1419_v45  ;;  %v1115_v44 = vor.u32 %v1383_v36, %v1112_v37  ;;  %v1119_v45 = vor.u32 %v1386_v39, %v1118_v38  ;;  %v1195_v37 = vor.u32 %v1403_v27, %v1192_v28 }
  0x33   :  { %673 = vmatmul.bf16.gmra.mxu3 %v1191_v48  ;;  %643 = vmatmul.bf16.gmra.mxu0 %v1071_v49  ;;  %v1388_v48 = vld [vmem:[%s2077_s0 + $0xa4] sm:$0xf]  ;;  %v1132_v49 = vld [vmem:[%s2077_s0 + $0xb4] sm:$0xf0]  ;;  %v1199_v38 = vor.u32 %v1406_v30, %v1198_v29 }
  0x34   :  { %781 = vmatpush.bf16.msrb.mxu3 %v1435_v50  ;;  %830 = vmatpush.bf16.msrb.mxu0 %v1443_v51  ;;  %v1138_v50 = vld [vmem:[%s2077_s0 + $0xa8] sm:$0xf]  ;;  %v1391_v51 = vld [vmem:[%s2077_s0 + $0xb8] sm:$0xf0] }
  0x36   :  { %733 = vmatpush.bf16.msrb.mxu2 %v1426_v52  ;;  %684 = vmatpush.bf16.msrb.mxu1 %v1418_v53  ;;  %v1389_v52 = vld [vmem:[%s2077_s0 + $0xac] sm:$0xf]  ;;  %v1140_v53 = vld [vmem:[%s2077_s0 + $0xbc] sm:$0xf0] }
  0x38   :  { %782 = vmatpush.bf16.msrb.mxu3 %v1434_v54  ;;  %831 = vmatpush.bf16.msrb.mxu0 %v1442_v55  ;;  %v1146_v54 = vld [vmem:[%s2077_s0 + $0xb0] sm:$0xf]  ;;  %v1392_v55 = vld [vmem:[%s2077_s0 + $0xc0] sm:$0xf0] }
  0x3a   :  { %734 = vmatpush.bf16.msrb.mxu2 %v1425_v56  ;;  %685 = vmatpush.bf16.msrb.mxu1 %v1417_v57  ;;  %v1135_v56 = vor.u32 %v1388_v48, %v1132_v49  ;;  %v1139_v57 = vor.u32 %v1391_v51, %v1138_v50 }
  0x3c   :  { %783 = vmatpush.bf16.msrb.mxu3 %v1433_v58  ;;  %832 = vmatpush.bf16.msrb.mxu0 %v1441_v59  ;;  %v1143_v58 = vor.u32 %v1389_v52, %v1140_v53  ;;  %v1147_v59 = vor.u32 %v1392_v55, %v1146_v54 }
  0x3e   :  { %735 = vmatpush.bf16.msrb.mxu2 %v1424_v60  ;;  %686 = vmatpush.bf16.msrb.mxu1 %v1416_v61  ;;  %v1393_v60 = vld [vmem:[%s2077_s0 + $0xcc] sm:$0xf]  ;;  %v1152_v61 = vld [vmem:[%s2077_s0 + $0xdc] sm:$0xf0] }
  0x3f   :  { %v1155_v4 = vor.u32 %v1393_v60, %v1152_v61 }
  0x40   :  { %784 = vmatpush.bf16.msrb.mxu3 %v1432_v62  ;;  %833 = vmatpush.bf16.msrb.mxu0 %v1440_v63  ;;  %v1158_v62 = vld [vmem:[%s2077_s0 + $0xd0] sm:$0xf]  ;;  %v1396_v63 = vld [vmem:[%s2077_s0 + $0xe0] sm:$0xf0] }
  0x41   :  { %687 = vmatmul.bf16.vlgmr.msrb.gmra.mxu1 %v1055_v8  ;;  %736 = vmatmul.bf16.vlgmr.msrb.gmra.mxu2 %v1059_v9  ;;  %v1159_v5 = vor.u32 %v1396_v63, %v1158_v62  ;;  %v1398_v8 = vld [vmem:[%s2077_s0 + $0xf4] sm:$0xf]  ;;  %v1172_v9 = vld [vmem:[%s2077_s0 + $0x104] sm:$0xf0] }
  0x42   :  { %v1175_v16 = vor.u32 %v1398_v8, %v1172_v9 }
  0x43   :  { %785 = vmatmul.bf16.vlgmr.msrb.gmra.mxu3 %v1063_v10  ;;  %834 = vmatmul.bf16.vlgmr.msrb.gmra.mxu0 %v1067_v11  ;;  %v1178_v10 = vld [vmem:[%s2077_s0 + $0xf8] sm:$0xf]  ;;  %v1401_v11 = vld [vmem:[%s2077_s0 + $0x108] sm:$0xf0] }
  0x44   :  { %v1179_v17 = vor.u32 %v1401_v11, %v1178_v10 }
  0x51   :  { %692 = vmatmul.bf16.gmra.mxu1 %v1075_v20  ;;  %741 = vmatmul.bf16.gmra.mxu2 %v1079_v21  ;;  %v1187_v20 = vor.u32 %v1402_v15, %v1186_v14 }
  0x53   :  { %790 = vmatmul.bf16.gmra.mxu3 %v1083_v22  ;;  %839 = vmatmul.bf16.gmra.mxu0 %v1087_v23  ;;  %v1513_v23 = vmov 0.0  }
  0x54   :  { %22 = vst.msk [vmem:[#allocation2] sm:$0xff] %vm21_vm0, %v1513_v23 }
  0x55   :  { %23 = vst.msk [vmem:[#allocation2 + $0x8] sm:$0xff] %vm21_vm0, %v1513_v23 }
  0x56   :  { %24 = vst.msk [vmem:[#allocation2 + $0x10] sm:$0xff] %vm21_vm0, %v1513_v23 }
  0x57   :  { %25 = vst.msk [vmem:[#allocation2 + $0x18] sm:$0xff] %vm21_vm0, %v1513_v23 }
  0x58   :  { %26 = vst.msk [vmem:[#allocation2 + $0x20] sm:$0xff] %vm21_vm0, %v1513_v23 }
  0x59   :  { %27 = vst.msk [vmem:[#allocation2 + $0x28] sm:$0xff] %vm21_vm0, %v1513_v23 }
  0x5a   :  { %28 = vst.msk [vmem:[#allocation2 + $0x30] sm:$0xff] %vm21_vm0, %v1513_v23 }
  0x5b   :  { %29 = vst.msk [vmem:[#allocation2 + $0x38] sm:$0xff] %vm21_vm0, %v1513_v23 }
  0x5c   :  { %30 = vst.msk [vmem:[#allocation2 + $0x40] sm:$0xff] %vm21_vm0, %v1513_v23 }
  0x5d   :  { %31 = vst.msk [vmem:[#allocation2 + $0x48] sm:$0xff] %vm21_vm0, %v1513_v23 }
  0x5e   :  { %32 = vst.msk [vmem:[#allocation2 + $0x50] sm:$0xff] %vm21_vm0, %v1513_v23 }
  0x5f   :  { %33 = vst.msk [vmem:[#allocation2 + $0x58] sm:$0xff] %vm21_vm0, %v1513_v23 }
  0x60   :  { %34 = vst.msk [vmem:[#allocation2 + $0x60] sm:$0xff] %vm21_vm0, %v1513_v23 }
  0x61   :  { %697 = vmatmul.bf16.gmra.mxu1 %v1095_v32  ;;  %746 = vmatmul.bf16.gmra.mxu2 %v1099_v33  ;;  %v1200_v32 = vld [vmem:[%s2077_s0 + $0x134] sm:$0xf0]  ;;  %v1206_v33 = vld [vmem:[%s2077_s0 + $0x128] sm:$0xf]  ;;  %35 = vst.msk [vmem:[#allocation2 + $0x68] sm:$0xff] %vm21_vm0, %v1513_v23 }
  0x62   :  { %v1203_v40 = vor.u32 %v1404_v31, %v1200_v32  ;;  %36 = vst.msk [vmem:[#allocation2 + $0x70] sm:$0xff] %vm21_vm0, %v1513_v23 }
  0x63   :  { %795 = vmatmul.bf16.gmra.mxu3 %v1103_v34  ;;  %844 = vmatmul.bf16.gmra.mxu0 %v1107_v35  ;;  %v1407_v34 = vld [vmem:[%s2077_s0 + $0x138] sm:$0xf0]  ;;  %37 = vst.msk [vmem:[#allocation2 + $0x78] sm:$0xff] %vm21_vm0, %v1513_v23 }
  0x64   :  { %v1207_v41 = vor.u32 %v1407_v34, %v1206_v33 }
  0x71   :  { %702 = vmatmul.bf16.gmra.mxu1 %v1115_v44  ;;  %751 = vmatmul.bf16.gmra.mxu2 %v1119_v45 }
  0x73   :  { %800 = vmatmul.bf16.gmra.mxu3 %v1123_v46  ;;  %849 = vmatmul.bf16.gmra.mxu0 %v1127_v47 }
  0x81   :  { %707 = vmatmul.bf16.gmra.mxu1 %v1135_v56  ;;  %756 = vmatmul.bf16.gmra.mxu2 %v1139_v57 }
  0x83   :  { %805 = vmatmul.bf16.gmra.mxu3 %v1143_v58  ;;  %854 = vmatmul.bf16.gmra.mxu0 %v1147_v59  ;;  %v38_v58 = vld [vmem:[#allocation2] sm:$0xff] }
  0x91   :  { %712 = vmatmul.bf16.gmra.mxu1 %v1155_v4  ;;  %761 = vmatmul.bf16.gmra.mxu2 %v1159_v5  ;;  %v1449_v4 = vld [vmem:[%s2079_s3] sm:$0xff]   ;;  %v39_v5 = vld [vmem:[#allocation2 + $0x8] sm:$0xff] }
  0x92   :  { %v1450_v8 = vunpack.c.l.bf16 %v1449_v4  ;;  %v1451_v28 = vunpack.c.h.bf16 %v1449_v4 }
  0x93   :  { %810 = vmatmul.bf16.gmra.mxu3 %v1163_v6  ;;  %859 = vmatmul.bf16.gmra.mxu0 %v1167_v7  ;;  %v1946_v6 = vld [vmem:[%s2078_s2] ss:$0 sm:$0xff] }
  0x9e   :  { %v1875_v18 = vpop.f32.mrf.mxu1 }
  0xa0   :  { %v639_v21 = vpop.f32.mrf.mxu0 }
  0xa1   :  { %717 = vmatmul.bf16.gmra.mxu1 %v1175_v16  ;;  %766 = vmatmul.bf16.gmra.mxu2 %v1179_v17 }
  0xa3   :  { %815 = vmatmul.bf16.gmra.mxu3 %v1183_v19  ;;  %864 = vmatmul.bf16.gmra.mxu0 %v1187_v20 }
  0xa4   :  { %v1877_v22 = vpop.f32.mrf.mxu2 }
  0xa6   :  { %v1880_v24 = vpop.f32.mrf.mxu3  ;;  %v1883_v25 = vpop.f32.mrf.mxu1 }
  0xa8   :  { %v641_v26 = vpop.f32.mrf.mxu0 }
  0xac   :  { %v1915_v35 = vpop.f32.mrf.mxu2 }
  0xae   :  { %v1918_v36 = vpop.f32.mrf.mxu3  ;;  %v1921_v39 = vpop.f32.mrf.mxu1 }
  0xb0   :  { %v644_v42 = vpop.f32.mrf.mxu0 }
  0xb1   :  { %722 = vmatmul.bf16.gmra.mxu1 %v1195_v37  ;;  %771 = vmatmul.bf16.gmra.mxu2 %v1199_v38 }
  0xb3   :  { %820 = vmatmul.bf16.gmra.mxu3 %v1203_v40  ;;  %869 = vmatmul.bf16.gmra.mxu0 %v1207_v41 }
  0xb4   :  { %v1929_v43 = vpop.f32.mrf.mxu2 }
  0xb6   :  { %v1931_v44 = vpop.f32.mrf.mxu3  ;;  %v1933_v45 = vpop.f32.mrf.mxu1 }
  0xb8   :  { %v646_v46 = vpop.f32.mrf.mxu0 }
  0xbc   :  { %v1935_v47 = vpop.f32.mrf.mxu2 }
  0xbe   :  { %v1937_v48 = vpop.f32.mrf.mxu3  ;;  %v688_v49 = vpop.f32.mrf.mxu1 }
  0xbf   :  { %v689_v51 = vadd.f32 %v688_v49, %v639_v21  ;;  %v40_v21 = vld [vmem:[#allocation2 + $0x10] sm:$0xff]  ;;  %v41_v49 = vld [vmem:[#allocation2 + $0x18] sm:$0xff] }
  0xc0   :  { %v835_v50 = vpop.f32.mrf.mxu0 }
  0xc4   :  { %v737_v52 = vpop.f32.mrf.mxu2 }
  0xc5   :  { %v738_v53 = vadd.f32 %v737_v52, %v689_v51 }
  0xc6   :  { %v786_v54 = vpop.f32.mrf.mxu3  ;;  %v690_v55 = vpop.f32.mrf.mxu1 }
  0xc7   :  { %v787_v56 = vadd.f32 %v786_v54, %v738_v53  ;;  %v691_v61 = vadd.f32 %v690_v55, %v641_v26 }
  0xc8   :  { %v837_v57 = vpop.f32.mrf.mxu0 }
  0xc9   :  { %v836_v59 = vadd.f32 %v835_v50, %v787_v56 }
  0xcb   :  { %v875_v60 = vadd.f32 %v836_v59, %v38_v58 }
  0xcc   :  { %v739_v62 = vpop.f32.mrf.mxu2 }
  0xcd   :  { %892 = vst.msk [vmem:[#allocation2] sm:$0xff] %vm21_vm0, %v875_v60  ;;  %v740_v63 = vadd.f32 %v739_v62, %v691_v61 }
  0xce   :  { %v788_v0 = vpop.f32.mrf.mxu3  ;;  %v693_v1 = vpop.f32.mrf.mxu1 }
  0xcf   :  { %v789_v2 = vadd.f32 %v788_v0, %v740_v63  ;;  %v694_v10 = vadd.f32 %v693_v1, %v644_v42  ;;  %v42_v1 = vld [vmem:[#allocation2 + $0x20] sm:$0xff] }
  0xd0   :  { %v840_v3 = vpop.f32.mrf.mxu0 }
  0xd1   :  { %v838_v7 = vadd.f32 %v837_v57, %v789_v2 }
  0xd3   :  { %v876_v9 = vadd.f32 %v838_v7, %v39_v5 }
  0xd4   :  { %v911_v11 = vld [vmem:[#allocation2] sm:$0xff]  ;;  %v742_v12 = vpop.f32.mrf.mxu2 }
  0xd5   :  { %v931_v13 = vadd.f32 %v1946_v6, %v911_v11  ;;  %893 = vst.msk [vmem:[#allocation2 + $0x8] sm:$0xff] %vm21_vm0, %v876_v9  ;;  %v743_v14 = vadd.f32 %v742_v12, %v694_v10 }
  0xd6   :  { %v791_v15 = vpop.f32.mrf.mxu3  ;;  %v695_v16 = vpop.f32.mrf.mxu1 }
  0xd7   :  { %v979_v17 = vadd.f32 %v1450_v8, %v931_v13  ;;  %v792_v19 = vadd.f32 %v791_v15, %v743_v14  ;;  %v696_v30 = vadd.f32 %v695_v16, %v646_v46  ;;  %v1480_v46 = vld [vmem:[%s2079_s3 + $0x8] sm:$0xff]  }
  0xd8   :  { %v842_v20 = vpop.f32.mrf.mxu0  ;;  %v1454_v55 = vunpack.c.l.bf16 %v1480_v46  ;;  %v1455_v7 = vunpack.c.h.bf16 %v1480_v46 }
  0xd9   :  { %v995_v23 = vmax.f32 %v979_v17, 0.0  ;;  %v841_v26 = vadd.f32 %v840_v3, %v792_v19  ;;  %v43_v17 = vld [vmem:[#allocation2 + $0x28] sm:$0xff] }
  0xdb   :  { %v1011_v27 = vpack.c.bf16 %v995_v23, %v995_v23  ;;  %v877_v29 = vadd.f32 %v841_v26, %v40_v21 }
  0xdc   :  { %v912_v31 = vld [vmem:[#allocation2 + $0x8] sm:$0xff]  ;;  %v744_v32 = vpop.f32.mrf.mxu2 }
  0xdd   :  { %1028 = vst.msk [vmem:[%s2080_s4] sm:$0xf] %vm1027_vm1, %v1011_v27  ;;  %v932_v33 = vadd.f32 %v1946_v6, %v912_v31  ;;  %v745_v34 = vadd.f32 %v744_v32, %v696_v30 }
  0xde   :  { %v793_v37 = vpop.f32.mrf.mxu3  ;;  %894 = vst.msk [vmem:[#allocation2 + $0x10] sm:$0xff] %vm21_vm0, %v877_v29  ;;  %v698_v38 = vpop.f32.mrf.mxu1 }
  0xdf   :  { %v980_v40 = vadd.f32 %v1451_v28, %v932_v33  ;;  %v794_v41 = vadd.f32 %v793_v37, %v745_v34  ;;  %v699_v54 = vadd.f32 %v698_v38, %v1875_v18 }
  0xe0   :  { %v845_v42 = vpop.f32.mrf.mxu0 }
  0xe1   :  { %v996_v50 = vmax.f32 %v980_v40, 0.0  ;;  %v843_v51 = vadd.f32 %v842_v20, %v794_v41  ;;  %v44_v40 = vld [vmem:[#allocation2 + $0x30] sm:$0xff] }
  0xe3   :  { %v1012_v52 = vpack.c.bf16 %v996_v50, %v996_v50  ;;  %v878_v53 = vadd.f32 %v843_v51, %v41_v49 }
  0xe4   :  { %v747_v56 = vpop.f32.mrf.mxu2 }
  0xe5   :  { %1029 = vst.msk [vmem:[%s2080_s4 + $0x4] sm:$0xf] %vm1027_vm1, %v1012_v52  ;;  %v913_v57 = vld [vmem:[#allocation2 + $0x10] sm:$0xff]  ;;  %v748_v58 = vadd.f32 %v747_v56, %v699_v54 }
  0xe6   :  { %v796_v59 = vpop.f32.mrf.mxu3  ;;  %v933_v60 = vadd.f32 %v1946_v6, %v913_v57  ;;  %895 = vst.msk [vmem:[#allocation2 + $0x18] sm:$0xff] %vm21_vm0, %v878_v53  ;;  %v700_v61 = vpop.f32.mrf.mxu1 }
  0xe7   :  { %v797_v62 = vadd.f32 %v796_v59, %v748_v58  ;;  %v701_v4 = vadd.f32 %v700_v61, %v1883_v25  ;;  %v1481_v25 = vld [vmem:[%s2079_s3 + $0x10] sm:$0xff]  }
  0xe8   :  { %v847_v63 = vpop.f32.mrf.mxu0  ;;  %v981_v0 = vadd.f32 %v1454_v55, %v933_v60  ;;  %v1458_v21 = vunpack.c.l.bf16 %v1481_v25  ;;  %v1459_v49 = vunpack.c.h.bf16 %v1481_v25  ;;  %v45_v60 = vld [vmem:[#allocation2 + $0x38] sm:$0xff] }
  0xe9   :  { %v846_v18 = vadd.f32 %v845_v42, %v797_v62 }
  0xea   :  { %v997_v2 = vmax.f32 %v981_v0, 0.0 }
  0xeb   :  { %v879_v3 = vadd.f32 %v846_v18, %v42_v1 }
  0xec   :  { %v1013_v5 = vpack.c.bf16 %v997_v2, %v997_v2  ;;  %v749_v8 = vpop.f32.mrf.mxu2 }
  0xed   :  { %v914_v9 = vld [vmem:[#allocation2 + $0x18] sm:$0xff]  ;;  %896 = vst.msk [vmem:[#allocation2 + $0x20] sm:$0xff] %vm21_vm0, %v879_v3  ;;  %v750_v10 = vadd.f32 %v749_v8, %v701_v4 }
  0xee   :  { %v798_v11 = vpop.f32.mrf.mxu3  ;;  %1030 = vst.msk [vmem:[%s2080_s4 + $0x8] sm:$0xf] %vm1027_vm1, %v1013_v5  ;;  %v934_v12 = vadd.f32 %v1946_v6, %v914_v9  ;;  %v703_v13 = vpop.f32.mrf.mxu1 }
  0xef   :  { %v799_v14 = vadd.f32 %v798_v11, %v750_v10  ;;  %v704_v26 = vadd.f32 %v703_v13, %v1921_v39 }
  0xf0   :  { %v850_v15 = vpop.f32.mrf.mxu0  ;;  %v982_v16 = vadd.f32 %v1455_v7, %v934_v12  ;;  %v46_v12 = vld [vmem:[#allocation2 + $0x40] sm:$0xff] }
  0xf1   :  { %v848_v19 = vadd.f32 %v847_v63, %v799_v14 }
  0xf2   :  { %v998_v20 = vmax.f32 %v982_v16, 0.0 }
  0xf3   :  { %v880_v23 = vadd.f32 %v848_v19, %v43_v17 }
  0xf4   :  { %v1014_v27 = vpack.c.bf16 %v998_v20, %v998_v20  ;;  %v915_v28 = vld [vmem:[#allocation2 + $0x20] sm:$0xff]  ;;  %v752_v29 = vpop.f32.mrf.mxu2 }
  0xf5   :  { %v935_v30 = vadd.f32 %v1946_v6, %v915_v28  ;;  %897 = vst.msk [vmem:[#allocation2 + $0x28] sm:$0xff] %vm21_vm0, %v880_v23  ;;  %v753_v31 = vadd.f32 %v752_v29, %v704_v26 }
  0xf6   :  { %v801_v32 = vpop.f32.mrf.mxu3  ;;  %1031 = vst.msk [vmem:[%s2080_s4 + $0xc] sm:$0xf] %vm1027_vm1, %v1014_v27  ;;  %v705_v33 = vpop.f32.mrf.mxu1 }
  0xf7   :  { %v983_v34 = vadd.f32 %v1458_v21, %v935_v30  ;;  %v802_v37 = vadd.f32 %v801_v32, %v753_v31  ;;  %v706_v46 = vadd.f32 %v705_v33, %v1933_v45  ;;  %v1482_v45 = vld [vmem:[%s2079_s3 + $0x18] sm:$0xff]   ;;  %v47_v30 = vld [vmem:[#allocation2 + $0x48] sm:$0xff] }
  0xf8   :  { %v852_v38 = vpop.f32.mrf.mxu0  ;;  %v1462_v18 = vunpack.c.l.bf16 %v1482_v45  ;;  %v1463_v25 = vunpack.c.h.bf16 %v1482_v45 }
  0xf9   :  { %v999_v39 = vmax.f32 %v983_v34, 0.0  ;;  %v851_v41 = vadd.f32 %v850_v15, %v802_v37 }
  0xfb   :  { %v1015_v42 = vpack.c.bf16 %v999_v39, %v999_v39  ;;  %v881_v50 = vadd.f32 %v851_v41, %v44_v40 }
  0xfc   :  { %v916_v51 = vld [vmem:[#allocation2 + $0x28] sm:$0xff]  ;;  %v754_v52 = vpop.f32.mrf.mxu2 }
  0xfd   :  { %1032 = vst.msk [vmem:[%s2080_s4 + $0x10] sm:$0xf] %vm1027_vm1, %v1015_v42  ;;  %v936_v53 = vadd.f32 %v1946_v6, %v916_v51  ;;  %v755_v54 = vadd.f32 %v754_v52, %v706_v46  ;;  %v48_v52 = vld [vmem:[#allocation2 + $0x50] sm:$0xff] }
  0xfe   :  { %v803_v55 = vpop.f32.mrf.mxu3  ;;  %898 = vst.msk [vmem:[#allocation2 + $0x30] sm:$0xff] %vm21_vm0, %v881_v50  ;;  %v708_v56 = vpop.f32.mrf.mxu1 }
  0xff   :  { %v984_v57 = vadd.f32 %v1459_v49, %v936_v53  ;;  %v804_v58 = vadd.f32 %v803_v55, %v755_v54  ;;  %v709_v1 = vadd.f32 %v708_v56, %v1877_v22 }
 0x100   :  { %v855_v59 = vpop.f32.mrf.mxu0 }
 0x101   :  { %v1000_v61 = vmax.f32 %v984_v57, 0.0  ;;  %v853_v62 = vadd.f32 %v852_v38, %v804_v58 }
 0x103   :  { %v1016_v63 = vpack.c.bf16 %v1000_v61, %v1000_v61  ;;  %v882_v0 = vadd.f32 %v853_v62, %v45_v60 }
 0x104   :  { %v757_v2 = vpop.f32.mrf.mxu2 }
 0x105   :  { %1033 = vst.msk [vmem:[%s2080_s4 + $0x14] sm:$0xf] %vm1027_vm1, %v1016_v63  ;;  %v917_v3 = vld [vmem:[#allocation2 + $0x30] sm:$0xff]  ;;  %v758_v4 = vadd.f32 %v757_v2, %v709_v1 }
 0x106   :  { %v806_v5 = vpop.f32.mrf.mxu3  ;;  %v937_v7 = vadd.f32 %v1946_v6, %v917_v3  ;;  %899 = vst.msk [vmem:[#allocation2 + $0x38] sm:$0xff] %vm21_vm0, %v882_v0  ;;  %v710_v8 = vpop.f32.mrf.mxu1 }
 0x107   :  { %v807_v9 = vadd.f32 %v806_v5, %v758_v4  ;;  %v711_v15 = vadd.f32 %v710_v8, %v1915_v35  ;;  %v1483_v35 = vld [vmem:[%s2079_s3 + $0x20] sm:$0xff]  }
 0x108   :  { %v857_v10 = vpop.f32.mrf.mxu0  ;;  %v985_v11 = vadd.f32 %v1462_v18, %v937_v7  ;;  %v1466_v33 = vunpack.c.l.bf16 %v1483_v35  ;;  %v1467_v56 = vunpack.c.h.bf16 %v1483_v35  ;;  %v49_v18 = vld [vmem:[#allocation2 + $0x58] sm:$0xff] }
 0x109   :  { %v856_v22 = vadd.f32 %v855_v59, %v807_v9 }
 0x10a   :  { %v1001_v13 = vmax.f32 %v985_v11, 0.0 }
 0x10b   :  { %v883_v14 = vadd.f32 %v856_v22, %v46_v12 }
 0x10c   :  { %v1017_v16 = vpack.c.bf16 %v1001_v13, %v1001_v13  ;;  %v759_v17 = vpop.f32.mrf.mxu2 }
 0x10d   :  { %v918_v19 = vld [vmem:[#allocation2 + $0x38] sm:$0xff]  ;;  %900 = vst.msk [vmem:[#allocation2 + $0x40] sm:$0xff] %vm21_vm0, %v883_v14  ;;  %v760_v20 = vadd.f32 %v759_v17, %v711_v15 }
 0x10e   :  { %v808_v21 = vpop.f32.mrf.mxu3  ;;  %1034 = vst.msk [vmem:[%s2080_s4 + $0x18] sm:$0xf] %vm1027_vm1, %v1017_v16  ;;  %v938_v23 = vadd.f32 %v1946_v6, %v918_v19  ;;  %v713_v26 = vpop.f32.mrf.mxu1 }
 0x10f   :  { %v809_v27 = vadd.f32 %v808_v21, %v760_v20  ;;  %v714_v37 = vadd.f32 %v713_v26, %v1929_v43 }
 0x110   :  { %v860_v28 = vpop.f32.mrf.mxu0  ;;  %v986_v29 = vadd.f32 %v1463_v25, %v938_v23  ;;  %v50_v25 = vld [vmem:[#allocation2 + $0x60] sm:$0xff] }
 0x111   :  { %v858_v31 = vadd.f32 %v857_v10, %v809_v27 }
 0x112   :  { %v1002_v32 = vmax.f32 %v986_v29, 0.0 }
 0x113   :  { %v884_v34 = vadd.f32 %v858_v31, %v47_v30 }
 0x114   :  { %v1018_v38 = vpack.c.bf16 %v1002_v32, %v1002_v32  ;;  %v919_v40 = vld [vmem:[#allocation2 + $0x40] sm:$0xff]  ;;  %v762_v39 = vpop.f32.mrf.mxu2 }
 0x115   :  { %v939_v41 = vadd.f32 %v1946_v6, %v919_v40  ;;  %901 = vst.msk [vmem:[#allocation2 + $0x48] sm:$0xff] %vm21_vm0, %v884_v34  ;;  %v763_v42 = vadd.f32 %v762_v39, %v714_v37  ;;  %v51_v34 = vld [vmem:[#allocation2 + $0x68] sm:$0xff] }
 0x116   :  { %v811_v49 = vpop.f32.mrf.mxu3  ;;  %1035 = vst.msk [vmem:[%s2080_s4 + $0x1c] sm:$0xf] %vm1027_vm1, %v1018_v38  ;;  %v715_v50 = vpop.f32.mrf.mxu1 }
 0x117   :  { %v987_v46 = vadd.f32 %v1466_v33, %v939_v41  ;;  %v812_v51 = vadd.f32 %v811_v49, %v763_v42  ;;  %v716_v58 = vadd.f32 %v715_v50, %v1935_v47  ;;  %v1484_v47 = vld [vmem:[%s2079_s3 + $0x28] sm:$0xff]  }
 0x118   :  { %v862_v53 = vpop.f32.mrf.mxu0  ;;  %v1470_v9 = vunpack.c.l.bf16 %v1484_v47  ;;  %v1471_v23 = vunpack.c.h.bf16 %v1484_v47 }
 0x119   :  { %v1003_v43 = vmax.f32 %v987_v46, 0.0  ;;  %v861_v54 = vadd.f32 %v860_v28, %v812_v51 }
 0x11b   :  { %v1019_v55 = vpack.c.bf16 %v1003_v43, %v1003_v43  ;;  %v885_v57 = vadd.f32 %v861_v54, %v48_v52 }
 0x11c   :  { %v920_v59 = vld [vmem:[#allocation2 + $0x48] sm:$0xff]  ;;  %v764_v60 = vpop.f32.mrf.mxu2 }
 0x11d   :  { %1036 = vst.msk [vmem:[%s2080_s4 + $0x20] sm:$0xf] %vm1027_vm1, %v1019_v55  ;;  %v940_v61 = vadd.f32 %v1946_v6, %v920_v59  ;;  %v765_v45 = vadd.f32 %v764_v60, %v716_v58  ;;  %v52_v55 = vld [vmem:[#allocation2 + $0x70] sm:$0xff] }
 0x11e   :  { %v813_v62 = vpop.f32.mrf.mxu3  ;;  %902 = vst.msk [vmem:[#allocation2 + $0x50] sm:$0xff] %vm21_vm0, %v885_v57  ;;  %v718_v63 = vpop.f32.mrf.mxu1 }
 0x11f   :  { %v988_v0 = vadd.f32 %v1467_v56, %v940_v61  ;;  %v814_v1 = vadd.f32 %v813_v62, %v765_v45  ;;  %v719_v8 = vadd.f32 %v718_v63, %v1880_v24 }
 0x120   :  { %v865_v4 = vpop.f32.mrf.mxu0 }
 0x121   :  { %v1004_v2 = vmax.f32 %v988_v0, 0.0  ;;  %v863_v3 = vadd.f32 %v862_v53, %v814_v1 }
 0x123   :  { %v1020_v5 = vpack.c.bf16 %v1004_v2, %v1004_v2  ;;  %v886_v7 = vadd.f32 %v863_v3, %v49_v18  ;;  %v53_v3 = vld [vmem:[#allocation2 + $0x78] sm:$0xff] }
 0x124   :  { %v767_v10 = vpop.f32.mrf.mxu2 }
 0x125   :  { %1037 = vst.msk [vmem:[%s2080_s4 + $0x24] sm:$0xf] %vm1027_vm1, %v1020_v5  ;;  %v921_v11 = vld [vmem:[#allocation2 + $0x50] sm:$0xff]  ;;  %v768_v12 = vadd.f32 %v767_v10, %v719_v8 }
 0x126   :  { %v816_v22 = vpop.f32.mrf.mxu3  ;;  %v941_v13 = vadd.f32 %v1946_v6, %v921_v11  ;;  %903 = vst.msk [vmem:[#allocation2 + $0x58] sm:$0xff] %vm21_vm0, %v886_v7  ;;  %v720_v14 = vpop.f32.mrf.mxu1 }
 0x127   :  { %v817_v15 = vadd.f32 %v816_v22, %v768_v12  ;;  %v721_v20 = vadd.f32 %v720_v14, %v1918_v36  ;;  %v1485_v36 = vld [vmem:[%s2079_s3 + $0x30] sm:$0xff]  }
 0x128   :  { %v989_v16 = vadd.f32 %v1470_v9, %v941_v13  ;;  %v867_v26 = vpop.f32.mrf.mxu0  ;;  %v1474_v40 = vunpack.c.l.bf16 %v1485_v36  ;;  %v1475_v59 = vunpack.c.h.bf16 %v1485_v36 }
 0x129   :  { %v866_v17 = vadd.f32 %v865_v4, %v817_v15 }
 0x12a   :  { %v1005_v24 = vmax.f32 %v989_v16, 0.0 }
 0x12b   :  { %v887_v19 = vadd.f32 %v866_v17, %v50_v25 }
 0x12c   :  { %v1021_v21 = vpack.c.bf16 %v1005_v24, %v1005_v24  ;;  %v769_v27 = vpop.f32.mrf.mxu2 }
 0x12d   :  { %v922_v28 = vld [vmem:[#allocation2 + $0x58] sm:$0xff]  ;;  %904 = vst.msk [vmem:[#allocation2 + $0x60] sm:$0xff] %vm21_vm0, %v887_v19  ;;  %v770_v29 = vadd.f32 %v769_v27, %v721_v20 }
 0x12e   :  { %v818_v35 = vpop.f32.mrf.mxu3  ;;  %1038 = vst.msk [vmem:[%s2080_s4 + $0x28] sm:$0xf] %vm1027_vm1, %v1021_v21  ;;  %v942_v30 = vadd.f32 %v1946_v6, %v922_v28  ;;  %v723_v31 = vpop.f32.mrf.mxu1 }
 0x12f   :  { %v819_v32 = vadd.f32 %v818_v35, %v770_v29  ;;  %v724_v41 = vadd.f32 %v723_v31, %v1931_v44 }
 0x130   :  { %v990_v33 = vadd.f32 %v1471_v23, %v942_v30  ;;  %v870_v53 = vpop.f32.mrf.mxu0 }
 0x131   :  { %v868_v37 = vadd.f32 %v867_v26, %v819_v32 }
 0x132   :  { %v1006_v38 = vmax.f32 %v990_v33, 0.0 }
 0x133   :  { %v888_v39 = vadd.f32 %v868_v37, %v51_v34 }
 0x134   :  { %v1022_v42 = vpack.c.bf16 %v1006_v38, %v1006_v38  ;;  %v923_v49 = vld [vmem:[#allocation2 + $0x60] sm:$0xff]  ;;  %v772_v50 = vpop.f32.mrf.mxu2 }
 0x135   :  { %v943_v46 = vadd.f32 %v1946_v6, %v923_v49  ;;  %905 = vst.msk [vmem:[#allocation2 + $0x68] sm:$0xff] %vm21_vm0, %v888_v39  ;;  %v773_v51 = vadd.f32 %v772_v50, %v724_v41 }
 0x136   :  { %v821_v52 = vpop.f32.mrf.mxu3  ;;  %1039 = vst.msk [vmem:[%s2080_s4 + $0x2c] sm:$0xf] %vm1027_vm1, %v1022_v42  ;;  %v725_v56 = vpop.f32.mrf.mxu1 }
 0x137   :  { %v991_v43 = vadd.f32 %v1474_v40, %v943_v46  ;;  %v822_v54 = vadd.f32 %v821_v52, %v773_v51  ;;  %v726_v61 = vadd.f32 %v725_v56, %v1937_v48  ;;  %v1486_v48 = vld [vmem:[%s2079_s3 + $0x38] sm:$0xff]  }
 0x138   :  { %v872_v47 = vpop.f32.mrf.mxu0  ;;  %v1478_v9 = vunpack.c.l.bf16 %v1486_v48  ;;  %v1479_v14 = vunpack.c.h.bf16 %v1486_v48 }
 0x139   :  { %v1007_v44 = vmax.f32 %v991_v43, 0.0  ;;  %v871_v57 = vadd.f32 %v870_v53, %v822_v54 }
 0x13b   :  { %v1023_v58 = vpack.c.bf16 %v1007_v44, %v1007_v44  ;;  %v889_v60 = vadd.f32 %v871_v57, %v52_v55 }
 0x13c   :  { %v924_v45 = vld [vmem:[#allocation2 + $0x68] sm:$0xff]  ;;  %v774_v62 = vpop.f32.mrf.mxu2 }
 0x13d   :  { %1040 = vst.msk [vmem:[%s2080_s4 + $0x30] sm:$0xf] %vm1027_vm1, %v1023_v58  ;;  %v944_v63 = vadd.f32 %v1946_v6, %v924_v45  ;;  %v775_v0 = vadd.f32 %v774_v62, %v726_v61 }
 0x13e   :  { %906 = vst.msk [vmem:[#allocation2 + $0x70] sm:$0xff] %vm21_vm0, %v889_v60  ;;  %v823_v1 = vpop.f32.mrf.mxu3 }
 0x13f   :  { %v992_v18 = vadd.f32 %v1475_v59, %v944_v63  ;;  %v824_v2 = vadd.f32 %v823_v1, %v775_v0 }
 0x141   :  { %v1008_v4 = vmax.f32 %v992_v18, 0.0  ;;  %v873_v5 = vadd.f32 %v872_v47, %v824_v2 }
 0x143   :  { %v1024_v7 = vpack.c.bf16 %v1008_v4, %v1008_v4  ;;  %v890_v8 = vadd.f32 %v873_v5, %v53_v3 }
 0x145   :  { %1041 = vst.msk [vmem:[%s2080_s4 + $0x34] sm:$0xf] %vm1027_vm1, %v1024_v7  ;;  %v925_v10 = vld [vmem:[#allocation2 + $0x70] sm:$0xff] }
 0x146   :  { %v945_v11 = vadd.f32 %v1946_v6, %v925_v10  ;;  %907 = vst.msk [vmem:[#allocation2 + $0x78] sm:$0xff] %vm21_vm0, %v890_v8 }
 0x148   :  { %v993_v12 = vadd.f32 %v1478_v9, %v945_v11 }
 0x14a   :  { %v1009_v22 = vmax.f32 %v993_v12, 0.0 }
 0x14c   :  { %v1025_v13 = vpack.c.bf16 %v1009_v22, %v1009_v22 }
 0x14d   :  { %v926_v15 = vld [vmem:[#allocation2 + $0x78] sm:$0xff] }
 0x14e   :  { %1042 = vst.msk [vmem:[%s2080_s4 + $0x38] sm:$0xf] %vm1027_vm1, %v1025_v13  ;;  %v946_v16 = vadd.f32 %v1946_v6, %v926_v15 }
 0x150   :  { %v994_v25 = vadd.f32 %v1479_v14, %v946_v16 }
 0x152   :  { %v1010_v17 = vmax.f32 %v994_v25, 0.0 }
 0x154   :  { %v1026_v24 = vpack.c.bf16 %v1010_v17, %v1010_v17 }
 0x156   :  { %1043 = vst.msk [vmem:[%s2080_s4 + $0x3c] sm:$0xf] %vm1027_vm1, %v1026_v24 }

// kernel: resnet_forward.16
= control target key start
LH: loop header
LB: loop body
LE: loop exit
PB: predicated region body
PF: predicated region fallthrough
CT: control target
= control target key end

     0   :  { %s289_s1 = inlined_call_operand.vmem [shape: bf16[128,128], index: 1, kind: input, shape index: {}]   ;;  %s290_s2 = inlined_call_operand.vmem [shape: f32[1,128], index: 2, kind: input, shape index: {}]   ;;  %s291_s0 = inlined_call_operand.vmem [shape: bf16[32,128], index: 0, kind: input, shape index: {}]   ;;  %s292_s3 = inlined_call_operand.vmem [shape: bf16[32,128], index: 3, kind: output, shape index: {}]  }
   0x1   :  { %v209_v0 = vld [vmem:[%s289_s1 + $0x38] sm:$0xff]  ;;  %v208_v1 = vld [vmem:[%s289_s1 + $0x30] sm:$0xff]  ;;  %v207_v2 = vld [vmem:[%s289_s1 + $0x28] sm:$0xff] }
   0x2   :  { %106 = vmatpush.bf16.msra.mxu0 %v209_v0  ;;  %221 = vmatpush.bf16.msra.mxu1 %v209_v0  ;;  %v206_v3 = vld [vmem:[%s289_s1 + $0x20] sm:$0xff]  ;;  %v205_v4 = vld [vmem:[%s289_s1 + $0x18] sm:$0xff]  ;;  %v204_v5 = vld [vmem:[%s289_s1 + $0x10] sm:$0xff] }
   0x3   :  { %v203_v6 = vld [vmem:[%s289_s1 + $0x8] sm:$0xff]  ;;  %v202_v7 = vld [vmem:[%s289_s1] sm:$0xff] }
   0x4   :  { %v200_v8 = vld [vmem:[%s291_s0] sm:$0xff]  ;;  %v201_v9 = vld [vmem:[%s291_s0 + $0x8] sm:$0xff] }
   0x5   :  { %v229_v12 = vld [vmem:[%s290_s2] ss:$0 sm:$0xff] }
   0x6   :  { %107 = vmatpush.bf16.msra.mxu0 %v208_v1  ;;  %222 = vmatpush.bf16.msra.mxu1 %v208_v1 }
   0xa   :  { %108 = vmatpush.bf16.msra.mxu0 %v207_v2  ;;  %223 = vmatpush.bf16.msra.mxu1 %v207_v2 }
   0xe   :  { %109 = vmatpush.bf16.msra.mxu0 %v206_v3  ;;  %224 = vmatpush.bf16.msra.mxu1 %v206_v3 }
  0x12   :  { %110 = vmatpush.bf16.msra.mxu0 %v205_v4  ;;  %225 = vmatpush.bf16.msra.mxu1 %v205_v4 }
  0x16   :  { %111 = vmatpush.bf16.msra.mxu0 %v204_v5  ;;  %226 = vmatpush.bf16.msra.mxu1 %v204_v5 }
  0x1a   :  { %112 = vmatpush.bf16.msra.mxu0 %v203_v6  ;;  %227 = vmatpush.bf16.msra.mxu1 %v203_v6 }
  0x1e   :  { %113 = vmatpush.bf16.msra.mxu0 %v202_v7  ;;  %228 = vmatpush.bf16.msra.mxu1 %v202_v7 }
  0x21   :  { %114 = vmatmul.bf16.vlgmr.msra.gmra.mxu0 %v200_v8  ;;  %119 = vmatmul.bf16.vlgmr.msra.gmra.mxu1 %v201_v9 }
  0x9e   :  { %v115_v10 = vpop.f32.mrf.mxu0  ;;  %v120_v11 = vpop.f32.mrf.mxu1 }
  0x9f   :  { %v144_v15 = vadd.f32 %v229_v12, %v115_v10  ;;  %v146_v16 = vadd.f32 %v229_v12, %v120_v11 }
  0xa6   :  { %v117_v13 = vpop.f32.mrf.mxu0  ;;  %v122_v14 = vpop.f32.mrf.mxu1 }
  0xa7   :  { %v145_v17 = vadd.f32 %v229_v12, %v117_v13  ;;  %v147_v18 = vadd.f32 %v229_v12, %v122_v14 }
  0xa9   :  { %v213_v19 = vpack.c.bf16 %v145_v17, %v144_v15  ;;  %v218_v20 = vpack.c.bf16 %v147_v18, %v146_v16 }
  0xab   :  { %214 = vst [vmem:[%s292_s3] sm:$0xff] %v213_v19  }
  0xac   :  { %220 = vst [vmem:[%s292_s3 + $0x8] sm:$0xff] %v218_v20  }

// kernel: resnet_forward.15
= control target key start
LH: loop header
LB: loop body
LE: loop exit
PB: predicated region body
PF: predicated region fallthrough
CT: control target
= control target key end

     0   :  { %s1023_s1 = inlined_call_operand.vmem [shape: bf16[640,128], index: 1, kind: input, shape index: {}]   ;;  %s1024_s0 = inlined_call_operand.vmem [shape: bf16[32,640], index: 0, kind: input, shape index: {}]   ;;  %s1025_s2 = inlined_call_operand.vmem [shape: f32[1,128], index: 2, kind: input, shape index: {}]   ;;  %s1026_s3 = inlined_call_operand.vmem [shape: bf16[32,128], index: 3, kind: output, shape index: {}]  }
   0x1   :  { %v761_v0 = vld [vmem:[%s1023_s1 + $0x38] sm:$0xff]  ;;  %v760_v4 = vld [vmem:[%s1023_s1 + $0x30] sm:$0xff]  ;;  %v759_v8 = vld [vmem:[%s1023_s1 + $0x28] sm:$0xff] }
   0x2   :  { %v769_v1 = vld [vmem:[%s1023_s1 + $0x78] sm:$0xff]  ;;  %410 = vmatpush.bf16.msra.mxu0 %v761_v0  ;;  %v768_v5 = vld [vmem:[%s1023_s1 + $0x70] sm:$0xff]  ;;  %v767_v9 = vld [vmem:[%s1023_s1 + $0x68] sm:$0xff] }
   0x3   :  { %v777_v2 = vld [vmem:[%s1023_s1 + $0xb8] sm:$0xff]  ;;  %429 = vmatpush.bf16.msra.mxu1 %v769_v1  ;;  %v776_v6 = vld [vmem:[%s1023_s1 + $0xb0] sm:$0xff]  ;;  %v775_v10 = vld [vmem:[%s1023_s1 + $0xa8] sm:$0xff] }
   0x4   :  { %v785_v3 = vld [vmem:[%s1023_s1 + $0xf8] sm:$0xff]  ;;  %448 = vmatpush.bf16.msra.mxu2 %v777_v2  ;;  %v784_v7 = vld [vmem:[%s1023_s1 + $0xf0] sm:$0xff]  ;;  %v783_v11 = vld [vmem:[%s1023_s1 + $0xe8] sm:$0xff] }
   0x5   :  { %467 = vmatpush.bf16.msra.mxu3 %v785_v3  ;;  %v758_v12 = vld [vmem:[%s1023_s1 + $0x20] sm:$0xff]  ;;  %v757_v16 = vld [vmem:[%s1023_s1 + $0x18] sm:$0xff]  ;;  %v756_v20 = vld [vmem:[%s1023_s1 + $0x10] sm:$0xff] }
   0x6   :  { %411 = vmatpush.bf16.msra.mxu0 %v760_v4  ;;  %v766_v13 = vld [vmem:[%s1023_s1 + $0x60] sm:$0xff]  ;;  %v765_v17 = vld [vmem:[%s1023_s1 + $0x58] sm:$0xff]  ;;  %v764_v21 = vld [vmem:[%s1023_s1 + $0x50] sm:$0xff] }
   0x7   :  { %430 = vmatpush.bf16.msra.mxu1 %v768_v5  ;;  %v774_v14 = vld [vmem:[%s1023_s1 + $0xa0] sm:$0xff]  ;;  %v773_v18 = vld [vmem:[%s1023_s1 + $0x98] sm:$0xff]  ;;  %v772_v22 = vld [vmem:[%s1023_s1 + $0x90] sm:$0xff] }
   0x8   :  { %449 = vmatpush.bf16.msra.mxu2 %v776_v6  ;;  %v782_v15 = vld [vmem:[%s1023_s1 + $0xe0] sm:$0xff]  ;;  %v781_v19 = vld [vmem:[%s1023_s1 + $0xd8] sm:$0xff]  ;;  %v780_v23 = vld [vmem:[%s1023_s1 + $0xd0] sm:$0xff] }
   0x9   :  { %468 = vmatpush.bf16.msra.mxu3 %v784_v7  ;;  %v755_v24 = vld [vmem:[%s1023_s1 + $0x8] sm:$0xff]  ;;  %v754_v28 = vld [vmem:[%s1023_s1] sm:$0xff]  ;;  %v746_v33 = vld [vmem:[%s1024_s0 + $0x10] sm:$0xf0] }
   0xa   :  { %412 = vmatpush.bf16.msra.mxu0 %v759_v8  ;;  %v763_v25 = vld [vmem:[%s1023_s1 + $0x48] sm:$0xff]  ;;  %v762_v29 = vld [vmem:[%s1023_s1 + $0x40] sm:$0xff]  ;;  %v548_v35 = vld [vmem:[%s1024_s0 + $0x14] sm:$0xf0] }
   0xb   :  { %431 = vmatpush.bf16.msra.mxu1 %v767_v9  ;;  %v771_v26 = vld [vmem:[%s1023_s1 + $0x88] sm:$0xff]  ;;  %v770_v30 = vld [vmem:[%s1023_s1 + $0x80] sm:$0xff]  ;;  %v747_v37 = vld [vmem:[%s1024_s0 + $0x18] sm:$0xf0] }
   0xc   :  { %450 = vmatpush.bf16.msra.mxu2 %v775_v10  ;;  %v779_v27 = vld [vmem:[%s1023_s1 + $0xc8] sm:$0xff]  ;;  %v778_v31 = vld [vmem:[%s1023_s1 + $0xc0] sm:$0xff]  ;;  %v793_v40 = vld [vmem:[%s1023_s1 + $0x138] sm:$0xff] }
   0xd   :  { %469 = vmatpush.bf16.msra.mxu3 %v783_v11  ;;  %v546_v32 = vld [vmem:[%s1024_s0] sm:$0xf]  ;;  %v744_v34 = vld [vmem:[%s1024_s0 + $0x4] sm:$0xf]  ;;  %v554_v36 = vld [vmem:[%s1024_s0 + $0x8] sm:$0xf] }
   0xe   :  { %413 = vmatpush.bf16.msra.mxu0 %v758_v12  ;;  %v745_v38 = vld [vmem:[%s1024_s0 + $0xc] sm:$0xf]  ;;  %v556_v39 = vld [vmem:[%s1024_s0 + $0x1c] sm:$0xf0]  ;;  %v547_v41 = vor.u32 %v746_v33, %v546_v32  ;;  %v551_v42 = vor.u32 %v744_v34, %v548_v35  ;;  %v555_v43 = vor.u32 %v747_v37, %v554_v36  ;;  %v792_v45 = vld [vmem:[%s1023_s1 + $0x130] sm:$0xff] }
   0xf   :  { %432 = vmatpush.bf16.msra.mxu1 %v766_v13  ;;  %v559_v44 = vor.u32 %v745_v38, %v556_v39  ;;  %v791_v46 = vld [vmem:[%s1023_s1 + $0x128] sm:$0xff]  ;;  %v790_v47 = vld [vmem:[%s1023_s1 + $0x120] sm:$0xff]  ;;  %v751_v49 = vld [vmem:[%s1024_s0 + $0x38] sm:$0xf0] }
  0x10   :  { %451 = vmatpush.bf16.msra.mxu2 %v774_v14  ;;  %v566_v48 = vld [vmem:[%s1024_s0 + $0x28] sm:$0xf]  ;;  %v749_v50 = vld [vmem:[%s1024_s0 + $0x2c] sm:$0xf]  ;;  %v568_v51 = vld [vmem:[%s1024_s0 + $0x3c] sm:$0xf0] }
  0x11   :  { %470 = vmatpush.bf16.msra.mxu3 %v782_v15  ;;  %v574_v52 = vld [vmem:[%s1024_s0 + $0x30] sm:$0xf]  ;;  %v752_v53 = vld [vmem:[%s1024_s0 + $0x40] sm:$0xf0]  ;;  %v750_v54 = vld [vmem:[%s1024_s0 + $0x34] sm:$0xf]  ;;  %v567_v57 = vor.u32 %v751_v49, %v566_v48  ;;  %v571_v58 = vor.u32 %v749_v50, %v568_v51 }
  0x12   :  { %414 = vmatpush.bf16.msra.mxu0 %v757_v16  ;;  %v576_v55 = vld [vmem:[%s1024_s0 + $0x44] sm:$0xf0]  ;;  %v789_v56 = vld [vmem:[%s1023_s1 + $0x118] sm:$0xff]  ;;  %v575_v59 = vor.u32 %v752_v53, %v574_v52  ;;  %v788_v61 = vld [vmem:[%s1023_s1 + $0x110] sm:$0xff] }
  0x13   :  { %433 = vmatpush.bf16.msra.mxu1 %v765_v17  ;;  %v579_v60 = vor.u32 %v750_v54, %v576_v55  ;;  %v787_v62 = vld [vmem:[%s1023_s1 + $0x108] sm:$0xff]  ;;  %v786_v63 = vld [vmem:[%s1023_s1 + $0x100] sm:$0xff]  ;;  %v562_v0 = vld [vmem:[%s1024_s0 + $0x10] sm:$0xf] }
  0x14   :  { %452 = vmatpush.bf16.msra.mxu2 %v773_v18  ;;  %v748_v1 = vld [vmem:[%s1024_s0 + $0x20] sm:$0xf0]  ;;  %v582_v2 = vld [vmem:[%s1024_s0 + $0x38] sm:$0xf]  ;;  %v753_v3 = vld [vmem:[%s1024_s0 + $0x48] sm:$0xf0] }
  0x15   :  { %471 = vmatpush.bf16.msra.mxu3 %v781_v19  ;;  %v563_v4 = vor.u32 %v748_v1, %v562_v0  ;;  %v583_v5 = vor.u32 %v753_v3, %v582_v2  ;;  %v813_v34 = vld [vmem:[%s1025_s2] ss:$0 sm:$0xff] }
  0x16   :  { %415 = vmatpush.bf16.msra.mxu0 %v756_v20 }
  0x17   :  { %434 = vmatpush.bf16.msra.mxu1 %v764_v21 }
  0x18   :  { %453 = vmatpush.bf16.msra.mxu2 %v772_v22 }
  0x19   :  { %472 = vmatpush.bf16.msra.mxu3 %v780_v23 }
  0x1a   :  { %416 = vmatpush.bf16.msra.mxu0 %v755_v24 }
  0x1b   :  { %435 = vmatpush.bf16.msra.mxu1 %v763_v25 }
  0x1c   :  { %454 = vmatpush.bf16.msra.mxu2 %v771_v26 }
  0x1d   :  { %473 = vmatpush.bf16.msra.mxu3 %v779_v27 }
  0x1e   :  { %417 = vmatpush.bf16.msra.mxu0 %v754_v28 }
  0x1f   :  { %436 = vmatpush.bf16.msra.mxu1 %v762_v29 }
  0x20   :  { %455 = vmatpush.bf16.msra.mxu2 %v770_v30 }
  0x21   :  { %474 = vmatpush.bf16.msra.mxu3 %v778_v31  ;;  %418 = vmatmul.bf16.vlgmr.msra.gmra.mxu0 %v547_v41 }
  0x22   :  { %486 = vmatpush.bf16.msrb.mxu0 %v793_v40  ;;  %437 = vmatmul.bf16.vlgmr.msra.gmra.mxu1 %v551_v42 }
  0x23   :  { %805 = vmatpush.bf16.msrb.mxu1 %v793_v40  ;;  %456 = vmatmul.bf16.vlgmr.msra.gmra.mxu2 %v555_v43 }
  0x24   :  { %475 = vmatmul.bf16.vlgmr.msra.gmra.mxu3 %v559_v44 }
  0x26   :  { %487 = vmatpush.bf16.msrb.mxu0 %v792_v45 }
  0x27   :  { %806 = vmatpush.bf16.msrb.mxu1 %v792_v45 }
  0x2a   :  { %488 = vmatpush.bf16.msrb.mxu0 %v791_v46 }
  0x2b   :  { %807 = vmatpush.bf16.msrb.mxu1 %v791_v46 }
  0x2e   :  { %489 = vmatpush.bf16.msrb.mxu0 %v790_v47 }
  0x2f   :  { %808 = vmatpush.bf16.msrb.mxu1 %v790_v47 }
  0x31   :  { %423 = vmatmul.bf16.gmra.mxu0 %v567_v57 }
  0x32   :  { %490 = vmatpush.bf16.msrb.mxu0 %v789_v56  ;;  %442 = vmatmul.bf16.gmra.mxu1 %v571_v58 }
  0x33   :  { %809 = vmatpush.bf16.msrb.mxu1 %v789_v56  ;;  %461 = vmatmul.bf16.gmra.mxu2 %v575_v59 }
  0x34   :  { %480 = vmatmul.bf16.gmra.mxu3 %v579_v60 }
  0x36   :  { %491 = vmatpush.bf16.msrb.mxu0 %v788_v61 }
  0x37   :  { %810 = vmatpush.bf16.msrb.mxu1 %v788_v61 }
  0x3a   :  { %492 = vmatpush.bf16.msrb.mxu0 %v787_v62 }
  0x3b   :  { %811 = vmatpush.bf16.msrb.mxu1 %v787_v62 }
  0x3e   :  { %493 = vmatpush.bf16.msrb.mxu0 %v786_v63 }
  0x3f   :  { %812 = vmatpush.bf16.msrb.mxu1 %v786_v63 }
  0x41   :  { %494 = vmatmul.bf16.vlgmr.msrb.gmra.mxu0 %v563_v4 }
  0x42   :  { %499 = vmatmul.bf16.vlgmr.msrb.gmra.mxu1 %v583_v5 }
  0x9e   :  { %v419_v6 = vpop.f32.mrf.mxu0 }
  0x9f   :  { %v438_v7 = vpop.f32.mrf.mxu1 }
  0xa0   :  { %v439_v20 = vadd.f32 %v438_v7, %v419_v6 }
  0xa6   :  { %v457_v8 = vpop.f32.mrf.mxu2  ;;  %v421_v10 = vpop.f32.mrf.mxu0 }
  0xa7   :  { %v476_v9 = vpop.f32.mrf.mxu3  ;;  %v440_v11 = vpop.f32.mrf.mxu1  ;;  %v458_v22 = vadd.f32 %v457_v8, %v439_v20 }
  0xa8   :  { %v441_v27 = vadd.f32 %v440_v11, %v421_v10 }
  0xa9   :  { %v477_v29 = vadd.f32 %v476_v9, %v458_v22 }
  0xae   :  { %v459_v12 = vpop.f32.mrf.mxu2  ;;  %v424_v13 = vpop.f32.mrf.mxu0 }
  0xaf   :  { %v443_v14 = vpop.f32.mrf.mxu1  ;;  %v478_v15 = vpop.f32.mrf.mxu3  ;;  %v460_v30 = vadd.f32 %v459_v12, %v441_v27 }
  0xb0   :  { %v444_v21 = vadd.f32 %v443_v14, %v424_v13 }
  0xb1   :  { %v479_v37 = vadd.f32 %v478_v15, %v460_v30 }
  0xb6   :  { %v462_v16 = vpop.f32.mrf.mxu2  ;;  %v426_v17 = vpop.f32.mrf.mxu0 }
  0xb7   :  { %v445_v18 = vpop.f32.mrf.mxu1  ;;  %v481_v19 = vpop.f32.mrf.mxu3  ;;  %v463_v23 = vadd.f32 %v462_v16, %v444_v21 }
  0xb8   :  { %v446_v28 = vadd.f32 %v445_v18, %v426_v17 }
  0xb9   :  { %v482_v31 = vadd.f32 %v481_v19, %v463_v23 }
  0xbe   :  { %v464_v24 = vpop.f32.mrf.mxu2  ;;  %v495_v25 = vpop.f32.mrf.mxu0 }
  0xbf   :  { %v500_v26 = vpop.f32.mrf.mxu1  ;;  %v465_v32 = vadd.f32 %v464_v24, %v446_v28  ;;  %v496_v33 = vadd.f32 %v495_v25, %v477_v29  ;;  %v483_v36 = vpop.f32.mrf.mxu3 }
  0xc0   :  { %v501_v35 = vadd.f32 %v500_v26, %v482_v31 }
  0xc1   :  { %v484_v38 = vadd.f32 %v483_v36, %v465_v32  ;;  %v524_v41 = vadd.f32 %v813_v34, %v496_v33 }
  0xc2   :  { %v526_v42 = vadd.f32 %v813_v34, %v501_v35 }
  0xc3   :  { %v528_v47 = vmax.f32 %v524_v41, 0.0 }
  0xc4   :  { %v530_v48 = vmax.f32 %v526_v42, 0.0 }
  0xc6   :  { %v497_v39 = vpop.f32.mrf.mxu0 }
  0xc7   :  { %v502_v40 = vpop.f32.mrf.mxu1  ;;  %v498_v43 = vadd.f32 %v497_v39, %v479_v37 }
  0xc8   :  { %v503_v44 = vadd.f32 %v502_v40, %v484_v38 }
  0xc9   :  { %v525_v45 = vadd.f32 %v813_v34, %v498_v43 }
  0xca   :  { %v527_v46 = vadd.f32 %v813_v34, %v503_v44 }
  0xcb   :  { %v529_v49 = vmax.f32 %v525_v45, 0.0 }
  0xcc   :  { %v531_v50 = vmax.f32 %v527_v46, 0.0 }
  0xcd   :  { %v797_v51 = vpack.c.bf16 %v529_v49, %v528_v47 }
  0xce   :  { %v802_v52 = vpack.c.bf16 %v531_v50, %v530_v48 }
  0xcf   :  { %798 = vst [vmem:[%s1026_s3] sm:$0xff] %v797_v51  }
  0xd0   :  { %804 = vst [vmem:[%s1026_s3 + $0x8] sm:$0xff] %v802_v52  }

// kernel: resnet_forward.17
= control target key start
LH: loop header
LB: loop body
LE: loop exit
PB: predicated region body
PF: predicated region fallthrough
CT: control target
= control target key end

     0   :  { %s1150_s15 = smov 0   ;;  %s1152_s16 = smov 0   ;;  %s1272_s0 = inlined_call_operand.vmem [shape: bf16[32,1152], index: 0, kind: input, shape index: {}]   ;;  %s1273_s1 = inlined_call_operand.vmem [shape: bf16[1152,128], index: 1, kind: input, shape index: {}]   ;;  %s1274_s2 = inlined_call_operand.vmem [shape: f32[1,128], index: 2, kind: input, shape index: {}]   ;;  %s1275_s3 = inlined_call_operand.vmem [shape: bf16[32,128], index: 3, kind: input, shape index: {}]   ;;  %s1276_s4 = inlined_call_operand.vmem [shape: bf16[32,128], index: 4, kind: output, shape index: {}]  }
   0x1   :  { %s1154_s17 = smov 0   ;;  %s1156_s18 = smov 0  }
   0x2   :  { %s1158_s19 = smov 0  }
   0x3 LB: > { %s26_s20 = sadd.s32 1, %s1118_s18  ;;  %p49_p1 = scmp.ne.s32.totalorder %s1110_s16, %s1106_s15  ;;  %s1122_s19 = sphi %s1158_s19, %s14_s19   ;;  %s1118_s18 = sphi %s1156_s18, %s1280_s18   ;;  %s1114_s17 = sphi %s1154_s17, %s1279_s17   ;;  %s1110_s16 = sphi %s1152_s16, %s1278_s16   ;;  %s1106_s15 = sphi %s1150_s15, %s1277_s15  }
   0x4   : > { %p27_p0 = scmp.ge.s32.totalorder %s26_s20, 3  ;;  %p50_p2 = scmp.eq.s32.totalorder %s1122_s19, 0 }
   0x5   : > { %s42_s22 = sadd.s32 1, %s1110_s16  ;;  %p843_p5 = scmp.ge.s32.totalorder %s1122_s19, 3 }
   0x6   : > { %s1282_s20 = smov (%p27_p0, %s26_s20), 0  ;;  %p51_p3 = por %p50_p2, %p49_p1 }
   0x7   : > { %s38_s21 = ssub.s32 %s1118_s18, %s1282_s20  ;;  %203 = sbr.rel (%p843_p5) target bundleno = 25 (0x19), region = 24 }
   0x8   : > { %p40_p4 = scmp.eq.s32.totalorder %s38_s21, 0 }
   0xa   : > { %s1185_s23 = scalar_select %p40_p4, %s1110_s16, %s42_s22  }
   0xc   : > { %206 = sbr.rel (!%p51_p3) target bundleno = 25 (0x19), region = 28  ;;  %s208_s24 = sand.u32 (%p51_p3), 1, %s1110_s16  }
   0xd   : > { %s981_s25 = smul.u32 (%p51_p3), 12, %s1118_s18 }
   0xe   : > { %s1040_s26 = smul.u32 (%p51_p3), 48, %s208_s24 }
   0xf   : > { %s216_s29 = scalar_lea.vmem (%p51_p3), %s1272_s0, %s981_s25 }
  0x10   : > { %v231_v0 = vld [vmem:[%s216_s29] sm:$0xff] (%p51_p3)  ;;  %v235_v2 = vld [vmem:[%s216_s29 + $0x48] sm:$0xff] (%p51_p3)  ;;  %s210_s30 = scalar_lea.vmem (%p51_p3), [#allocation3], %s1040_s26  ;;  %v849_v6 = vld [vmem:[%s216_s29 + $0x50] sm:$0xf] (%p51_p3) }
  0x11   : > { %v233_v1 = vld [vmem:[%s216_s29 + $0x24] sm:$0xff]  ;;  %232 = vst [vmem:[%s210_s30] sm:$0xff] %v231_v0  ;;  %v237_v3 = vld [vmem:[%s216_s29 + $0x6c] sm:$0xff]  ;;  %v851_v7 = vld [vmem:[%s216_s29 + $0x74] sm:$0xf] }
  0x12   : > { %234 = vst [vmem:[%s210_s30 + $0xc] sm:$0xff] %v233_v1  ;;  %v845_v4 = vld [vmem:[%s216_s29 + $0x8] sm:$0xf]  ;;  %v847_v5 = vld [vmem:[%s216_s29 + $0x2c] sm:$0xf] }
  0x13   : > { %236 = vst [vmem:[%s210_s30 + $0x18] sm:$0xff] %v235_v2 }
  0x14   : > { %238 = vst [vmem:[%s210_s30 + $0x24] sm:$0xff] %v237_v3 }
  0x15   : > { %846 = vst [vmem:[%s210_s30 + $0x8] sm:$0xf] %v845_v4 }
  0x16   : > { %848 = vst [vmem:[%s210_s30 + $0x14] sm:$0xf] %v847_v5 }
  0x17   : > { %850 = vst [vmem:[%s210_s30 + $0x20] sm:$0xf] %v849_v6 }
  0x18   : > { %852 = vst [vmem:[%s210_s30 + $0x2c] sm:$0xf] %v851_v7 }
  0x19 PF: > { %p853_p6 = scmp.ge.s32.totalorder %s1122_s19, 1  ;;  %p271_p7 = scmp.lt.s32.totalorder %s1122_s19, 4 }
  0x1b   : > { %p272_p8 = pnand %p853_p6, %p271_p7 }
  0x1c   : > { %s278_s5 = sand.u32 (!%p272_p8), 1, %s1106_s15   ;;  %s327_s6 = smul.u32 (!%p272_p8), 48, %s1114_s17 }
  0x1d   : > { %275 = sbr.rel (%p272_p8) target bundleno = 255 (0xff), region = 58  ;;  %p855_p10 = scmp.ne.s32.totalorder (!%p272_p8), %s1114_s17, 0 }
  0x1e   : > { %s1041_s7 = smul.u32 (!%p272_p8), 48, %s278_s5  ;;  %p328_p9 = scmp.lt.s32.totalorder (!%p272_p8), %s327_s6, 143 }
  0x20   : > { %s1202_s12 = scalar_lea.vmem (!%p272_p8), [#allocation3], %s1041_s7 }
  0x22   : > { %s1284_s6 = smov (!%p328_p9, %s327_s6), 143  ;;  %360 = sbr.rel (%p855_p10) target bundleno = 44 (0x2c), region = 66 }
  0x23   : > { %s854_s8 = sshll.u32 %s1284_s6, 2 }
  0x24   : > { %s1200_s11 = scalar_lea.vmem %s1273_s1, %s854_s8 }
  0x27   : > { %v1124_v8 = vmov 0.0  }
  0x28   : > { %361 = vst [vmem:[#allocation2 + $0x10] sm:$0xff] %v1124_v8 }
  0x29   : > { %362 = vst [vmem:[#allocation2] sm:$0xff] %v1124_v8 }
  0x2a   : > { %363 = vst [vmem:[#allocation2 + $0x18] sm:$0xff] %v1124_v8 }
  0x2b   : > { %364 = vst [vmem:[#allocation2 + $0x8] sm:$0xff] %v1124_v8 }
  0x2c PF: > { %v995_v9 = vld [vmem:[%s1200_s11 + $0x38] sm:$0xff]  ;;  %v994_v12 = vld [vmem:[%s1200_s11 + $0x30] sm:$0xff]  ;;  %v993_v15 = vld [vmem:[%s1200_s11 + $0x28] sm:$0xff]  ;;  %p976_p11 = scmp.ne.s32.totalorder %s1114_s17, 2 }
  0x2d   : > { %v1003_v10 = vld [vmem:[%s1200_s11 + $0x78] sm:$0xff]  ;;  %601 = vmatpush.bf16.msra.mxu0 %v995_v9  ;;  %v1002_v13 = vld [vmem:[%s1200_s11 + $0x70] sm:$0xff]  ;;  %1032 = vmatpush.bf16.msra.mxu3 %v995_v9  ;;  %v1001_v16 = vld [vmem:[%s1200_s11 + $0x68] sm:$0xff] }
  0x2e   : > { %v1011_v11 = vld [vmem:[%s1200_s11 + $0xb8] sm:$0xff]  ;;  %620 = vmatpush.bf16.msra.mxu1 %v1003_v10  ;;  %v1010_v14 = vld [vmem:[%s1200_s11 + $0xb0] sm:$0xff]  ;;  %v1009_v17 = vld [vmem:[%s1200_s11 + $0xa8] sm:$0xff] }
  0x2f   : > { %639 = vmatpush.bf16.msra.mxu2 %v1011_v11  ;;  %v992_v18 = vld [vmem:[%s1200_s11 + $0x20] sm:$0xff]  ;;  %v991_v21 = vld [vmem:[%s1200_s11 + $0x18] sm:$0xff]  ;;  %v990_v24 = vld [vmem:[%s1200_s11 + $0x10] sm:$0xff] }
  0x30   : > { %v1000_v19 = vld [vmem:[%s1200_s11 + $0x60] sm:$0xff]  ;;  %v999_v22 = vld [vmem:[%s1200_s11 + $0x58] sm:$0xff]  ;;  %v998_v25 = vld [vmem:[%s1200_s11 + $0x50] sm:$0xff] }
  0x31   : > { %602 = vmatpush.bf16.msra.mxu0 %v994_v12  ;;  %1033 = vmatpush.bf16.msra.mxu3 %v994_v12  ;;  %v1008_v20 = vld [vmem:[%s1200_s11 + $0xa0] sm:$0xff]  ;;  %v1007_v23 = vld [vmem:[%s1200_s11 + $0x98] sm:$0xff]  ;;  %v1006_v26 = vld [vmem:[%s1200_s11 + $0x90] sm:$0xff] }
  0x32   : > { %621 = vmatpush.bf16.msra.mxu1 %v1002_v13  ;;  %v989_v27 = vld [vmem:[%s1200_s11 + $0x8] sm:$0xff]  ;;  %v988_v30 = vld [vmem:[%s1200_s11] sm:$0xff]  ;;  %v365_v54 = vld [vmem:[#allocation2 + $0x10] sm:$0xff] }
  0x33   : > { %640 = vmatpush.bf16.msra.mxu2 %v1010_v14  ;;  %v997_v28 = vld [vmem:[%s1200_s11 + $0x48] sm:$0xff]  ;;  %v996_v31 = vld [vmem:[%s1200_s11 + $0x40] sm:$0xff]  ;;  %v367_v4 = vld [vmem:[#allocation2 + $0x18] sm:$0xff] }
  0x34   : > { %v1005_v29 = vld [vmem:[%s1200_s11 + $0x88] sm:$0xff]  ;;  %v1004_v32 = vld [vmem:[%s1200_s11 + $0x80] sm:$0xff] }
  0x35   : > { %603 = vmatpush.bf16.msra.mxu0 %v993_v15  ;;  %1034 = vmatpush.bf16.msra.mxu3 %v993_v15  ;;  %v858_v33 = vld [vmem:[%s1202_s12] sm:$0xf]  ;;  %v983_v34 = vld [vmem:[%s1202_s12 + $0x8] sm:$0xf0]  ;;  %v982_v35 = vld [vmem:[%s1202_s12 + $0x4] sm:$0xf] }
  0x36   : > { %622 = vmatpush.bf16.msra.mxu1 %v1001_v16  ;;  %v860_v36 = vld [vmem:[%s1202_s12 + $0xc] sm:$0xf0]  ;;  %v866_v37 = vld [vmem:[%s1202_s12 + $0x8] sm:$0xf]  ;;  %v984_v38 = vld [vmem:[%s1202_s12 + $0x10] sm:$0xf0]  ;;  %v859_v41 = vor.u32 %v983_v34, %v858_v33 }
  0x37   : > { %641 = vmatpush.bf16.msra.mxu2 %v1009_v17  ;;  %v870_v39 = vld [vmem:[%s1202_s12 + $0x18] sm:$0xf]  ;;  %v986_v40 = vld [vmem:[%s1202_s12 + $0x20] sm:$0xf0]  ;;  %v863_v42 = vor.u32 %v982_v35, %v860_v36  ;;  %v867_v43 = vor.u32 %v984_v38, %v866_v37  ;;  %v985_v45 = vld [vmem:[%s1202_s12 + $0x1c] sm:$0xf] }
  0x38   : > { %v871_v44 = vor.u32 %v986_v40, %v870_v39  ;;  %v872_v46 = vld [vmem:[%s1202_s12 + $0x24] sm:$0xf0]  ;;  %v878_v47 = vld [vmem:[%s1202_s12 + $0x20] sm:$0xf]  ;;  %v987_v48 = vld [vmem:[%s1202_s12 + $0x28] sm:$0xf0] }
  0x39   : > { %604 = vmatpush.bf16.msra.mxu0 %v992_v18  ;;  %1035 = vmatpush.bf16.msra.mxu3 %v992_v18  ;;  %v875_v49 = vor.u32 %v985_v45, %v872_v46  ;;  %v879_v50 = vor.u32 %v987_v48, %v878_v47  ;;  %v366_v61 = vld [vmem:[#allocation2] sm:$0xff]  ;;  %v368_v11 = vld [vmem:[#allocation2 + $0x8] sm:$0xff] }
  0x3a   : > { %623 = vmatpush.bf16.msra.mxu1 %v1000_v19 }
  0x3b   : > { %642 = vmatpush.bf16.msra.mxu2 %v1008_v20 }
  0x3d   : > { %605 = vmatpush.bf16.msra.mxu0 %v991_v21  ;;  %1036 = vmatpush.bf16.msra.mxu3 %v991_v21 }
  0x3e   : > { %624 = vmatpush.bf16.msra.mxu1 %v999_v22 }
  0x3f   : > { %643 = vmatpush.bf16.msra.mxu2 %v1007_v23 }
  0x41   : > { %606 = vmatpush.bf16.msra.mxu0 %v990_v24  ;;  %1037 = vmatpush.bf16.msra.mxu3 %v990_v24 }
  0x42   : > { %625 = vmatpush.bf16.msra.mxu1 %v998_v25 }
  0x43   : > { %644 = vmatpush.bf16.msra.mxu2 %v1006_v26 }
  0x45   : > { %607 = vmatpush.bf16.msra.mxu0 %v989_v27  ;;  %1038 = vmatpush.bf16.msra.mxu3 %v989_v27 }
  0x46   : > { %626 = vmatpush.bf16.msra.mxu1 %v997_v28 }
  0x47   : > { %645 = vmatpush.bf16.msra.mxu2 %v1005_v29 }
  0x49   : > { %608 = vmatpush.bf16.msra.mxu0 %v988_v30  ;;  %1039 = vmatpush.bf16.msra.mxu3 %v988_v30 }
  0x4a   : > { %627 = vmatpush.bf16.msra.mxu1 %v996_v31 }
  0x4b   : > { %646 = vmatpush.bf16.msra.mxu2 %v1004_v32 }
  0x4c   : > { %609 = vmatmul.bf16.vlgmr.msra.gmra.mxu0 %v859_v41  ;;  %614 = vmatmul.bf16.vlgmr.msra.gmra.mxu3 %v871_v44 }
  0x4d   : > { %628 = vmatmul.bf16.vlgmr.msra.gmra.mxu1 %v863_v42 }
  0x4e   : > { %647 = vmatmul.bf16.vlgmr.msra.gmra.mxu2 %v867_v43 }
  0x5d   : > { %633 = vmatmul.bf16.gmra.mxu1 %v875_v49 }
  0x5e   : > { %652 = vmatmul.bf16.gmra.mxu2 %v879_v50 }
  0xc9   : > { %v610_v52 = vpop.f32.mrf.mxu0 }
  0xca   : > { %v629_v51 = vpop.f32.mrf.mxu1 }
  0xcb   : > { %v630_v53 = vadd.f32 %v629_v51, %v610_v52 }
  0xcf   : > { %v615_v2 = vpop.f32.mrf.mxu3 }
  0xd1   : > { %v648_v55 = vpop.f32.mrf.mxu2  ;;  %v612_v59 = vpop.f32.mrf.mxu0 }
  0xd2   : > { %v649_v56 = vadd.f32 %v648_v55, %v630_v53  ;;  %v631_v57 = vpop.f32.mrf.mxu1 }
  0xd3   : > { %v632_v60 = vadd.f32 %v631_v57, %v612_v59 }
  0xd4   : > { %v658_v58 = vadd.f32 %v649_v56, %v365_v54 }
  0xd6   : > { %662 = vst [vmem:[#allocation2 + $0x10] sm:$0xff] %v658_v58 }
  0xd7   : > { %v617_v9 = vpop.f32.mrf.mxu3 }
  0xd9   : > { %v650_v62 = vpop.f32.mrf.mxu2 }
  0xda   : > { %v651_v63 = vadd.f32 %v650_v62, %v632_v60  ;;  %v634_v0 = vpop.f32.mrf.mxu1 }
  0xdb   : > { %v635_v3 = vadd.f32 %v634_v0, %v615_v2 }
  0xdc   : > { %v659_v1 = vadd.f32 %v651_v63, %v366_v61 }
  0xde   : > { %663 = vst [vmem:[#allocation2] sm:$0xff] %v659_v1 }
  0xe1   : > { %v653_v5 = vpop.f32.mrf.mxu2 }
  0xe2   : > { %v654_v6 = vadd.f32 %v653_v5, %v635_v3  ;;  %v636_v8 = vpop.f32.mrf.mxu1 }
  0xe3   : > { %v637_v10 = vadd.f32 %v636_v8, %v617_v9 }
  0xe4   : > { %v660_v7 = vadd.f32 %v654_v6, %v367_v4 }
  0xe6   : > { %664 = vst [vmem:[#allocation2 + $0x18] sm:$0xff] %v660_v7 }
  0xe9   : > { %v655_v12 = vpop.f32.mrf.mxu2 }
  0xea   : > { %v656_v13 = vadd.f32 %v655_v12, %v637_v10  ;;  %669 = sbr.rel (%p976_p11) target bundleno = 255 (0xff), region = 70 }
  0xec   : > { %v661_v14 = vadd.f32 %v656_v13, %v368_v11 }
  0xee   : > { %665 = vst [vmem:[#allocation2 + $0x8] sm:$0xff] %v661_v14 }
  0xef   : > { %v670_v15 = vld [vmem:[#allocation2 + $0x10] sm:$0xff]  ;;  %v671_v16 = vld [vmem:[#allocation2] sm:$0xff]  ;;  %v672_v19 = vld [vmem:[#allocation2 + $0x18] sm:$0xff] }
  0xf0   : > { %v1083_v17 = vld [vmem:[%s1274_s2] ss:$0 sm:$0xff]  ;;  %v1030_v23 = vld [vmem:[%s1275_s3 + $0x8] sm:$0xff]  }
  0xf1   : > { %v1013_v18 = vld [vmem:[%s1275_s3] sm:$0xff]   ;;  %v678_v24 = vadd.f32 %v1083_v17, %v670_v15  ;;  %v679_v25 = vadd.f32 %v1083_v17, %v671_v16  ;;  %v680_v26 = vadd.f32 %v1083_v17, %v672_v19  ;;  %v1018_v28 = vunpack.c.l.bf16 %v1030_v23 }
  0xf2   : > { %v1014_v20 = vunpack.c.l.bf16 %v1013_v18  ;;  %v1015_v21 = vunpack.c.h.bf16 %v1013_v18  ;;  %v1019_v29 = vunpack.c.h.bf16 %v1030_v23 }
  0xf3   : > { %v692_v32 = vadd.f32 %v1018_v28, %v680_v26 }
  0xf4   : > { %v690_v30 = vadd.f32 %v1014_v20, %v678_v24  ;;  %v691_v31 = vadd.f32 %v1015_v21, %v679_v25 }
  0xf5   : > { %v673_v22 = vld [vmem:[#allocation2 + $0x8] sm:$0xff]  ;;  %v696_v36 = vmax.f32 %v692_v32, 0.0 }
  0xf6   : > { %v681_v27 = vadd.f32 %v1083_v17, %v673_v22  ;;  %v694_v34 = vmax.f32 %v690_v30, 0.0  ;;  %v695_v35 = vmax.f32 %v691_v31, 0.0 }
  0xf8   : > { %v693_v33 = vadd.f32 %v1019_v29, %v681_v27  ;;  %v1023_v38 = vpack.c.bf16 %v695_v35, %v694_v34 }
  0xfa   : > { %v697_v37 = vmax.f32 %v693_v33, 0.0  ;;  %1024 = vst [vmem:[%s1276_s4] sm:$0xff] %v1023_v38  }
  0xfc   : > { %v1028_v39 = vpack.c.bf16 %v697_v37, %v696_v36 }
  0xfe   : > { %1031 = vst [vmem:[%s1276_s4 + $0x8] sm:$0xff] %v1028_v39  }
  0xff PF: > { %s14_s19 = sadd.s32 1, %s1122_s19   ;;  %s1277_s15 = smov %s1110_s16 }
 0x100   : > { %p11_p12 = scmp.ge.s32.totalorder %s14_s19, 5   ;;  %s1278_s16 = smov %s1185_s23 }
 0x101   : > { %s1279_s17 = smov %s1118_s18  ;;  %s1280_s18 = smov %s1282_s20 }
 0x102   :  { %13 = sbr.rel (!%p11_p12) target bundleno = 3 (0x3), region = 120 }

// kernel: resnet_forward.21
= control target key start
LH: loop header
LB: loop body
LE: loop exit
PB: predicated region body
PF: predicated region fallthrough
CT: control target
= control target key end

     0   :  { %s1412_s12 = smov 0   ;;  %s1414_s13 = smov 0   ;;  %s1727_s0 = inlined_call_operand.vmem [shape: bf16[8,2304], index: 0, kind: input, shape index: {}]   ;;  %s1728_s1 = inlined_call_operand.vmem [shape: bf16[2304,512], index: 1, kind: input, shape index: {}]   ;;  %s1729_s2 = inlined_call_operand.vmem [shape: f32[1,512], index: 2, kind: input, shape index: {}]   ;;  %s1730_s3 = inlined_call_operand.vmem [shape: bf16[8,512], index: 3, kind: output, shape index: {}]  }
   0x1   :  { %s1416_s14 = smov 0   ;;  %s1418_s15 = smov 0  }
   0x2   :  { %s1420_s16 = smov 0   ;;  %s1422_s17 = smov 0  }
   0x3   :  { %s1424_s18 = smov 0  }
   0x4 LB: > { %s25_s19 = sadd.s32 1, %s1381_s16  ;;  %s28_s20 = sadd.s32 1, %s1385_s17  ;;  %s1389_s18 = sphi %s1424_s18, %s13_s18   ;;  %s1385_s17 = sphi %s1422_s17, %s1736_s17   ;;  %s1381_s16 = sphi %s1420_s16, %s1735_s16   ;;  %s1377_s15 = sphi %s1418_s15, %s1734_s15   ;;  %s1373_s14 = sphi %s1416_s14, %s1733_s14   ;;  %s1369_s13 = sphi %s1414_s13, %s1732_s13   ;;  %s1365_s12 = sphi %s1412_s12, %s1731_s12  }
   0x5   : > { %p26_p0 = scmp.ge.s32.totalorder %s25_s19, 6  ;;  %p76_p1 = scmp.ne.s32.totalorder %s1369_s13, %s1365_s12 }
   0x6   : > { %p77_p2 = scmp.eq.s32.totalorder %s1389_s18, 0  ;;  %s69_s24 = sadd.s32 1, %s1369_s13 }
   0x7   : > { %s1738_s19 = smov (%p26_p0, %s25_s19), 0  ;;  %s1740_s20 = smov (!%p26_p0, %s28_s20), %s1385_s17 }
   0x8   : > { %p78_p3 = por %p77_p2, %p76_p1  ;;  %p30_p4 = scmp.ge.s32.totalorder %s1740_s20, 2 }
   0x9   : > { %s64_s21 = ssub.s32 %s1381_s16, %s1738_s19  ;;  %p1022_p6 = scmp.ge.s32.totalorder %s1389_s18, 12 }
   0xa   : > { %s1742_s20 = smov (%p30_p4, %s1740_s20), 0 }
   0xb   : > { %s65_s22 = ssub.s32 %s1385_s17, %s1742_s20  ;;  %156 = sbr.rel (%p1022_p6) target bundleno = 72 (0x48), region = 16 }
   0xc   : > { %s66_s23 = sor.u32 %s65_s22, %s64_s21 }
   0xd   : > { %p67_p5 = scmp.eq.s32.totalorder %s66_s23, 0 }
   0xf   : > { %s1463_s25 = scalar_select %p67_p5, %s1369_s13, %s69_s24  }
  0x10   : > { %172 = sbr.rel (!%p78_p3) target bundleno = 72 (0x48), region = 24  ;;  %s174_s26 = sand.u32 (%p78_p3), 1, %s1369_s13  }
  0x11   : > { %s1276_s27 = smul.u32 (%p78_p3), 384, %s174_s26  ;;  %s1023_s28 = sshll.u32 (%p78_p3), %s1385_s17, 1 }
  0x12   : > { %s1227_s29 = smul.u32 (%p78_p3), 192, %s1381_s16 }
  0x13   : > { %s1477_s8 = scalar_lea.vmem (%p78_p3), [#allocation3], %s1276_s27 }
  0x14   : > { %s180_s30 = sadd.s32 (%p78_p3), %s1227_s29, %s1023_s28 }
  0x15   : > { %s1025_s4 = sshll.u32 %s180_s30, 2 }
  0x16   : > { %s1472_s7 = scalar_lea.vmem %s1728_s1, %s1025_s4 }
  0x17   : > { %v305_v0 = vld [vmem:[%s1472_s7] sm:$0xff]  ;;  %v307_v1 = vld [vmem:[%s1472_s7 + $0x10] sm:$0xff] }
  0x18   : > { %v309_v2 = vld [vmem:[%s1472_s7 + $0x20] sm:$0xff]  ;;  %306 = vst [vmem:[%s1477_s8] sm:$0xff] %v305_v0  ;;  %v311_v3 = vld [vmem:[%s1472_s7 + $0x30] sm:$0xff] }
  0x19   : > { %308 = vst [vmem:[%s1477_s8 + $0x8] sm:$0xff] %v307_v1  ;;  %v313_v4 = vld [vmem:[%s1472_s7 + $0x40] sm:$0xff]  ;;  %v315_v5 = vld [vmem:[%s1472_s7 + $0x50] sm:$0xff] }
  0x1a   : > { %310 = vst [vmem:[%s1477_s8 + $0x10] sm:$0xff] %v309_v2  ;;  %v317_v6 = vld [vmem:[%s1472_s7 + $0x60] sm:$0xff]  ;;  %v319_v7 = vld [vmem:[%s1472_s7 + $0x70] sm:$0xff] }
  0x1b   : > { %312 = vst [vmem:[%s1477_s8 + $0x18] sm:$0xff] %v311_v3  ;;  %v321_v8 = vld [vmem:[%s1472_s7 + $0x80] sm:$0xff]  ;;  %v323_v9 = vld [vmem:[%s1472_s7 + $0x90] sm:$0xff] }
  0x1c   : > { %314 = vst [vmem:[%s1477_s8 + $0x20] sm:$0xff] %v313_v4  ;;  %v325_v10 = vld [vmem:[%s1472_s7 + $0xa0] sm:$0xff]  ;;  %v327_v11 = vld [vmem:[%s1472_s7 + $0xb0] sm:$0xff] }
  0x1d   : > { %316 = vst [vmem:[%s1477_s8 + $0x28] sm:$0xff] %v315_v5  ;;  %v329_v12 = vld [vmem:[%s1472_s7 + $0xc0] sm:$0xff]  ;;  %v331_v13 = vld [vmem:[%s1472_s7 + $0xd0] sm:$0xff] }
  0x1e   : > { %318 = vst [vmem:[%s1477_s8 + $0x30] sm:$0xff] %v317_v6  ;;  %v333_v14 = vld [vmem:[%s1472_s7 + $0xe0] sm:$0xff]  ;;  %v335_v15 = vld [vmem:[%s1472_s7 + $0xf0] sm:$0xff] }
  0x1f   : > { %320 = vst [vmem:[%s1477_s8 + $0x38] sm:$0xff] %v319_v7  ;;  %v337_v16 = vld [vmem:[%s1472_s7 + $0x100] sm:$0xff]  ;;  %v339_v17 = vld [vmem:[%s1472_s7 + $0x110] sm:$0xff] }
  0x20   : > { %322 = vst [vmem:[%s1477_s8 + $0x40] sm:$0xff] %v321_v8  ;;  %v341_v18 = vld [vmem:[%s1472_s7 + $0x120] sm:$0xff]  ;;  %v343_v19 = vld [vmem:[%s1472_s7 + $0x130] sm:$0xff] }
  0x21   : > { %324 = vst [vmem:[%s1477_s8 + $0x48] sm:$0xff] %v323_v9  ;;  %v345_v20 = vld [vmem:[%s1472_s7 + $0x140] sm:$0xff]  ;;  %v347_v21 = vld [vmem:[%s1472_s7 + $0x150] sm:$0xff] }
  0x22   : > { %326 = vst [vmem:[%s1477_s8 + $0x50] sm:$0xff] %v325_v10  ;;  %v349_v22 = vld [vmem:[%s1472_s7 + $0x160] sm:$0xff]  ;;  %v351_v23 = vld [vmem:[%s1472_s7 + $0x170] sm:$0xff] }
  0x23   : > { %328 = vst [vmem:[%s1477_s8 + $0x58] sm:$0xff] %v327_v11  ;;  %v353_v24 = vld [vmem:[%s1472_s7 + $0x180] sm:$0xff]  ;;  %v355_v25 = vld [vmem:[%s1472_s7 + $0x190] sm:$0xff] }
  0x24   : > { %330 = vst [vmem:[%s1477_s8 + $0x60] sm:$0xff] %v329_v12  ;;  %v357_v26 = vld [vmem:[%s1472_s7 + $0x1a0] sm:$0xff]  ;;  %v359_v27 = vld [vmem:[%s1472_s7 + $0x1b0] sm:$0xff] }
  0x25   : > { %332 = vst [vmem:[%s1477_s8 + $0x68] sm:$0xff] %v331_v13  ;;  %v361_v28 = vld [vmem:[%s1472_s7 + $0x1c0] sm:$0xff]  ;;  %v363_v29 = vld [vmem:[%s1472_s7 + $0x1d0] sm:$0xff] }
  0x26   : > { %334 = vst [vmem:[%s1477_s8 + $0x70] sm:$0xff] %v333_v14  ;;  %v365_v30 = vld [vmem:[%s1472_s7 + $0x1e0] sm:$0xff]  ;;  %v367_v31 = vld [vmem:[%s1472_s7 + $0x1f0] sm:$0xff] }
  0x27   : > { %336 = vst [vmem:[%s1477_s8 + $0x78] sm:$0xff] %v335_v15  ;;  %v369_v32 = vld [vmem:[%s1472_s7 + $0x200] sm:$0xff]  ;;  %v371_v33 = vld [vmem:[%s1472_s7 + $0x210] sm:$0xff] }
  0x28   : > { %338 = vst [vmem:[%s1477_s8 + $0x80] sm:$0xff] %v337_v16  ;;  %v373_v34 = vld [vmem:[%s1472_s7 + $0x220] sm:$0xff]  ;;  %v375_v35 = vld [vmem:[%s1472_s7 + $0x230] sm:$0xff] }
  0x29   : > { %340 = vst [vmem:[%s1477_s8 + $0x88] sm:$0xff] %v339_v17  ;;  %v377_v36 = vld [vmem:[%s1472_s7 + $0x240] sm:$0xff]  ;;  %v379_v37 = vld [vmem:[%s1472_s7 + $0x250] sm:$0xff] }
  0x2a   : > { %342 = vst [vmem:[%s1477_s8 + $0x90] sm:$0xff] %v341_v18  ;;  %v381_v38 = vld [vmem:[%s1472_s7 + $0x260] sm:$0xff]  ;;  %v383_v39 = vld [vmem:[%s1472_s7 + $0x270] sm:$0xff] }
  0x2b   : > { %344 = vst [vmem:[%s1477_s8 + $0x98] sm:$0xff] %v343_v19  ;;  %v385_v40 = vld [vmem:[%s1472_s7 + $0x280] sm:$0xff]  ;;  %v387_v41 = vld [vmem:[%s1472_s7 + $0x290] sm:$0xff] }
  0x2c   : > { %346 = vst [vmem:[%s1477_s8 + $0xa0] sm:$0xff] %v345_v20  ;;  %v389_v42 = vld [vmem:[%s1472_s7 + $0x2a0] sm:$0xff]  ;;  %v391_v43 = vld [vmem:[%s1472_s7 + $0x2b0] sm:$0xff] }
  0x2d   : > { %348 = vst [vmem:[%s1477_s8 + $0xa8] sm:$0xff] %v347_v21  ;;  %v393_v44 = vld [vmem:[%s1472_s7 + $0x2c0] sm:$0xff]  ;;  %v395_v45 = vld [vmem:[%s1472_s7 + $0x2d0] sm:$0xff] }
  0x2e   : > { %350 = vst [vmem:[%s1477_s8 + $0xb0] sm:$0xff] %v349_v22  ;;  %v397_v46 = vld [vmem:[%s1472_s7 + $0x2e0] sm:$0xff]  ;;  %v399_v47 = vld [vmem:[%s1472_s7 + $0x2f0] sm:$0xff] }
  0x2f   : > { %352 = vst [vmem:[%s1477_s8 + $0xb8] sm:$0xff] %v351_v23 }
  0x30   : > { %354 = vst [vmem:[%s1477_s8 + $0xc0] sm:$0xff] %v353_v24 }
  0x31   : > { %356 = vst [vmem:[%s1477_s8 + $0xc8] sm:$0xff] %v355_v25 }
  0x32   : > { %358 = vst [vmem:[%s1477_s8 + $0xd0] sm:$0xff] %v357_v26 }
  0x33   : > { %360 = vst [vmem:[%s1477_s8 + $0xd8] sm:$0xff] %v359_v27 }
  0x34   : > { %362 = vst [vmem:[%s1477_s8 + $0xe0] sm:$0xff] %v361_v28 }
  0x35   : > { %364 = vst [vmem:[%s1477_s8 + $0xe8] sm:$0xff] %v363_v29 }
  0x36   : > { %366 = vst [vmem:[%s1477_s8 + $0xf0] sm:$0xff] %v365_v30 }
  0x37   : > { %368 = vst [vmem:[%s1477_s8 + $0xf8] sm:$0xff] %v367_v31 }
  0x38   : > { %370 = vst [vmem:[%s1477_s8 + $0x100] sm:$0xff] %v369_v32 }
  0x39   : > { %372 = vst [vmem:[%s1477_s8 + $0x108] sm:$0xff] %v371_v33 }
  0x3a   : > { %374 = vst [vmem:[%s1477_s8 + $0x110] sm:$0xff] %v373_v34 }
  0x3b   : > { %376 = vst [vmem:[%s1477_s8 + $0x118] sm:$0xff] %v375_v35 }
  0x3c   : > { %378 = vst [vmem:[%s1477_s8 + $0x120] sm:$0xff] %v377_v36 }
  0x3d   : > { %380 = vst [vmem:[%s1477_s8 + $0x128] sm:$0xff] %v379_v37 }
  0x3e   : > { %382 = vst [vmem:[%s1477_s8 + $0x130] sm:$0xff] %v381_v38 }
  0x3f   : > { %384 = vst [vmem:[%s1477_s8 + $0x138] sm:$0xff] %v383_v39 }
  0x40   : > { %386 = vst [vmem:[%s1477_s8 + $0x140] sm:$0xff] %v385_v40 }
  0x41   : > { %388 = vst [vmem:[%s1477_s8 + $0x148] sm:$0xff] %v387_v41 }
  0x42   : > { %390 = vst [vmem:[%s1477_s8 + $0x150] sm:$0xff] %v389_v42 }
  0x43   : > { %392 = vst [vmem:[%s1477_s8 + $0x158] sm:$0xff] %v391_v43 }
  0x44   : > { %394 = vst [vmem:[%s1477_s8 + $0x160] sm:$0xff] %v393_v44 }
  0x45   : > { %396 = vst [vmem:[%s1477_s8 + $0x168] sm:$0xff] %v395_v45 }
  0x46   : > { %398 = vst [vmem:[%s1477_s8 + $0x170] sm:$0xff] %v397_v46 }
  0x47   : > { %400 = vst [vmem:[%s1477_s8 + $0x178] sm:$0xff] %v399_v47 }
  0x48 PF: > { %p1026_p7 = scmp.ge.s32.totalorder %s1389_s18, 1  ;;  %p413_p8 = scmp.lt.s32.totalorder %s1389_s18, 13 }
  0x4a   : > { %p414_p9 = pnand %p1026_p7, %p413_p8 }
  0x4b   : > { %s420_s9 = sand.u32 (!%p414_p9), 1, %s1365_s12   ;;  %s460_s10 = smul.u32 (!%p414_p9), 3, %s1373_s14 }
  0x4c   : > { %417 = sbr.rel (%p414_p9) target bundleno = 305 (0x131), region = 66  ;;  %s1028_s21 = sshll.u32 (!%p414_p9), %s1377_s15, 1 }
  0x4d   : > { %s1277_s11 = smul.u32 (!%p414_p9), 384, %s420_s9  ;;  %p463_p10 = scmp.lt.s32.totalorder (!%p414_p9), %s460_s10, 17 }
  0x4e   : > { %p473_p11 = scmp.lt.s32.totalorder (!%p414_p9), %s1028_s21, 3  ;;  %p1031_p12 = scmp.ne.s32.totalorder (!%p414_p9), %s1373_s14, 0 }
  0x4f   : > { %s1594_s5 = scalar_lea.vmem (!%p414_p9), [#allocation3], %s1277_s11 }
  0x51   : > { %s1744_s10 = smov (!%p463_p10, %s460_s10), 17  ;;  %s1746_s21 = smov (!%p473_p11, %s1028_s21), 3 }
  0x52   : > { %s1027_s22 = sshll.u32 %s1744_s10, 2  ;;  %s475_s12 = scalar_lea.vmem %s1729_s2, %s1746_s21 }
  0x53   : > { %s1582_s26 = scalar_lea.vmem %s1727_s0, %s1027_s22  ;;  %s1030_s29 = sshll.u32 %s1746_s21, 2 }
  0x54   : > { %s1592_s4 = scalar_lea.vmem %s1730_s3, %s1030_s29  ;;  %490 = sbr.rel (%p1031_p12) target bundleno = 92 (0x5c), region = 74 }
  0x59   : > { %v1391_v48 = vmov 0.0  }
  0x5a   : > { %491 = vst [vmem:[#allocation2] sm:$0xff] %v1391_v48 }
  0x5b   : > { %492 = vst [vmem:[#allocation2 + $0x8] sm:$0xff] %v1391_v48 }
  0x5c PF: > { %v1090_v49 = vld [vmem:[%s1594_s5 + $0x70] sm:$0xf]  ;;  %v1243_v50 = vld [vmem:[%s1594_s5 + $0x74] sm:$0xf0]  ;;  %v1082_v54 = vld [vmem:[%s1594_s5 + $0x60] sm:$0xf] }
  0x5d   : > { %v1154_v51 = vld [vmem:[%s1594_s5 + $0xf0] sm:$0xf]  ;;  %v1091_v52 = vor.u32 %v1243_v50, %v1090_v49  ;;  %v1259_v53 = vld [vmem:[%s1594_s5 + $0xf4] sm:$0xf0]  ;;  %v1241_v55 = vld [vmem:[%s1594_s5 + $0x64] sm:$0xf0] }
  0x5e   : > { %v1155_v56 = vor.u32 %v1259_v53, %v1154_v51  ;;  %v1146_v57 = vld [vmem:[%s1594_s5 + $0xe0] sm:$0xf]  ;;  %v1257_v58 = vld [vmem:[%s1594_s5 + $0xe4] sm:$0xf0]  ;;  %v1083_v59 = vor.u32 %v1241_v55, %v1082_v54  ;;  %v1074_v60 = vld [vmem:[%s1594_s5 + $0x50] sm:$0xf] }
  0x5f   : > { %796 = vmatpush.bf16.msra.mxu0 %v1091_v52  ;;  %v1147_v61 = vor.u32 %v1257_v58, %v1146_v57  ;;  %v1239_v62 = vld [vmem:[%s1594_s5 + $0x54] sm:$0xf0]  ;;  %v1218_v63 = vld [vmem:[%s1594_s5 + $0x170] sm:$0xf]  ;;  %v1210_v4 = vld [vmem:[%s1594_s5 + $0x160] sm:$0xf] }
  0x60   : > { %809 = vmatpush.bf16.msra.mxu1 %v1155_v56  ;;  %v1275_v0 = vld [vmem:[%s1594_s5 + $0x174] sm:$0xf0]  ;;  %v1138_v1 = vld [vmem:[%s1594_s5 + $0xd0] sm:$0xf]  ;;  %v1273_v5 = vld [vmem:[%s1594_s5 + $0x164] sm:$0xf0]  ;;  %v1075_v7 = vor.u32 %v1239_v62, %v1074_v60 }
  0x61   : > { %v1255_v2 = vld [vmem:[%s1594_s5 + $0xd4] sm:$0xf0]  ;;  %v1219_v3 = vor.u32 %v1275_v0, %v1218_v63  ;;  %v1242_v6 = vld [vmem:[%s1594_s5 + $0x74] sm:$0xf]  ;;  %v1066_v8 = vld [vmem:[%s1594_s5 + $0x40] sm:$0xf]  ;;  %v1211_v10 = vor.u32 %v1273_v5, %v1210_v4 }
  0x62   : > { %v1237_v9 = vld [vmem:[%s1594_s5 + $0x44] sm:$0xf0]  ;;  %v1092_v11 = vld [vmem:[%s1594_s5 + $0x78] sm:$0xf0]  ;;  %v1139_v12 = vor.u32 %v1255_v2, %v1138_v1  ;;  %v1130_v13 = vld [vmem:[%s1594_s5 + $0xc0] sm:$0xf] }
  0x63   : > { %797 = vmatpush.bf16.msra.mxu0 %v1083_v59  ;;  %822 = vmatpush.bf16.msra.mxu2 %v1219_v3  ;;  %v1253_v14 = vld [vmem:[%s1594_s5 + $0xc4] sm:$0xf0]  ;;  %v1095_v15 = vor.u32 %v1242_v6, %v1092_v11  ;;  %v1202_v16 = vld [vmem:[%s1594_s5 + $0x150] sm:$0xf]  ;;  %v1271_v17 = vld [vmem:[%s1594_s5 + $0x154] sm:$0xf0]  ;;  %v1067_v21 = vor.u32 %v1237_v9, %v1066_v8 }
  0x64   : > { %810 = vmatpush.bf16.msra.mxu1 %v1147_v61  ;;  %v1240_v18 = vld [vmem:[%s1594_s5 + $0x64] sm:$0xf]  ;;  %v1084_v19 = vld [vmem:[%s1594_s5 + $0x68] sm:$0xf0]  ;;  %v1058_v22 = vld [vmem:[%s1594_s5 + $0x30] sm:$0xf]  ;;  %v1203_v24 = vor.u32 %v1271_v17, %v1202_v16  ;;  %v1131_v26 = vor.u32 %v1253_v14, %v1130_v13 }
  0x65   : > { %835 = vmatpush.bf16.msra.mxu3 %v1095_v15  ;;  %v1087_v20 = vor.u32 %v1240_v18, %v1084_v19  ;;  %v1235_v23 = vld [vmem:[%s1594_s5 + $0x34] sm:$0xf0]  ;;  %v1194_v25 = vld [vmem:[%s1594_s5 + $0x140] sm:$0xf]  ;;  %v1269_v27 = vld [vmem:[%s1594_s5 + $0x144] sm:$0xf0] }
  0x66   : > { %v1238_v28 = vld [vmem:[%s1594_s5 + $0x54] sm:$0xf]  ;;  %v1076_v29 = vld [vmem:[%s1594_s5 + $0x58] sm:$0xf0]  ;;  %v1122_v30 = vld [vmem:[%s1594_s5 + $0xb0] sm:$0xf]  ;;  %v1059_v33 = vor.u32 %v1235_v23, %v1058_v22  ;;  %v1195_v35 = vor.u32 %v1269_v27, %v1194_v25 }
  0x67   : > { %798 = vmatpush.bf16.msra.mxu0 %v1075_v7  ;;  %823 = vmatpush.bf16.msra.mxu2 %v1211_v10  ;;  %v1251_v31 = vld [vmem:[%s1594_s5 + $0xb4] sm:$0xf0]  ;;  %v1079_v32 = vor.u32 %v1238_v28, %v1076_v29  ;;  %v1050_v34 = vld [vmem:[%s1594_s5 + $0x20] sm:$0xf]  ;;  %v1236_v36 = vld [vmem:[%s1594_s5 + $0x44] sm:$0xf] }
  0x68   : > { %811 = vmatpush.bf16.msra.mxu1 %v1139_v12  ;;  %v1068_v37 = vld [vmem:[%s1594_s5 + $0x48] sm:$0xf0]  ;;  %v1123_v38 = vor.u32 %v1251_v31, %v1122_v30  ;;  %v1233_v39 = vld [vmem:[%s1594_s5 + $0x24] sm:$0xf0]  ;;  %v1186_v40 = vld [vmem:[%s1594_s5 + $0x130] sm:$0xf] }
  0x69   : > { %836 = vmatpush.bf16.msra.mxu3 %v1087_v20  ;;  %v1267_v41 = vld [vmem:[%s1594_s5 + $0x134] sm:$0xf0]  ;;  %v1114_v42 = vld [vmem:[%s1594_s5 + $0xa0] sm:$0xf]  ;;  %v1249_v43 = vld [vmem:[%s1594_s5 + $0xa4] sm:$0xf0]  ;;  %v1071_v44 = vor.u32 %v1236_v36, %v1068_v37  ;;  %v1051_v45 = vor.u32 %v1233_v39, %v1050_v34 }
  0x6a   : > { %v1042_v46 = vld [vmem:[%s1594_s5 + $0x10] sm:$0xf]  ;;  %v1187_v47 = vor.u32 %v1267_v41, %v1186_v40  ;;  %v1234_v48 = vld [vmem:[%s1594_s5 + $0x34] sm:$0xf]  ;;  %v1060_v49 = vld [vmem:[%s1594_s5 + $0x38] sm:$0xf0]  ;;  %v1115_v50 = vor.u32 %v1249_v43, %v1114_v42 }
  0x6b   : > { %799 = vmatpush.bf16.msra.mxu0 %v1067_v21  ;;  %824 = vmatpush.bf16.msra.mxu2 %v1203_v24  ;;  %v1231_v51 = vld [vmem:[%s1594_s5 + $0x14] sm:$0xf0]  ;;  %v1178_v52 = vld [vmem:[%s1594_s5 + $0x120] sm:$0xf]  ;;  %v1265_v53 = vld [vmem:[%s1594_s5 + $0x124] sm:$0xf0]  ;;  %v1063_v58 = vor.u32 %v1234_v48, %v1060_v49 }
  0x6c   : > { %812 = vmatpush.bf16.msra.mxu1 %v1131_v26  ;;  %v1106_v54 = vld [vmem:[%s1594_s5 + $0x90] sm:$0xf]  ;;  %v1247_v55 = vld [vmem:[%s1594_s5 + $0x94] sm:$0xf0]  ;;  %v1034_v56 = vld [vmem:[%s1594_s5] sm:$0xf]  ;;  %v1043_v59 = vor.u32 %v1231_v51, %v1042_v46  ;;  %v1179_v60 = vor.u32 %v1265_v53, %v1178_v52 }
  0x6d   : > { %837 = vmatpush.bf16.msra.mxu3 %v1079_v32  ;;  %v1229_v57 = vld [vmem:[%s1594_s5 + $0x4] sm:$0xf0]  ;;  %v1232_v61 = vld [vmem:[%s1594_s5 + $0x24] sm:$0xf]  ;;  %v1052_v62 = vld [vmem:[%s1594_s5 + $0x28] sm:$0xf0]  ;;  %v1107_v0 = vor.u32 %v1247_v55, %v1106_v54 }
  0x6e   : > { %v495_v63 = vld [vmem:[%s1582_s26] sm:$0xff]  ;;  %v1098_v1 = vld [vmem:[%s1594_s5 + $0x80] sm:$0xf]  ;;  %v1263_v3 = vld [vmem:[%s1594_s5 + $0x114] sm:$0xf0]  ;;  %v1055_v9 = vor.u32 %v1232_v61, %v1052_v62  ;;  %v1035_v11 = vor.u32 %v1229_v57, %v1034_v56  ;;  %p1224_p13 = scmp.ne.s32.totalorder %s1373_s14, 5 }
  0x6f   : > { %800 = vmatpush.bf16.msra.mxu0 %v1059_v33  ;;  %825 = vmatpush.bf16.msra.mxu2 %v1195_v35  ;;  %v1170_v2 = vld [vmem:[%s1594_s5 + $0x110] sm:$0xf]  ;;  %v1245_v4 = vld [vmem:[%s1594_s5 + $0x84] sm:$0xf0]  ;;  %v1258_v5 = vld [vmem:[%s1594_s5 + $0xf4] sm:$0xf]  ;;  %v547_v10 = vunpack.c.l.b16 %v495_v63  ;;  %v548_v13 = vunpack.c.h.b16 %v495_v63 }
  0x70   : > { %813 = vmatpush.bf16.msra.mxu1 %v1123_v38  ;;  %v1156_v6 = vld [vmem:[%s1594_s5 + $0xf8] sm:$0xf0]  ;;  %v1274_v7 = vld [vmem:[%s1594_s5 + $0x174] sm:$0xf]  ;;  %v1171_v12 = vor.u32 %v1263_v3, %v1170_v2  ;;  %v496_v16 = vld [vmem:[%s1582_s26 + $0x8] sm:$0xf]  ;;  %v1099_v17 = vor.u32 %v1245_v4, %v1098_v1 }
  0x71   : > { %838 = vmatpush.bf16.msra.mxu3 %v1071_v44  ;;  %v1220_v8 = vld [vmem:[%s1594_s5 + $0x178] sm:$0xf0]  ;;  %v1230_v14 = vld [vmem:[%s1594_s5 + $0x14] sm:$0xf]  ;;  %v1159_v18 = vor.u32 %v1258_v5, %v1156_v6  ;;  %v1162_v19 = vld [vmem:[%s1594_s5 + $0x100] sm:$0xf]  ;;  %v550_v26 = vpack.c.b16 %v547_v10, %v547_v10  ;;  %v549_v28 = vunpack.c.l.b16 %v496_v16  ;;  %v1669_v29 = vpack.c.b16 %v548_v13, %v548_v13 }
  0x72   : > { %v1044_v15 = vld [vmem:[%s1594_s5 + $0x18] sm:$0xf0]  ;;  %v1261_v20 = vld [vmem:[%s1594_s5 + $0x104] sm:$0xf0]  ;;  %v1223_v21 = vor.u32 %v1274_v7, %v1220_v8  ;;  %v1256_v22 = vld [vmem:[%s1594_s5 + $0xe4] sm:$0xf] }
  0x73   : > { %801 = vmatpush.bf16.msra.mxu0 %v1051_v45  ;;  %826 = vmatpush.bf16.msra.mxu2 %v1187_v47  ;;  %v1148_v23 = vld [vmem:[%s1594_s5 + $0xe8] sm:$0xf0]  ;;  %v1272_v24 = vld [vmem:[%s1594_s5 + $0x164] sm:$0xf]  ;;  %v1047_v27 = vor.u32 %v1230_v14, %v1044_v15  ;;  %v1163_v30 = vor.u32 %v1261_v20, %v1162_v19  ;;  %v1254_v35 = vld [vmem:[%s1594_s5 + $0xd4] sm:$0xf]  ;;  %v552_v39 = vpack.c.b16 %v549_v28, %v549_v28 }
  0x74   : > { %814 = vmatpush.bf16.msra.mxu1 %v1115_v50  ;;  %v1212_v25 = vld [vmem:[%s1594_s5 + $0x168] sm:$0xf0]  ;;  %v1228_v31 = vld [vmem:[%s1594_s5 + $0x4] sm:$0xf]  ;;  %v1151_v33 = vor.u32 %v1256_v22, %v1148_v23  ;;  %v1140_v36 = vld [vmem:[%s1594_s5 + $0xd8] sm:$0xf0] }
  0x75   : > { %839 = vmatpush.bf16.msra.mxu3 %v1063_v58  ;;  %v1036_v32 = vld [vmem:[%s1594_s5 + $0x8] sm:$0xf0]  ;;  %v1215_v34 = vor.u32 %v1272_v24, %v1212_v25  ;;  %v1270_v37 = vld [vmem:[%s1594_s5 + $0x154] sm:$0xf]  ;;  %v1204_v38 = vld [vmem:[%s1594_s5 + $0x158] sm:$0xf0]  ;;  %v1143_v41 = vor.u32 %v1254_v35, %v1140_v36 }
  0x76   : > { %v1039_v40 = vor.u32 %v1228_v31, %v1036_v32  ;;  %v1207_v42 = vor.u32 %v1270_v37, %v1204_v38  ;;  %v1252_v43 = vld [vmem:[%s1594_s5 + $0xc4] sm:$0xf]  ;;  %v1132_v44 = vld [vmem:[%s1594_s5 + $0xc8] sm:$0xf0]  ;;  %v1250_v49 = vld [vmem:[%s1594_s5 + $0xb4] sm:$0xf] }
  0x77   : > { %802 = vmatpush.bf16.msra.mxu0 %v1043_v59  ;;  %827 = vmatpush.bf16.msra.mxu2 %v1179_v60  ;;  %v1268_v45 = vld [vmem:[%s1594_s5 + $0x144] sm:$0xf]  ;;  %v1196_v46 = vld [vmem:[%s1594_s5 + $0x148] sm:$0xf0]  ;;  %v1135_v47 = vor.u32 %v1252_v43, %v1132_v44  ;;  %v1124_v50 = vld [vmem:[%s1594_s5 + $0xb8] sm:$0xf0] }
  0x78   : > { %815 = vmatpush.bf16.msra.mxu1 %v1107_v0  ;;  %v1199_v48 = vor.u32 %v1268_v45, %v1196_v46  ;;  %v1266_v51 = vld [vmem:[%s1594_s5 + $0x134] sm:$0xf]  ;;  %v1188_v52 = vld [vmem:[%s1594_s5 + $0x138] sm:$0xf0]  ;;  %v1127_v53 = vor.u32 %v1250_v49, %v1124_v50  ;;  %v1248_v55 = vld [vmem:[%s1594_s5 + $0xa4] sm:$0xf] }
  0x79   : > { %840 = vmatpush.bf16.msra.mxu3 %v1055_v9  ;;  %v1191_v54 = vor.u32 %v1266_v51, %v1188_v52  ;;  %v1116_v56 = vld [vmem:[%s1594_s5 + $0xa8] sm:$0xf0]  ;;  %v1264_v57 = vld [vmem:[%s1594_s5 + $0x124] sm:$0xf]  ;;  %v1246_v61 = vld [vmem:[%s1594_s5 + $0x94] sm:$0xf] }
  0x7a   : > { %v1180_v58 = vld [vmem:[%s1594_s5 + $0x128] sm:$0xf0]  ;;  %v1119_v59 = vor.u32 %v1248_v55, %v1116_v56  ;;  %v1108_v62 = vld [vmem:[%s1594_s5 + $0x98] sm:$0xf0]  ;;  %v1262_v63 = vld [vmem:[%s1594_s5 + $0x114] sm:$0xf] }
  0x7b   : > { %803 = vmatpush.bf16.msra.mxu0 %v1035_v11  ;;  %828 = vmatpush.bf16.msra.mxu2 %v1171_v12  ;;  %v1183_v60 = vor.u32 %v1264_v57, %v1180_v58  ;;  %v1172_v0 = vld [vmem:[%s1594_s5 + $0x118] sm:$0xf0]  ;;  %v1111_v1 = vor.u32 %v1246_v61, %v1108_v62  ;;  %v1244_v3 = vld [vmem:[%s1594_s5 + $0x84] sm:$0xf]  ;;  %v1100_v4 = vld [vmem:[%s1594_s5 + $0x88] sm:$0xf0] }
  0x7c   : > { %816 = vmatpush.bf16.msra.mxu1 %v1099_v17  ;;  %v1175_v2 = vor.u32 %v1262_v63, %v1172_v0  ;;  %v1260_v5 = vld [vmem:[%s1594_s5 + $0x104] sm:$0xf]  ;;  %v1164_v6 = vld [vmem:[%s1594_s5 + $0x108] sm:$0xf0]  ;;  %v1103_v7 = vor.u32 %v1244_v3, %v1100_v4  ;;  %v493_v14 = vld [vmem:[#allocation2] sm:$0xff] }
  0x7d   : > { %841 = vmatpush.bf16.msra.mxu3 %v1047_v27  ;;  %v1167_v8 = vor.u32 %v1260_v5, %v1164_v6  ;;  %v494_v24 = vld [vmem:[#allocation2 + $0x8] sm:$0xff] }
  0x7e   : > { %804 = vmatmul.bf16.vlgmr.msra.gmra.mxu0 %v550_v26 }
  0x7f   : > { %848 = vmatpush.bf16.msrb.mxu0 %v1159_v18  ;;  %817 = vmatmul.bf16.vlgmr.msra.gmra.mxu1 %v1669_v29 }
  0x80   : > { %861 = vmatpush.bf16.msrb.mxu1 %v1223_v21  ;;  %829 = vmatpush.bf16.msra.mxu2 %v1163_v30 }
  0x81   : > { %842 = vmatpush.bf16.msra.mxu3 %v1039_v40 }
  0x83   : > { %849 = vmatpush.bf16.msrb.mxu0 %v1151_v33  ;;  %830 = vmatmul.bf16.vlgmr.msra.gmra.mxu2 %v552_v39 }
  0x84   : > { %862 = vmatpush.bf16.msrb.mxu1 %v1215_v34  ;;  %843 = vmatmul.bf16.vlgmr.msra.gmra.mxu3 %v550_v26 }
  0x87   : > { %850 = vmatpush.bf16.msrb.mxu0 %v1143_v41 }
  0x88   : > { %863 = vmatpush.bf16.msrb.mxu1 %v1207_v42 }
  0x8b   : > { %851 = vmatpush.bf16.msrb.mxu0 %v1135_v47 }
  0x8c   : > { %864 = vmatpush.bf16.msrb.mxu1 %v1199_v48 }
  0x8f   : > { %852 = vmatpush.bf16.msrb.mxu0 %v1127_v53 }
  0x90   : > { %865 = vmatpush.bf16.msrb.mxu1 %v1191_v54 }
  0x93   : > { %853 = vmatpush.bf16.msrb.mxu0 %v1119_v59 }
  0x94   : > { %866 = vmatpush.bf16.msrb.mxu1 %v1183_v60 }
  0x97   : > { %854 = vmatpush.bf16.msrb.mxu0 %v1111_v1 }
  0x98   : > { %867 = vmatpush.bf16.msrb.mxu1 %v1175_v2 }
  0x9b   : > { %855 = vmatpush.bf16.msrb.mxu0 %v1103_v7 }
  0x9c   : > { %868 = vmatpush.bf16.msrb.mxu1 %v1167_v8 }
  0x9e   : > { %856 = vmatmul.bf16.vlgmr.msrb.gmra.mxu0 %v1669_v29 }
  0x9f   : > { %869 = vmatmul.bf16.vlgmr.msrb.gmra.mxu1 %v552_v39 }
  0xfb   : > { %v805_v9 = vpop.f32.mrf.mxu0 }
  0xfc   : > { %v818_v10 = vpop.f32.mrf.mxu1 }
  0xfd   : > { %v819_v11 = vadd.f32 %v818_v10, %v805_v9 }
 0x103   : > { %v807_v12 = vpop.f32.mrf.mxu0 }
 0x104   : > { %v820_v13 = vpop.f32.mrf.mxu1 }
 0x106   : > { %v831_v15 = vpop.f32.mrf.mxu2 }
 0x107   : > { %v832_v16 = vadd.f32 %v831_v15, %v819_v11  ;;  %v844_v18 = vpop.f32.mrf.mxu3 }
 0x109   : > { %v874_v17 = vadd.f32 %v832_v16, %v493_v14 }
 0x10b   : > { %876 = vst [vmem:[#allocation2] sm:$0xff] %v874_v17 }
 0x10e   : > { %v833_v19 = vpop.f32.mrf.mxu2 }
 0x10f   : > { %v846_v20 = vpop.f32.mrf.mxu3 }
 0x11b   : > { %v857_v21 = vpop.f32.mrf.mxu0 }
 0x11c   : > { %v858_v22 = vadd.f32 %v857_v21, %v844_v18  ;;  %v870_v23 = vpop.f32.mrf.mxu1 }
 0x11e   : > { %v871_v25 = vadd.f32 %v870_v23, %v858_v22 }
 0x120   : > { %v875_v26 = vadd.f32 %v871_v25, %v494_v24  ;;  %881 = sbr.rel (%p1224_p13) target bundleno = 305 (0x131), region = 78 }
 0x122   : > { %877 = vst [vmem:[#allocation2 + $0x8] sm:$0xff] %v875_v26 }
 0x123   : > { %v859_v27 = vpop.f32.mrf.mxu0 }
 0x124   : > { %v872_v28 = vpop.f32.mrf.mxu1 }
 0x125   : > { %v882_v29 = vld [vmem:[#allocation2] sm:$0xff] }
 0x126   : > { %v884_v31 = vld [vmem:[%s475_s12] sm:$0x3] }
 0x127   : > { %v886_v32 = vperm.slane %v884_v31, 0  ;;  %v887_v33 = vperm.slane %v884_v31, 1 }
 0x129   : > { %v883_v30 = vld [vmem:[#allocation2 + $0x8] sm:$0xff]  ;;  %v890_v34 = vadd.f32 %v886_v32, %v882_v29 }
 0x12a   : > { %v891_v35 = vadd.f32 %v887_v33, %v883_v30 }
 0x12b   : > { %v892_v36 = vmax.f32 %v890_v34, 0.0 }
 0x12c   : > { %v893_v37 = vmax.f32 %v891_v35, 0.0 }
 0x12e   : > { %v894_v38 = vpack.c.bf16 %v893_v37, %v892_v36 }
 0x130   : > { %895 = vst [vmem:[%s1592_s4] sm:$0xff] %v894_v38 }
 0x131 PF: > { %s13_s18 = sadd.s32 1, %s1389_s18   ;;  %s1731_s12 = smov %s1369_s13 }
 0x132   : > { %p10_p0 = scmp.ge.s32.totalorder %s13_s18, 14   ;;  %s1732_s13 = smov %s1463_s25 }
 0x133   : > { %s1733_s14 = smov %s1381_s16  ;;  %s1734_s15 = smov %s1385_s17 }
 0x134   : > { %s1735_s16 = smov %s1738_s19  ;;  %s1736_s17 = smov %s1742_s20 }
 0x135   :  { %12 = sbr.rel (!%p10_p0) target bundleno = 4 (0x4), region = 119 }

// kernel: resnet_forward.20
= control target key start
LH: loop header
LB: loop body
LE: loop exit
PB: predicated region body
PF: predicated region fallthrough
CT: control target
= control target key end

     0   :  { %s1223_s15 = smov 0   ;;  %s1225_s16 = smov 0   ;;  %s1377_s0 = inlined_call_operand.vmem [shape: bf16[8,2304], index: 0, kind: input, shape index: {}]   ;;  %s1378_s1 = inlined_call_operand.vmem [shape: bf16[2304,256], index: 1, kind: input, shape index: {}]   ;;  %s1379_s2 = inlined_call_operand.vmem [shape: f32[1,256], index: 2, kind: input, shape index: {}]   ;;  %s1380_s3 = inlined_call_operand.vmem [shape: bf16[8,256], index: 3, kind: input, shape index: {}]   ;;  %s1381_s4 = inlined_call_operand.vmem [shape: bf16[8,256], index: 4, kind: output, shape index: {}]  }
   0x1   :  { %s1227_s17 = smov 0  }
   0x2 LB: > { %s26_s18 = sadd.s32 1, %s1191_s16  ;;  %p897_p0 = scmp.ge.s32.totalorder %s1195_s17, 1  ;;  %s1195_s17 = sphi %s1227_s17, %s14_s17   ;;  %s1191_s16 = sphi %s1225_s16, %s1383_s16   ;;  %s1187_s15 = sphi %s1223_s15, %s1382_s15  }
   0x3   : > { %p27_p1 = scmp.ge.s32.totalorder %s26_s18, 6  ;;  %p236_p2 = scmp.lt.s32.totalorder %s1195_s17, 7 }
   0x5   : > { %s1385_s18 = smov (%p27_p1, %s26_s18), 0  ;;  %p237_p3 = pnand %p897_p0, %p236_p2 }
   0x6   : > { %s293_s19 = smul.u32 (!%p237_p3), 3, %s1187_s15  ;;  %p901_p6 = scmp.ne.s32.totalorder (!%p237_p3), %s1187_s15, 0 }
   0x7   : > { %240 = sbr.rel (%p237_p3) target bundleno = 238 (0xee), region = 36 }
   0x8   : > { %s303_s20 = smul.u32 (!%p237_p3), 48, %s1187_s15  ;;  %p296_p4 = scmp.lt.s32.totalorder (!%p237_p3), %s293_s19, 17 }
   0xa   : > { %p305_p5 = scmp.lt.s32.totalorder (!%p237_p3), %s303_s20, 287 }
   0xc   : > { %s1387_s19 = smov (!%p296_p4, %s293_s19), 17  ;;  %s1389_s20 = smov (!%p305_p5, %s303_s20), 287 }
   0xd   : > { %s898_s21 = sshll.u32 %s1387_s19, 2  ;;  %s1099_s25 = sshll.u32 %s1389_s20, 3 }
   0xe   : > { %s1248_s24 = scalar_lea.vmem %s1377_s0, %s898_s21  ;;  %s1253_s28 = scalar_lea.vmem %s1378_s1, %s1099_s25 }
   0xf   : > { %343 = sbr.rel (%p901_p6) target bundleno = 23 (0x17), region = 40 }
  0x14   : > { %v1197_v0 = vmov 0.0  }
  0x15   : > { %344 = vst [vmem:[#allocation2] sm:$0xff] %v1197_v0 }
  0x16   : > { %345 = vst [vmem:[#allocation2 + $0x8] sm:$0xff] %v1197_v0 }
  0x17 PF: > { %v960_v1 = vld [vmem:[%s1253_s28 + $0x70] sm:$0xf]  ;;  %v1115_v2 = vld [vmem:[%s1253_s28 + $0x74] sm:$0xf0]  ;;  %v952_v6 = vld [vmem:[%s1253_s28 + $0x60] sm:$0xf] }
  0x18   : > { %v1024_v3 = vld [vmem:[%s1253_s28 + $0xf0] sm:$0xf]  ;;  %v961_v4 = vor.u32 %v1115_v2, %v960_v1  ;;  %v1131_v5 = vld [vmem:[%s1253_s28 + $0xf4] sm:$0xf0]  ;;  %v1113_v7 = vld [vmem:[%s1253_s28 + $0x64] sm:$0xf0] }
  0x19   : > { %v1025_v8 = vor.u32 %v1131_v5, %v1024_v3  ;;  %v1016_v9 = vld [vmem:[%s1253_s28 + $0xe0] sm:$0xf]  ;;  %v1129_v10 = vld [vmem:[%s1253_s28 + $0xe4] sm:$0xf0]  ;;  %v953_v11 = vor.u32 %v1113_v7, %v952_v6  ;;  %v944_v12 = vld [vmem:[%s1253_s28 + $0x50] sm:$0xf] }
  0x1a   : > { %649 = vmatpush.bf16.msra.mxu0 %v961_v4  ;;  %v1017_v13 = vor.u32 %v1129_v10, %v1016_v9  ;;  %v1111_v14 = vld [vmem:[%s1253_s28 + $0x54] sm:$0xf0]  ;;  %v1088_v15 = vld [vmem:[%s1253_s28 + $0x170] sm:$0xf]  ;;  %v1080_v20 = vld [vmem:[%s1253_s28 + $0x160] sm:$0xf] }
  0x1b   : > { %662 = vmatpush.bf16.msra.mxu1 %v1025_v8  ;;  %v1147_v16 = vld [vmem:[%s1253_s28 + $0x174] sm:$0xf0]  ;;  %v1008_v17 = vld [vmem:[%s1253_s28 + $0xd0] sm:$0xf]  ;;  %v1145_v21 = vld [vmem:[%s1253_s28 + $0x164] sm:$0xf0]  ;;  %v945_v23 = vor.u32 %v1111_v14, %v944_v12 }
  0x1c   : > { %v1127_v18 = vld [vmem:[%s1253_s28 + $0xd4] sm:$0xf0]  ;;  %v1089_v19 = vor.u32 %v1147_v16, %v1088_v15  ;;  %v1114_v22 = vld [vmem:[%s1253_s28 + $0x74] sm:$0xf]  ;;  %v936_v24 = vld [vmem:[%s1253_s28 + $0x40] sm:$0xf]  ;;  %v1081_v26 = vor.u32 %v1145_v21, %v1080_v20 }
  0x1d   : > { %v1109_v25 = vld [vmem:[%s1253_s28 + $0x44] sm:$0xf0]  ;;  %v962_v27 = vld [vmem:[%s1253_s28 + $0x78] sm:$0xf0]  ;;  %v1009_v28 = vor.u32 %v1127_v18, %v1008_v17  ;;  %v1000_v29 = vld [vmem:[%s1253_s28 + $0xc0] sm:$0xf] }
  0x1e   : > { %650 = vmatpush.bf16.msra.mxu0 %v953_v11  ;;  %675 = vmatpush.bf16.msra.mxu2 %v1089_v19  ;;  %v1125_v30 = vld [vmem:[%s1253_s28 + $0xc4] sm:$0xf0]  ;;  %v965_v31 = vor.u32 %v1114_v22, %v962_v27  ;;  %v1072_v32 = vld [vmem:[%s1253_s28 + $0x150] sm:$0xf]  ;;  %v1143_v33 = vld [vmem:[%s1253_s28 + $0x154] sm:$0xf0]  ;;  %v937_v37 = vor.u32 %v1109_v25, %v936_v24 }
  0x1f   : > { %663 = vmatpush.bf16.msra.mxu1 %v1017_v13  ;;  %v1112_v34 = vld [vmem:[%s1253_s28 + $0x64] sm:$0xf]  ;;  %v954_v35 = vld [vmem:[%s1253_s28 + $0x68] sm:$0xf0]  ;;  %v928_v38 = vld [vmem:[%s1253_s28 + $0x30] sm:$0xf]  ;;  %v1073_v40 = vor.u32 %v1143_v33, %v1072_v32  ;;  %v1001_v42 = vor.u32 %v1125_v30, %v1000_v29 }
  0x20   : > { %688 = vmatpush.bf16.msra.mxu3 %v965_v31  ;;  %v957_v36 = vor.u32 %v1112_v34, %v954_v35  ;;  %v1107_v39 = vld [vmem:[%s1253_s28 + $0x34] sm:$0xf0]  ;;  %v1064_v41 = vld [vmem:[%s1253_s28 + $0x140] sm:$0xf]  ;;  %v1141_v43 = vld [vmem:[%s1253_s28 + $0x144] sm:$0xf0] }
  0x21   : > { %v1110_v44 = vld [vmem:[%s1253_s28 + $0x54] sm:$0xf]  ;;  %v946_v45 = vld [vmem:[%s1253_s28 + $0x58] sm:$0xf0]  ;;  %v992_v46 = vld [vmem:[%s1253_s28 + $0xb0] sm:$0xf]  ;;  %v929_v49 = vor.u32 %v1107_v39, %v928_v38  ;;  %v1065_v51 = vor.u32 %v1141_v43, %v1064_v41 }
  0x22   : > { %651 = vmatpush.bf16.msra.mxu0 %v945_v23  ;;  %676 = vmatpush.bf16.msra.mxu2 %v1081_v26  ;;  %v1123_v47 = vld [vmem:[%s1253_s28 + $0xb4] sm:$0xf0]  ;;  %v949_v48 = vor.u32 %v1110_v44, %v946_v45  ;;  %v920_v50 = vld [vmem:[%s1253_s28 + $0x20] sm:$0xf]  ;;  %v1108_v52 = vld [vmem:[%s1253_s28 + $0x44] sm:$0xf] }
  0x23   : > { %664 = vmatpush.bf16.msra.mxu1 %v1009_v28  ;;  %v938_v53 = vld [vmem:[%s1253_s28 + $0x48] sm:$0xf0]  ;;  %v993_v54 = vor.u32 %v1123_v47, %v992_v46  ;;  %v1105_v55 = vld [vmem:[%s1253_s28 + $0x24] sm:$0xf0]  ;;  %v1056_v56 = vld [vmem:[%s1253_s28 + $0x130] sm:$0xf] }
  0x24   : > { %689 = vmatpush.bf16.msra.mxu3 %v957_v36  ;;  %v1139_v57 = vld [vmem:[%s1253_s28 + $0x134] sm:$0xf0]  ;;  %v984_v58 = vld [vmem:[%s1253_s28 + $0xa0] sm:$0xf]  ;;  %v1121_v59 = vld [vmem:[%s1253_s28 + $0xa4] sm:$0xf0]  ;;  %v941_v60 = vor.u32 %v1108_v52, %v938_v53  ;;  %v921_v61 = vor.u32 %v1105_v55, %v920_v50 }
  0x25   : > { %v912_v62 = vld [vmem:[%s1253_s28 + $0x10] sm:$0xf]  ;;  %v1057_v63 = vor.u32 %v1139_v57, %v1056_v56  ;;  %v1106_v0 = vld [vmem:[%s1253_s28 + $0x34] sm:$0xf]  ;;  %v930_v1 = vld [vmem:[%s1253_s28 + $0x38] sm:$0xf0]  ;;  %v985_v2 = vor.u32 %v1121_v59, %v984_v58 }
  0x26   : > { %652 = vmatpush.bf16.msra.mxu0 %v937_v37  ;;  %677 = vmatpush.bf16.msra.mxu2 %v1073_v40  ;;  %v1103_v3 = vld [vmem:[%s1253_s28 + $0x14] sm:$0xf0]  ;;  %v1048_v4 = vld [vmem:[%s1253_s28 + $0x120] sm:$0xf]  ;;  %v1137_v5 = vld [vmem:[%s1253_s28 + $0x124] sm:$0xf0]  ;;  %v933_v10 = vor.u32 %v1106_v0, %v930_v1 }
  0x27   : > { %665 = vmatpush.bf16.msra.mxu1 %v1001_v42  ;;  %v976_v6 = vld [vmem:[%s1253_s28 + $0x90] sm:$0xf]  ;;  %v1119_v7 = vld [vmem:[%s1253_s28 + $0x94] sm:$0xf0]  ;;  %v904_v8 = vld [vmem:[%s1253_s28] sm:$0xf]  ;;  %v913_v11 = vor.u32 %v1103_v3, %v912_v62  ;;  %v1049_v12 = vor.u32 %v1137_v5, %v1048_v4 }
  0x28   : > { %690 = vmatpush.bf16.msra.mxu3 %v949_v48  ;;  %v1101_v9 = vld [vmem:[%s1253_s28 + $0x4] sm:$0xf0]  ;;  %v1104_v13 = vld [vmem:[%s1253_s28 + $0x24] sm:$0xf]  ;;  %v922_v14 = vld [vmem:[%s1253_s28 + $0x28] sm:$0xf0]  ;;  %v977_v16 = vor.u32 %v1119_v7, %v976_v6 }
  0x29   : > { %v348_v15 = vld [vmem:[%s1248_s24] sm:$0xff]  ;;  %v1040_v18 = vld [vmem:[%s1253_s28 + $0x110] sm:$0xf]  ;;  %v1135_v19 = vld [vmem:[%s1253_s28 + $0x114] sm:$0xf0]  ;;  %v925_v25 = vor.u32 %v1104_v13, %v922_v14  ;;  %v905_v27 = vor.u32 %v1101_v9, %v904_v8  ;;  %p1094_p7 = scmp.ne.s32.totalorder %s1187_s15, 5 }
  0x2a   : > { %653 = vmatpush.bf16.msra.mxu0 %v929_v49  ;;  %678 = vmatpush.bf16.msra.mxu2 %v1065_v51  ;;  %v968_v17 = vld [vmem:[%s1253_s28 + $0x80] sm:$0xf]  ;;  %v1117_v20 = vld [vmem:[%s1253_s28 + $0x84] sm:$0xf0]  ;;  %v1130_v21 = vld [vmem:[%s1253_s28 + $0xf4] sm:$0xf]  ;;  %v400_v26 = vunpack.c.l.b16 %v348_v15  ;;  %v1041_v28 = vor.u32 %v1135_v19, %v1040_v18  ;;  %v401_v29 = vunpack.c.h.b16 %v348_v15 }
  0x2b   : > { %666 = vmatpush.bf16.msra.mxu1 %v993_v54  ;;  %v1026_v22 = vld [vmem:[%s1253_s28 + $0xf8] sm:$0xf0]  ;;  %v1146_v23 = vld [vmem:[%s1253_s28 + $0x174] sm:$0xf]  ;;  %v349_v32 = vld [vmem:[%s1248_s24 + $0x8] sm:$0xf]  ;;  %v969_v33 = vor.u32 %v1117_v20, %v968_v17 }
  0x2c   : > { %691 = vmatpush.bf16.msra.mxu3 %v941_v60  ;;  %v1090_v24 = vld [vmem:[%s1253_s28 + $0x178] sm:$0xf0]  ;;  %v1102_v30 = vld [vmem:[%s1253_s28 + $0x14] sm:$0xf]  ;;  %v1029_v34 = vor.u32 %v1130_v21, %v1026_v22  ;;  %v1032_v35 = vld [vmem:[%s1253_s28 + $0x100] sm:$0xf]  ;;  %v403_v42 = vpack.c.b16 %v400_v26, %v400_v26  ;;  %v402_v44 = vunpack.c.l.b16 %v349_v32  ;;  %v1328_v45 = vpack.c.b16 %v401_v29, %v401_v29 }
  0x2d   : > { %v914_v31 = vld [vmem:[%s1253_s28 + $0x18] sm:$0xf0]  ;;  %v1133_v36 = vld [vmem:[%s1253_s28 + $0x104] sm:$0xf0]  ;;  %v1093_v37 = vor.u32 %v1146_v23, %v1090_v24  ;;  %v1128_v38 = vld [vmem:[%s1253_s28 + $0xe4] sm:$0xf] }
  0x2e   : > { %654 = vmatpush.bf16.msra.mxu0 %v921_v61  ;;  %679 = vmatpush.bf16.msra.mxu2 %v1057_v63  ;;  %v1018_v39 = vld [vmem:[%s1253_s28 + $0xe8] sm:$0xf0]  ;;  %v1144_v40 = vld [vmem:[%s1253_s28 + $0x164] sm:$0xf]  ;;  %v917_v43 = vor.u32 %v1102_v30, %v914_v31  ;;  %v1033_v46 = vor.u32 %v1133_v36, %v1032_v35  ;;  %v1126_v51 = vld [vmem:[%s1253_s28 + $0xd4] sm:$0xf]  ;;  %v405_v55 = vpack.c.b16 %v402_v44, %v402_v44 }
  0x2f   : > { %667 = vmatpush.bf16.msra.mxu1 %v985_v2  ;;  %v1082_v41 = vld [vmem:[%s1253_s28 + $0x168] sm:$0xf0]  ;;  %v1100_v47 = vld [vmem:[%s1253_s28 + $0x4] sm:$0xf]  ;;  %v1021_v49 = vor.u32 %v1128_v38, %v1018_v39  ;;  %v1010_v52 = vld [vmem:[%s1253_s28 + $0xd8] sm:$0xf0] }
  0x30   : > { %692 = vmatpush.bf16.msra.mxu3 %v933_v10  ;;  %v906_v48 = vld [vmem:[%s1253_s28 + $0x8] sm:$0xf0]  ;;  %v1085_v50 = vor.u32 %v1144_v40, %v1082_v41  ;;  %v1142_v53 = vld [vmem:[%s1253_s28 + $0x154] sm:$0xf]  ;;  %v1074_v54 = vld [vmem:[%s1253_s28 + $0x158] sm:$0xf0]  ;;  %v1013_v57 = vor.u32 %v1126_v51, %v1010_v52 }
  0x31   : > { %v909_v56 = vor.u32 %v1100_v47, %v906_v48  ;;  %v1077_v58 = vor.u32 %v1142_v53, %v1074_v54  ;;  %v1124_v59 = vld [vmem:[%s1253_s28 + $0xc4] sm:$0xf]  ;;  %v1002_v60 = vld [vmem:[%s1253_s28 + $0xc8] sm:$0xf0]  ;;  %v1122_v1 = vld [vmem:[%s1253_s28 + $0xb4] sm:$0xf] }
  0x32   : > { %655 = vmatpush.bf16.msra.mxu0 %v913_v11  ;;  %680 = vmatpush.bf16.msra.mxu2 %v1049_v12  ;;  %v1140_v61 = vld [vmem:[%s1253_s28 + $0x144] sm:$0xf]  ;;  %v1066_v62 = vld [vmem:[%s1253_s28 + $0x148] sm:$0xf0]  ;;  %v1005_v63 = vor.u32 %v1124_v59, %v1002_v60  ;;  %v994_v2 = vld [vmem:[%s1253_s28 + $0xb8] sm:$0xf0] }
  0x33   : > { %668 = vmatpush.bf16.msra.mxu1 %v977_v16  ;;  %v1069_v0 = vor.u32 %v1140_v61, %v1066_v62  ;;  %v1138_v3 = vld [vmem:[%s1253_s28 + $0x134] sm:$0xf]  ;;  %v1058_v4 = vld [vmem:[%s1253_s28 + $0x138] sm:$0xf0]  ;;  %v997_v5 = vor.u32 %v1122_v1, %v994_v2  ;;  %v1120_v7 = vld [vmem:[%s1253_s28 + $0xa4] sm:$0xf] }
  0x34   : > { %693 = vmatpush.bf16.msra.mxu3 %v925_v25  ;;  %v1061_v6 = vor.u32 %v1138_v3, %v1058_v4  ;;  %v986_v8 = vld [vmem:[%s1253_s28 + $0xa8] sm:$0xf0]  ;;  %v1136_v9 = vld [vmem:[%s1253_s28 + $0x124] sm:$0xf]  ;;  %v1118_v13 = vld [vmem:[%s1253_s28 + $0x94] sm:$0xf] }
  0x35   : > { %v1050_v10 = vld [vmem:[%s1253_s28 + $0x128] sm:$0xf0]  ;;  %v989_v11 = vor.u32 %v1120_v7, %v986_v8  ;;  %v978_v14 = vld [vmem:[%s1253_s28 + $0x98] sm:$0xf0]  ;;  %v1134_v15 = vld [vmem:[%s1253_s28 + $0x114] sm:$0xf] }
  0x36   : > { %656 = vmatpush.bf16.msra.mxu0 %v905_v27  ;;  %681 = vmatpush.bf16.msra.mxu2 %v1041_v28  ;;  %v1053_v12 = vor.u32 %v1136_v9, %v1050_v10  ;;  %v1042_v16 = vld [vmem:[%s1253_s28 + $0x118] sm:$0xf0]  ;;  %v981_v17 = vor.u32 %v1118_v13, %v978_v14  ;;  %v1116_v19 = vld [vmem:[%s1253_s28 + $0x84] sm:$0xf]  ;;  %v970_v20 = vld [vmem:[%s1253_s28 + $0x88] sm:$0xf0] }
  0x37   : > { %669 = vmatpush.bf16.msra.mxu1 %v969_v33  ;;  %v1045_v18 = vor.u32 %v1134_v15, %v1042_v16  ;;  %v1132_v21 = vld [vmem:[%s1253_s28 + $0x104] sm:$0xf]  ;;  %v1034_v22 = vld [vmem:[%s1253_s28 + $0x108] sm:$0xf0]  ;;  %v973_v23 = vor.u32 %v1116_v19, %v970_v20 }
  0x38   : > { %694 = vmatpush.bf16.msra.mxu3 %v917_v43  ;;  %v1037_v24 = vor.u32 %v1132_v21, %v1034_v22  ;;  %v346_v30 = vld [vmem:[#allocation2] sm:$0xff]  ;;  %v347_v40 = vld [vmem:[#allocation2 + $0x8] sm:$0xff] }
  0x39   : > { %657 = vmatmul.bf16.vlgmr.msra.gmra.mxu0 %v403_v42 }
  0x3a   : > { %701 = vmatpush.bf16.msrb.mxu0 %v1029_v34  ;;  %670 = vmatmul.bf16.vlgmr.msra.gmra.mxu1 %v1328_v45 }
  0x3b   : > { %714 = vmatpush.bf16.msrb.mxu1 %v1093_v37  ;;  %682 = vmatpush.bf16.msra.mxu2 %v1033_v46 }
  0x3c   : > { %695 = vmatpush.bf16.msra.mxu3 %v909_v56 }
  0x3e   : > { %702 = vmatpush.bf16.msrb.mxu0 %v1021_v49  ;;  %683 = vmatmul.bf16.vlgmr.msra.gmra.mxu2 %v405_v55 }
  0x3f   : > { %715 = vmatpush.bf16.msrb.mxu1 %v1085_v50  ;;  %696 = vmatmul.bf16.vlgmr.msra.gmra.mxu3 %v403_v42 }
  0x42   : > { %703 = vmatpush.bf16.msrb.mxu0 %v1013_v57 }
  0x43   : > { %716 = vmatpush.bf16.msrb.mxu1 %v1077_v58 }
  0x46   : > { %704 = vmatpush.bf16.msrb.mxu0 %v1005_v63 }
  0x47   : > { %717 = vmatpush.bf16.msrb.mxu1 %v1069_v0 }
  0x4a   : > { %705 = vmatpush.bf16.msrb.mxu0 %v997_v5 }
  0x4b   : > { %718 = vmatpush.bf16.msrb.mxu1 %v1061_v6 }
  0x4e   : > { %706 = vmatpush.bf16.msrb.mxu0 %v989_v11 }
  0x4f   : > { %719 = vmatpush.bf16.msrb.mxu1 %v1053_v12 }
  0x52   : > { %707 = vmatpush.bf16.msrb.mxu0 %v981_v17 }
  0x53   : > { %720 = vmatpush.bf16.msrb.mxu1 %v1045_v18 }
  0x56   : > { %708 = vmatpush.bf16.msrb.mxu0 %v973_v23 }
  0x57   : > { %721 = vmatpush.bf16.msrb.mxu1 %v1037_v24 }
  0x59   : > { %709 = vmatmul.bf16.vlgmr.msrb.gmra.mxu0 %v1328_v45 }
  0x5a   : > { %722 = vmatmul.bf16.vlgmr.msrb.gmra.mxu1 %v405_v55 }
  0xb6   : > { %v658_v25 = vpop.f32.mrf.mxu0 }
  0xb7   : > { %v671_v26 = vpop.f32.mrf.mxu1 }
  0xb8   : > { %v672_v27 = vadd.f32 %v671_v26, %v658_v25 }
  0xbe   : > { %v660_v28 = vpop.f32.mrf.mxu0 }
  0xbf   : > { %v673_v29 = vpop.f32.mrf.mxu1 }
  0xc1   : > { %v684_v31 = vpop.f32.mrf.mxu2 }
  0xc2   : > { %v685_v32 = vadd.f32 %v684_v31, %v672_v27  ;;  %v697_v34 = vpop.f32.mrf.mxu3 }
  0xc4   : > { %v727_v33 = vadd.f32 %v685_v32, %v346_v30 }
  0xc6   : > { %729 = vst [vmem:[#allocation2] sm:$0xff] %v727_v33 }
  0xc9   : > { %v686_v35 = vpop.f32.mrf.mxu2 }
  0xca   : > { %v699_v36 = vpop.f32.mrf.mxu3 }
  0xd6   : > { %v710_v37 = vpop.f32.mrf.mxu0 }
  0xd7   : > { %v711_v38 = vadd.f32 %v710_v37, %v697_v34  ;;  %v723_v39 = vpop.f32.mrf.mxu1 }
  0xd9   : > { %v724_v41 = vadd.f32 %v723_v39, %v711_v38 }
  0xdb   : > { %v728_v42 = vadd.f32 %v724_v41, %v347_v40  ;;  %734 = sbr.rel (%p1094_p7) target bundleno = 238 (0xee), region = 44 }
  0xdd   : > { %730 = vst [vmem:[#allocation2 + $0x8] sm:$0xff] %v728_v42 }
  0xde   : > { %v712_v43 = vpop.f32.mrf.mxu0 }
  0xdf   : > { %v725_v44 = vpop.f32.mrf.mxu1 }
  0xe0   : > { %v735_v45 = vld [vmem:[#allocation2] sm:$0xff] }
  0xe1   : > { %v737_v47 = vld [vmem:[%s1379_s2] sm:$0x3] }
  0xe2   : > { %v739_v48 = vperm.slane %v737_v47, 0  ;;  %v740_v49 = vperm.slane %v737_v47, 1  ;;  %v745_v50 = vld [vmem:[%s1380_s3] sm:$0xff] }
  0xe3   : > { %v746_v51 = vunpack.c.l.bf16 %v745_v50  ;;  %v747_v52 = vunpack.c.h.bf16 %v745_v50 }
  0xe4   : > { %v736_v46 = vld [vmem:[#allocation2 + $0x8] sm:$0xff]  ;;  %v743_v53 = vadd.f32 %v739_v48, %v735_v45 }
  0xe5   : > { %v744_v54 = vadd.f32 %v740_v49, %v736_v46 }
  0xe6   : > { %v748_v55 = vadd.f32 %v746_v51, %v743_v53 }
  0xe7   : > { %v749_v56 = vadd.f32 %v747_v52, %v744_v54 }
  0xe8   : > { %v750_v57 = vmax.f32 %v748_v55, 0.0 }
  0xe9   : > { %v751_v58 = vmax.f32 %v749_v56, 0.0 }
  0xeb   : > { %v752_v59 = vpack.c.bf16 %v751_v58, %v750_v57 }
  0xed   : > { %753 = vst [vmem:[%s1381_s4] sm:$0xff] %v752_v59 }
  0xee PF: > { %s14_s17 = sadd.s32 1, %s1195_s17   ;;  %s1382_s15 = smov %s1191_s16 }
  0xef   : > { %p11_p8 = scmp.ge.s32.totalorder %s14_s17, 8   ;;  %s1383_s16 = smov %s1385_s18 }
  0xf1   :  { %13 = sbr.rel (!%p11_p8) target bundleno = 2 (0x2), region = 83 }

// kernel: resnet_forward.18
= control target key start
LH: loop header
LB: loop body
LE: loop exit
PB: predicated region body
PF: predicated region fallthrough
CT: control target
= control target key end

     0   :  { %s1128_s12 = smov 0   ;;  %s1130_s13 = smov 0   ;;  %s1279_s0 = inlined_call_operand.vmem [shape: bf16[8,1152], index: 0, kind: input, shape index: {}]   ;;  %s1280_s1 = inlined_call_operand.vmem [shape: bf16[1152,256], index: 1, kind: input, shape index: {}]   ;;  %s1281_s2 = inlined_call_operand.vmem [shape: f32[1,256], index: 2, kind: input, shape index: {}]   ;;  %s1282_s3 = inlined_call_operand.vmem [shape: bf16[8,256], index: 3, kind: output, shape index: {}]  }
   0x1   :  { %s1132_s14 = smov 0  }
   0x2 LB: > { %s25_s15 = sadd.s32 1, %s1101_s13  ;;  %p807_p0 = scmp.ge.s32.totalorder %s1105_s14, 1  ;;  %s1105_s14 = sphi %s1132_s14, %s13_s14   ;;  %s1101_s13 = sphi %s1130_s13, %s1284_s13   ;;  %s1097_s12 = sphi %s1128_s12, %s1283_s12  }
   0x3   : > { %p26_p1 = scmp.ge.s32.totalorder %s25_s15, 3  ;;  %p194_p2 = scmp.lt.s32.totalorder %s1105_s14, 4 }
   0x5   : > { %s1286_s15 = smov (%p26_p1, %s25_s15), 0  ;;  %p195_p3 = pnand %p807_p0, %p194_p2 }
   0x6   : > { %s240_s16 = smul.u32 (!%p195_p3), 3, %s1097_s12  ;;  %p811_p6 = scmp.ne.s32.totalorder (!%p195_p3), %s1097_s12, 0 }
   0x7   : > { %198 = sbr.rel (%p195_p3) target bundleno = 236 (0xec), region = 32 }
   0x8   : > { %s250_s17 = smul.u32 (!%p195_p3), 48, %s1097_s12  ;;  %p243_p4 = scmp.lt.s32.totalorder (!%p195_p3), %s240_s16, 8 }
   0xa   : > { %p252_p5 = scmp.lt.s32.totalorder (!%p195_p3), %s250_s17, 143 }
   0xc   : > { %s1288_s16 = smov (!%p243_p4, %s240_s16), 8  ;;  %s1290_s17 = smov (!%p252_p5, %s250_s17), 143 }
   0xd   : > { %s808_s18 = sshll.u32 %s1288_s16, 2  ;;  %s1009_s22 = sshll.u32 %s1290_s17, 3 }
   0xe   : > { %s1153_s21 = scalar_lea.vmem %s1279_s0, %s808_s18  ;;  %s1158_s25 = scalar_lea.vmem %s1280_s1, %s1009_s22 }
   0xf   : > { %280 = sbr.rel (%p811_p6) target bundleno = 23 (0x17), region = 36 }
  0x14   : > { %v1107_v0 = vmov 0.0  }
  0x15   : > { %281 = vst [vmem:[#allocation2] sm:$0xff] %v1107_v0 }
  0x16   : > { %282 = vst [vmem:[#allocation2 + $0x8] sm:$0xff] %v1107_v0 }
  0x17 PF: > { %v870_v1 = vld [vmem:[%s1158_s25 + $0x70] sm:$0xf]  ;;  %v1025_v2 = vld [vmem:[%s1158_s25 + $0x74] sm:$0xf0]  ;;  %v862_v6 = vld [vmem:[%s1158_s25 + $0x60] sm:$0xf] }
  0x18   : > { %v934_v3 = vld [vmem:[%s1158_s25 + $0xf0] sm:$0xf]  ;;  %v871_v4 = vor.u32 %v1025_v2, %v870_v1  ;;  %v1041_v5 = vld [vmem:[%s1158_s25 + $0xf4] sm:$0xf0]  ;;  %v1023_v7 = vld [vmem:[%s1158_s25 + $0x64] sm:$0xf0] }
  0x19   : > { %v935_v8 = vor.u32 %v1041_v5, %v934_v3  ;;  %v926_v9 = vld [vmem:[%s1158_s25 + $0xe0] sm:$0xf]  ;;  %v1039_v10 = vld [vmem:[%s1158_s25 + $0xe4] sm:$0xf0]  ;;  %v863_v11 = vor.u32 %v1023_v7, %v862_v6  ;;  %v854_v12 = vld [vmem:[%s1158_s25 + $0x50] sm:$0xf] }
  0x1a   : > { %586 = vmatpush.bf16.msra.mxu0 %v871_v4  ;;  %v927_v13 = vor.u32 %v1039_v10, %v926_v9  ;;  %v1021_v14 = vld [vmem:[%s1158_s25 + $0x54] sm:$0xf0]  ;;  %v998_v15 = vld [vmem:[%s1158_s25 + $0x170] sm:$0xf]  ;;  %v990_v20 = vld [vmem:[%s1158_s25 + $0x160] sm:$0xf] }
  0x1b   : > { %599 = vmatpush.bf16.msra.mxu1 %v935_v8  ;;  %v1057_v16 = vld [vmem:[%s1158_s25 + $0x174] sm:$0xf0]  ;;  %v918_v17 = vld [vmem:[%s1158_s25 + $0xd0] sm:$0xf]  ;;  %v1055_v21 = vld [vmem:[%s1158_s25 + $0x164] sm:$0xf0]  ;;  %v855_v23 = vor.u32 %v1021_v14, %v854_v12 }
  0x1c   : > { %v1037_v18 = vld [vmem:[%s1158_s25 + $0xd4] sm:$0xf0]  ;;  %v999_v19 = vor.u32 %v1057_v16, %v998_v15  ;;  %v1024_v22 = vld [vmem:[%s1158_s25 + $0x74] sm:$0xf]  ;;  %v846_v24 = vld [vmem:[%s1158_s25 + $0x40] sm:$0xf]  ;;  %v991_v26 = vor.u32 %v1055_v21, %v990_v20 }
  0x1d   : > { %v1019_v25 = vld [vmem:[%s1158_s25 + $0x44] sm:$0xf0]  ;;  %v872_v27 = vld [vmem:[%s1158_s25 + $0x78] sm:$0xf0]  ;;  %v919_v28 = vor.u32 %v1037_v18, %v918_v17  ;;  %v910_v29 = vld [vmem:[%s1158_s25 + $0xc0] sm:$0xf] }
  0x1e   : > { %587 = vmatpush.bf16.msra.mxu0 %v863_v11  ;;  %612 = vmatpush.bf16.msra.mxu2 %v999_v19  ;;  %v1035_v30 = vld [vmem:[%s1158_s25 + $0xc4] sm:$0xf0]  ;;  %v875_v31 = vor.u32 %v1024_v22, %v872_v27  ;;  %v982_v32 = vld [vmem:[%s1158_s25 + $0x150] sm:$0xf]  ;;  %v1053_v33 = vld [vmem:[%s1158_s25 + $0x154] sm:$0xf0]  ;;  %v847_v37 = vor.u32 %v1019_v25, %v846_v24 }
  0x1f   : > { %600 = vmatpush.bf16.msra.mxu1 %v927_v13  ;;  %v1022_v34 = vld [vmem:[%s1158_s25 + $0x64] sm:$0xf]  ;;  %v864_v35 = vld [vmem:[%s1158_s25 + $0x68] sm:$0xf0]  ;;  %v838_v38 = vld [vmem:[%s1158_s25 + $0x30] sm:$0xf]  ;;  %v983_v40 = vor.u32 %v1053_v33, %v982_v32  ;;  %v911_v42 = vor.u32 %v1035_v30, %v910_v29 }
  0x20   : > { %625 = vmatpush.bf16.msra.mxu3 %v875_v31  ;;  %v867_v36 = vor.u32 %v1022_v34, %v864_v35  ;;  %v1017_v39 = vld [vmem:[%s1158_s25 + $0x34] sm:$0xf0]  ;;  %v974_v41 = vld [vmem:[%s1158_s25 + $0x140] sm:$0xf]  ;;  %v1051_v43 = vld [vmem:[%s1158_s25 + $0x144] sm:$0xf0] }
  0x21   : > { %v1020_v44 = vld [vmem:[%s1158_s25 + $0x54] sm:$0xf]  ;;  %v856_v45 = vld [vmem:[%s1158_s25 + $0x58] sm:$0xf0]  ;;  %v902_v46 = vld [vmem:[%s1158_s25 + $0xb0] sm:$0xf]  ;;  %v839_v49 = vor.u32 %v1017_v39, %v838_v38  ;;  %v975_v51 = vor.u32 %v1051_v43, %v974_v41 }
  0x22   : > { %588 = vmatpush.bf16.msra.mxu0 %v855_v23  ;;  %613 = vmatpush.bf16.msra.mxu2 %v991_v26  ;;  %v1033_v47 = vld [vmem:[%s1158_s25 + $0xb4] sm:$0xf0]  ;;  %v859_v48 = vor.u32 %v1020_v44, %v856_v45  ;;  %v830_v50 = vld [vmem:[%s1158_s25 + $0x20] sm:$0xf]  ;;  %v1018_v52 = vld [vmem:[%s1158_s25 + $0x44] sm:$0xf] }
  0x23   : > { %601 = vmatpush.bf16.msra.mxu1 %v919_v28  ;;  %v848_v53 = vld [vmem:[%s1158_s25 + $0x48] sm:$0xf0]  ;;  %v903_v54 = vor.u32 %v1033_v47, %v902_v46  ;;  %v1015_v55 = vld [vmem:[%s1158_s25 + $0x24] sm:$0xf0]  ;;  %v966_v56 = vld [vmem:[%s1158_s25 + $0x130] sm:$0xf] }
  0x24   : > { %626 = vmatpush.bf16.msra.mxu3 %v867_v36  ;;  %v1049_v57 = vld [vmem:[%s1158_s25 + $0x134] sm:$0xf0]  ;;  %v894_v58 = vld [vmem:[%s1158_s25 + $0xa0] sm:$0xf]  ;;  %v1031_v59 = vld [vmem:[%s1158_s25 + $0xa4] sm:$0xf0]  ;;  %v851_v60 = vor.u32 %v1018_v52, %v848_v53  ;;  %v831_v61 = vor.u32 %v1015_v55, %v830_v50 }
  0x25   : > { %v822_v62 = vld [vmem:[%s1158_s25 + $0x10] sm:$0xf]  ;;  %v967_v63 = vor.u32 %v1049_v57, %v966_v56  ;;  %v1016_v0 = vld [vmem:[%s1158_s25 + $0x34] sm:$0xf]  ;;  %v840_v1 = vld [vmem:[%s1158_s25 + $0x38] sm:$0xf0]  ;;  %v895_v2 = vor.u32 %v1031_v59, %v894_v58 }
  0x26   : > { %589 = vmatpush.bf16.msra.mxu0 %v847_v37  ;;  %614 = vmatpush.bf16.msra.mxu2 %v983_v40  ;;  %v1013_v3 = vld [vmem:[%s1158_s25 + $0x14] sm:$0xf0]  ;;  %v958_v4 = vld [vmem:[%s1158_s25 + $0x120] sm:$0xf]  ;;  %v1047_v5 = vld [vmem:[%s1158_s25 + $0x124] sm:$0xf0]  ;;  %v843_v10 = vor.u32 %v1016_v0, %v840_v1 }
  0x27   : > { %602 = vmatpush.bf16.msra.mxu1 %v911_v42  ;;  %v886_v6 = vld [vmem:[%s1158_s25 + $0x90] sm:$0xf]  ;;  %v1029_v7 = vld [vmem:[%s1158_s25 + $0x94] sm:$0xf0]  ;;  %v814_v8 = vld [vmem:[%s1158_s25] sm:$0xf]  ;;  %v823_v11 = vor.u32 %v1013_v3, %v822_v62  ;;  %v959_v12 = vor.u32 %v1047_v5, %v958_v4 }
  0x28   : > { %627 = vmatpush.bf16.msra.mxu3 %v859_v48  ;;  %v1011_v9 = vld [vmem:[%s1158_s25 + $0x4] sm:$0xf0]  ;;  %v1014_v13 = vld [vmem:[%s1158_s25 + $0x24] sm:$0xf]  ;;  %v832_v14 = vld [vmem:[%s1158_s25 + $0x28] sm:$0xf0]  ;;  %v887_v16 = vor.u32 %v1029_v7, %v886_v6 }
  0x29   : > { %v285_v15 = vld [vmem:[%s1153_s21] sm:$0xff]  ;;  %v950_v18 = vld [vmem:[%s1158_s25 + $0x110] sm:$0xf]  ;;  %v1045_v19 = vld [vmem:[%s1158_s25 + $0x114] sm:$0xf0]  ;;  %v835_v25 = vor.u32 %v1014_v13, %v832_v14  ;;  %v815_v27 = vor.u32 %v1011_v9, %v814_v8  ;;  %p1004_p7 = scmp.ne.s32.totalorder %s1097_s12, 2 }
  0x2a   : > { %590 = vmatpush.bf16.msra.mxu0 %v839_v49  ;;  %615 = vmatpush.bf16.msra.mxu2 %v975_v51  ;;  %v878_v17 = vld [vmem:[%s1158_s25 + $0x80] sm:$0xf]  ;;  %v1027_v20 = vld [vmem:[%s1158_s25 + $0x84] sm:$0xf0]  ;;  %v1040_v21 = vld [vmem:[%s1158_s25 + $0xf4] sm:$0xf]  ;;  %v337_v26 = vunpack.c.l.b16 %v285_v15  ;;  %v951_v28 = vor.u32 %v1045_v19, %v950_v18  ;;  %v338_v29 = vunpack.c.h.b16 %v285_v15 }
  0x2b   : > { %603 = vmatpush.bf16.msra.mxu1 %v903_v54  ;;  %v936_v22 = vld [vmem:[%s1158_s25 + $0xf8] sm:$0xf0]  ;;  %v1056_v23 = vld [vmem:[%s1158_s25 + $0x174] sm:$0xf]  ;;  %v286_v32 = vld [vmem:[%s1153_s21 + $0x8] sm:$0xf]  ;;  %v879_v33 = vor.u32 %v1027_v20, %v878_v17 }
  0x2c   : > { %628 = vmatpush.bf16.msra.mxu3 %v851_v60  ;;  %v1000_v24 = vld [vmem:[%s1158_s25 + $0x178] sm:$0xf0]  ;;  %v1012_v30 = vld [vmem:[%s1158_s25 + $0x14] sm:$0xf]  ;;  %v939_v34 = vor.u32 %v1040_v21, %v936_v22  ;;  %v942_v35 = vld [vmem:[%s1158_s25 + $0x100] sm:$0xf]  ;;  %v340_v42 = vpack.c.b16 %v337_v26, %v337_v26  ;;  %v339_v44 = vunpack.c.l.b16 %v286_v32  ;;  %v1233_v45 = vpack.c.b16 %v338_v29, %v338_v29 }
  0x2d   : > { %v824_v31 = vld [vmem:[%s1158_s25 + $0x18] sm:$0xf0]  ;;  %v1043_v36 = vld [vmem:[%s1158_s25 + $0x104] sm:$0xf0]  ;;  %v1003_v37 = vor.u32 %v1056_v23, %v1000_v24  ;;  %v1038_v38 = vld [vmem:[%s1158_s25 + $0xe4] sm:$0xf] }
  0x2e   : > { %591 = vmatpush.bf16.msra.mxu0 %v831_v61  ;;  %616 = vmatpush.bf16.msra.mxu2 %v967_v63  ;;  %v928_v39 = vld [vmem:[%s1158_s25 + $0xe8] sm:$0xf0]  ;;  %v1054_v40 = vld [vmem:[%s1158_s25 + $0x164] sm:$0xf]  ;;  %v827_v43 = vor.u32 %v1012_v30, %v824_v31  ;;  %v943_v46 = vor.u32 %v1043_v36, %v942_v35  ;;  %v1036_v51 = vld [vmem:[%s1158_s25 + $0xd4] sm:$0xf]  ;;  %v342_v55 = vpack.c.b16 %v339_v44, %v339_v44 }
  0x2f   : > { %604 = vmatpush.bf16.msra.mxu1 %v895_v2  ;;  %v992_v41 = vld [vmem:[%s1158_s25 + $0x168] sm:$0xf0]  ;;  %v1010_v47 = vld [vmem:[%s1158_s25 + $0x4] sm:$0xf]  ;;  %v931_v49 = vor.u32 %v1038_v38, %v928_v39  ;;  %v920_v52 = vld [vmem:[%s1158_s25 + $0xd8] sm:$0xf0] }
  0x30   : > { %629 = vmatpush.bf16.msra.mxu3 %v843_v10  ;;  %v816_v48 = vld [vmem:[%s1158_s25 + $0x8] sm:$0xf0]  ;;  %v995_v50 = vor.u32 %v1054_v40, %v992_v41  ;;  %v1052_v53 = vld [vmem:[%s1158_s25 + $0x154] sm:$0xf]  ;;  %v984_v54 = vld [vmem:[%s1158_s25 + $0x158] sm:$0xf0]  ;;  %v923_v57 = vor.u32 %v1036_v51, %v920_v52 }
  0x31   : > { %v819_v56 = vor.u32 %v1010_v47, %v816_v48  ;;  %v987_v58 = vor.u32 %v1052_v53, %v984_v54  ;;  %v1034_v59 = vld [vmem:[%s1158_s25 + $0xc4] sm:$0xf]  ;;  %v912_v60 = vld [vmem:[%s1158_s25 + $0xc8] sm:$0xf0]  ;;  %v1032_v1 = vld [vmem:[%s1158_s25 + $0xb4] sm:$0xf] }
  0x32   : > { %592 = vmatpush.bf16.msra.mxu0 %v823_v11  ;;  %617 = vmatpush.bf16.msra.mxu2 %v959_v12  ;;  %v1050_v61 = vld [vmem:[%s1158_s25 + $0x144] sm:$0xf]  ;;  %v976_v62 = vld [vmem:[%s1158_s25 + $0x148] sm:$0xf0]  ;;  %v915_v63 = vor.u32 %v1034_v59, %v912_v60  ;;  %v904_v2 = vld [vmem:[%s1158_s25 + $0xb8] sm:$0xf0] }
  0x33   : > { %605 = vmatpush.bf16.msra.mxu1 %v887_v16  ;;  %v979_v0 = vor.u32 %v1050_v61, %v976_v62  ;;  %v1048_v3 = vld [vmem:[%s1158_s25 + $0x134] sm:$0xf]  ;;  %v968_v4 = vld [vmem:[%s1158_s25 + $0x138] sm:$0xf0]  ;;  %v907_v5 = vor.u32 %v1032_v1, %v904_v2  ;;  %v1030_v7 = vld [vmem:[%s1158_s25 + $0xa4] sm:$0xf] }
  0x34   : > { %630 = vmatpush.bf16.msra.mxu3 %v835_v25  ;;  %v971_v6 = vor.u32 %v1048_v3, %v968_v4  ;;  %v896_v8 = vld [vmem:[%s1158_s25 + $0xa8] sm:$0xf0]  ;;  %v1046_v9 = vld [vmem:[%s1158_s25 + $0x124] sm:$0xf]  ;;  %v1028_v13 = vld [vmem:[%s1158_s25 + $0x94] sm:$0xf] }
  0x35   : > { %v960_v10 = vld [vmem:[%s1158_s25 + $0x128] sm:$0xf0]  ;;  %v899_v11 = vor.u32 %v1030_v7, %v896_v8  ;;  %v888_v14 = vld [vmem:[%s1158_s25 + $0x98] sm:$0xf0]  ;;  %v1044_v15 = vld [vmem:[%s1158_s25 + $0x114] sm:$0xf] }
  0x36   : > { %593 = vmatpush.bf16.msra.mxu0 %v815_v27  ;;  %618 = vmatpush.bf16.msra.mxu2 %v951_v28  ;;  %v963_v12 = vor.u32 %v1046_v9, %v960_v10  ;;  %v952_v16 = vld [vmem:[%s1158_s25 + $0x118] sm:$0xf0]  ;;  %v891_v17 = vor.u32 %v1028_v13, %v888_v14  ;;  %v1026_v19 = vld [vmem:[%s1158_s25 + $0x84] sm:$0xf]  ;;  %v880_v20 = vld [vmem:[%s1158_s25 + $0x88] sm:$0xf0] }
  0x37   : > { %606 = vmatpush.bf16.msra.mxu1 %v879_v33  ;;  %v955_v18 = vor.u32 %v1044_v15, %v952_v16  ;;  %v1042_v21 = vld [vmem:[%s1158_s25 + $0x104] sm:$0xf]  ;;  %v944_v22 = vld [vmem:[%s1158_s25 + $0x108] sm:$0xf0]  ;;  %v883_v23 = vor.u32 %v1026_v19, %v880_v20 }
  0x38   : > { %631 = vmatpush.bf16.msra.mxu3 %v827_v43  ;;  %v947_v24 = vor.u32 %v1042_v21, %v944_v22  ;;  %v283_v30 = vld [vmem:[#allocation2] sm:$0xff]  ;;  %v284_v40 = vld [vmem:[#allocation2 + $0x8] sm:$0xff] }
  0x39   : > { %594 = vmatmul.bf16.vlgmr.msra.gmra.mxu0 %v340_v42 }
  0x3a   : > { %638 = vmatpush.bf16.msrb.mxu0 %v939_v34  ;;  %607 = vmatmul.bf16.vlgmr.msra.gmra.mxu1 %v1233_v45 }
  0x3b   : > { %651 = vmatpush.bf16.msrb.mxu1 %v1003_v37  ;;  %619 = vmatpush.bf16.msra.mxu2 %v943_v46 }
  0x3c   : > { %632 = vmatpush.bf16.msra.mxu3 %v819_v56 }
  0x3e   : > { %639 = vmatpush.bf16.msrb.mxu0 %v931_v49  ;;  %620 = vmatmul.bf16.vlgmr.msra.gmra.mxu2 %v342_v55 }
  0x3f   : > { %652 = vmatpush.bf16.msrb.mxu1 %v995_v50  ;;  %633 = vmatmul.bf16.vlgmr.msra.gmra.mxu3 %v340_v42 }
  0x42   : > { %640 = vmatpush.bf16.msrb.mxu0 %v923_v57 }
  0x43   : > { %653 = vmatpush.bf16.msrb.mxu1 %v987_v58 }
  0x46   : > { %641 = vmatpush.bf16.msrb.mxu0 %v915_v63 }
  0x47   : > { %654 = vmatpush.bf16.msrb.mxu1 %v979_v0 }
  0x4a   : > { %642 = vmatpush.bf16.msrb.mxu0 %v907_v5 }
  0x4b   : > { %655 = vmatpush.bf16.msrb.mxu1 %v971_v6 }
  0x4e   : > { %643 = vmatpush.bf16.msrb.mxu0 %v899_v11 }
  0x4f   : > { %656 = vmatpush.bf16.msrb.mxu1 %v963_v12 }
  0x52   : > { %644 = vmatpush.bf16.msrb.mxu0 %v891_v17 }
  0x53   : > { %657 = vmatpush.bf16.msrb.mxu1 %v955_v18 }
  0x56   : > { %645 = vmatpush.bf16.msrb.mxu0 %v883_v23 }
  0x57   : > { %658 = vmatpush.bf16.msrb.mxu1 %v947_v24 }
  0x59   : > { %646 = vmatmul.bf16.vlgmr.msrb.gmra.mxu0 %v1233_v45 }
  0x5a   : > { %659 = vmatmul.bf16.vlgmr.msrb.gmra.mxu1 %v342_v55 }
  0xb6   : > { %v595_v25 = vpop.f32.mrf.mxu0 }
  0xb7   : > { %v608_v26 = vpop.f32.mrf.mxu1 }
  0xb8   : > { %v609_v27 = vadd.f32 %v608_v26, %v595_v25 }
  0xbe   : > { %v597_v28 = vpop.f32.mrf.mxu0 }
  0xbf   : > { %v610_v29 = vpop.f32.mrf.mxu1 }
  0xc1   : > { %v621_v31 = vpop.f32.mrf.mxu2 }
  0xc2   : > { %v622_v32 = vadd.f32 %v621_v31, %v609_v27  ;;  %v634_v34 = vpop.f32.mrf.mxu3 }
  0xc4   : > { %v664_v33 = vadd.f32 %v622_v32, %v283_v30 }
  0xc6   : > { %666 = vst [vmem:[#allocation2] sm:$0xff] %v664_v33 }
  0xc9   : > { %v623_v35 = vpop.f32.mrf.mxu2 }
  0xca   : > { %v636_v36 = vpop.f32.mrf.mxu3 }
  0xd6   : > { %v647_v37 = vpop.f32.mrf.mxu0 }
  0xd7   : > { %v648_v38 = vadd.f32 %v647_v37, %v634_v34  ;;  %v660_v39 = vpop.f32.mrf.mxu1 }
  0xd9   : > { %v661_v41 = vadd.f32 %v660_v39, %v648_v38 }
  0xdb   : > { %v665_v42 = vadd.f32 %v661_v41, %v284_v40  ;;  %671 = sbr.rel (%p1004_p7) target bundleno = 236 (0xec), region = 40 }
  0xdd   : > { %667 = vst [vmem:[#allocation2 + $0x8] sm:$0xff] %v665_v42 }
  0xde   : > { %v649_v43 = vpop.f32.mrf.mxu0 }
  0xdf   : > { %v662_v44 = vpop.f32.mrf.mxu1 }
  0xe0   : > { %v672_v45 = vld [vmem:[#allocation2] sm:$0xff] }
  0xe1   : > { %v674_v47 = vld [vmem:[%s1281_s2] sm:$0x3] }
  0xe2   : > { %v676_v48 = vperm.slane %v674_v47, 0  ;;  %v677_v49 = vperm.slane %v674_v47, 1 }
  0xe4   : > { %v673_v46 = vld [vmem:[#allocation2 + $0x8] sm:$0xff]  ;;  %v680_v50 = vadd.f32 %v676_v48, %v672_v45 }
  0xe5   : > { %v681_v51 = vadd.f32 %v677_v49, %v673_v46 }
  0xe6   : > { %v682_v52 = vmax.f32 %v680_v50, 0.0 }
  0xe7   : > { %v683_v53 = vmax.f32 %v681_v51, 0.0 }
  0xe9   : > { %v684_v54 = vpack.c.bf16 %v683_v53, %v682_v52 }
  0xeb   : > { %685 = vst [vmem:[%s1282_s3] sm:$0xff] %v684_v54 }
  0xec PF: > { %s13_s14 = sadd.s32 1, %s1105_s14   ;;  %s1283_s12 = smov %s1101_s13 }
  0xed   : > { %p10_p8 = scmp.ge.s32.totalorder %s13_s14, 5   ;;  %s1284_s13 = smov %s1286_s15 }
  0xef   :  { %12 = sbr.rel (!%p10_p8) target bundleno = 2 (0x2), region = 76 }

// kernel: resnet_forward.19
= control target key start
LH: loop header
LB: loop body
LE: loop exit
PB: predicated region body
PF: predicated region fallthrough
CT: control target
= control target key end

     0   :  { %s373_s1 = inlined_call_operand.vmem [shape: bf16[128,256], index: 1, kind: input, shape index: {}]   ;;  %s374_s0 = inlined_call_operand.vmem [shape: bf16[8,128], index: 0, kind: input, shape index: {}]   ;;  %s375_s2 = inlined_call_operand.vmem [shape: f32[1,256], index: 2, kind: input, shape index: {}]   ;;  %s376_s3 = inlined_call_operand.vmem [shape: bf16[8,256], index: 3, kind: output, shape index: {}]  }
   0x1   :  { %v226_v0 = vld [vmem:[%s373_s1 + $0x70] sm:$0xf]  ;;  %v247_v1 = vld [vmem:[%s373_s1 + $0x74] sm:$0xf0]  ;;  %v246_v2 = vld [vmem:[%s373_s1 + $0x74] sm:$0xf] }
   0x2   :  { %v227_v3 = vor.u32 %v247_v1, %v226_v0  ;;  %v228_v4 = vld [vmem:[%s373_s1 + $0x78] sm:$0xf0]  ;;  %v218_v5 = vld [vmem:[%s373_s1 + $0x60] sm:$0xf]  ;;  %v245_v6 = vld [vmem:[%s373_s1 + $0x64] sm:$0xf0] }
   0x3   :  { %v231_v7 = vor.u32 %v246_v2, %v228_v4  ;;  %v244_v8 = vld [vmem:[%s373_s1 + $0x64] sm:$0xf]  ;;  %v220_v9 = vld [vmem:[%s373_s1 + $0x68] sm:$0xf0]  ;;  %v219_v10 = vor.u32 %v245_v6, %v218_v5  ;;  %v210_v12 = vld [vmem:[%s373_s1 + $0x50] sm:$0xf] }
   0x4   :  { %119 = vmatpush.bf16.msra.mxu0 %v227_v3  ;;  %v223_v11 = vor.u32 %v244_v8, %v220_v9  ;;  %v243_v13 = vld [vmem:[%s373_s1 + $0x54] sm:$0xf0]  ;;  %v242_v14 = vld [vmem:[%s373_s1 + $0x54] sm:$0xf]  ;;  %v212_v15 = vld [vmem:[%s373_s1 + $0x58] sm:$0xf0] }
   0x5   :  { %132 = vmatpush.bf16.msra.mxu1 %v231_v7  ;;  %v211_v16 = vor.u32 %v243_v13, %v210_v12  ;;  %v215_v17 = vor.u32 %v242_v14, %v212_v15  ;;  %v202_v18 = vld [vmem:[%s373_s1 + $0x40] sm:$0xf]  ;;  %v241_v19 = vld [vmem:[%s373_s1 + $0x44] sm:$0xf0]  ;;  %v240_v20 = vld [vmem:[%s373_s1 + $0x44] sm:$0xf] }
   0x6   :  { %v204_v21 = vld [vmem:[%s373_s1 + $0x48] sm:$0xf0]  ;;  %v203_v22 = vor.u32 %v241_v19, %v202_v18  ;;  %v194_v24 = vld [vmem:[%s373_s1 + $0x30] sm:$0xf]  ;;  %v239_v25 = vld [vmem:[%s373_s1 + $0x34] sm:$0xf0] }
   0x7   :  { %v207_v23 = vor.u32 %v240_v20, %v204_v21  ;;  %v238_v26 = vld [vmem:[%s373_s1 + $0x34] sm:$0xf]  ;;  %v196_v27 = vld [vmem:[%s373_s1 + $0x38] sm:$0xf0]  ;;  %v195_v28 = vor.u32 %v239_v25, %v194_v24  ;;  %v186_v30 = vld [vmem:[%s373_s1 + $0x20] sm:$0xf] }
   0x8   :  { %120 = vmatpush.bf16.msra.mxu0 %v219_v10  ;;  %v199_v29 = vor.u32 %v238_v26, %v196_v27  ;;  %v237_v31 = vld [vmem:[%s373_s1 + $0x24] sm:$0xf0]  ;;  %v236_v32 = vld [vmem:[%s373_s1 + $0x24] sm:$0xf]  ;;  %v188_v33 = vld [vmem:[%s373_s1 + $0x28] sm:$0xf0] }
   0x9   :  { %133 = vmatpush.bf16.msra.mxu1 %v223_v11  ;;  %v187_v34 = vor.u32 %v237_v31, %v186_v30  ;;  %v191_v35 = vor.u32 %v236_v32, %v188_v33  ;;  %v178_v36 = vld [vmem:[%s373_s1 + $0x10] sm:$0xf]  ;;  %v235_v37 = vld [vmem:[%s373_s1 + $0x14] sm:$0xf0]  ;;  %v234_v38 = vld [vmem:[%s373_s1 + $0x14] sm:$0xf] }
   0xa   :  { %v180_v39 = vld [vmem:[%s373_s1 + $0x18] sm:$0xf0]  ;;  %v179_v40 = vor.u32 %v235_v37, %v178_v36  ;;  %v170_v42 = vld [vmem:[%s373_s1] sm:$0xf]  ;;  %v233_v43 = vld [vmem:[%s373_s1 + $0x4] sm:$0xf0] }
   0xb   :  { %v183_v41 = vor.u32 %v234_v38, %v180_v39  ;;  %v232_v44 = vld [vmem:[%s373_s1 + $0x4] sm:$0xf]  ;;  %v172_v45 = vld [vmem:[%s373_s1 + $0x8] sm:$0xf0]  ;;  %v171_v46 = vor.u32 %v233_v43, %v170_v42  ;;  %v22_v48 = vld [vmem:[%s374_s0] sm:$0xf] }
   0xc   :  { %121 = vmatpush.bf16.msra.mxu0 %v211_v16  ;;  %v175_v47 = vor.u32 %v232_v44, %v172_v45  ;;  %v154_v49 = vld [vmem:[%s375_s2] sm:$0x3] }
   0xd   :  { %134 = vmatpush.bf16.msra.mxu1 %v215_v17  ;;  %v156_v50 = vperm.slane %v154_v49, 0  ;;  %v157_v51 = vperm.slane %v154_v49, 1 }
  0x10   :  { %122 = vmatpush.bf16.msra.mxu0 %v203_v22 }
  0x11   :  { %135 = vmatpush.bf16.msra.mxu1 %v207_v23 }
  0x14   :  { %123 = vmatpush.bf16.msra.mxu0 %v195_v28 }
  0x15   :  { %136 = vmatpush.bf16.msra.mxu1 %v199_v29 }
  0x18   :  { %124 = vmatpush.bf16.msra.mxu0 %v187_v34 }
  0x19   :  { %137 = vmatpush.bf16.msra.mxu1 %v191_v35 }
  0x1c   :  { %125 = vmatpush.bf16.msra.mxu0 %v179_v40 }
  0x1d   :  { %138 = vmatpush.bf16.msra.mxu1 %v183_v41 }
  0x20   :  { %126 = vmatpush.bf16.msra.mxu0 %v171_v46 }
  0x21   :  { %139 = vmatpush.bf16.msra.mxu1 %v175_v47 }
  0x23   :  { %127 = vmatmul.bf16.vlgmr.msra.gmra.mxu0 %v22_v48 }
  0x24   :  { %140 = vmatmul.bf16.vlgmr.msra.gmra.mxu1 %v22_v48 }
  0xa0   :  { %v128_v52 = vpop.f32.mrf.mxu0 }
  0xa1   :  { %v160_v53 = vadd.f32 %v156_v50, %v128_v52  ;;  %v141_v54 = vpop.f32.mrf.mxu1 }
  0xa2   :  { %v161_v55 = vadd.f32 %v157_v51, %v141_v54 }
  0xa4   :  { %v162_v56 = vpack.c.bf16 %v161_v55, %v160_v53 }
  0xa6   :  { %163 = vst [vmem:[%s376_s3] sm:$0xff] %v162_v56 }
  0xa8   :  { %v130_v57 = vpop.f32.mrf.mxu0 }
  0xa9   :  { %v143_v58 = vpop.f32.mrf.mxu1 }

// kernel: resnet_forward.23
= control target key start
LH: loop header
LB: loop body
LE: loop exit
PB: predicated region body
PF: predicated region fallthrough
CT: control target
= control target key end

     0   :  { %s1776_s15 = smov 0   ;;  %s1778_s16 = smov 0   ;;  %s2173_s0 = inlined_call_operand.vmem [shape: bf16[8,4608], index: 0, kind: input, shape index: {}]   ;;  %s2174_s1 = inlined_call_operand.vmem [shape: bf16[4608,512], index: 1, kind: input, shape index: {}]   ;;  %s2175_s2 = inlined_call_operand.vmem [shape: f32[1,512], index: 2, kind: input, shape index: {}]   ;;  %s2176_s3 = inlined_call_operand.vmem [shape: bf16[8,512], index: 3, kind: input, shape index: {}]   ;;  %s2177_s4 = inlined_call_operand.vmem [shape: bf16[8,512], index: 4, kind: output, shape index: {}]  }
   0x1   :  { %s1780_s17 = smov 0   ;;  %s1782_s18 = smov 0  }
   0x2   :  { %s1784_s19 = smov 0   ;;  %s1786_s20 = smov 0  }
   0x3   :  { %s1788_s21 = smov 0  }
   0x4 LB: > { %s26_s22 = sadd.s32 1, %s1740_s19  ;;  %s29_s23 = sadd.s32 1, %s1744_s20  ;;  %s1748_s21 = sphi %s1788_s21, %s14_s21   ;;  %s1744_s20 = sphi %s1786_s20, %s2183_s20   ;;  %s1740_s19 = sphi %s1784_s19, %s2182_s19   ;;  %s1736_s18 = sphi %s1782_s18, %s2181_s18   ;;  %s1732_s17 = sphi %s1780_s17, %s2180_s17   ;;  %s1728_s16 = sphi %s1778_s16, %s2179_s16   ;;  %s1724_s15 = sphi %s1776_s15, %s2178_s15  }
   0x5   : > { %p27_p0 = scmp.ge.s32.totalorder %s26_s22, 9  ;;  %p77_p1 = scmp.ne.s32.totalorder %s1728_s16, %s1724_s15 }
   0x6   : > { %p78_p2 = scmp.eq.s32.totalorder %s1748_s21, 0  ;;  %s70_s27 = sadd.s32 1, %s1728_s16 }
   0x7   : > { %s2185_s22 = smov (%p27_p0, %s26_s22), 0  ;;  %s2187_s23 = smov (!%p27_p0, %s29_s23), %s1744_s20 }
   0x8   : > { %p79_p3 = por %p78_p2, %p77_p1  ;;  %p31_p4 = scmp.ge.s32.totalorder %s2187_s23, 2 }
   0x9   : > { %s65_s24 = ssub.s32 %s1740_s19, %s2185_s22  ;;  %p1297_p6 = scmp.ge.s32.totalorder %s1748_s21, 18 }
   0xa   : > { %s2189_s23 = smov (%p31_p4, %s2187_s23), 0 }
   0xb   : > { %s66_s25 = ssub.s32 %s1744_s20, %s2189_s23  ;;  %185 = sbr.rel (%p1297_p6) target bundleno = 87 (0x57), region = 16 }
   0xc   : > { %s67_s26 = sor.u32 %s66_s25, %s65_s24 }
   0xd   : > { %p68_p5 = scmp.eq.s32.totalorder %s67_s26, 0 }
   0xf   : > { %s1827_s28 = scalar_select %p68_p5, %s1728_s16, %s70_s27  }
  0x10   : > { %201 = sbr.rel (!%p79_p3) target bundleno = 87 (0x57), region = 24  ;;  %s203_s29 = sand.u32 (%p79_p3), 1, %s1728_s16  }
  0x11   : > { %s1300_s30 = sshll.u32 (%p79_p3), %s1744_s20, 1  ;;  %s1298_s5 = sshll.u32 (%p79_p3), %s203_s29, 9 }
  0x12   : > { %s1572_s6 = sshll.u32 (%p79_p3), %s1740_s19, 8  ;;  %s1841_s12 = scalar_lea.vmem (%p79_p3), [#allocation3], %s1298_s5 }
  0x13   : > { %s209_s7 = sadd.s32 (%p79_p3), %s1572_s6, %s1300_s30 }
  0x14   : > { %s1302_s8 = sshll.u32 (%p79_p3), %s209_s7, 2 }
  0x15   : > { %s1836_s11 = scalar_lea.vmem %s2174_s1, %s1302_s8 }
  0x16   : > { %v366_v0 = vld [vmem:[%s1836_s11] sm:$0xff]  ;;  %v368_v1 = vld [vmem:[%s1836_s11 + $0x10] sm:$0xff] }
  0x17   : > { %v370_v2 = vld [vmem:[%s1836_s11 + $0x20] sm:$0xff]  ;;  %367 = vst [vmem:[%s1841_s12] sm:$0xff] %v366_v0  ;;  %v372_v3 = vld [vmem:[%s1836_s11 + $0x30] sm:$0xff] }
  0x18   : > { %369 = vst [vmem:[%s1841_s12 + $0x8] sm:$0xff] %v368_v1  ;;  %v374_v4 = vld [vmem:[%s1836_s11 + $0x40] sm:$0xff]  ;;  %v376_v5 = vld [vmem:[%s1836_s11 + $0x50] sm:$0xff] }
  0x19   : > { %371 = vst [vmem:[%s1841_s12 + $0x10] sm:$0xff] %v370_v2  ;;  %v378_v6 = vld [vmem:[%s1836_s11 + $0x60] sm:$0xff]  ;;  %v380_v7 = vld [vmem:[%s1836_s11 + $0x70] sm:$0xff] }
  0x1a   : > { %373 = vst [vmem:[%s1841_s12 + $0x18] sm:$0xff] %v372_v3  ;;  %v382_v8 = vld [vmem:[%s1836_s11 + $0x80] sm:$0xff]  ;;  %v384_v9 = vld [vmem:[%s1836_s11 + $0x90] sm:$0xff] }
  0x1b   : > { %375 = vst [vmem:[%s1841_s12 + $0x20] sm:$0xff] %v374_v4  ;;  %v386_v10 = vld [vmem:[%s1836_s11 + $0xa0] sm:$0xff]  ;;  %v388_v11 = vld [vmem:[%s1836_s11 + $0xb0] sm:$0xff] }
  0x1c   : > { %377 = vst [vmem:[%s1841_s12 + $0x28] sm:$0xff] %v376_v5  ;;  %v390_v12 = vld [vmem:[%s1836_s11 + $0xc0] sm:$0xff]  ;;  %v392_v13 = vld [vmem:[%s1836_s11 + $0xd0] sm:$0xff] }
  0x1d   : > { %379 = vst [vmem:[%s1841_s12 + $0x30] sm:$0xff] %v378_v6  ;;  %v394_v14 = vld [vmem:[%s1836_s11 + $0xe0] sm:$0xff]  ;;  %v396_v15 = vld [vmem:[%s1836_s11 + $0xf0] sm:$0xff] }
  0x1e   : > { %381 = vst [vmem:[%s1841_s12 + $0x38] sm:$0xff] %v380_v7  ;;  %v398_v16 = vld [vmem:[%s1836_s11 + $0x100] sm:$0xff]  ;;  %v400_v17 = vld [vmem:[%s1836_s11 + $0x110] sm:$0xff] }
  0x1f   : > { %383 = vst [vmem:[%s1841_s12 + $0x40] sm:$0xff] %v382_v8  ;;  %v402_v18 = vld [vmem:[%s1836_s11 + $0x120] sm:$0xff]  ;;  %v404_v19 = vld [vmem:[%s1836_s11 + $0x130] sm:$0xff] }
  0x20   : > { %385 = vst [vmem:[%s1841_s12 + $0x48] sm:$0xff] %v384_v9  ;;  %v406_v20 = vld [vmem:[%s1836_s11 + $0x140] sm:$0xff]  ;;  %v408_v21 = vld [vmem:[%s1836_s11 + $0x150] sm:$0xff] }
  0x21   : > { %387 = vst [vmem:[%s1841_s12 + $0x50] sm:$0xff] %v386_v10  ;;  %v410_v22 = vld [vmem:[%s1836_s11 + $0x160] sm:$0xff]  ;;  %v412_v23 = vld [vmem:[%s1836_s11 + $0x170] sm:$0xff] }
  0x22   : > { %389 = vst [vmem:[%s1841_s12 + $0x58] sm:$0xff] %v388_v11  ;;  %v414_v24 = vld [vmem:[%s1836_s11 + $0x180] sm:$0xff]  ;;  %v416_v25 = vld [vmem:[%s1836_s11 + $0x190] sm:$0xff] }
  0x23   : > { %391 = vst [vmem:[%s1841_s12 + $0x60] sm:$0xff] %v390_v12  ;;  %v418_v26 = vld [vmem:[%s1836_s11 + $0x1a0] sm:$0xff]  ;;  %v420_v27 = vld [vmem:[%s1836_s11 + $0x1b0] sm:$0xff] }
  0x24   : > { %393 = vst [vmem:[%s1841_s12 + $0x68] sm:$0xff] %v392_v13  ;;  %v422_v28 = vld [vmem:[%s1836_s11 + $0x1c0] sm:$0xff]  ;;  %v424_v29 = vld [vmem:[%s1836_s11 + $0x1d0] sm:$0xff] }
  0x25   : > { %395 = vst [vmem:[%s1841_s12 + $0x70] sm:$0xff] %v394_v14  ;;  %v426_v30 = vld [vmem:[%s1836_s11 + $0x1e0] sm:$0xff]  ;;  %v428_v31 = vld [vmem:[%s1836_s11 + $0x1f0] sm:$0xff] }
  0x26   : > { %397 = vst [vmem:[%s1841_s12 + $0x78] sm:$0xff] %v396_v15  ;;  %v430_v32 = vld [vmem:[%s1836_s11 + $0x200] sm:$0xff]  ;;  %v432_v33 = vld [vmem:[%s1836_s11 + $0x210] sm:$0xff] }
  0x27   : > { %399 = vst [vmem:[%s1841_s12 + $0x80] sm:$0xff] %v398_v16  ;;  %v434_v34 = vld [vmem:[%s1836_s11 + $0x220] sm:$0xff]  ;;  %v436_v35 = vld [vmem:[%s1836_s11 + $0x230] sm:$0xff] }
  0x28   : > { %401 = vst [vmem:[%s1841_s12 + $0x88] sm:$0xff] %v400_v17  ;;  %v438_v36 = vld [vmem:[%s1836_s11 + $0x240] sm:$0xff]  ;;  %v440_v37 = vld [vmem:[%s1836_s11 + $0x250] sm:$0xff] }
  0x29   : > { %403 = vst [vmem:[%s1841_s12 + $0x90] sm:$0xff] %v402_v18  ;;  %v442_v38 = vld [vmem:[%s1836_s11 + $0x260] sm:$0xff]  ;;  %v444_v39 = vld [vmem:[%s1836_s11 + $0x270] sm:$0xff] }
  0x2a   : > { %405 = vst [vmem:[%s1841_s12 + $0x98] sm:$0xff] %v404_v19  ;;  %v446_v40 = vld [vmem:[%s1836_s11 + $0x280] sm:$0xff]  ;;  %v448_v41 = vld [vmem:[%s1836_s11 + $0x290] sm:$0xff] }
  0x2b   : > { %407 = vst [vmem:[%s1841_s12 + $0xa0] sm:$0xff] %v406_v20  ;;  %v450_v42 = vld [vmem:[%s1836_s11 + $0x2a0] sm:$0xff]  ;;  %v452_v43 = vld [vmem:[%s1836_s11 + $0x2b0] sm:$0xff] }
  0x2c   : > { %409 = vst [vmem:[%s1841_s12 + $0xa8] sm:$0xff] %v408_v21  ;;  %v454_v44 = vld [vmem:[%s1836_s11 + $0x2c0] sm:$0xff]  ;;  %v456_v45 = vld [vmem:[%s1836_s11 + $0x2d0] sm:$0xff] }
  0x2d   : > { %411 = vst [vmem:[%s1841_s12 + $0xb0] sm:$0xff] %v410_v22  ;;  %v458_v46 = vld [vmem:[%s1836_s11 + $0x2e0] sm:$0xff]  ;;  %v460_v47 = vld [vmem:[%s1836_s11 + $0x2f0] sm:$0xff] }
  0x2e   : > { %413 = vst [vmem:[%s1841_s12 + $0xb8] sm:$0xff] %v412_v23  ;;  %v462_v48 = vld [vmem:[%s1836_s11 + $0x300] sm:$0xff]  ;;  %v464_v49 = vld [vmem:[%s1836_s11 + $0x310] sm:$0xff] }
  0x2f   : > { %415 = vst [vmem:[%s1841_s12 + $0xc0] sm:$0xff] %v414_v24  ;;  %v466_v50 = vld [vmem:[%s1836_s11 + $0x320] sm:$0xff]  ;;  %v468_v51 = vld [vmem:[%s1836_s11 + $0x330] sm:$0xff] }
  0x30   : > { %417 = vst [vmem:[%s1841_s12 + $0xc8] sm:$0xff] %v416_v25  ;;  %v470_v52 = vld [vmem:[%s1836_s11 + $0x340] sm:$0xff]  ;;  %v472_v53 = vld [vmem:[%s1836_s11 + $0x350] sm:$0xff] }
  0x31   : > { %419 = vst [vmem:[%s1841_s12 + $0xd0] sm:$0xff] %v418_v26  ;;  %v474_v54 = vld [vmem:[%s1836_s11 + $0x360] sm:$0xff]  ;;  %v476_v55 = vld [vmem:[%s1836_s11 + $0x370] sm:$0xff] }
  0x32   : > { %421 = vst [vmem:[%s1841_s12 + $0xd8] sm:$0xff] %v420_v27  ;;  %v478_v56 = vld [vmem:[%s1836_s11 + $0x380] sm:$0xff]  ;;  %v480_v57 = vld [vmem:[%s1836_s11 + $0x390] sm:$0xff] }
  0x33   : > { %423 = vst [vmem:[%s1841_s12 + $0xe0] sm:$0xff] %v422_v28  ;;  %v482_v58 = vld [vmem:[%s1836_s11 + $0x3a0] sm:$0xff]  ;;  %v484_v59 = vld [vmem:[%s1836_s11 + $0x3b0] sm:$0xff] }
  0x34   : > { %425 = vst [vmem:[%s1841_s12 + $0xe8] sm:$0xff] %v424_v29  ;;  %v486_v60 = vld [vmem:[%s1836_s11 + $0x3c0] sm:$0xff]  ;;  %v488_v61 = vld [vmem:[%s1836_s11 + $0x3d0] sm:$0xff] }
  0x35   : > { %427 = vst [vmem:[%s1841_s12 + $0xf0] sm:$0xff] %v426_v30  ;;  %v490_v62 = vld [vmem:[%s1836_s11 + $0x3e0] sm:$0xff]  ;;  %v492_v63 = vld [vmem:[%s1836_s11 + $0x3f0] sm:$0xff] }
  0x36   : > { %429 = vst [vmem:[%s1841_s12 + $0xf8] sm:$0xff] %v428_v31 }
  0x37   : > { %431 = vst [vmem:[%s1841_s12 + $0x100] sm:$0xff] %v430_v32 }
  0x38   : > { %433 = vst [vmem:[%s1841_s12 + $0x108] sm:$0xff] %v432_v33 }
  0x39   : > { %435 = vst [vmem:[%s1841_s12 + $0x110] sm:$0xff] %v434_v34 }
  0x3a   : > { %437 = vst [vmem:[%s1841_s12 + $0x118] sm:$0xff] %v436_v35 }
  0x3b   : > { %439 = vst [vmem:[%s1841_s12 + $0x120] sm:$0xff] %v438_v36 }
  0x3c   : > { %441 = vst [vmem:[%s1841_s12 + $0x128] sm:$0xff] %v440_v37 }
  0x3d   : > { %443 = vst [vmem:[%s1841_s12 + $0x130] sm:$0xff] %v442_v38 }
  0x3e   : > { %445 = vst [vmem:[%s1841_s12 + $0x138] sm:$0xff] %v444_v39 }
  0x3f   : > { %447 = vst [vmem:[%s1841_s12 + $0x140] sm:$0xff] %v446_v40 }
  0x40   : > { %449 = vst [vmem:[%s1841_s12 + $0x148] sm:$0xff] %v448_v41 }
  0x41   : > { %451 = vst [vmem:[%s1841_s12 + $0x150] sm:$0xff] %v450_v42 }
  0x42   : > { %453 = vst [vmem:[%s1841_s12 + $0x158] sm:$0xff] %v452_v43 }
  0x43   : > { %455 = vst [vmem:[%s1841_s12 + $0x160] sm:$0xff] %v454_v44 }
  0x44   : > { %457 = vst [vmem:[%s1841_s12 + $0x168] sm:$0xff] %v456_v45 }
  0x45   : > { %459 = vst [vmem:[%s1841_s12 + $0x170] sm:$0xff] %v458_v46 }
  0x46   : > { %461 = vst [vmem:[%s1841_s12 + $0x178] sm:$0xff] %v460_v47 }
  0x47   : > { %463 = vst [vmem:[%s1841_s12 + $0x180] sm:$0xff] %v462_v48 }
  0x48   : > { %465 = vst [vmem:[%s1841_s12 + $0x188] sm:$0xff] %v464_v49 }
  0x49   : > { %467 = vst [vmem:[%s1841_s12 + $0x190] sm:$0xff] %v466_v50 }
  0x4a   : > { %469 = vst [vmem:[%s1841_s12 + $0x198] sm:$0xff] %v468_v51 }
  0x4b   : > { %471 = vst [vmem:[%s1841_s12 + $0x1a0] sm:$0xff] %v470_v52 }
  0x4c   : > { %473 = vst [vmem:[%s1841_s12 + $0x1a8] sm:$0xff] %v472_v53 }
  0x4d   : > { %475 = vst [vmem:[%s1841_s12 + $0x1b0] sm:$0xff] %v474_v54 }
  0x4e   : > { %477 = vst [vmem:[%s1841_s12 + $0x1b8] sm:$0xff] %v476_v55 }
  0x4f   : > { %479 = vst [vmem:[%s1841_s12 + $0x1c0] sm:$0xff] %v478_v56 }
  0x50   : > { %481 = vst [vmem:[%s1841_s12 + $0x1c8] sm:$0xff] %v480_v57 }
  0x51   : > { %483 = vst [vmem:[%s1841_s12 + $0x1d0] sm:$0xff] %v482_v58 }
  0x52   : > { %485 = vst [vmem:[%s1841_s12 + $0x1d8] sm:$0xff] %v484_v59 }
  0x53   : > { %487 = vst [vmem:[%s1841_s12 + $0x1e0] sm:$0xff] %v486_v60 }
  0x54   : > { %489 = vst [vmem:[%s1841_s12 + $0x1e8] sm:$0xff] %v488_v61 }
  0x55   : > { %491 = vst [vmem:[%s1841_s12 + $0x1f0] sm:$0xff] %v490_v62 }
  0x56   : > { %493 = vst [vmem:[%s1841_s12 + $0x1f8] sm:$0xff] %v492_v63 }
  0x57 PF: > { %p1303_p7 = scmp.ge.s32.totalorder %s1748_s21, 1  ;;  %p519_p8 = scmp.lt.s32.totalorder %s1748_s21, 19 }
  0x59   : > { %p520_p9 = pnand %p1303_p7, %p519_p8 }
  0x5a   : > { %s526_s13 = sand.u32 (!%p520_p9), 1, %s1724_s15   ;;  %s1305_s14 = sshll.u32 (!%p520_p9), %s1732_s17, 2 }
  0x5b   : > { %523 = sbr.rel (%p520_p9) target bundleno = 331 (0x14b), region = 70  ;;  %s1304_s24 = sshll.u32 (!%p520_p9), %s526_s13, 9 }
  0x5c   : > { %p580_p10 = scmp.lt.s32.totalorder (!%p520_p9), %s1305_s14, 35  ;;  %s1307_s25 = sshll.u32 (!%p520_p9), %s1736_s18, 1 }
  0x5d   : > { %p590_p11 = scmp.lt.s32.totalorder (!%p520_p9), %s1307_s25, 3  ;;  %s1995_s13 = scalar_lea.vmem (!%p520_p9), [#allocation3], %s1304_s24 }
  0x5e   : > { %p1312_p12 = scmp.ne.s32.totalorder (!%p520_p9), %s1732_s17, 0 }
  0x60   : > { %s2191_s14 = smov (!%p580_p10, %s1305_s14), 35  ;;  %s2193_s25 = smov (!%p590_p11, %s1307_s25), 3 }
  0x61   : > { %s1306_s26 = sshll.u32 %s2191_s14, 2  ;;  %s592_s15 = scalar_lea.vmem %s2175_s2, %s2193_s25 }
  0x62   : > { %s1976_s30 = scalar_lea.vmem %s2173_s0, %s1306_s26  ;;  %s1309_s7 = sshll.u32 %s2193_s25, 2 }
  0x63   : > { %s1988_s18 = scalar_lea.vmem %s2176_s3, %s1309_s7  ;;  %s1993_s12 = scalar_lea.vmem %s2177_s4, %s1309_s7 }
  0x64   : > { %617 = sbr.rel (%p1312_p12) target bundleno = 108 (0x6c), region = 78 }
  0x69   : > { %v1750_v0 = vmov 0.0  }
  0x6a   : > { %618 = vst [vmem:[#allocation2] sm:$0xff] %v1750_v0 }
  0x6b   : > { %619 = vst [vmem:[#allocation2 + $0x8] sm:$0xff] %v1750_v0 }
  0x6c PF: > { %v1371_v1 = vld [vmem:[%s1995_s13 + $0x70] sm:$0xf]  ;;  %v1588_v2 = vld [vmem:[%s1995_s13 + $0x74] sm:$0xf0]  ;;  %v1363_v12 = vld [vmem:[%s1995_s13 + $0x60] sm:$0xf] }
  0x6d   : > { %v1435_v3 = vld [vmem:[%s1995_s13 + $0xf0] sm:$0xf]  ;;  %v1372_v4 = vor.u32 %v1588_v2, %v1371_v1  ;;  %v1604_v5 = vld [vmem:[%s1995_s13 + $0xf4] sm:$0xf0]  ;;  %v1586_v14 = vld [vmem:[%s1995_s13 + $0x64] sm:$0xf0] }
  0x6e   : > { %v1499_v6 = vld [vmem:[%s1995_s13 + $0x170] sm:$0xf]  ;;  %v1620_v7 = vld [vmem:[%s1995_s13 + $0x174] sm:$0xf0]  ;;  %v1436_v8 = vor.u32 %v1604_v5, %v1435_v3  ;;  %v1427_v15 = vld [vmem:[%s1995_s13 + $0xe0] sm:$0xf]  ;;  %v1364_v17 = vor.u32 %v1586_v14, %v1363_v12 }
  0x6f   : > { %v1500_v9 = vor.u32 %v1620_v7, %v1499_v6  ;;  %v1563_v10 = vld [vmem:[%s1995_s13 + $0x1f0] sm:$0xf]  ;;  %v1636_v11 = vld [vmem:[%s1995_s13 + $0x1f4] sm:$0xf0]  ;;  %1022 = vmatpush.bf16.msra.mxu0 %v1372_v4  ;;  %v1602_v16 = vld [vmem:[%s1995_s13 + $0xe4] sm:$0xf0] }
  0x70   : > { %v1564_v13 = vor.u32 %v1636_v11, %v1563_v10  ;;  %1035 = vmatpush.bf16.msra.mxu1 %v1436_v8  ;;  %v1428_v18 = vor.u32 %v1602_v16, %v1427_v15  ;;  %v1491_v19 = vld [vmem:[%s1995_s13 + $0x160] sm:$0xf]  ;;  %v1618_v20 = vld [vmem:[%s1995_s13 + $0x164] sm:$0xf0]  ;;  %v1355_v24 = vld [vmem:[%s1995_s13 + $0x50] sm:$0xf] }
  0x71   : > { %1048 = vmatpush.bf16.msra.mxu2 %v1500_v9  ;;  %v1555_v21 = vld [vmem:[%s1995_s13 + $0x1e0] sm:$0xf]  ;;  %v1492_v22 = vor.u32 %v1618_v20, %v1491_v19  ;;  %v1634_v23 = vld [vmem:[%s1995_s13 + $0x1e4] sm:$0xf0]  ;;  %v1584_v25 = vld [vmem:[%s1995_s13 + $0x54] sm:$0xf0] }
  0x72   : > { %1061 = vmatpush.bf16.msra.mxu3 %v1564_v13  ;;  %v1556_v26 = vor.u32 %v1634_v23, %v1555_v21  ;;  %v1419_v27 = vld [vmem:[%s1995_s13 + $0xd0] sm:$0xf]  ;;  %v1600_v28 = vld [vmem:[%s1995_s13 + $0xd4] sm:$0xf0]  ;;  %v1356_v30 = vor.u32 %v1584_v25, %v1355_v24  ;;  %v1347_v36 = vld [vmem:[%s1995_s13 + $0x40] sm:$0xf] }
  0x73   : > { %v1483_v29 = vld [vmem:[%s1995_s13 + $0x150] sm:$0xf]  ;;  %1023 = vmatpush.bf16.msra.mxu0 %v1364_v17  ;;  %v1616_v31 = vld [vmem:[%s1995_s13 + $0x154] sm:$0xf0]  ;;  %v1420_v34 = vor.u32 %v1600_v28, %v1419_v27  ;;  %v1582_v37 = vld [vmem:[%s1995_s13 + $0x44] sm:$0xf0] }
  0x74   : > { %v1547_v32 = vld [vmem:[%s1995_s13 + $0x1d0] sm:$0xf]  ;;  %v1632_v33 = vld [vmem:[%s1995_s13 + $0x1d4] sm:$0xf0]  ;;  %1036 = vmatpush.bf16.msra.mxu1 %v1428_v18  ;;  %v1484_v35 = vor.u32 %v1616_v31, %v1483_v29  ;;  %v1411_v38 = vld [vmem:[%s1995_s13 + $0xc0] sm:$0xf]  ;;  %v1348_v45 = vor.u32 %v1582_v37, %v1347_v36 }
  0x75   : > { %1049 = vmatpush.bf16.msra.mxu2 %v1492_v22  ;;  %v1548_v39 = vor.u32 %v1632_v33, %v1547_v32  ;;  %v1598_v40 = vld [vmem:[%s1995_s13 + $0xc4] sm:$0xf0]  ;;  %v1475_v41 = vld [vmem:[%s1995_s13 + $0x140] sm:$0xf]  ;;  %v1339_v48 = vld [vmem:[%s1995_s13 + $0x30] sm:$0xf] }
  0x76   : > { %1062 = vmatpush.bf16.msra.mxu3 %v1556_v26  ;;  %v1614_v42 = vld [vmem:[%s1995_s13 + $0x144] sm:$0xf0]  ;;  %v1539_v43 = vld [vmem:[%s1995_s13 + $0x1c0] sm:$0xf]  ;;  %v1412_v46 = vor.u32 %v1598_v40, %v1411_v38  ;;  %v1580_v49 = vld [vmem:[%s1995_s13 + $0x34] sm:$0xf0] }
  0x77   : > { %v1630_v44 = vld [vmem:[%s1995_s13 + $0x1c4] sm:$0xf0]  ;;  %1024 = vmatpush.bf16.msra.mxu0 %v1356_v30  ;;  %v1476_v47 = vor.u32 %v1614_v42, %v1475_v41  ;;  %v1403_v50 = vld [vmem:[%s1995_s13 + $0xb0] sm:$0xf]  ;;  %v1596_v52 = vld [vmem:[%s1995_s13 + $0xb4] sm:$0xf0]  ;;  %v1340_v57 = vor.u32 %v1580_v49, %v1339_v48 }
  0x78   : > { %1037 = vmatpush.bf16.msra.mxu1 %v1420_v34  ;;  %v1540_v51 = vor.u32 %v1630_v44, %v1539_v43  ;;  %v1467_v53 = vld [vmem:[%s1995_s13 + $0x130] sm:$0xf]  ;;  %v1612_v54 = vld [vmem:[%s1995_s13 + $0x134] sm:$0xf0]  ;;  %v1404_v58 = vor.u32 %v1596_v52, %v1403_v50  ;;  %v1331_v60 = vld [vmem:[%s1995_s13 + $0x20] sm:$0xf] }
  0x79   : > { %1050 = vmatpush.bf16.msra.mxu2 %v1484_v35  ;;  %v1531_v55 = vld [vmem:[%s1995_s13 + $0x1b0] sm:$0xf]  ;;  %v1628_v56 = vld [vmem:[%s1995_s13 + $0x1b4] sm:$0xf0]  ;;  %v1468_v59 = vor.u32 %v1612_v54, %v1467_v53  ;;  %v1578_v61 = vld [vmem:[%s1995_s13 + $0x24] sm:$0xf0] }
  0x7a   : > { %1063 = vmatpush.bf16.msra.mxu3 %v1548_v39  ;;  %v1395_v62 = vld [vmem:[%s1995_s13 + $0xa0] sm:$0xf]  ;;  %v1532_v63 = vor.u32 %v1628_v56, %v1531_v55  ;;  %v1594_v0 = vld [vmem:[%s1995_s13 + $0xa4] sm:$0xf0]  ;;  %v1332_v5 = vor.u32 %v1578_v61, %v1331_v60  ;;  %v1323_v8 = vld [vmem:[%s1995_s13 + $0x10] sm:$0xf] }
  0x7b   : > { %1025 = vmatpush.bf16.msra.mxu0 %v1348_v45  ;;  %v1459_v1 = vld [vmem:[%s1995_s13 + $0x120] sm:$0xf]  ;;  %v1610_v2 = vld [vmem:[%s1995_s13 + $0x124] sm:$0xf0]  ;;  %v1396_v6 = vor.u32 %v1594_v0, %v1395_v62  ;;  %v1576_v9 = vld [vmem:[%s1995_s13 + $0x14] sm:$0xf0] }
  0x7c   : > { %1038 = vmatpush.bf16.msra.mxu1 %v1412_v46  ;;  %v1523_v3 = vld [vmem:[%s1995_s13 + $0x1a0] sm:$0xf]  ;;  %v1626_v4 = vld [vmem:[%s1995_s13 + $0x1a4] sm:$0xf0]  ;;  %v1460_v7 = vor.u32 %v1610_v2, %v1459_v1  ;;  %v1387_v10 = vld [vmem:[%s1995_s13 + $0x90] sm:$0xf]  ;;  %v1324_v17 = vor.u32 %v1576_v9, %v1323_v8 }
  0x7d   : > { %1051 = vmatpush.bf16.msra.mxu2 %v1476_v47  ;;  %v1524_v11 = vor.u32 %v1626_v4, %v1523_v3  ;;  %v1592_v12 = vld [vmem:[%s1995_s13 + $0x94] sm:$0xf0]  ;;  %v1451_v13 = vld [vmem:[%s1995_s13 + $0x110] sm:$0xf]  ;;  %v1315_v18 = vld [vmem:[%s1995_s13] sm:$0xf] }
  0x7e   : > { %1064 = vmatpush.bf16.msra.mxu3 %v1540_v51  ;;  %v1608_v14 = vld [vmem:[%s1995_s13 + $0x114] sm:$0xf0]  ;;  %v1515_v15 = vld [vmem:[%s1995_s13 + $0x190] sm:$0xf]  ;;  %v1574_v19 = vld [vmem:[%s1995_s13 + $0x4] sm:$0xf0]  ;;  %v1388_v21 = vor.u32 %v1592_v12, %v1387_v10 }
  0x7f   : > { %1026 = vmatpush.bf16.msra.mxu0 %v1340_v57  ;;  %v1624_v16 = vld [vmem:[%s1995_s13 + $0x194] sm:$0xf0]  ;;  %v1379_v20 = vld [vmem:[%s1995_s13 + $0x80] sm:$0xf]  ;;  %v1452_v22 = vor.u32 %v1608_v14, %v1451_v13  ;;  %v1590_v23 = vld [vmem:[%s1995_s13 + $0x84] sm:$0xf0]  ;;  %v1316_v33 = vor.u32 %v1574_v19, %v1315_v18 }
  0x80   : > { %1039 = vmatpush.bf16.msra.mxu1 %v1404_v58  ;;  %v1443_v24 = vld [vmem:[%s1995_s13 + $0x100] sm:$0xf]  ;;  %v1606_v25 = vld [vmem:[%s1995_s13 + $0x104] sm:$0xf0]  ;;  %v1516_v26 = vor.u32 %v1624_v16, %v1515_v15  ;;  %v1587_v29 = vld [vmem:[%s1995_s13 + $0x74] sm:$0xf]  ;;  %v1380_v38 = vor.u32 %v1590_v23, %v1379_v20 }
  0x81   : > { %1052 = vmatpush.bf16.msra.mxu2 %v1468_v59  ;;  %v1507_v27 = vld [vmem:[%s1995_s13 + $0x180] sm:$0xf]  ;;  %v1622_v28 = vld [vmem:[%s1995_s13 + $0x184] sm:$0xf0]  ;;  %v1373_v30 = vld [vmem:[%s1995_s13 + $0x78] sm:$0xf0]  ;;  %v1444_v39 = vor.u32 %v1606_v25, %v1443_v24 }
  0x82   : > { %1065 = vmatpush.bf16.msra.mxu3 %v1532_v63  ;;  %v1603_v31 = vld [vmem:[%s1995_s13 + $0xf4] sm:$0xf]  ;;  %v623_v32 = vld [vmem:[%s1976_s30 + $0x8] sm:$0xff]  ;;  %v1508_v43 = vor.u32 %v1622_v28, %v1507_v27  ;;  %v1376_v44 = vor.u32 %v1587_v29, %v1373_v30  ;;  %v1585_v48 = vld [vmem:[%s1995_s13 + $0x64] sm:$0xf]  ;;  %p1569_p13 = scmp.ne.s32.totalorder %s1732_s17, 8 }
  0x83   : > { %1027 = vmatpush.bf16.msra.mxu0 %v1332_v5  ;;  %v1437_v34 = vld [vmem:[%s1995_s13 + $0xf8] sm:$0xf0]  ;;  %v1619_v35 = vld [vmem:[%s1995_s13 + $0x174] sm:$0xf]  ;;  %v692_v37 = vunpack.c.l.b16 %v623_v32  ;;  %v693_v42 = vunpack.c.h.b16 %v623_v32  ;;  %v1365_v49 = vld [vmem:[%s1995_s13 + $0x68] sm:$0xf0] }
  0x84   : > { %1040 = vmatpush.bf16.msra.mxu1 %v1396_v6  ;;  %v1501_v36 = vld [vmem:[%s1995_s13 + $0x178] sm:$0xf0]  ;;  %v1635_v40 = vld [vmem:[%s1995_s13 + $0x1f4] sm:$0xf]  ;;  %v1440_v46 = vor.u32 %v1603_v31, %v1437_v34  ;;  %v1601_v50 = vld [vmem:[%s1995_s13 + $0xe4] sm:$0xf]  ;;  %v1368_v62 = vor.u32 %v1585_v48, %v1365_v49 }
  0x85   : > { %1053 = vmatpush.bf16.msra.mxu2 %v1460_v7  ;;  %v1565_v41 = vld [vmem:[%s1995_s13 + $0x1f8] sm:$0xf0]  ;;  %v622_v45 = vld [vmem:[%s1976_s30] sm:$0xff]  ;;  %v1504_v47 = vor.u32 %v1619_v35, %v1501_v36  ;;  %v1429_v54 = vld [vmem:[%s1995_s13 + $0xe8] sm:$0xf0]  ;;  %v2078_v57 = vpack.c.b16 %v692_v37, %v692_v37  ;;  %v2082_v60 = vpack.c.b16 %v693_v42, %v693_v42 }
  0x86   : > { %1066 = vmatpush.bf16.msra.mxu3 %v1524_v11  ;;  %v690_v51 = vunpack.c.l.b16 %v622_v45  ;;  %v691_v52 = vunpack.c.h.b16 %v622_v45  ;;  %v1568_v53 = vor.u32 %v1635_v40, %v1565_v41  ;;  %v1617_v55 = vld [vmem:[%s1995_s13 + $0x164] sm:$0xf]  ;;  %v1493_v56 = vld [vmem:[%s1995_s13 + $0x168] sm:$0xf0]  ;;  %v1432_v0 = vor.u32 %v1601_v50, %v1429_v54  ;;  %v1583_v2 = vld [vmem:[%s1995_s13 + $0x54] sm:$0xf] }
  0x87   : > { %1028 = vmatpush.bf16.msra.mxu0 %v1324_v17  ;;  %v1633_v58 = vld [vmem:[%s1995_s13 + $0x1e4] sm:$0xf]  ;;  %v1557_v59 = vld [vmem:[%s1995_s13 + $0x1e8] sm:$0xf0]  ;;  %v1496_v1 = vor.u32 %v1617_v55, %v1493_v56  ;;  %v1357_v3 = vld [vmem:[%s1995_s13 + $0x58] sm:$0xf0] }
  0x88   : > { %1041 = vmatpush.bf16.msra.mxu1 %v1388_v21  ;;  %v2084_v61 = vpack.c.b16 %v690_v51, %v690_v51  ;;  %v2086_v63 = vpack.c.b16 %v691_v52, %v691_v52  ;;  %v1599_v4 = vld [vmem:[%s1995_s13 + $0xd4] sm:$0xf]  ;;  %v1560_v5 = vor.u32 %v1633_v58, %v1557_v59  ;;  %v1421_v6 = vld [vmem:[%s1995_s13 + $0xd8] sm:$0xf0]  ;;  %v1360_v11 = vor.u32 %v1583_v2, %v1357_v3  ;;  %v1581_v14 = vld [vmem:[%s1995_s13 + $0x44] sm:$0xf] }
  0x89   : > { %1054 = vmatpush.bf16.msra.mxu2 %v1452_v22  ;;  %v1615_v7 = vld [vmem:[%s1995_s13 + $0x154] sm:$0xf]  ;;  %v1485_v8 = vld [vmem:[%s1995_s13 + $0x158] sm:$0xf0]  ;;  %v1424_v12 = vor.u32 %v1599_v4, %v1421_v6  ;;  %v1349_v15 = vld [vmem:[%s1995_s13 + $0x48] sm:$0xf0] }
  0x8a   : > { %1067 = vmatpush.bf16.msra.mxu3 %v1516_v26  ;;  %v1631_v9 = vld [vmem:[%s1995_s13 + $0x1d4] sm:$0xf]  ;;  %v1549_v10 = vld [vmem:[%s1995_s13 + $0x1d8] sm:$0xf0]  ;;  %v1488_v13 = vor.u32 %v1615_v7, %v1485_v8  ;;  %v1597_v16 = vld [vmem:[%s1995_s13 + $0xc4] sm:$0xf]  ;;  %v1352_v23 = vor.u32 %v1581_v14, %v1349_v15 }
  0x8b   : > { %1029 = vmatpush.bf16.msra.mxu0 %v1316_v33  ;;  %v1552_v17 = vor.u32 %v1631_v9, %v1549_v10  ;;  %v1413_v18 = vld [vmem:[%s1995_s13 + $0xc8] sm:$0xf0]  ;;  %v1613_v19 = vld [vmem:[%s1995_s13 + $0x144] sm:$0xf]  ;;  %v1579_v26 = vld [vmem:[%s1995_s13 + $0x34] sm:$0xf] }
  0x8c   : > { %1042 = vmatpush.bf16.msra.mxu1 %v1380_v38  ;;  %v1477_v20 = vld [vmem:[%s1995_s13 + $0x148] sm:$0xf0]  ;;  %v1629_v21 = vld [vmem:[%s1995_s13 + $0x1c4] sm:$0xf]  ;;  %v1416_v24 = vor.u32 %v1597_v16, %v1413_v18  ;;  %v1341_v27 = vld [vmem:[%s1995_s13 + $0x38] sm:$0xf0] }
  0x8d   : > { %1055 = vmatpush.bf16.msra.mxu2 %v1444_v39  ;;  %v1541_v22 = vld [vmem:[%s1995_s13 + $0x1c8] sm:$0xf0]  ;;  %v1480_v25 = vor.u32 %v1613_v19, %v1477_v20  ;;  %v1595_v28 = vld [vmem:[%s1995_s13 + $0xb4] sm:$0xf]  ;;  %v1405_v30 = vld [vmem:[%s1995_s13 + $0xb8] sm:$0xf0]  ;;  %v1344_v35 = vor.u32 %v1579_v26, %v1341_v27 }
  0x8e   : > { %1068 = vmatpush.bf16.msra.mxu3 %v1508_v43  ;;  %1030 = vmatmul.bf16.vlgmr.msra.gmra.mxu0 %v2084_v61  ;;  %v1544_v29 = vor.u32 %v1629_v21, %v1541_v22  ;;  %v1611_v31 = vld [vmem:[%s1995_s13 + $0x134] sm:$0xf]  ;;  %v1469_v32 = vld [vmem:[%s1995_s13 + $0x138] sm:$0xf0]  ;;  %v1408_v36 = vor.u32 %v1595_v28, %v1405_v30  ;;  %v1577_v38 = vld [vmem:[%s1995_s13 + $0x24] sm:$0xf] }
  0x8f   : > { %1074 = vmatpush.bf16.msrb.mxu0 %v1376_v44  ;;  %1043 = vmatmul.bf16.vlgmr.msra.gmra.mxu1 %v2086_v63  ;;  %v1627_v33 = vld [vmem:[%s1995_s13 + $0x1b4] sm:$0xf]  ;;  %v1533_v34 = vld [vmem:[%s1995_s13 + $0x1b8] sm:$0xf0]  ;;  %v1472_v37 = vor.u32 %v1611_v31, %v1469_v32  ;;  %v1333_v39 = vld [vmem:[%s1995_s13 + $0x28] sm:$0xf0] }
  0x90   : > { %1087 = vmatpush.bf16.msrb.mxu1 %v1440_v46  ;;  %1056 = vmatmul.bf16.vlgmr.msra.gmra.mxu2 %v2078_v57  ;;  %v1593_v40 = vld [vmem:[%s1995_s13 + $0xa4] sm:$0xf]  ;;  %v1536_v41 = vor.u32 %v1627_v33, %v1533_v34  ;;  %v1397_v42 = vld [vmem:[%s1995_s13 + $0xa8] sm:$0xf0]  ;;  %v1575_v50 = vld [vmem:[%s1995_s13 + $0x14] sm:$0xf] }
  0x91   : > { %1100 = vmatpush.bf16.msrb.mxu2 %v1504_v47  ;;  %1069 = vmatmul.bf16.vlgmr.msra.gmra.mxu3 %v2082_v60  ;;  %v1609_v43 = vld [vmem:[%s1995_s13 + $0x124] sm:$0xf]  ;;  %v1461_v44 = vld [vmem:[%s1995_s13 + $0x128] sm:$0xf0]  ;;  %v1336_v47 = vor.u32 %v1577_v38, %v1333_v39  ;;  %v1400_v48 = vor.u32 %v1593_v40, %v1397_v42  ;;  %v1325_v51 = vld [vmem:[%s1995_s13 + $0x18] sm:$0xf0] }
  0x92   : > { %1113 = vmatpush.bf16.msrb.mxu3 %v1568_v53  ;;  %v1625_v45 = vld [vmem:[%s1995_s13 + $0x1a4] sm:$0xf]  ;;  %v1525_v46 = vld [vmem:[%s1995_s13 + $0x1a8] sm:$0xf0]  ;;  %v1464_v49 = vor.u32 %v1609_v43, %v1461_v44  ;;  %v1591_v52 = vld [vmem:[%s1995_s13 + $0x94] sm:$0xf] }
  0x93   : > { %1075 = vmatpush.bf16.msrb.mxu0 %v1368_v62  ;;  %v1528_v53 = vor.u32 %v1625_v45, %v1525_v46  ;;  %v1389_v54 = vld [vmem:[%s1995_s13 + $0x98] sm:$0xf0]  ;;  %v1607_v55 = vld [vmem:[%s1995_s13 + $0x114] sm:$0xf]  ;;  %v1328_v62 = vor.u32 %v1575_v50, %v1325_v51  ;;  %v1573_v2 = vld [vmem:[%s1995_s13 + $0x4] sm:$0xf] }
  0x94   : > { %1088 = vmatpush.bf16.msrb.mxu1 %v1432_v0  ;;  %v1453_v56 = vld [vmem:[%s1995_s13 + $0x118] sm:$0xf0]  ;;  %v1623_v58 = vld [vmem:[%s1995_s13 + $0x194] sm:$0xf]  ;;  %v1392_v0 = vor.u32 %v1591_v52, %v1389_v54  ;;  %v1317_v3 = vld [vmem:[%s1995_s13 + $0x8] sm:$0xf0] }
  0x95   : > { %1101 = vmatpush.bf16.msrb.mxu2 %v1496_v1  ;;  %v1517_v59 = vld [vmem:[%s1995_s13 + $0x198] sm:$0xf0]  ;;  %v1456_v1 = vor.u32 %v1607_v55, %v1453_v56  ;;  %v1589_v4 = vld [vmem:[%s1995_s13 + $0x84] sm:$0xf]  ;;  %v1381_v6 = vld [vmem:[%s1995_s13 + $0x88] sm:$0xf0] }
  0x96   : > { %1114 = vmatpush.bf16.msrb.mxu3 %v1560_v5  ;;  %v1520_v5 = vor.u32 %v1623_v58, %v1517_v59  ;;  %v1605_v7 = vld [vmem:[%s1995_s13 + $0x104] sm:$0xf]  ;;  %v1445_v8 = vld [vmem:[%s1995_s13 + $0x108] sm:$0xf0]  ;;  %v620_v21 = vld [vmem:[#allocation2] sm:$0xff] }
  0x97   : > { %1076 = vmatpush.bf16.msrb.mxu0 %v1360_v11  ;;  %v1621_v9 = vld [vmem:[%s1995_s13 + $0x184] sm:$0xf]  ;;  %v1509_v10 = vld [vmem:[%s1995_s13 + $0x188] sm:$0xf0]  ;;  %v1320_v11 = vor.u32 %v1573_v2, %v1317_v3  ;;  %v621_v31 = vld [vmem:[#allocation2 + $0x8] sm:$0xff] }
  0x98   : > { %1089 = vmatpush.bf16.msrb.mxu1 %v1424_v12  ;;  %v1384_v12 = vor.u32 %v1589_v4, %v1381_v6  ;;  %v1512_v14 = vor.u32 %v1621_v9, %v1509_v10 }
  0x99   : > { %1102 = vmatpush.bf16.msrb.mxu2 %v1488_v13  ;;  %v1448_v13 = vor.u32 %v1605_v7, %v1445_v8 }
  0x9a   : > { %1115 = vmatpush.bf16.msrb.mxu3 %v1552_v17 }
  0x9b   : > { %1077 = vmatpush.bf16.msrb.mxu0 %v1352_v23 }
  0x9c   : > { %1090 = vmatpush.bf16.msrb.mxu1 %v1416_v24 }
  0x9d   : > { %1103 = vmatpush.bf16.msrb.mxu2 %v1480_v25 }
  0x9e   : > { %1116 = vmatpush.bf16.msrb.mxu3 %v1544_v29 }
  0x9f   : > { %1078 = vmatpush.bf16.msrb.mxu0 %v1344_v35 }
  0xa0   : > { %1091 = vmatpush.bf16.msrb.mxu1 %v1408_v36 }
  0xa1   : > { %1104 = vmatpush.bf16.msrb.mxu2 %v1472_v37 }
  0xa2   : > { %1117 = vmatpush.bf16.msrb.mxu3 %v1536_v41 }
  0xa3   : > { %1079 = vmatpush.bf16.msrb.mxu0 %v1336_v47 }
  0xa4   : > { %1092 = vmatpush.bf16.msrb.mxu1 %v1400_v48 }
  0xa5   : > { %1105 = vmatpush.bf16.msrb.mxu2 %v1464_v49 }
  0xa6   : > { %1118 = vmatpush.bf16.msrb.mxu3 %v1528_v53 }
  0xa7   : > { %1080 = vmatpush.bf16.msrb.mxu0 %v1328_v62 }
  0xa8   : > { %1093 = vmatpush.bf16.msrb.mxu1 %v1392_v0 }
  0xa9   : > { %1106 = vmatpush.bf16.msrb.mxu2 %v1456_v1 }
  0xaa   : > { %1119 = vmatpush.bf16.msrb.mxu3 %v1520_v5 }
  0xab   : > { %1081 = vmatpush.bf16.msrb.mxu0 %v1320_v11 }
  0xac   : > { %1094 = vmatpush.bf16.msrb.mxu1 %v1384_v12 }
  0xad   : > { %1107 = vmatpush.bf16.msrb.mxu2 %v1448_v13 }
  0xae   : > { %1120 = vmatpush.bf16.msrb.mxu3 %v1512_v14  ;;  %1082 = vmatmul.bf16.vlgmr.msrb.gmra.mxu0 %v2084_v61 }
  0xaf   : > { %1095 = vmatmul.bf16.vlgmr.msrb.gmra.mxu1 %v2086_v63 }
  0xb0   : > { %1108 = vmatmul.bf16.vlgmr.msrb.gmra.mxu2 %v2078_v57 }
  0xb1   : > { %1121 = vmatmul.bf16.vlgmr.msrb.gmra.mxu3 %v2082_v60 }
 0x10b   : > { %v1031_v15 = vpop.f32.mrf.mxu0 }
 0x10c   : > { %v1044_v16 = vpop.f32.mrf.mxu1 }
 0x10d   : > { %v1045_v17 = vadd.f32 %v1044_v16, %v1031_v15 }
 0x113   : > { %v1057_v18 = vpop.f32.mrf.mxu2  ;;  %v1033_v23 = vpop.f32.mrf.mxu0 }
 0x114   : > { %v1058_v19 = vadd.f32 %v1057_v18, %v1045_v17  ;;  %v1070_v20 = vpop.f32.mrf.mxu3  ;;  %v1046_v24 = vpop.f32.mrf.mxu1 }
 0x116   : > { %v1071_v22 = vadd.f32 %v1070_v20, %v1058_v19 }
 0x118   : > { %v1126_v25 = vadd.f32 %v1071_v22, %v620_v21 }
 0x11a   : > { %1128 = vst [vmem:[#allocation2] sm:$0xff] %v1126_v25 }
 0x11b   : > { %v1059_v26 = vpop.f32.mrf.mxu2 }
 0x11c   : > { %v1072_v61 = vpop.f32.mrf.mxu3 }
 0x12b   : > { %v1083_v27 = vpop.f32.mrf.mxu0 }
 0x12c   : > { %v1096_v63 = vpop.f32.mrf.mxu1 }
 0x12d   : > { %v1097_v28 = vadd.f32 %v1096_v63, %v1083_v27 }
 0x133   : > { %v1109_v57 = vpop.f32.mrf.mxu2  ;;  %v1085_v30 = vpop.f32.mrf.mxu0 }
 0x134   : > { %v1110_v29 = vadd.f32 %v1109_v57, %v1097_v28  ;;  %v1122_v60 = vpop.f32.mrf.mxu3  ;;  %v1098_v32 = vpop.f32.mrf.mxu1 }
 0x136   : > { %v1123_v33 = vadd.f32 %v1122_v60, %v1110_v29 }
 0x138   : > { %v1127_v34 = vadd.f32 %v1123_v33, %v621_v31  ;;  %1133 = sbr.rel (%p1569_p13) target bundleno = 331 (0x14b), region = 82 }
 0x13a   : > { %1129 = vst [vmem:[#allocation2 + $0x8] sm:$0xff] %v1127_v34 }
 0x13b   : > { %v1111_v35 = vpop.f32.mrf.mxu2 }
 0x13c   : > { %v1124_v36 = vpop.f32.mrf.mxu3 }
 0x13d   : > { %v1134_v37 = vld [vmem:[#allocation2] sm:$0xff] }
 0x13e   : > { %v1136_v39 = vld [vmem:[%s592_s15] sm:$0x3] }
 0x13f   : > { %v1138_v40 = vperm.slane %v1136_v39, 0  ;;  %v1139_v41 = vperm.slane %v1136_v39, 1  ;;  %v1144_v42 = vld [vmem:[%s1988_s18] sm:$0xff] }
 0x140   : > { %v1145_v43 = vunpack.c.l.bf16 %v1144_v42  ;;  %v1146_v44 = vunpack.c.h.bf16 %v1144_v42 }
 0x141   : > { %v1135_v38 = vld [vmem:[#allocation2 + $0x8] sm:$0xff]  ;;  %v1142_v45 = vadd.f32 %v1138_v40, %v1134_v37 }
 0x142   : > { %v1143_v46 = vadd.f32 %v1139_v41, %v1135_v38 }
 0x143   : > { %v1147_v47 = vadd.f32 %v1145_v43, %v1142_v45 }
 0x144   : > { %v1148_v48 = vadd.f32 %v1146_v44, %v1143_v46 }
 0x145   : > { %v1149_v49 = vmax.f32 %v1147_v47, 0.0 }
 0x146   : > { %v1150_v50 = vmax.f32 %v1148_v48, 0.0 }
 0x148   : > { %v1151_v51 = vpack.c.bf16 %v1150_v50, %v1149_v49 }
 0x14a   : > { %1152 = vst [vmem:[%s1993_s12] sm:$0xff] %v1151_v51 }
 0x14b PF: > { %s14_s21 = sadd.s32 1, %s1748_s21   ;;  %s2178_s15 = smov %s1728_s16 }
 0x14c   : > { %p11_p0 = scmp.ge.s32.totalorder %s14_s21, 20   ;;  %s2179_s16 = smov %s1827_s28 }
 0x14d   : > { %s2180_s17 = smov %s1740_s19  ;;  %s2181_s18 = smov %s1744_s20 }
 0x14e   : > { %s2182_s19 = smov %s2185_s22  ;;  %s2183_s20 = smov %s2189_s23 }
 0x14f   :  { %13 = sbr.rel (!%p11_p0) target bundleno = 4 (0x4), region = 126 }

// kernel: resnet_forward.22
= control target key start
LH: loop header
LB: loop body
LE: loop exit
PB: predicated region body
PF: predicated region fallthrough
CT: control target
= control target key end

     0   :  { %s1101_s12 = smov 0   ;;  %s1103_s13 = smov 0   ;;  %s1306_s0 = inlined_call_operand.vmem [shape: bf16[8,256], index: 0, kind: input, shape index: {}]   ;;  %s1307_s1 = inlined_call_operand.vmem [shape: bf16[256,512], index: 1, kind: input, shape index: {}]   ;;  %s1308_s2 = inlined_call_operand.vmem [shape: f32[1,512], index: 2, kind: input, shape index: {}]   ;;  %s1309_s3 = inlined_call_operand.vmem [shape: bf16[8,512], index: 3, kind: output, shape index: {}]  }
   0x1   :  { %s1105_s14 = smov 0   ;;  %s1107_s15 = smov 0  }
   0x2   :  { %s1109_s16 = smov 0  }
   0x3 LB: > { %s28_s17 = sadd.s32 1, %s1075_s15  ;;  %p76_p1 = scmp.ne.s32.totalorder %s1067_s13, %s1063_s12  ;;  %s1079_s16 = sphi %s1109_s16, %s13_s16   ;;  %s1075_s15 = sphi %s1107_s15, %s1313_s15   ;;  %s1071_s14 = sphi %s1105_s14, %s1312_s14   ;;  %s1067_s13 = sphi %s1103_s13, %s1311_s13   ;;  %s1063_s12 = sphi %s1101_s12, %s1310_s12  }
   0x4   : > { %p30_p0 = scmp.ge.s32.totalorder %s28_s17, 2  ;;  %p77_p2 = scmp.eq.s32.totalorder %s1079_s16, 0 }
   0x5   : > { %s69_s19 = sadd.s32 1, %s1067_s13  ;;  %p829_p5 = scmp.ge.s32.totalorder %s1079_s16, 2 }
   0x6   : > { %s1315_s17 = smov (%p30_p0, %s28_s17), 0  ;;  %p78_p3 = por %p77_p2, %p76_p1 }
   0x7   : > { %s65_s18 = ssub.s32 %s1075_s15, %s1315_s17  ;;  %169 = sbr.rel (%p829_p5) target bundleno = 48 (0x30), region = 20 }
   0x8   : > { %p67_p4 = scmp.eq.s32.totalorder %s65_s18, 0 }
   0xa   : > { %s1136_s20 = scalar_select %p67_p4, %s1067_s13, %s69_s19  }
   0xc   : > { %172 = sbr.rel (!%p78_p3) target bundleno = 48 (0x30), region = 24  ;;  %s174_s21 = sand.u32 (%p78_p3), 1, %s1067_s13  }
   0xd   : > { %s968_s22 = sshll.u32 (%p78_p3), %s1075_s15, 3  ;;  %s830_s23 = sshll.u32 (%p78_p3), %s174_s21, 8 }
   0xe   : > { %s1144_s26 = scalar_lea.vmem (%p78_p3), %s1307_s1, %s968_s22  ;;  %s1149_s27 = scalar_lea.vmem (%p78_p3), [#allocation3], %s830_s23 }
   0xf   : > { %v273_v0 = vld [vmem:[%s1144_s26] sm:$0xff] (%p78_p3)  ;;  %v275_v1 = vld [vmem:[%s1144_s26 + $0x10] sm:$0xff] (%p78_p3) }
  0x10   : > { %v277_v2 = vld [vmem:[%s1144_s26 + $0x20] sm:$0xff] (%p78_p3)  ;;  %274 = vst [vmem:[%s1149_s27] sm:$0xff] (%p78_p3), %v273_v0  ;;  %v279_v3 = vld [vmem:[%s1144_s26 + $0x30] sm:$0xff] (%p78_p3) }
  0x11   : > { %276 = vst [vmem:[%s1149_s27 + $0x8] sm:$0xff] %v275_v1  ;;  %v281_v4 = vld [vmem:[%s1144_s26 + $0x40] sm:$0xff]  ;;  %v283_v5 = vld [vmem:[%s1144_s26 + $0x50] sm:$0xff] }
  0x12   : > { %278 = vst [vmem:[%s1149_s27 + $0x10] sm:$0xff] %v277_v2  ;;  %v285_v6 = vld [vmem:[%s1144_s26 + $0x60] sm:$0xff]  ;;  %v287_v7 = vld [vmem:[%s1144_s26 + $0x70] sm:$0xff] }
  0x13   : > { %280 = vst [vmem:[%s1149_s27 + $0x18] sm:$0xff] %v279_v3  ;;  %v289_v8 = vld [vmem:[%s1144_s26 + $0x80] sm:$0xff]  ;;  %v291_v9 = vld [vmem:[%s1144_s26 + $0x90] sm:$0xff] }
  0x14   : > { %282 = vst [vmem:[%s1149_s27 + $0x20] sm:$0xff] %v281_v4  ;;  %v293_v10 = vld [vmem:[%s1144_s26 + $0xa0] sm:$0xff]  ;;  %v295_v11 = vld [vmem:[%s1144_s26 + $0xb0] sm:$0xff] }
  0x15   : > { %284 = vst [vmem:[%s1149_s27 + $0x28] sm:$0xff] %v283_v5  ;;  %v297_v12 = vld [vmem:[%s1144_s26 + $0xc0] sm:$0xff]  ;;  %v299_v13 = vld [vmem:[%s1144_s26 + $0xd0] sm:$0xff] }
  0x16   : > { %286 = vst [vmem:[%s1149_s27 + $0x30] sm:$0xff] %v285_v6  ;;  %v301_v14 = vld [vmem:[%s1144_s26 + $0xe0] sm:$0xff]  ;;  %v303_v15 = vld [vmem:[%s1144_s26 + $0xf0] sm:$0xff] }
  0x17   : > { %288 = vst [vmem:[%s1149_s27 + $0x38] sm:$0xff] %v287_v7  ;;  %v305_v16 = vld [vmem:[%s1144_s26 + $0x100] sm:$0xff]  ;;  %v307_v17 = vld [vmem:[%s1144_s26 + $0x110] sm:$0xff] }
  0x18   : > { %290 = vst [vmem:[%s1149_s27 + $0x40] sm:$0xff] %v289_v8  ;;  %v309_v18 = vld [vmem:[%s1144_s26 + $0x120] sm:$0xff]  ;;  %v311_v19 = vld [vmem:[%s1144_s26 + $0x130] sm:$0xff] }
  0x19   : > { %292 = vst [vmem:[%s1149_s27 + $0x48] sm:$0xff] %v291_v9  ;;  %v313_v20 = vld [vmem:[%s1144_s26 + $0x140] sm:$0xff]  ;;  %v315_v21 = vld [vmem:[%s1144_s26 + $0x150] sm:$0xff] }
  0x1a   : > { %294 = vst [vmem:[%s1149_s27 + $0x50] sm:$0xff] %v293_v10  ;;  %v317_v22 = vld [vmem:[%s1144_s26 + $0x160] sm:$0xff]  ;;  %v319_v23 = vld [vmem:[%s1144_s26 + $0x170] sm:$0xff] }
  0x1b   : > { %296 = vst [vmem:[%s1149_s27 + $0x58] sm:$0xff] %v295_v11  ;;  %v321_v24 = vld [vmem:[%s1144_s26 + $0x180] sm:$0xff]  ;;  %v323_v25 = vld [vmem:[%s1144_s26 + $0x190] sm:$0xff] }
  0x1c   : > { %298 = vst [vmem:[%s1149_s27 + $0x60] sm:$0xff] %v297_v12  ;;  %v325_v26 = vld [vmem:[%s1144_s26 + $0x1a0] sm:$0xff]  ;;  %v327_v27 = vld [vmem:[%s1144_s26 + $0x1b0] sm:$0xff] }
  0x1d   : > { %300 = vst [vmem:[%s1149_s27 + $0x68] sm:$0xff] %v299_v13  ;;  %v329_v28 = vld [vmem:[%s1144_s26 + $0x1c0] sm:$0xff]  ;;  %v331_v29 = vld [vmem:[%s1144_s26 + $0x1d0] sm:$0xff] }
  0x1e   : > { %302 = vst [vmem:[%s1149_s27 + $0x70] sm:$0xff] %v301_v14  ;;  %v333_v30 = vld [vmem:[%s1144_s26 + $0x1e0] sm:$0xff]  ;;  %v335_v31 = vld [vmem:[%s1144_s26 + $0x1f0] sm:$0xff] }
  0x1f   : > { %304 = vst [vmem:[%s1149_s27 + $0x78] sm:$0xff] %v303_v15 }
  0x20   : > { %306 = vst [vmem:[%s1149_s27 + $0x80] sm:$0xff] %v305_v16 }
  0x21   : > { %308 = vst [vmem:[%s1149_s27 + $0x88] sm:$0xff] %v307_v17 }
  0x22   : > { %310 = vst [vmem:[%s1149_s27 + $0x90] sm:$0xff] %v309_v18 }
  0x23   : > { %312 = vst [vmem:[%s1149_s27 + $0x98] sm:$0xff] %v311_v19 }
  0x24   : > { %314 = vst [vmem:[%s1149_s27 + $0xa0] sm:$0xff] %v313_v20 }
  0x25   : > { %316 = vst [vmem:[%s1149_s27 + $0xa8] sm:$0xff] %v315_v21 }
  0x26   : > { %318 = vst [vmem:[%s1149_s27 + $0xb0] sm:$0xff] %v317_v22 }
  0x27   : > { %320 = vst [vmem:[%s1149_s27 + $0xb8] sm:$0xff] %v319_v23 }
  0x28   : > { %322 = vst [vmem:[%s1149_s27 + $0xc0] sm:$0xff] %v321_v24 }
  0x29   : > { %324 = vst [vmem:[%s1149_s27 + $0xc8] sm:$0xff] %v323_v25 }
  0x2a   : > { %326 = vst [vmem:[%s1149_s27 + $0xd0] sm:$0xff] %v325_v26 }
  0x2b   : > { %328 = vst [vmem:[%s1149_s27 + $0xd8] sm:$0xff] %v327_v27 }
  0x2c   : > { %330 = vst [vmem:[%s1149_s27 + $0xe0] sm:$0xff] %v329_v28 }
  0x2d   : > { %332 = vst [vmem:[%s1149_s27 + $0xe8] sm:$0xff] %v331_v29 }
  0x2e   : > { %334 = vst [vmem:[%s1149_s27 + $0xf0] sm:$0xff] %v333_v30 }
  0x2f   : > { %336 = vst [vmem:[%s1149_s27 + $0xf8] sm:$0xff] %v335_v31 }
  0x30 PF: > { %p833_p6 = scmp.ge.s32.totalorder %s1079_s16, 1  ;;  %p349_p7 = scmp.lt.s32.totalorder %s1079_s16, 3 }
  0x32   : > { %p350_p8 = pnand %p833_p6, %p349_p7 }
  0x33   : > { %s356_s28 = sand.u32 (!%p350_p8), 1, %s1063_s12   ;;  %s835_s6 = sshll.u32 (!%p350_p8), %s1071_s14, 1 }
  0x34   : > { %353 = sbr.rel (%p350_p8) target bundleno = 233 (0xe9), region = 66  ;;  %s834_s29 = sshll.u32 (!%p350_p8), %s356_s28, 8 }
  0x35   : > { %s1215_s30 = scalar_lea.vmem (!%p350_p8), [#allocation3], %s834_s29  ;;  %p409_p9 = scmp.lt.s32.totalorder (!%p350_p8), %s835_s6, 3 }
  0x39   : > { %v896_v32 = vld [vmem:[%s1215_s30 + $0x70] sm:$0xf]  ;;  %v984_v33 = vld [vmem:[%s1215_s30 + $0x74] sm:$0xf0]  ;;  %v983_v37 = vld [vmem:[%s1215_s30 + $0x74] sm:$0xf] }
  0x3a   : > { %v960_v34 = vld [vmem:[%s1215_s30 + $0xf0] sm:$0xf]  ;;  %v897_v35 = vor.u32 %v984_v33, %v896_v32  ;;  %v1000_v36 = vld [vmem:[%s1215_s30 + $0xf4] sm:$0xf0]  ;;  %v898_v38 = vld [vmem:[%s1215_s30 + $0x78] sm:$0xf0] }
  0x3b   : > { %v961_v39 = vor.u32 %v1000_v36, %v960_v34  ;;  %v901_v40 = vor.u32 %v983_v37, %v898_v38  ;;  %v999_v41 = vld [vmem:[%s1215_s30 + $0xf4] sm:$0xf]  ;;  %v962_v42 = vld [vmem:[%s1215_s30 + $0xf8] sm:$0xf0]  ;;  %v888_v43 = vld [vmem:[%s1215_s30 + $0x60] sm:$0xf] }
  0x3c   : > { %631 = vmatpush.bf16.msra.mxu0 %v897_v35  ;;  %v965_v44 = vor.u32 %v999_v41, %v962_v42  ;;  %v982_v45 = vld [vmem:[%s1215_s30 + $0x64] sm:$0xf0]  ;;  %v952_v46 = vld [vmem:[%s1215_s30 + $0xe0] sm:$0xf]  ;;  %v981_v50 = vld [vmem:[%s1215_s30 + $0x64] sm:$0xf] }
  0x3d   : > { %v998_v47 = vld [vmem:[%s1215_s30 + $0xe4] sm:$0xf0]  ;;  %644 = vmatpush.bf16.msra.mxu1 %v961_v39  ;;  %657 = vmatpush.bf16.msra.mxu2 %v901_v40  ;;  %v889_v48 = vor.u32 %v982_v45, %v888_v43  ;;  %v890_v51 = vld [vmem:[%s1215_s30 + $0x68] sm:$0xf0]  ;;  %v997_v52 = vld [vmem:[%s1215_s30 + $0xe4] sm:$0xf] }
  0x3e   : > { %v953_v49 = vor.u32 %v998_v47, %v952_v46  ;;  %670 = vmatpush.bf16.msra.mxu3 %v965_v44  ;;  %v893_v53 = vor.u32 %v981_v50, %v890_v51  ;;  %v954_v54 = vld [vmem:[%s1215_s30 + $0xe8] sm:$0xf0]  ;;  %v880_v55 = vld [vmem:[%s1215_s30 + $0x50] sm:$0xf]  ;;  %v980_v56 = vld [vmem:[%s1215_s30 + $0x54] sm:$0xf0] }
  0x3f   : > { %v957_v57 = vor.u32 %v997_v52, %v954_v54  ;;  %v944_v58 = vld [vmem:[%s1215_s30 + $0xd0] sm:$0xf]  ;;  %v996_v59 = vld [vmem:[%s1215_s30 + $0xd4] sm:$0xf0]  ;;  %v979_v60 = vld [vmem:[%s1215_s30 + $0x54] sm:$0xf]  ;;  %v881_v61 = vor.u32 %v980_v56, %v880_v55 }
  0x40   : > { %632 = vmatpush.bf16.msra.mxu0 %v889_v48  ;;  %v882_v62 = vld [vmem:[%s1215_s30 + $0x58] sm:$0xf0]  ;;  %v995_v63 = vld [vmem:[%s1215_s30 + $0xd4] sm:$0xf]  ;;  %v945_v1 = vor.u32 %v996_v59, %v944_v58  ;;  %v872_v3 = vld [vmem:[%s1215_s30 + $0x40] sm:$0xf] }
  0x41   : > { %v946_v0 = vld [vmem:[%s1215_s30 + $0xd8] sm:$0xf0]  ;;  %645 = vmatpush.bf16.msra.mxu1 %v953_v49  ;;  %658 = vmatpush.bf16.msra.mxu2 %v893_v53  ;;  %v885_v2 = vor.u32 %v979_v60, %v882_v62  ;;  %v978_v4 = vld [vmem:[%s1215_s30 + $0x44] sm:$0xf0]  ;;  %v936_v5 = vld [vmem:[%s1215_s30 + $0xc0] sm:$0xf] }
  0x42   : > { %671 = vmatpush.bf16.msra.mxu3 %v957_v57  ;;  %v949_v6 = vor.u32 %v995_v63, %v946_v0  ;;  %v994_v7 = vld [vmem:[%s1215_s30 + $0xc4] sm:$0xf0]  ;;  %v977_v8 = vld [vmem:[%s1215_s30 + $0x44] sm:$0xf]  ;;  %v874_v9 = vld [vmem:[%s1215_s30 + $0x48] sm:$0xf0]  ;;  %v873_v12 = vor.u32 %v978_v4, %v872_v3 }
  0x43   : > { %v993_v10 = vld [vmem:[%s1215_s30 + $0xc4] sm:$0xf]  ;;  %v938_v11 = vld [vmem:[%s1215_s30 + $0xc8] sm:$0xf0]  ;;  %v937_v13 = vor.u32 %v994_v7, %v936_v5  ;;  %v877_v14 = vor.u32 %v977_v8, %v874_v9  ;;  %v864_v15 = vld [vmem:[%s1215_s30 + $0x30] sm:$0xf] }
  0x44   : > { %633 = vmatpush.bf16.msra.mxu0 %v881_v61  ;;  %v976_v16 = vld [vmem:[%s1215_s30 + $0x34] sm:$0xf0]  ;;  %v928_v17 = vld [vmem:[%s1215_s30 + $0xb0] sm:$0xf]  ;;  %v941_v18 = vor.u32 %v993_v10, %v938_v11  ;;  %v975_v20 = vld [vmem:[%s1215_s30 + $0x34] sm:$0xf] }
  0x45   : > { %646 = vmatpush.bf16.msra.mxu1 %v945_v1  ;;  %659 = vmatpush.bf16.msra.mxu2 %v885_v2  ;;  %v992_v19 = vld [vmem:[%s1215_s30 + $0xb4] sm:$0xf0]  ;;  %v866_v21 = vld [vmem:[%s1215_s30 + $0x38] sm:$0xf0]  ;;  %v991_v22 = vld [vmem:[%s1215_s30 + $0xb4] sm:$0xf]  ;;  %v865_v24 = vor.u32 %v976_v16, %v864_v15 }
  0x46   : > { %672 = vmatpush.bf16.msra.mxu3 %v949_v6  ;;  %v930_v23 = vld [vmem:[%s1215_s30 + $0xb8] sm:$0xf0]  ;;  %v929_v25 = vor.u32 %v992_v19, %v928_v17  ;;  %v869_v26 = vor.u32 %v975_v20, %v866_v21  ;;  %v856_v27 = vld [vmem:[%s1215_s30 + $0x20] sm:$0xf]  ;;  %v974_v28 = vld [vmem:[%s1215_s30 + $0x24] sm:$0xf0] }
  0x47   : > { %v920_v29 = vld [vmem:[%s1215_s30 + $0xa0] sm:$0xf]  ;;  %v933_v30 = vor.u32 %v991_v22, %v930_v23  ;;  %v990_v31 = vld [vmem:[%s1215_s30 + $0xa4] sm:$0xf0]  ;;  %v973_v32 = vld [vmem:[%s1215_s30 + $0x24] sm:$0xf]  ;;  %v857_v36 = vor.u32 %v974_v28, %v856_v27 }
  0x48   : > { %634 = vmatpush.bf16.msra.mxu0 %v873_v12  ;;  %v858_v33 = vld [vmem:[%s1215_s30 + $0x28] sm:$0xf0]  ;;  %v989_v34 = vld [vmem:[%s1215_s30 + $0xa4] sm:$0xf]  ;;  %v921_v37 = vor.u32 %v990_v31, %v920_v29  ;;  %v848_v39 = vld [vmem:[%s1215_s30 + $0x10] sm:$0xf] }
  0x49   : > { %647 = vmatpush.bf16.msra.mxu1 %v937_v13  ;;  %660 = vmatpush.bf16.msra.mxu2 %v877_v14  ;;  %v922_v35 = vld [vmem:[%s1215_s30 + $0xa8] sm:$0xf0]  ;;  %v861_v38 = vor.u32 %v973_v32, %v858_v33  ;;  %v972_v40 = vld [vmem:[%s1215_s30 + $0x14] sm:$0xf0]  ;;  %v912_v41 = vld [vmem:[%s1215_s30 + $0x90] sm:$0xf] }
  0x4a   : > { %673 = vmatpush.bf16.msra.mxu3 %v941_v18  ;;  %v925_v42 = vor.u32 %v989_v34, %v922_v35  ;;  %v988_v43 = vld [vmem:[%s1215_s30 + $0x94] sm:$0xf0]  ;;  %v971_v44 = vld [vmem:[%s1215_s30 + $0x14] sm:$0xf]  ;;  %v850_v45 = vld [vmem:[%s1215_s30 + $0x18] sm:$0xf0]  ;;  %v849_v48 = vor.u32 %v972_v40, %v848_v39 }
  0x4b   : > { %v987_v46 = vld [vmem:[%s1215_s30 + $0x94] sm:$0xf]  ;;  %v914_v47 = vld [vmem:[%s1215_s30 + $0x98] sm:$0xf0]  ;;  %v431_v49 = vld [vmem:[%s1306_s0] sm:$0xff]  ;;  %v913_v50 = vor.u32 %v988_v43, %v912_v41  ;;  %v853_v51 = vor.u32 %v971_v44, %v850_v45  ;;  %s1317_s6 = smov (!%p409_p9, %s835_s6), 3 }
  0x4c   : > { %635 = vmatpush.bf16.msra.mxu0 %v865_v24  ;;  %v840_v52 = vld [vmem:[%s1215_s30] sm:$0xf]  ;;  %v970_v53 = vld [vmem:[%s1215_s30 + $0x4] sm:$0xf0]  ;;  %v917_v55 = vor.u32 %v987_v46, %v914_v47  ;;  %v969_v57 = vld [vmem:[%s1215_s30 + $0x4] sm:$0xf]  ;;  %v465_v61 = vunpack.c.l.b16 %v431_v49  ;;  %v466_v63 = vunpack.c.h.b16 %v431_v49  ;;  %s411_s9 = scalar_lea.vmem %s1308_s2, %s1317_s6 }
  0x4d   : > { %648 = vmatpush.bf16.msra.mxu1 %v929_v25  ;;  %661 = vmatpush.bf16.msra.mxu2 %v869_v26  ;;  %v904_v54 = vld [vmem:[%s1215_s30 + $0x80] sm:$0xf]  ;;  %v986_v56 = vld [vmem:[%s1215_s30 + $0x84] sm:$0xf0]  ;;  %v842_v58 = vld [vmem:[%s1215_s30 + $0x8] sm:$0xf0]  ;;  %v841_v62 = vor.u32 %v970_v53, %v840_v52 }
  0x4e   : > { %674 = vmatpush.bf16.msra.mxu3 %v933_v30  ;;  %v985_v59 = vld [vmem:[%s1215_s30 + $0x84] sm:$0xf]  ;;  %v906_v60 = vld [vmem:[%s1215_s30 + $0x88] sm:$0xf0]  ;;  %v905_v0 = vor.u32 %v986_v56, %v904_v54  ;;  %v845_v1 = vor.u32 %v969_v57, %v842_v58  ;;  %v467_v3 = vpack.c.b16 %v465_v61, %v465_v61  ;;  %v468_v4 = vpack.c.b16 %v466_v63, %v466_v63  ;;  %v692_v7 = vld [vmem:[%s411_s9] sm:$0x3] }
  0x4f   : > { %v909_v2 = vor.u32 %v985_v59, %v906_v60  ;;  %v694_v9 = vperm.slane %v692_v7, 0  ;;  %v695_v11 = vperm.slane %v692_v7, 1  ;;  %s837_s10 = sshll.u32 %s1317_s6, 2 }
  0x50   : > { %636 = vmatpush.bf16.msra.mxu0 %v857_v36  ;;  %s421_s14 = scalar_lea.vmem %s1309_s3, %s837_s10 }
  0x51   : > { %649 = vmatpush.bf16.msra.mxu1 %v921_v37  ;;  %662 = vmatpush.bf16.msra.mxu2 %v861_v38 }
  0x52   : > { %675 = vmatpush.bf16.msra.mxu3 %v925_v42 }
  0x54   : > { %637 = vmatpush.bf16.msra.mxu0 %v849_v48 }
  0x55   : > { %650 = vmatpush.bf16.msra.mxu1 %v913_v50  ;;  %663 = vmatpush.bf16.msra.mxu2 %v853_v51 }
  0x56   : > { %676 = vmatpush.bf16.msra.mxu3 %v917_v55 }
  0x58   : > { %638 = vmatpush.bf16.msra.mxu0 %v841_v62 }
  0x59   : > { %651 = vmatpush.bf16.msra.mxu1 %v905_v0  ;;  %664 = vmatpush.bf16.msra.mxu2 %v845_v1 }
  0x5a   : > { %677 = vmatpush.bf16.msra.mxu3 %v909_v2 }
  0x5b   : > { %639 = vmatmul.bf16.vlgmr.msra.gmra.mxu0 %v467_v3 }
  0x5c   : > { %652 = vmatmul.bf16.vlgmr.msra.gmra.mxu1 %v468_v4  ;;  %665 = vmatmul.bf16.vlgmr.msra.gmra.mxu2 %v467_v3 }
  0x5d   : > { %678 = vmatmul.bf16.vlgmr.msra.gmra.mxu3 %v468_v4 }
  0xd8   : > { %v640_v5 = vpop.f32.mrf.mxu0 }
  0xd9   : > { %v653_v6 = vpop.f32.mrf.mxu1 }
  0xda   : > { %v654_v8 = vadd.f32 %v653_v6, %v640_v5 }
  0xdc   : > { %v698_v14 = vadd.f32 %v694_v9, %v654_v8 }
  0xdf   : > { %v666_v10 = vpop.f32.mrf.mxu2 }
  0xe0   : > { %v679_v12 = vpop.f32.mrf.mxu3  ;;  %v642_v13 = vpop.f32.mrf.mxu0 }
  0xe1   : > { %v680_v15 = vadd.f32 %v679_v12, %v666_v10  ;;  %v655_v16 = vpop.f32.mrf.mxu1 }
  0xe3   : > { %v699_v17 = vadd.f32 %v695_v11, %v680_v15 }
  0xe5   : > { %v700_v18 = vpack.c.bf16 %v699_v17, %v698_v14 }
  0xe7   : > { %701 = vst [vmem:[%s421_s14] sm:$0xff] %v700_v18  ;;  %v668_v19 = vpop.f32.mrf.mxu2 }
  0xe8   : > { %v681_v20 = vpop.f32.mrf.mxu3 }
  0xe9 PF: > { %s13_s16 = sadd.s32 1, %s1079_s16   ;;  %s1310_s12 = smov %s1067_s13 }
  0xea   : > { %p10_p10 = scmp.ge.s32.totalorder %s13_s16, 4   ;;  %s1311_s13 = smov %s1136_s20 }
  0xeb   : > { %s1312_s14 = smov %s1075_s15  ;;  %s1313_s15 = smov %s1315_s17 }
  0xec   :  { %12 = sbr.rel (!%p10_p10) target bundleno = 3 (0x3), region = 119 }

</bundles_post_ra>
